<compile_context>
chip_gen: v7x
topology: tpu7x:2x2x1
jax: 0.10.0
libtpu: 0.0.40
codegen_flags: <defaults>
</compile_context>

<pallas_src>
import jax
import jax.numpy as jnp
from jax.experimental import pallas as pl
from jax.experimental.pallas import tpu as pltpu

BN_EPS = 1e-5
INV_SQRT2 = 0.7071067811865476        # 1/sqrt(2)
SQRT_2_OVER_PI = 0.7978845608028654   # sqrt(2/pi)


def _round_up(a, m):
    return ((a + m - 1) // m) * m


def _gelu_erf(x):
    # PyTorch nn.GELU() default = exact erf formulation.
    return 0.5 * x * (1.0 + jax.lax.erf(x * INV_SQRT2))


def _gelu_tanh(x):
    # tanh-approx GELU: one EUP tanh instead of a long VALU erf polynomial.
    return 0.5 * x * (1.0 + jnp.tanh(SQRT_2_OVER_PI * (x + 0.044715 * x * x * x)))


def _num_tensorcores():
    """Best-effort TensorCores-per-chip (2 on v7x, 1 on v5e/v6e)."""
    try:
        n = getattr(jax.devices()[0], "num_cores", None)
        if n:
            return int(n)
    except Exception:
        pass
    return 1


# --------------------------------------------------------------------------- #
# Kernel: 4 bf16 matmuls (f32 accumulation) + shift + GELU, fully lane-dense
# --------------------------------------------------------------------------- #
def _make_kernel(gelu_fn):
    def kernel(x_ref, k1_ref, t1_ref, k2_ref, t2_ref, k3_ref, t3_ref,
               k4_ref, b4_ref, o_ref):
        f32 = jnp.float32
        bf16 = jnp.bfloat16
        # layer 1: conv1 (bias + BN folded into weights/shift) -> GELU
        h = jnp.dot(x_ref[...], k1_ref[...], preferred_element_type=f32)
        h = gelu_fn(h + t1_ref[...])
        # layer 2
        h = jnp.dot(h.astype(bf16), k2_ref[...], preferred_element_type=f32)
        h = gelu_fn(h + t2_ref[...])
        # layer 3
        h = jnp.dot(h.astype(bf16), k3_ref[...], preferred_element_type=f32)
        h = gelu_fn(h + t3_ref[...])
        # AdaptiveAvgPool1d(1) + Linear, folded into one matmul (+ bias)
        y = jnp.dot(h.astype(bf16), k4_ref[...], preferred_element_type=f32)
        o_ref[...] = (y + b4_ref[...]).astype(o_ref.dtype)
    return kernel


# --------------------------------------------------------------------------- #
# Wrapper-side weight preprocessing (pure XLA, done once per call)
# --------------------------------------------------------------------------- #
def _expand_conv_weight(w, L, *, channel_major_in):
    """Expand a Conv1d weight (C_out, C_in, K) with padding=K//2 into a dense
    block-banded matrix mapping a flattened per-sample input vector to the
    flattened output vector.

    Input flattening:  channel_major_in=True  -> row index = ci*L + m
                       channel_major_in=False -> row index = m*C_in + ci
    Output flattening: column index = l*C_out + co   (position-major).
    All entries are exact copies of w (or zero) — no value change."""
    C_out, C_in, K = w.shape
    pad = K // 2
    t = jnp.arange(K)[:, None, None]
    m = jnp.arange(L)[None, :, None]
    l = jnp.arange(L)[None, None, :]
    taps = (m == (l + t - pad)).astype(w.dtype)            # (K, L, L)
    if channel_major_in:
        kb = jnp.einsum('tml,oit->imlo', taps, w)          # (C_in, L, L, C_out)
    else:
        kb = jnp.einsum('tml,oit->milo', taps, w)          # (L, C_in, L, C_out)
    return kb.reshape(C_in * L, L * C_out)


def _bn_fold(gamma, beta, mean, var, conv_bias, L):
    """Fold conv bias + eval-mode BatchNorm into a per-output-lane scale (to be
    multiplied into the weight columns) and an additive shift (kept in-kernel),
    for the flattened (l*C + c) output layout."""
    s = gamma * jax.lax.rsqrt(var + BN_EPS)
    t = (conv_bias - mean) * s + beta
    return jnp.tile(s, L), jnp.tile(t, L).reshape(1, -1)


def edge_grid_encoder_1d(edge_grid, params, *, tile_b=512, gelu="tanh"):
    """edge_grid: [B, edge_grid_dim, L] float32. Returns [B, edge_grid_emb]."""
    B, C_in, L = edge_grid.shape
    E = params['fc_w'].shape[0]
    D_in = C_in * L
    gelu_fn = _gelu_tanh if gelu == "tanh" else _gelu_erf

    # ---- structural weight expansion + BN-scale folding + bf16 cast ----
    s1, t1 = _bn_fold(params['bn1_gamma'], params['bn1_beta'],
                      params['bn1_mean'], params['bn1_var'], params['conv1_b'], L)
    s2, t2 = _bn_fold(params['bn2_gamma'], params['bn2_beta'],
                      params['bn2_mean'], params['bn2_var'], params['conv2_b'], L)
    s3, t3 = _bn_fold(params['bn3_gamma'], params['bn3_beta'],
                      params['bn3_mean'], params['bn3_var'], params['conv3_b'], L)
    k1 = (_expand_conv_weight(params['conv1_w'], L, channel_major_in=True)
          * s1[None, :]).astype(jnp.bfloat16)
    k2 = (_expand_conv_weight(params['conv2_w'], L, channel_major_in=False)
          * s2[None, :]).astype(jnp.bfloat16)
    k3 = (_expand_conv_weight(params['conv3_w'], L, channel_major_in=False)
          * s3[None, :]).astype(jnp.bfloat16)

    # AvgPool + Linear folded; zero-pad output columns to a lane-dense width.
    E_pad = _round_up(max(E, 128), 128)
    k4 = jnp.tile(params['fc_w'].T / L, (L, 1))                       # (L*64, E)
    k4 = jnp.pad(k4, ((0, 0), (0, E_pad - E))).astype(jnp.bfloat16)   # (L*64, E_pad)
    b4 = jnp.pad(params['fc_b'], (0, E_pad - E)).reshape(1, E_pad).astype(jnp.float32)
    t1, t2, t3 = (t.astype(jnp.float32) for t in (t1, t2, t3))

    # ---- flatten input (channel-major, matches k1 row layout); bf16 halves DMA ----
    x = edge_grid.reshape(B, D_in).astype(jnp.bfloat16)

    # ---- batch tiling ----
    if _num_tensorcores() >= 2 and B > 8:
        # v7x: ensure >= 2 (parallel) grid steps so both TensorCores get work.
        tile_b = min(tile_b, _round_up(pl.cdiv(B, 2), 8))
    tile_b = max(8, min(tile_b, _round_up(B, 8)))
    B_pad = _round_up(B, tile_b)
    if B_pad != B:
        x = jnp.pad(x, ((0, B_pad - B), (0, 0)))   # rows are independent (eval mode)

    kernel = _make_kernel(gelu_fn)
    operands = (x, k1, t1, k2, t2, k3, t3, k4, b4)
    weight_shapes = [a.shape for a in operands[1:]]

    def build(weight_mode):
        def wspec(shape):
            if weight_mode is None:
                return pl.BlockSpec(shape, lambda i: (0, 0))
            return pl.BlockSpec(shape, lambda i: (0, 0), pipeline_mode=weight_mode)
        return pl.pallas_call(
            kernel,
            out_shape=jax.ShapeDtypeStruct((B_pad, E_pad), edge_grid.dtype),
            grid_spec=pltpu.PrefetchScalarGridSpec(
                num_scalar_prefetch=0,
                grid=(B_pad // tile_b,),
                in_specs=[pl.BlockSpec((tile_b, D_in), lambda i: (i, 0))]
                         + [wspec(s) for s in weight_shapes],
                out_specs=pl.BlockSpec((tile_b, E_pad), lambda i: (i, 0)),
            ),
            compiler_params=pltpu.CompilerParams(
                dimension_semantics=("parallel",)),
        )

    try:
        # Constant-index_map weights need only one buffer: halves resident VMEM.
        out = build(pl.Buffered(1))(*operands)
    except Exception:
        # Fallback for jax builds that reject Buffered(1): default double
        # buffering (weights are only ~1.4 MiB bf16 at L=16, so this is safe).
        out = build(None)(*operands)

    return out[:B, :E]


# --------------------------------------------------------------------------- #
# Synthetic parameters (PyTorch layouts) and pure-JAX reference
# --------------------------------------------------------------------------- #
def init_params(key, edge_grid_dim, edge_grid_emb):
    keys = jax.random.split(key, 20)
    u = lambda k, shape, s: jax.random.uniform(k, shape, jnp.float32, -1.0, 1.0) * s
    p = {
        'conv1_w': u(keys[0], (16, edge_grid_dim, 3), (edge_grid_dim * 3) ** -0.5),
        'conv1_b': u(keys[1], (16,), 0.1),
        'conv2_w': u(keys[2], (32, 16, 3), (16 * 3) ** -0.5),
        'conv2_b': u(keys[3], (32,), 0.1),
        'conv3_w': u(keys[4], (64, 32, 3), (32 * 3) ** -0.5),
        'conv3_b': u(keys[5], (64,), 0.1),
        'fc_w':    u(keys[6], (edge_grid_emb, 64), 64 ** -0.5),
        'fc_b':    u(keys[7], (edge_grid_emb,), 0.1),
    }
    for idx, (i, c) in enumerate(((1, 16), (2, 32), (3, 64))):
        p[f'bn{i}_gamma'] = 1.0 + u(keys[8 + idx], (c,), 0.2)
        p[f'bn{i}_beta'] = u(keys[11 + idx], (c,), 0.1)
        p[f'bn{i}_mean'] = u(keys[14 + idx], (c,), 0.2)
        p[f'bn{i}_var'] = 0.5 + jax.random.uniform(keys[17 + idx], (c,), jnp.float32, 0.0, 1.0)
    return p


def reference_forward(edge_grid, params):
    """Pure-JAX eval-mode forward of EdgeGridEncoder1D (f32, exact-erf GELU)."""
    def conv1d(x, w, b):  # x: (B, C_in, L), w: (C_out, C_in, 3), padding=1
        L = x.shape[-1]
        xp = jnp.pad(x, ((0, 0), (0, 0), (1, 1)))
        y = sum(jnp.einsum('bil,oi->bol', xp[:, :, t:t + L], w[:, :, t])
                for t in range(w.shape[-1]))
        return y + b[None, :, None]

    def bn(x, g, bta, m, v):
        return ((x - m[None, :, None]) * (g * jax.lax.rsqrt(v + BN_EPS))[None, :, None]
                + bta[None, :, None])

    h = edge_grid
    for i, (wk, bk) in enumerate((('conv1_w', 'conv1_b'),
                                  ('conv2_w', 'conv2_b'),
                                  ('conv3_w', 'conv3_b')), start=1):
        h = conv1d(h, params[wk], params[bk])
        h = bn(h, params[f'bn{i}_gamma'], params[f'bn{i}_beta'],
               params[f'bn{i}_mean'], params[f'bn{i}_var'])
        h = _gelu_erf(h)
    pooled = h.mean(axis=-1)                       # AdaptiveAvgPool1d(1) + view
    return pooled @ params['fc_w'].T + params['fc_b']


if __name__ == "__main__":
    key = jax.random.PRNGKey(0)
    k_x, k_p = jax.random.split(key)

    B = 50                  # ragged batch (exercises cdiv + padding path)
    edge_grid_dim = 4
    L = 16
    edge_grid_emb = 16

    edge_grid = jax.random.normal(k_x, (B, edge_grid_dim, L), jnp.float32)
    params = init_params(k_p, edge_grid_dim, edge_grid_emb)

    out = edge_grid_encoder_1d(edge_grid, params)
    out = jax.block_until_ready(out)

    ref = reference_forward(edge_grid, params)
    assert out.shape == (B, edge_grid_emb)
    max_err = float(jnp.max(jnp.abs(out - ref)))
    # Tolerance accounts for bf16 MXU inputs + tanh-approx GELU vs the f32
    # exact-erf reference (both reviewed/accepted numeric deviations).
    assert jnp.allclose(out, ref, atol=2e-2, rtol=2e-2), f"max abs err = {max_err}"

    print("KERNEL_OK")
</pallas_src>

<mosaic_0001>
module attributes {stable_mosaic.version = 11 : i64} {
  func.func @kernel(%arg0: i32, %arg1: memref<56x64xbf16, #tpu.memory_space<vmem>>, %arg2: memref<64x256xbf16, #tpu.memory_space<vmem>>, %arg3: memref<1x256xf32, #tpu.memory_space<vmem>>, %arg4: memref<256x512xbf16, #tpu.memory_space<vmem>>, %arg5: memref<1x512xf32, #tpu.memory_space<vmem>>, %arg6: memref<512x1024xbf16, #tpu.memory_space<vmem>>, %arg7: memref<1x1024xf32, #tpu.memory_space<vmem>>, %arg8: memref<1024x128xbf16, #tpu.memory_space<vmem>>, %arg9: memref<1x128xf32, #tpu.memory_space<vmem>>, %arg10: memref<56x128xf32, #tpu.memory_space<vmem>>) attributes {dimension_semantics = [#tpu.dimension_semantics<parallel>], iteration_bounds = array<i64: 1>, scalar_prefetch = 0 : i64, scratch_operands = 0 : i64, tpu.core_type = #tpu.core_type<tc>, window_params = [{transform_indices = @transform_0, window_bounds = array<i64: 56, 64>}, {pipeline_mode = #tpu.pipeline_mode<synchronous>, transform_indices = @transform_1, window_bounds = array<i64: 64, 256>}, {pipeline_mode = #tpu.pipeline_mode<synchronous>, transform_indices = @transform_2, window_bounds = array<i64: 1, 256>}, {pipeline_mode = #tpu.pipeline_mode<synchronous>, transform_indices = @transform_3, window_bounds = array<i64: 256, 512>}, {pipeline_mode = #tpu.pipeline_mode<synchronous>, transform_indices = @transform_4, window_bounds = array<i64: 1, 512>}, {pipeline_mode = #tpu.pipeline_mode<synchronous>, transform_indices = @transform_5, window_bounds = array<i64: 512, 1024>}, {pipeline_mode = #tpu.pipeline_mode<synchronous>, transform_indices = @transform_6, window_bounds = array<i64: 1, 1024>}, {pipeline_mode = #tpu.pipeline_mode<synchronous>, transform_indices = @transform_7, window_bounds = array<i64: 1024, 128>}, {pipeline_mode = #tpu.pipeline_mode<synchronous>, transform_indices = @transform_8, window_bounds = array<i64: 1, 128>}, {transform_indices = @transform_9, window_bounds = array<i64: 56, 128>}]} {
    %c0 = arith.constant 0 : index
    %c0_0 = arith.constant 0 : index
    %0 = vector.load %arg1[%c0, %c0_0] : memref<56x64xbf16, #tpu.memory_space<vmem>>, vector<56x64xbf16>
    %c0_1 = arith.constant 0 : index
    %c0_2 = arith.constant 0 : index
    %1 = vector.load %arg2[%c0_1, %c0_2] : memref<64x256xbf16, #tpu.memory_space<vmem>>, vector<64x256xbf16>
    %cst = arith.constant dense<0.000000e+00> : vector<56x256xf32>
    %2 = tpu.matmul %0, %1, %cst {dimension_numbers = #tpu.dot_dimension_numbers<[1], [0], [0], [1], [0, 0, 1, 1], [], []>} : vector<56x64xbf16>, vector<64x256xbf16>, vector<56x256xf32> -> vector<56x256xf32>
    %c0_3 = arith.constant 0 : index
    %c0_4 = arith.constant 0 : index
    %3 = vector.load %arg3[%c0_3, %c0_4] : memref<1x256xf32, #tpu.memory_space<vmem>>, vector<1x256xf32>
    %4 = vector.broadcast %3 : vector<1x256xf32> to vector<56x256xf32>
    %5 = arith.addf %2, %4 : vector<56x256xf32>
    %cst_5 = arith.constant 5.000000e-01 : f32
    %6 = vector.broadcast %cst_5 : f32 to vector<56x256xf32>
    %7 = arith.mulf %6, %5 : vector<56x256xf32>
    %cst_6 = arith.constant 4.471500e-02 : f32
    %8 = vector.broadcast %cst_6 : f32 to vector<56x256xf32>
    %9 = arith.mulf %8, %5 : vector<56x256xf32>
    %10 = arith.mulf %9, %5 : vector<56x256xf32>
    %11 = arith.mulf %10, %5 : vector<56x256xf32>
    %12 = arith.addf %5, %11 : vector<56x256xf32>
    %cst_7 = arith.constant 0.797884583 : f32
    %13 = vector.broadcast %cst_7 : f32 to vector<56x256xf32>
    %14 = arith.mulf %13, %12 : vector<56x256xf32>
    %15 = math.tanh %14 : vector<56x256xf32>
    %cst_8 = arith.constant 1.000000e+00 : f32
    %16 = vector.broadcast %cst_8 : f32 to vector<56x256xf32>
    %17 = arith.addf %16, %15 : vector<56x256xf32>
    %18 = arith.mulf %7, %17 : vector<56x256xf32>
    %19 = arith.truncf %18 : vector<56x256xf32> to vector<56x256xbf16>
    %c0_9 = arith.constant 0 : index
    %c0_10 = arith.constant 0 : index
    %20 = vector.load %arg4[%c0_9, %c0_10] : memref<256x512xbf16, #tpu.memory_space<vmem>>, vector<256x512xbf16>
    %cst_11 = arith.constant dense<0.000000e+00> : vector<56x512xf32>
    %21 = tpu.matmul %19, %20, %cst_11 {dimension_numbers = #tpu.dot_dimension_numbers<[1], [0], [0], [1], [0, 0, 1, 1], [], []>} : vector<56x256xbf16>, vector<256x512xbf16>, vector<56x512xf32> -> vector<56x512xf32>
    %c0_12 = arith.constant 0 : index
    %c0_13 = arith.constant 0 : index
    %22 = vector.load %arg5[%c0_12, %c0_13] : memref<1x512xf32, #tpu.memory_space<vmem>>, vector<1x512xf32>
    %23 = vector.broadcast %22 : vector<1x512xf32> to vector<56x512xf32>
    %24 = arith.addf %21, %23 : vector<56x512xf32>
    %cst_14 = arith.constant 5.000000e-01 : f32
    %25 = vector.broadcast %cst_14 : f32 to vector<56x512xf32>
    %26 = arith.mulf %25, %24 : vector<56x512xf32>
    %cst_15 = arith.constant 4.471500e-02 : f32
    %27 = vector.broadcast %cst_15 : f32 to vector<56x512xf32>
    %28 = arith.mulf %27, %24 : vector<56x512xf32>
    %29 = arith.mulf %28, %24 : vector<56x512xf32>
    %30 = arith.mulf %29, %24 : vector<56x512xf32>
    %31 = arith.addf %24, %30 : vector<56x512xf32>
    %cst_16 = arith.constant 0.797884583 : f32
    %32 = vector.broadcast %cst_16 : f32 to vector<56x512xf32>
    %33 = arith.mulf %32, %31 : vector<56x512xf32>
    %34 = math.tanh %33 : vector<56x512xf32>
    %cst_17 = arith.constant 1.000000e+00 : f32
    %35 = vector.broadcast %cst_17 : f32 to vector<56x512xf32>
    %36 = arith.addf %35, %34 : vector<56x512xf32>
    %37 = arith.mulf %26, %36 : vector<56x512xf32>
    %38 = arith.truncf %37 : vector<56x512xf32> to vector<56x512xbf16>
    %c0_18 = arith.constant 0 : index
    %c0_19 = arith.constant 0 : index
    %39 = vector.load %arg6[%c0_18, %c0_19] : memref<512x1024xbf16, #tpu.memory_space<vmem>>, vector<512x1024xbf16>
    %cst_20 = arith.constant dense<0.000000e+00> : vector<56x1024xf32>
    %40 = tpu.matmul %38, %39, %cst_20 {dimension_numbers = #tpu.dot_dimension_numbers<[1], [0], [0], [1], [0, 0, 1, 1], [], []>} : vector<56x512xbf16>, vector<512x1024xbf16>, vector<56x1024xf32> -> vector<56x1024xf32>
    %c0_21 = arith.constant 0 : index
    %c0_22 = arith.constant 0 : index
    %41 = vector.load %arg7[%c0_21, %c0_22] : memref<1x1024xf32, #tpu.memory_space<vmem>>, vector<1x1024xf32>
    %42 = vector.broadcast %41 : vector<1x1024xf32> to vector<56x1024xf32>
    %43 = arith.addf %40, %42 : vector<56x1024xf32>
    %cst_23 = arith.constant 5.000000e-01 : f32
    %44 = vector.broadcast %cst_23 : f32 to vector<56x1024xf32>
    %45 = arith.mulf %44, %43 : vector<56x1024xf32>
    %cst_24 = arith.constant 4.471500e-02 : f32
    %46 = vector.broadcast %cst_24 : f32 to vector<56x1024xf32>
    %47 = arith.mulf %46, %43 : vector<56x1024xf32>
    %48 = arith.mulf %47, %43 : vector<56x1024xf32>
    %49 = arith.mulf %48, %43 : vector<56x1024xf32>
    %50 = arith.addf %43, %49 : vector<56x1024xf32>
    %cst_25 = arith.constant 0.797884583 : f32
    %51 = vector.broadcast %cst_25 : f32 to vector<56x1024xf32>
    %52 = arith.mulf %51, %50 : vector<56x1024xf32>
    %53 = math.tanh %52 : vector<56x1024xf32>
    %cst_26 = arith.constant 1.000000e+00 : f32
    %54 = vector.broadcast %cst_26 : f32 to vector<56x1024xf32>
    %55 = arith.addf %54, %53 : vector<56x1024xf32>
    %56 = arith.mulf %45, %55 : vector<56x1024xf32>
    %57 = arith.truncf %56 : vector<56x1024xf32> to vector<56x1024xbf16>
    %c0_27 = arith.constant 0 : index
    %c0_28 = arith.constant 0 : index
    %58 = vector.load %arg8[%c0_27, %c0_28] : memref<1024x128xbf16, #tpu.memory_space<vmem>>, vector<1024x128xbf16>
    %cst_29 = arith.constant dense<0.000000e+00> : vector<56x128xf32>
    %59 = tpu.matmul %57, %58, %cst_29 {dimension_numbers = #tpu.dot_dimension_numbers<[1], [0], [0], [1], [0, 0, 1, 1], [], []>} : vector<56x1024xbf16>, vector<1024x128xbf16>, vector<56x128xf32> -> vector<56x128xf32>
    %c0_30 = arith.constant 0 : index
    %c0_31 = arith.constant 0 : index
    %60 = vector.load %arg9[%c0_30, %c0_31] : memref<1x128xf32, #tpu.memory_space<vmem>>, vector<1x128xf32>
    %61 = vector.broadcast %60 : vector<1x128xf32> to vector<56x128xf32>
    %62 = arith.addf %59, %61 : vector<56x128xf32>
    %c0_32 = arith.constant 0 : index
    %c0_33 = arith.constant 0 : index
    %63 = vector.load %arg10[%c0_32, %c0_33] : memref<56x128xf32, #tpu.memory_space<vmem>>, vector<56x128xf32>
    tpu.vector_store %arg10[%c0_32, %c0_33], %62 {strides = array<i32>} : memref<56x128xf32, #tpu.memory_space<vmem>>, vector<56x128xf32>,
    return
  }
  func.func @transform_0(%arg0: i32) -> (i32, i32) {
    %c0_i32 = arith.constant 0 : i32
    %c0_i32_0 = arith.constant 0 : i32
    return %arg0, %c0_i32 : i32, i32
  }
  func.func @transform_1(%arg0: i32) -> (i32, i32) {
    %c0_i32 = arith.constant 0 : i32
    %c0_i32_0 = arith.constant 0 : i32
    %c0_i32_1 = arith.constant 0 : i32
    return %c0_i32, %c0_i32_0 : i32, i32
  }
  func.func @transform_2(%arg0: i32) -> (i32, i32) {
    %c0_i32 = arith.constant 0 : i32
    %c0_i32_0 = arith.constant 0 : i32
    %c0_i32_1 = arith.constant 0 : i32
    return %c0_i32, %c0_i32_0 : i32, i32
  }
  func.func @transform_3(%arg0: i32) -> (i32, i32) {
    %c0_i32 = arith.constant 0 : i32
    %c0_i32_0 = arith.constant 0 : i32
    %c0_i32_1 = arith.constant 0 : i32
    return %c0_i32, %c0_i32_0 : i32, i32
  }
  func.func @transform_4(%arg0: i32) -> (i32, i32) {
    %c0_i32 = arith.constant 0 : i32
    %c0_i32_0 = arith.constant 0 : i32
    %c0_i32_1 = arith.constant 0 : i32
    return %c0_i32, %c0_i32_0 : i32, i32
  }
  func.func @transform_5(%arg0: i32) -> (i32, i32) {
    %c0_i32 = arith.constant 0 : i32
    %c0_i32_0 = arith.constant 0 : i32
    %c0_i32_1 = arith.constant 0 : i32
    return %c0_i32, %c0_i32_0 : i32, i32
  }
  func.func @transform_6(%arg0: i32) -> (i32, i32) {
    %c0_i32 = arith.constant 0 : i32
    %c0_i32_0 = arith.constant 0 : i32
    %c0_i32_1 = arith.constant 0 : i32
    return %c0_i32, %c0_i32_0 : i32, i32
  }
  func.func @transform_7(%arg0: i32) -> (i32, i32) {
    %c0_i32 = arith.constant 0 : i32
    %c0_i32_0 = arith.constant 0 : i32
    %c0_i32_1 = arith.constant 0 : i32
    return %c0_i32, %c0_i32_0 : i32, i32
  }
  func.func @transform_8(%arg0: i32) -> (i32, i32) {
    %c0_i32 = arith.constant 0 : i32
    %c0_i32_0 = arith.constant 0 : i32
    %c0_i32_1 = arith.constant 0 : i32
    return %c0_i32, %c0_i32_0 : i32, i32
  }
  func.func @transform_9(%arg0: i32) -> (i32, i32) {
    %c0_i32 = arith.constant 0 : i32
    %c0_i32_0 = arith.constant 0 : i32
    return %arg0, %c0_i32 : i32, i32
  }
}

module attributes {stable_mosaic.version = 11 : i64} {
  func.func @kernel(%arg0: i32, %arg1: memref<56x64xbf16, #tpu.memory_space<vmem>>, %arg2: memref<64x256xbf16, #tpu.memory_space<vmem>>, %arg3: memref<1x256xf32, #tpu.memory_space<vmem>>, %arg4: memref<256x512xbf16, #tpu.memory_space<vmem>>, %arg5: memref<1x512xf32, #tpu.memory_space<vmem>>, %arg6: memref<512x1024xbf16, #tpu.memory_space<vmem>>, %arg7: memref<1x1024xf32, #tpu.memory_space<vmem>>, %arg8: memref<1024x128xbf16, #tpu.memory_space<vmem>>, %arg9: memref<1x128xf32, #tpu.memory_space<vmem>>, %arg10: memref<56x128xf32, #tpu.memory_space<vmem>>) attributes {dimension_semantics = [#tpu.dimension_semantics<parallel>], iteration_bounds = array<i64: 1>, scalar_prefetch = 0 : i64, scratch_operands = 0 : i64, tpu.core_type = #tpu.core_type<tc>, window_params = [{transform_indices = @transform_0, window_bounds = array<i64: 56, 64>}, {pipeline_mode = #tpu.pipeline_mode<synchronous>, transform_indices = @transform_1, window_bounds = array<i64: 64, 256>}, {pipeline_mode = #tpu.pipeline_mode<synchronous>, transform_indices = @transform_2, window_bounds = array<i64: 1, 256>}, {pipeline_mode = #tpu.pipeline_mode<synchronous>, transform_indices = @transform_3, window_bounds = array<i64: 256, 512>}, {pipeline_mode = #tpu.pipeline_mode<synchronous>, transform_indices = @transform_4, window_bounds = array<i64: 1, 512>}, {pipeline_mode = #tpu.pipeline_mode<synchronous>, transform_indices = @transform_5, window_bounds = array<i64: 512, 1024>}, {pipeline_mode = #tpu.pipeline_mode<synchronous>, transform_indices = @transform_6, window_bounds = array<i64: 1, 1024>}, {pipeline_mode = #tpu.pipeline_mode<synchronous>, transform_indices = @transform_7, window_bounds = array<i64: 1024, 128>}, {pipeline_mode = #tpu.pipeline_mode<synchronous>, transform_indices = @transform_8, window_bounds = array<i64: 1, 128>}, {transform_indices = @transform_9, window_bounds = array<i64: 56, 128>}]} {
    %c0 = arith.constant 0 : index
    %c0_0 = arith.constant 0 : index
    %0 = vector.load %arg1[%c0, %c0_0] : memref<56x64xbf16, #tpu.memory_space<vmem>>, vector<56x64xbf16>
    %c0_1 = arith.constant 0 : index
    %c0_2 = arith.constant 0 : index
    %1 = vector.load %arg2[%c0_1, %c0_2] : memref<64x256xbf16, #tpu.memory_space<vmem>>, vector<64x256xbf16>
    %cst = arith.constant dense<0.000000e+00> : vector<56x256xf32>
    %2 = tpu.matmul %0, %1, %cst {dimension_numbers = #tpu.dot_dimension_numbers<[1], [0], [0], [1], [0, 0, 1, 1], [], []>} : vector<56x64xbf16>, vector<64x256xbf16>, vector<56x256xf32> -> vector<56x256xf32>
    %c0_3 = arith.constant 0 : index
    %c0_4 = arith.constant 0 : index
    %3 = vector.load %arg3[%c0_3, %c0_4] : memref<1x256xf32, #tpu.memory_space<vmem>>, vector<1x256xf32>
    %4 = vector.broadcast %3 : vector<1x256xf32> to vector<56x256xf32>
    %5 = arith.addf %2, %4 : vector<56x256xf32>
    %cst_5 = arith.constant 5.000000e-01 : f32
    %6 = vector.broadcast %cst_5 : f32 to vector<56x256xf32>
    %7 = arith.mulf %6, %5 : vector<56x256xf32>
    %cst_6 = arith.constant 4.471500e-02 : f32
    %8 = vector.broadcast %cst_6 : f32 to vector<56x256xf32>
    %9 = arith.mulf %8, %5 : vector<56x256xf32>
    %10 = arith.mulf %9, %5 : vector<56x256xf32>
    %11 = arith.mulf %10, %5 : vector<56x256xf32>
    %12 = arith.addf %5, %11 : vector<56x256xf32>
    %cst_7 = arith.constant 0.797884583 : f32
    %13 = vector.broadcast %cst_7 : f32 to vector<56x256xf32>
    %14 = arith.mulf %13, %12 : vector<56x256xf32>
    %15 = math.tanh %14 : vector<56x256xf32>
    %cst_8 = arith.constant 1.000000e+00 : f32
    %16 = vector.broadcast %cst_8 : f32 to vector<56x256xf32>
    %17 = arith.addf %16, %15 : vector<56x256xf32>
    %18 = arith.mulf %7, %17 : vector<56x256xf32>
    %19 = arith.truncf %18 : vector<56x256xf32> to vector<56x256xbf16>
    %c0_9 = arith.constant 0 : index
    %c0_10 = arith.constant 0 : index
    %20 = vector.load %arg4[%c0_9, %c0_10] : memref<256x512xbf16, #tpu.memory_space<vmem>>, vector<256x512xbf16>
    %cst_11 = arith.constant dense<0.000000e+00> : vector<56x512xf32>
    %21 = tpu.matmul %19, %20, %cst_11 {dimension_numbers = #tpu.dot_dimension_numbers<[1], [0], [0], [1], [0, 0, 1, 1], [], []>} : vector<56x256xbf16>, vector<256x512xbf16>, vector<56x512xf32> -> vector<56x512xf32>
    %c0_12 = arith.constant 0 : index
    %c0_13 = arith.constant 0 : index
    %22 = vector.load %arg5[%c0_12, %c0_13] : memref<1x512xf32, #tpu.memory_space<vmem>>, vector<1x512xf32>
    %23 = vector.broadcast %22 : vector<1x512xf32> to vector<56x512xf32>
    %24 = arith.addf %21, %23 : vector<56x512xf32>
    %cst_14 = arith.constant 5.000000e-01 : f32
    %25 = vector.broadcast %cst_14 : f32 to vector<56x512xf32>
    %26 = arith.mulf %25, %24 : vector<56x512xf32>
    %cst_15 = arith.constant 4.471500e-02 : f32
    %27 = vector.broadcast %cst_15 : f32 to vector<56x512xf32>
    %28 = arith.mulf %27, %24 : vector<56x512xf32>
    %29 = arith.mulf %28, %24 : vector<56x512xf32>
    %30 = arith.mulf %29, %24 : vector<56x512xf32>
    %31 = arith.addf %24, %30 : vector<56x512xf32>
    %cst_16 = arith.constant 0.797884583 : f32
    %32 = vector.broadcast %cst_16 : f32 to vector<56x512xf32>
    %33 = arith.mulf %32, %31 : vector<56x512xf32>
    %34 = math.tanh %33 : vector<56x512xf32>
    %cst_17 = arith.constant 1.000000e+00 : f32
    %35 = vector.broadcast %cst_17 : f32 to vector<56x512xf32>
    %36 = arith.addf %35, %34 : vector<56x512xf32>
    %37 = arith.mulf %26, %36 : vector<56x512xf32>
    %38 = arith.truncf %37 : vector<56x512xf32> to vector<56x512xbf16>
    %c0_18 = arith.constant 0 : index
    %c0_19 = arith.constant 0 : index
    %39 = vector.load %arg6[%c0_18, %c0_19] : memref<512x1024xbf16, #tpu.memory_space<vmem>>, vector<512x1024xbf16>
    %cst_20 = arith.constant dense<0.000000e+00> : vector<56x1024xf32>
    %40 = tpu.matmul %38, %39, %cst_20 {dimension_numbers = #tpu.dot_dimension_numbers<[1], [0], [0], [1], [0, 0, 1, 1], [], []>} : vector<56x512xbf16>, vector<512x1024xbf16>, vector<56x1024xf32> -> vector<56x1024xf32>
    %c0_21 = arith.constant 0 : index
    %c0_22 = arith.constant 0 : index
    %41 = vector.load %arg7[%c0_21, %c0_22] : memref<1x1024xf32, #tpu.memory_space<vmem>>, vector<1x1024xf32>
    %42 = vector.broadcast %41 : vector<1x1024xf32> to vector<56x1024xf32>
    %43 = arith.addf %40, %42 : vector<56x1024xf32>
    %cst_23 = arith.constant 5.000000e-01 : f32
    %44 = vector.broadcast %cst_23 : f32 to vector<56x1024xf32>
    %45 = arith.mulf %44, %43 : vector<56x1024xf32>
    %cst_24 = arith.constant 4.471500e-02 : f32
    %46 = vector.broadcast %cst_24 : f32 to vector<56x1024xf32>
    %47 = arith.mulf %46, %43 : vector<56x1024xf32>
    %48 = arith.mulf %47, %43 : vector<56x1024xf32>
    %49 = arith.mulf %48, %43 : vector<56x1024xf32>
    %50 = arith.addf %43, %49 : vector<56x1024xf32>
    %cst_25 = arith.constant 0.797884583 : f32
    %51 = vector.broadcast %cst_25 : f32 to vector<56x1024xf32>
    %52 = arith.mulf %51, %50 : vector<56x1024xf32>
    %53 = math.tanh %52 : vector<56x1024xf32>
    %cst_26 = arith.constant 1.000000e+00 : f32
    %54 = vector.broadcast %cst_26 : f32 to vector<56x1024xf32>
    %55 = arith.addf %54, %53 : vector<56x1024xf32>
    %56 = arith.mulf %45, %55 : vector<56x1024xf32>
    %57 = arith.truncf %56 : vector<56x1024xf32> to vector<56x1024xbf16>
    %c0_27 = arith.constant 0 : index
    %c0_28 = arith.constant 0 : index
    %58 = vector.load %arg8[%c0_27, %c0_28] : memref<1024x128xbf16, #tpu.memory_space<vmem>>, vector<1024x128xbf16>
    %cst_29 = arith.constant dense<0.000000e+00> : vector<56x128xf32>
    %59 = tpu.matmul %57, %58, %cst_29 {dimension_numbers = #tpu.dot_dimension_numbers<[1], [0], [0], [1], [0, 0, 1, 1], [], []>} : vector<56x1024xbf16>, vector<1024x128xbf16>, vector<56x128xf32> -> vector<56x128xf32>
    %c0_30 = arith.constant 0 : index
    %c0_31 = arith.constant 0 : index
    %60 = vector.load %arg9[%c0_30, %c0_31] : memref<1x128xf32, #tpu.memory_space<vmem>>, vector<1x128xf32>
    %61 = vector.broadcast %60 : vector<1x128xf32> to vector<56x128xf32>
    %62 = arith.addf %59, %61 : vector<56x128xf32>
    %c0_32 = arith.constant 0 : index
    %c0_33 = arith.constant 0 : index
    %63 = vector.load %arg10[%c0_32, %c0_33] : memref<56x128xf32, #tpu.memory_space<vmem>>, vector<56x128xf32>
    tpu.vector_store %arg10[%c0_32, %c0_33], %62 {strides = array<i32>} : memref<56x128xf32, #tpu.memory_space<vmem>>, vector<56x128xf32>,
    return
  }
  func.func @transform_0(%arg0: i32) -> (i32, i32) {
    %c0_i32 = arith.constant 0 : i32
    %c0_i32_0 = arith.constant 0 : i32
    return %arg0, %c0_i32 : i32, i32
  }
  func.func @transform_1(%arg0: i32) -> (i32, i32) {
    %c0_i32 = arith.constant 0 : i32
    %c0_i32_0 = arith.constant 0 : i32
    %c0_i32_1 = arith.constant 0 : i32
    return %c0_i32, %c0_i32_0 : i32, i32
  }
  func.func @transform_2(%arg0: i32) -> (i32, i32) {
    %c0_i32 = arith.constant 0 : i32
    %c0_i32_0 = arith.constant 0 : i32
    %c0_i32_1 = arith.constant 0 : i32
    return %c0_i32, %c0_i32_0 : i32, i32
  }
  func.func @transform_3(%arg0: i32) -> (i32, i32) {
    %c0_i32 = arith.constant 0 : i32
    %c0_i32_0 = arith.constant 0 : i32
    %c0_i32_1 = arith.constant 0 : i32
    return %c0_i32, %c0_i32_0 : i32, i32
  }
  func.func @transform_4(%arg0: i32) -> (i32, i32) {
    %c0_i32 = arith.constant 0 : i32
    %c0_i32_0 = arith.constant 0 : i32
    %c0_i32_1 = arith.constant 0 : i32
    return %c0_i32, %c0_i32_0 : i32, i32
  }
  func.func @transform_5(%arg0: i32) -> (i32, i32) {
    %c0_i32 = arith.constant 0 : i32
    %c0_i32_0 = arith.constant 0 : i32
    %c0_i32_1 = arith.constant 0 : i32
    return %c0_i32, %c0_i32_0 : i32, i32
  }
  func.func @transform_6(%arg0: i32) -> (i32, i32) {
    %c0_i32 = arith.constant 0 : i32
    %c0_i32_0 = arith.constant 0 : i32
    %c0_i32_1 = arith.constant 0 : i32
    return %c0_i32, %c0_i32_0 : i32, i32
  }
  func.func @transform_7(%arg0: i32) -> (i32, i32) {
    %c0_i32 = arith.constant 0 : i32
    %c0_i32_0 = arith.constant 0 : i32
    %c0_i32_1 = arith.constant 0 : i32
    return %c0_i32, %c0_i32_0 : i32, i32
  }
  func.func @transform_8(%arg0: i32) -> (i32, i32) {
    %c0_i32 = arith.constant 0 : i32
    %c0_i32_0 = arith.constant 0 : i32
    %c0_i32_1 = arith.constant 0 : i32
    return %c0_i32, %c0_i32_0 : i32, i32
  }
  func.func @transform_9(%arg0: i32) -> (i32, i32) {
    %c0_i32 = arith.constant 0 : i32
    %c0_i32_0 = arith.constant 0 : i32
    return %arg0, %c0_i32 : i32, i32
  }
}

</mosaic_0001>

<bundles_post_ra>
// kernel: tpu_custom_call.1
= control target key start
LH: loop header
LB: loop body
LE: loop exit
PB: predicated region body
PF: predicated region fallthrough
CT: control target
= control target key end

     0   :  { %14 = vsyncpa [#allocation3], 0  ;;  %s7516_s0 = inlined_call_operand.hbm [shape: bf16[56,64], index: 0, kind: input, shape index: {}]   ;;  %s7517_s1 = inlined_call_operand.hbm [shape: bf16[64,256], index: 1, kind: input, shape index: {}]   ;;  %s7518_s2 = inlined_call_operand.vmem [shape: f32[1,256], index: 2, kind: input, shape index: {}]   ;;  %s7519_s3 = inlined_call_operand.hbm [shape: bf16[256,512], index: 3, kind: input, shape index: {}]   ;;  %s7520_s4 = inlined_call_operand.vmem [shape: f32[1,512], index: 4, kind: input, shape index: {}]   ;;  %s7521_s5 = inlined_call_operand.hbm [shape: bf16[512,1024], index: 5, kind: input, shape index: {}]   ;;  %s7522_s6 = inlined_call_operand.vmem [shape: f32[1,1024], index: 6, kind: input, shape index: {}]   ;;  %s7523_s7 = inlined_call_operand.hbm [shape: bf16[1024,128], index: 7, kind: input, shape index: {}]   ;;  %s7524_s8 = inlined_call_operand.vmem [shape: f32[1,128], index: 8, kind: input, shape index: {}]   ;;  %s7525_s9 = inlined_call_operand.hbm [shape: f32[56,128], index: 9, kind: output, shape index: {}]  }
   0x1   :  { %15 = vsyncpa [#allocation6], 0 }
   0x2   :  { %16 = vsyncpa [#allocation9], 0 }
   0x3   :  { %17 = vsyncpa [#allocation4], 0  ;;  %s5928_s30 = smov [#allocation5]   ;;  %s5788_s13 = scalar_lea.hbm %s7517_s1, 1024 }
   0x4   :  { %s35_s10 = sshll.u32 %s5928_s30, 4  ;;  %p5789_p0 = scmp.ne.s32.totalorder %s7517_s1, %s5788_s13  ;;  %s36_s10 = int_to_ptr.vmem [resolvable:$true] %s35_s10 }
   0x5   :  { %p5792_p1 = scmp.lt.u32.totalorder %s5788_s13, %s7517_s1 }
   0x7   :  { %p5794_p2 = pnand %p5792_p1, %p5789_p0 }
   0x9   :  { %5797 = shalt.err (!%p5794_p2)
}
   0xa   :  { %s5798_s18 = scalar_lea.vmem %s36_s10, 1024  ;;  %p5803_p4 = scmp.lt.s32.totalorder %s36_s10, %s36_s10 }
   0xb   :  { %p5799_p3 = scmp.ne.s32.totalorder %s36_s10, %s5798_s18  ;;  %p5804_p5 = scmp.lt.s32.totalorder %s5798_s18, %s5798_s18 }
   0xd   :  { %p5805_p6 = por %p5804_p5, %p5803_p4 }
   0xf   :  { %p5806_p7 = pnand %p5805_p6, %p5799_p3 }
  0x11   :  { %5809 = shalt.err (!%p5806_p7)
}
  0x12   :  { %s5929_s19 = smov 128   ;;  %s5930_s20 = smov 8  }
  0x13   :  { %41 = dma.hbm_to_vmem [thread:$0]  %s7517_s1, 1024, %s36_s10, [#allocation6], %s5929_s19, %s5929_s19, %s5930_s20  }
  0x14   :  { %s5931_s23 = smov [#allocation8]   ;;  %s5810_s27 = scalar_lea.hbm %s7521_s5, 32768 }
  0x15   :  { %s63_s24 = sshll.u32 %s5931_s23, 4  ;;  %p5811_p8 = scmp.ne.s32.totalorder %s7521_s5, %s5810_s27  ;;  %s64_s24 = int_to_ptr.vmem [resolvable:$true] %s63_s24 }
  0x16   :  { %p5814_p9 = scmp.lt.u32.totalorder %s5810_s27, %s7521_s5 }
  0x18   :  { %p5816_p10 = pnand %p5814_p9, %p5811_p8 }
  0x1a   :  { %5819 = shalt.err (!%p5816_p10)
}
  0x1b   :  { %s5820_s12 = scalar_lea.vmem %s64_s24, 32768  ;;  %p5825_p12 = scmp.lt.s32.totalorder %s64_s24, %s64_s24 }
  0x1c   :  { %p5821_p11 = scmp.ne.s32.totalorder %s64_s24, %s5820_s12  ;;  %p5826_p13 = scmp.lt.s32.totalorder %s5820_s12, %s5820_s12 }
  0x1e   :  { %p5827_p0 = por %p5826_p13, %p5825_p12 }
  0x20   :  { %p5828_p1 = pnand %p5827_p0, %p5821_p11 }
  0x22   :  { %5831 = shalt.err (!%p5828_p1)
}
  0x23   :  { %s5932_s1 = smov 512   ;;  %s5933_s10 = smov 32  }
  0x24   :  { %69 = dma.hbm_to_vmem [thread:$0]  %s7521_s5, 32768, %s64_s24, [#allocation9], %s5932_s1, %s5932_s1, %s5933_s10  }
  0x25   :  { %s5934_s15 = smov [#allocation2]   ;;  %s5832_s21 = scalar_lea.hbm %s7516_s0, 448 }
  0x26   :  { %s23_s16 = sshll.u32 %s5934_s15, 4  ;;  %p5833_p2 = scmp.ne.s32.totalorder %s7516_s0, %s5832_s21  ;;  %s24_s16 = int_to_ptr.vmem [resolvable:$true] %s23_s16 }
  0x27   :  { %p5836_p3 = scmp.lt.u32.totalorder %s5832_s21, %s7516_s0 }
  0x29   :  { %p5838_p4 = pnand %p5836_p3, %p5833_p2 }
  0x2b   :  { %5841 = shalt.err (!%p5838_p4)
}
  0x2c   :  { %s5842_s27 = scalar_lea.vmem %s24_s16, 448  ;;  %p5847_p6 = scmp.lt.s32.totalorder %s24_s16, %s24_s16 }
  0x2d   :  { %p5843_p5 = scmp.ne.s32.totalorder %s24_s16, %s5842_s27  ;;  %p5848_p7 = scmp.lt.s32.totalorder %s5842_s27, %s5842_s27 }
  0x2f   :  { %p5849_p8 = por %p5848_p7, %p5847_p6 }
  0x31   :  { %p5850_p9 = pnand %p5849_p8, %p5843_p5 }
  0x33   :  { %5853 = shalt.err (!%p5850_p9)
}
  0x34   :  { %s5935_s5 = smov 64   ;;  %s5936_s24 = smov 4  }
  0x35   :  { %29 = dma.hbm_to_vmem [thread:$0]  %s7516_s0, 448, %s24_s16, [#allocation3], %s5935_s5, %s5935_s5, %s5936_s24  }
  0x36   :  { %s5937_s30 = smov [#allocation7]   ;;  %s5854_s10 = scalar_lea.hbm %s7519_s3, 8192 }
  0x37   :  { %s49_s11 = sshll.u32 %s5937_s30, 4  ;;  %p5855_p10 = scmp.ne.s32.totalorder %s7519_s3, %s5854_s10  ;;  %s50_s11 = int_to_ptr.vmem [resolvable:$true] %s49_s11 }
  0x38   :  { %p5858_p11 = scmp.lt.u32.totalorder %s5854_s10, %s7519_s3 }
  0x3a   :  { %p5860_p12 = pnand %p5858_p11, %p5855_p10 }
  0x3c   :  { %5863 = shalt.err (!%p5860_p12)
}
  0x3d   :  { %s5864_s18 = scalar_lea.vmem %s50_s11, 8192  ;;  %p5869_p0 = scmp.lt.s32.totalorder %s50_s11, %s50_s11 }
  0x3e   :  { %p5865_p13 = scmp.ne.s32.totalorder %s50_s11, %s5864_s18  ;;  %p5870_p1 = scmp.lt.s32.totalorder %s5864_s18, %s5864_s18 }
  0x40   :  { %p5871_p2 = por %p5870_p1, %p5869_p0 }
  0x42   :  { %p5872_p3 = pnand %p5871_p2, %p5865_p13 }
  0x44   :  { %5875 = shalt.err (!%p5872_p3)
}
  0x45   :  { %s5938_s0 = smov 256   ;;  %s5939_s16 = smov 16  }
  0x46   :  { %55 = dma.hbm_to_vmem [thread:$0]  %s7519_s3, 8192, %s50_s11, [#allocation6], %s5938_s0, %s5938_s0, %s5939_s16  }
  0x47   :  { %s5940_s23 = smov [#allocation10]   ;;  %s5876_s28 = scalar_lea.hbm %s7523_s7, 8192 }
  0x48   :  { %s77_s25 = sshll.u32 %s5940_s23, 4  ;;  %p5877_p4 = scmp.ne.s32.totalorder %s7523_s7, %s5876_s28  ;;  %s78_s25 = int_to_ptr.vmem [resolvable:$true] %s77_s25 }
  0x49   :  { %p5880_p5 = scmp.lt.u32.totalorder %s5876_s28, %s7523_s7 }
  0x4b   :  { %p5882_p6 = pnand %p5880_p5, %p5877_p4 }
  0x4d   :  { %5885 = shalt.err (!%p5882_p6)
}
  0x4e   :  { %s5886_s10 = scalar_lea.vmem %s78_s25, 8192  ;;  %p5891_p8 = scmp.lt.s32.totalorder %s78_s25, %s78_s25 }
  0x4f   :  { %p5887_p7 = scmp.ne.s32.totalorder %s78_s25, %s5886_s10  ;;  %p5892_p9 = scmp.lt.s32.totalorder %s5886_s10, %s5886_s10 }
  0x51   :  { %p5893_p10 = por %p5892_p9, %p5891_p8 }
  0x53   :  { %p5894_p11 = pnand %p5893_p10, %p5887_p7 }
  0x55   :  { %5897 = shalt.err (!%p5894_p11)
}
  0x56   :  { %83 = dma.hbm_to_vmem [thread:$0]  %s7523_s7, 8192, %s78_s25, [#allocation9], %s5935_s5, %s5935_s5, %s5936_s24  }
  0x57   :  { %5920 = dma.done.wait [#allocation3], 448  }
  0x58   :  { %5921 = vsyncadd [#allocation3], 4294966848 }
  0x59   :  { %5922 = dma.done.wait [#allocation6], 9216  }
  0x5a   :  { %5923 = vsyncadd [#allocation6], 4294958080 }
  0x5b   :  { %5924 = dma.done.wait [#allocation9], 40960  }
  0x5c   :  { %5925 = vsyncadd [#allocation9], 4294926336  ;;  %v5941_v0 = vmov 0   ;;  %v5416_v1 = vld [vmem:[#allocation5 + $0x4] ss:$8 sps:$4 sm:$0xff]   ;;  %vm187_vm0 = vcmask 523264  }
  0x5d   :  { %232 = vmatprep.mubr.bf16.mxu0 %v5941_v0  ;;  %v5418_v2 = vld [vmem:[#allocation5] ss:$8 sps:$4 sm:$0xff]   ;;  %200 = vmatprep.subr.bf16.mxu0 %v5416_v1  ;;  %v5419_v3 = vld [vmem:[#allocation5 + $0x14] ss:$8 sps:$4 sm:$0xff]   ;;  %v5421_v4 = vld [vmem:[#allocation5 + $0x10] ss:$8 sps:$4 sm:$0xff]  }
  0x5e   :  { %201 = vmatpush1.bf16.msra.mxu0 %v5418_v2  ;;  %v5422_v5 = vld [vmem:[#allocation5 + $0x24] ss:$8 sps:$4 sm:$0xff]   ;;  %v5424_v6 = vld [vmem:[#allocation5 + $0x20] ss:$8 sps:$4 sm:$0xff]   ;;  %v5425_v7 = vld [vmem:[#allocation5 + $0x34] ss:$8 sps:$4 sm:$0xff]  }
  0x5f   :  { %202 = vmatprep.subr.bf16.mxu0 %v5419_v3  ;;  %v5432_v8 = vld [vmem:[#allocation7 + $0x4] ss:$16 sps:$4 sm:$0xff]   ;;  %v5427_v9 = vld [vmem:[#allocation5 + $0x30] ss:$8 sps:$4 sm:$0xff]   ;;  %v5436_v10 = vld [vmem:[#allocation7 + $0xc] ss:$16 sps:$4 sm:$0xff]  }
  0x60   :  { %811 = vmatprep.subr.bf16.mxu1 %v5432_v8  ;;  %v5437_v11 = vld [vmem:[#allocation7] ss:$16 sps:$4 sm:$0xff]   ;;  %v5438_v12 = vld [vmem:[#allocation7 + $0x24] ss:$16 sps:$4 sm:$0xff]   ;;  %v5434_v14 = vld [vmem:[#allocation7 + $0x8] ss:$16 sps:$4 sm:$0xff]  }
  0x61   :  { %v5428_v13 = vld [vmem:[#allocation2] sm:$0xff]   ;;  %812 = vmatpush1.bf16.msra.mxu1 %v5437_v11  ;;  %v5443_v15 = vld [vmem:[#allocation7 + $0x20] ss:$16 sps:$4 sm:$0xff]   ;;  %v5442_v17 = vld [vmem:[#allocation7 + $0x2c] ss:$16 sps:$4 sm:$0xff]  }
  0x62   :  { %203 = vmatpush1.bf16.msra.mxu0 %v5421_v4  ;;  %813 = vmatprep.subr.bf16.mxu1 %v5438_v12  ;;  %v5444_v16 = vld [vmem:[#allocation7 + $0x44] ss:$16 sps:$4 sm:$0xff]   ;;  %v5449_v18 = vld [vmem:[#allocation7 + $0x40] ss:$16 sps:$4 sm:$0xff]   ;;  %v5440_v20 = vld [vmem:[#allocation7 + $0x28] ss:$16 sps:$4 sm:$0xff]  }
  0x63   :  { %204 = vmatprep.subr.bf16.mxu0 %v5422_v5  ;;  %v5450_v19 = vld [vmem:[#allocation7 + $0x64] ss:$16 sps:$4 sm:$0xff]   ;;  %v5448_v21 = vld [vmem:[#allocation7 + $0x4c] ss:$16 sps:$4 sm:$0xff]   ;;  %v5455_v23 = vld [vmem:[#allocation7 + $0x60] ss:$16 sps:$4 sm:$0xff]  }
  0x64   :  { %v5429_v22 = vld [vmem:[#allocation2 + $0x8] sm:$0xff]   ;;  %v5456_v24 = vld [vmem:[#allocation7 + $0x84] ss:$16 sps:$4 sm:$0xff]   ;;  %v5446_v25 = vld [vmem:[#allocation7 + $0x48] ss:$16 sps:$4 sm:$0xff]  }
  0x65   :  { %814 = vmatpush1.bf16.msra.mxu1 %v5443_v15  ;;  %v5454_v26 = vld [vmem:[#allocation7 + $0x6c] ss:$16 sps:$4 sm:$0xff]   ;;  %v5461_v27 = vld [vmem:[#allocation7 + $0x80] ss:$16 sps:$4 sm:$0xff]   ;;  %v5462_v28 = vld [vmem:[#allocation7 + $0xa4] ss:$16 sps:$4 sm:$0xff]  }
  0x66   :  { %205 = vmatpush1.bf16.msra.mxu0 %v5424_v6  ;;  %815 = vmatprep.subr.bf16.mxu1 %v5444_v16  ;;  %v5452_v29 = vld [vmem:[#allocation7 + $0x68] ss:$16 sps:$4 sm:$0xff]   ;;  %v5460_v31 = vld [vmem:[#allocation7 + $0x8c] ss:$16 sps:$4 sm:$0xff]   ;;  %v5467_v33 = vld [vmem:[#allocation7 + $0xa0] ss:$16 sps:$4 sm:$0xff]  }
  0x67   :  { %206 = vmatprep.subr.bf16.mxu0 %v5425_v7  ;;  %v5430_v30 = vld [vmem:[#allocation2 + $0x10] sm:$0xff]   ;;  %v5466_v34 = vld [vmem:[#allocation7 + $0xac] ss:$16 sps:$4 sm:$0xff]   ;;  %v5473_v36 = vld [vmem:[#allocation7 + $0xc0] ss:$16 sps:$4 sm:$0xff]  }
  0x68   :  { %v5458_v32 = vld [vmem:[#allocation7 + $0x88] ss:$16 sps:$4 sm:$0xff]   ;;  %v5468_v35 = vld [vmem:[#allocation7 + $0xc4] ss:$16 sps:$4 sm:$0xff]   ;;  %v5472_v39 = vld [vmem:[#allocation7 + $0xcc] ss:$16 sps:$4 sm:$0xff]  }
  0x69   :  { %816 = vmatpush1.bf16.msra.mxu1 %v5449_v18  ;;  %v5474_v37 = vld [vmem:[#allocation7 + $0xe4] ss:$16 sps:$4 sm:$0xff]   ;;  %v5464_v38 = vld [vmem:[#allocation7 + $0xa8] ss:$16 sps:$4 sm:$0xff]   ;;  %v5479_v40 = vld [vmem:[#allocation7 + $0xe0] ss:$16 sps:$4 sm:$0xff]  }
  0x6a   :  { %207 = vmatpush1.bf16.msra.mxu0 %v5427_v9  ;;  %817 = vmatprep.subr.bf16.mxu1 %v5450_v19  ;;  %v5431_v41 = vld [vmem:[#allocation2 + $0x18] ss:$0 sps:$4 sm:$0xff]   ;;  %v5470_v42 = vld [vmem:[#allocation7 + $0xc8] ss:$16 sps:$4 sm:$0xff]   ;;  %v5480_v45 = vld [vmem:[#allocation7 + $0x104] ss:$16 sps:$4 sm:$0xff]  }
  0x6b   :  { %882 = vmatprep.subr.bf16.mxu0 %v5436_v10  ;;  %v5478_v43 = vld [vmem:[#allocation7 + $0xec] ss:$16 sps:$4 sm:$0xff]   ;;  %v5476_v44 = vld [vmem:[#allocation7 + $0xe8] ss:$16 sps:$4 sm:$0xff]   ;;  %v5485_v48 = vld [vmem:[#allocation7 + $0x100] ss:$16 sps:$4 sm:$0xff]  }
  0x6c   :  { %v5484_v46 = vld [vmem:[#allocation7 + $0x10c] ss:$16 sps:$4 sm:$0xff]   ;;  %v5482_v47 = vld [vmem:[#allocation7 + $0x108] ss:$16 sps:$4 sm:$0xff]   ;;  %v5486_v49 = vld [vmem:[#allocation7 + $0x124] ss:$16 sps:$4 sm:$0xff]  }
  0x6d   :  { %4716 = vmatmul.mubr.msk.bf16.vlgmr.msra.gmra.mrb[0].mxu0 %vm187_vm0, %v5428_v13  ;;  %818 = vmatpush1.bf16.msra.mxu1 %v5455_v23  ;;  %v5490_v50 = vld [vmem:[#allocation7 + $0x12c] ss:$16 sps:$4 sm:$0xff]   ;;  %v5488_v51 = vld [vmem:[#allocation7 + $0x128] ss:$16 sps:$4 sm:$0xff]   ;;  %v5491_v52 = vld [vmem:[#allocation7 + $0x120] ss:$16 sps:$4 sm:$0xff]  }
  0x6e   :  { %242 = vmatprep.mubr.bf16.mxu0 %v5941_v0  ;;  %883 = vmatpush1.bf16.msra.mxu0 %v5434_v14  ;;  %v5492_v53 = vld [vmem:[#allocation7 + $0x144] ss:$16 sps:$4 sm:$0xff]   ;;  %v5496_v54 = vld [vmem:[#allocation7 + $0x14c] ss:$16 sps:$4 sm:$0xff]   ;;  %v5494_v55 = vld [vmem:[#allocation7 + $0x148] ss:$16 sps:$4 sm:$0xff]  }
  0x6f   :  { %884 = vmatprep.subr.bf16.mxu0 %v5442_v17  ;;  %819 = vmatprep.subr.bf16.mxu1 %v5456_v24  ;;  %v5497_v56 = vld [vmem:[#allocation7 + $0x140] ss:$16 sps:$4 sm:$0xff]   ;;  %v5498_v57 = vld [vmem:[#allocation7 + $0x164] ss:$16 sps:$4 sm:$0xff]   ;;  %v5502_v58 = vld [vmem:[#allocation7 + $0x16c] ss:$16 sps:$4 sm:$0xff]  }
  0x70   :  { %v5500_v59 = vld [vmem:[#allocation7 + $0x168] ss:$16 sps:$4 sm:$0xff]   ;;  %v5503_v60 = vld [vmem:[#allocation7 + $0x160] ss:$16 sps:$4 sm:$0xff]   ;;  %v5504_v61 = vld [vmem:[#allocation7 + $0x184] ss:$16 sps:$4 sm:$0xff]  }
  0x71   :  { %820 = vmatpush1.bf16.msra.mxu1 %v5461_v27  ;;  %v5508_v62 = vld [vmem:[#allocation7 + $0x18c] ss:$16 sps:$4 sm:$0xff]   ;;  %v5506_v63 = vld [vmem:[#allocation7 + $0x188] ss:$16 sps:$4 sm:$0xff]   ;;  %v5510_v1 = vld [vmem:[#allocation7 + $0x1a4] ss:$16 sps:$4 sm:$0xff]  }
  0x72   :  { %885 = vmatpush1.bf16.msra.mxu0 %v5440_v20  ;;  %821 = vmatprep.subr.bf16.mxu1 %v5462_v28  ;;  %v5514_v2 = vld [vmem:[#allocation7 + $0x1ac] ss:$16 sps:$4 sm:$0xff]   ;;  %v5512_v3 = vld [vmem:[#allocation7 + $0x1a8] ss:$16 sps:$4 sm:$0xff]   ;;  %v5515_v4 = vld [vmem:[#allocation7 + $0x1a0] ss:$16 sps:$4 sm:$0xff]  }
  0x73   :  { %886 = vmatprep.subr.bf16.mxu0 %v5448_v21  ;;  %v5516_v5 = vld [vmem:[#allocation7 + $0x1c4] ss:$16 sps:$4 sm:$0xff]   ;;  %v5520_v6 = vld [vmem:[#allocation7 + $0x1cc] ss:$16 sps:$4 sm:$0xff]   ;;  %v5518_v7 = vld [vmem:[#allocation7 + $0x1c8] ss:$16 sps:$4 sm:$0xff]   ;;  %v119_v21 = vlaneseq }
  0x74   :  { %v5521_v8 = vld [vmem:[#allocation7 + $0x1c0] ss:$16 sps:$4 sm:$0xff]   ;;  %v5522_v9 = vld [vmem:[#allocation7 + $0x1e4] ss:$16 sps:$4 sm:$0xff]   ;;  %v5526_v10 = vld [vmem:[#allocation7 + $0x1ec] ss:$16 sps:$4 sm:$0xff]  }
  0x75   :  { %4717 = vmatmul.mubr.msk.bf16.gmra.mrb[4].mxu0 %vm187_vm0, %v5429_v22  ;;  %822 = vmatpush1.bf16.msra.mxu1 %v5467_v33  ;;  %v5524_v11 = vld [vmem:[#allocation7 + $0x1e8] ss:$16 sps:$4 sm:$0xff]   ;;  %v5527_v12 = vld [vmem:[#allocation7 + $0x1e0] ss:$16 sps:$4 sm:$0xff]   ;;  %v6086_v22 = vshrl.u32 %v119_v21, 7 }
  0x76   :  { %252 = vmatprep.mubr.bf16.mxu0 %v5941_v0  ;;  %887 = vmatpush1.bf16.msra.mxu0 %v5446_v25  ;;  %v6070_v13 = vld [vmem:[#allocation8] sm:$0xff]  ;;  %v6074_v15 = vld [vmem:[#allocation8 + $0x8] sm:$0xff] }
  0x77   :  { %888 = vmatprep.subr.bf16.mxu0 %v5454_v26  ;;  %823 = vmatprep.subr.bf16.mxu1 %v5468_v35  ;;  %v6072_v14 = vld [vmem:[#allocation8 + $0x20] sm:$0xff]  ;;  %v6080_v18 = vld [vmem:[#allocation8 + $0x28] sm:$0xff]  ;;  %7576 = vst [vmem:[#allocation16_spill] sm:$0xff] %v6086_v22  ;;  %v6089_v23 = vsub.s32 0, %v6086_v22  ;;  %v6095_v25 = vsub.s32 1, %v6086_v22 }
  0x78   :  { %v4784_v16 = vcombine.low %v6070_v13, %v6072_v14  ;;  %v4785_v17 = vcombine.high %v6070_v13, %v6072_v14  ;;  %v4786_v19 = vcombine.low %v6074_v15, %v6080_v18  ;;  %v4787_v20 = vcombine.high %v6074_v15, %v6080_v18  ;;  %v117_v24 = vld [vmem:[%s7518_s2] sm:$0x3] }
  0x79   :  { %824 = vmatpush1.bf16.msra.mxu1 %v5473_v36  ;;  %7577 = vst [vmem:[#allocation17_spill] sm:$0xff] %v6089_v23  ;;  %7578 = vst [vmem:[#allocation18_spill] sm:$0xff] %v6095_v25  ;;  %v6098_v26 = vrot.slane %v117_v24, %v6089_v23  ;;  %v6101_v27 = vrot.slane %v117_v24, %v6095_v25  ;;  %v1249_v14 = vld [vmem:[#allocation8 + $0xe0] sm:$0xff] }
  0x7a   :  { %889 = vmatpush1.bf16.msra.mxu0 %v5452_v29  ;;  %825 = vmatprep.subr.bf16.mxu1 %v5474_v37 }
  0x7b   :  { %890 = vmatprep.subr.bf16.mxu0 %v5460_v31 }
  0x7d   :  { %4718 = vmatmul.mubr.msk.bf16.gmra.mrb[8].mxu0 %vm187_vm0, %v5430_v30  ;;  %826 = vmatpush1.bf16.msra.mxu1 %v5479_v40 }
  0x7e   :  { %262 = vmatprep.mubr.bf16.mxu0 %v5941_v0  ;;  %891 = vmatpush1.bf16.msra.mxu0 %v5458_v32  ;;  %v5509_v0 = vld [vmem:[#allocation7 + $0x180] ss:$16 sps:$4 sm:$0xff]  }
  0x7f   :  { %892 = vmatprep.subr.bf16.mxu0 %v5466_v34  ;;  %827 = vmatprep.subr.bf16.mxu1 %v5480_v45 }
  0x81   :  { %828 = vmatpush1.bf16.msra.mxu1 %v5485_v48 }
  0x82   :  { %893 = vmatpush1.bf16.msra.mxu0 %v5464_v38  ;;  %829 = vmatprep.subr.bf16.mxu1 %v5486_v49 }
  0x83   :  { %894 = vmatprep.subr.bf16.mxu0 %v5472_v39 }
  0x85   :  { %4719 = vmatmul.mubr.msk.bf16.gmra.mrb[12].mxu0 %vm187_vm0, %v5431_v41  ;;  %830 = vmatpush1.bf16.msra.mxu1 %v5491_v52 }
  0x86   :  { %895 = vmatpush1.bf16.msra.mxu0 %v5470_v42  ;;  %831 = vmatprep.subr.bf16.mxu1 %v5492_v53  ;;  %v6117_v42 = vld [vmem:[#allocation8 + $0x40] sm:$0xff] }
  0x87   :  { %896 = vmatprep.subr.bf16.mxu0 %v5478_v43  ;;  %v6119_v43 = vld [vmem:[#allocation8 + $0x60] sm:$0xff] }
  0x88   :  { %v4792_v53 = vcombine.low %v6117_v42, %v6119_v43 }
  0x89   :  { %832 = vmatpush1.bf16.msra.mxu1 %v5497_v56 }
  0x8a   :  { %897 = vmatpush1.bf16.msra.mxu0 %v5476_v44  ;;  %833 = vmatprep.subr.bf16.mxu1 %v5498_v57 }
  0x8b   :  { %898 = vmatprep.subr.bf16.mxu0 %v5484_v46 }
  0x8d   :  { %834 = vmatpush1.bf16.msra.mxu1 %v5503_v60 }
  0x8e   :  { %899 = vmatpush1.bf16.msra.mxu0 %v5482_v47  ;;  %835 = vmatprep.subr.bf16.mxu1 %v5504_v61 }
  0x8f   :  { %900 = vmatprep.subr.bf16.mxu0 %v5490_v50 }
  0x91   :  { %836 = vmatpush1.bf16.msra.mxu1 %v5509_v0 }
  0x92   :  { %901 = vmatpush1.bf16.msra.mxu0 %v5488_v51  ;;  %837 = vmatprep.subr.bf16.mxu1 %v5510_v1 }
  0x93   :  { %902 = vmatprep.subr.bf16.mxu0 %v5496_v54 }
  0x95   :  { %838 = vmatpush1.bf16.msra.mxu1 %v5515_v4  ;;  %v6147_v4 = vld [vmem:[#allocation8 + $0x48] sm:$0xff] }
  0x96   :  { %903 = vmatpush1.bf16.msra.mxu0 %v5494_v55  ;;  %839 = vmatprep.subr.bf16.mxu1 %v5516_v5  ;;  %v6149_v5 = vld [vmem:[#allocation8 + $0x68] sm:$0xff] }
  0x97   :  { %904 = vmatprep.subr.bf16.mxu0 %v5502_v58  ;;  %v4793_v58 = vcombine.high %v6117_v42, %v6119_v43  ;;  %v4794_v24 = vcombine.low %v6147_v4, %v6149_v5  ;;  %v1257_v43 = vld [vmem:[#allocation8 + $0x120] sm:$0xff] }
  0x99   :  { %840 = vmatpush1.bf16.msra.mxu1 %v5521_v8 }
  0x9a   :  { %905 = vmatpush1.bf16.msra.mxu0 %v5500_v59  ;;  %841 = vmatprep.subr.bf16.mxu1 %v5522_v9 }
  0x9b   :  { %906 = vmatprep.subr.bf16.mxu0 %v5508_v62 }
  0x9d   :  { %842 = vmatpush1.bf16.msra.mxu1 %v5527_v12  ;;  %v6155_v12 = vld [vmem:[#allocation8 + $0x80] sm:$0xff] }
  0x9e   :  { %907 = vmatpush1.bf16.msra.mxu0 %v5506_v63  ;;  %2799 = vmatprep.subr.bf16.mxu1 %v4785_v17  ;;  %v6157_v17 = vld [vmem:[#allocation8 + $0xa0] sm:$0xff] }
  0x9f   :  { %908 = vmatprep.subr.bf16.mxu0 %v5514_v2 }
  0xa2   :  { %909 = vmatpush1.bf16.msra.mxu0 %v5512_v3 }
  0xa3   :  { %910 = vmatprep.subr.bf16.mxu0 %v5520_v6 }
  0xa6   :  { %911 = vmatpush1.bf16.msra.mxu0 %v5518_v7 }
  0xa7   :  { %912 = vmatprep.subr.bf16.mxu0 %v5526_v10 }
  0xaa   :  { %913 = vmatpush1.bf16.msra.mxu0 %v5524_v11 }
  0xab   :  { %2941 = vmatprep.subr.bf16.mxu0 %v4787_v20 }
 0x140   :  { %v234_v28 = vpop.f32.mrb[0].mxu0 }
 0x141   :  { %v235_v29 = vadd.f32 %v234_v28, %v6098_v26  ;;  %v236_v30 = vpop.f32.mrb[1].mxu0 }
 0x142   :  { %v6105_v31 = vadd.f32 %v236_v30, %v6101_v27  ;;  %v238_v32 = vpop.f32.mrb[2].mxu0 }
 0x143   :  { %v285_v33 = vmul.f32 0.044715, %v235_v29  ;;  %v6108_v34 = vadd.f32 %v238_v32, %v6098_v26  ;;  %v240_v35 = vpop.f32.mrb[3].mxu0 }
 0x144   :  { %v286_v36 = vmul.f32 0.044715, %v6105_v31  ;;  %v6112_v37 = vadd.f32 %v240_v35, %v6101_v27 }
 0x145   :  { %v299_v38 = vmul.f32 %v285_v33, %v235_v29  ;;  %v287_v39 = vmul.f32 0.044715, %v6108_v34  ;;  %v4795_v33 = vcombine.high %v6147_v4, %v6149_v5  ;;  %v1258_v4 = vld [vmem:[#allocation8 + $0x128] sm:$0xff] }
 0x146   :  { %v300_v40 = vmul.f32 %v286_v36, %v6105_v31  ;;  %v288_v41 = vmul.f32 0.044715, %v6112_v37 }
 0x147   :  { %v313_v44 = vmul.f32 %v299_v38, %v235_v29  ;;  %v301_v45 = vmul.f32 %v287_v39, %v6108_v34  ;;  %v271_v39 = vmul.f32 0.5, %v235_v29 }
 0x148   :  { %v302_v46 = vmul.f32 %v288_v41, %v6112_v37  ;;  %v244_v47 = vpop.f32.mrb[4].mxu0  ;;  %v314_v48 = vmul.f32 %v300_v40, %v6105_v31  ;;  %v4801_v40 = vcombine.high %v6155_v12, %v6157_v17 }
 0x149   :  { %v315_v49 = vmul.f32 %v301_v45, %v6108_v34  ;;  %v6126_v50 = vadd.f32 %v244_v47, %v6098_v26  ;;  %v246_v51 = vpop.f32.mrb[5].mxu0  ;;  %v327_v52 = vadd.f32 %v313_v44, %v235_v29  ;;  %v272_v29 = vmul.f32 0.5, %v6105_v31 }
 0x14a   :  { %v6131_v54 = vadd.f32 %v246_v51, %v6101_v27  ;;  %v248_v55 = vpop.f32.mrb[6].mxu0  ;;  %v316_v56 = vmul.f32 %v302_v46, %v6112_v37  ;;  %v328_v57 = vadd.f32 %v314_v48, %v6105_v31 }
 0x14b   :  { %v289_v59 = vmul.f32 0.044715, %v6126_v50  ;;  %v6139_v60 = vadd.f32 %v248_v55, %v6098_v26  ;;  %v250_v61 = vpop.f32.mrb[7].mxu0  ;;  %v329_v62 = vadd.f32 %v315_v49, %v6108_v34  ;;  %v341_v63 = vmul.f32 0.7978846, %v327_v52 }
 0x14c   :  { %v290_v0 = vmul.f32 0.044715, %v6131_v54  ;;  %v6144_v1 = vadd.f32 %v250_v61, %v6101_v27  ;;  %v330_v2 = vadd.f32 %v316_v56, %v6112_v37  ;;  %v342_v3 = vmul.f32 0.7978846, %v328_v57 }
 0x14d   :  { %v303_v6 = vmul.f32 %v289_v59, %v6126_v50  ;;  %v291_v7 = vmul.f32 0.044715, %v6139_v60  ;;  %v343_v8 = vmul.f32 0.7978846, %v329_v62  ;;  %5592 = vtanh.f32 %v341_v63 }
 0x14e   :  { %v304_v9 = vmul.f32 %v290_v0, %v6131_v54  ;;  %v292_v10 = vmul.f32 0.044715, %v6144_v1  ;;  %v344_v11 = vmul.f32 0.7978846, %v330_v2  ;;  %5594 = vtanh.f32 %v342_v3 }
 0x14f   :  { %v317_v20 = vmul.f32 %v303_v6, %v6126_v50  ;;  %v305_v21 = vmul.f32 %v291_v7, %v6139_v60  ;;  %5596 = vtanh.f32 %v343_v8  ;;  %v274_v8 = vmul.f32 0.5, %v6112_v37 }
 0x150   :  { %v318_v28 = vmul.f32 %v304_v9, %v6131_v54  ;;  %v306_v30 = vmul.f32 %v292_v10, %v6144_v1  ;;  %v254_v32 = vpop.f32.mrb[8].mxu0  ;;  %5598 = vtanh.f32 %v344_v11  ;;  %v273_v9 = vmul.f32 0.5, %v6108_v34 }
 0x151   :  { %v319_v35 = vmul.f32 %v305_v21, %v6139_v60  ;;  %v6169_v36 = vadd.f32 %v254_v32, %v6098_v26  ;;  %v256_v38 = vpop.f32.mrb[9].mxu0  ;;  %v331_v47 = vadd.f32 %v317_v20, %v6126_v50 }
 0x152   :  { %v320_v41 = vmul.f32 %v306_v30, %v6144_v1  ;;  %v6175_v44 = vadd.f32 %v256_v38, %v6101_v27  ;;  %v258_v45 = vpop.f32.mrb[10].mxu0  ;;  %v332_v46 = vadd.f32 %v318_v28, %v6131_v54 }
 0x153   :  { %v293_v48 = vmul.f32 0.044715, %v6169_v36  ;;  %v6181_v49 = vadd.f32 %v258_v45, %v6098_v26  ;;  %v260_v51 = vpop.f32.mrb[11].mxu0  ;;  %v333_v52 = vadd.f32 %v319_v35, %v6139_v60  ;;  %v345_v63 = vmul.f32 0.7978846, %v331_v47 }
 0x154   :  { %v294_v55 = vmul.f32 0.044715, %v6175_v44  ;;  %v6187_v56 = vadd.f32 %v260_v51, %v6101_v27  ;;  %v334_v57 = vadd.f32 %v320_v41, %v6144_v1  ;;  %v346_v59 = vmul.f32 0.7978846, %v332_v46 }
 0x155   :  { %v307_v61 = vmul.f32 %v293_v48, %v6169_v36  ;;  %v295_v62 = vmul.f32 0.044715, %v6181_v49  ;;  %v347_v0 = vmul.f32 0.7978846, %v333_v52  ;;  %v276_v47 = vmul.f32 0.5, %v6131_v54 }
 0x156   :  { %v308_v2 = vmul.f32 %v294_v55, %v6175_v44  ;;  %v296_v31 = vmul.f32 0.044715, %v6187_v56  ;;  %v348_v3 = vmul.f32 0.7978846, %v334_v57  ;;  %5600 = vtanh.f32 %v346_v59 }
 0x157   :  { %v5593_v6 = vpop.eup %5592  ;;  %v309_v7 = vmul.f32 %v295_v62, %v6181_v49  ;;  %5602 = vtanh.f32 %v345_v63  ;;  %v321_v32 = vmul.f32 %v307_v61, %v6169_v36  ;;  %v280_v42 = vmul.f32 0.5, %v6175_v44 }
 0x158   :  { %v5595_v10 = vpop.eup %5594  ;;  %v322_v11 = vmul.f32 %v308_v2, %v6175_v44  ;;  %v310_v20 = vmul.f32 %v296_v31, %v6187_v56  ;;  %v264_v21 = vpop.f32.mrb[12].mxu0  ;;  %v369_v28 = vadd.f32 1.0, %v5593_v6  ;;  %5604 = vtanh.f32 %v348_v3 }
 0x159   :  { %v5597_v30 = vpop.eup %5596  ;;  %v6201_v35 = vadd.f32 %v264_v21, %v6098_v26  ;;  %v266_v38 = vpop.f32.mrb[13].mxu0  ;;  %v370_v41 = vadd.f32 1.0, %v5595_v10  ;;  %5606 = vtanh.f32 %v347_v0  ;;  %v323_v51 = vmul.f32 %v309_v7, %v6181_v49 }
 0x15a   :  { %v5599_v37 = vpop.eup %5598  ;;  %v324_v34 = vmul.f32 %v310_v20, %v6187_v56  ;;  %v6205_v45 = vadd.f32 %v266_v38, %v6101_v27  ;;  %v371_v46 = vadd.f32 1.0, %v5597_v30  ;;  %v268_v48 = vpop.f32.mrb[14].mxu0  ;;  %v383_v26 = vmul.f32 %v369_v28, %v271_v39  ;;  %v1238_v28 = vld [vmem:[#allocation8 + $0x88] sm:$0xff] }
 0x15b   :  { %v297_v52 = vmul.f32 0.044715, %v6201_v35  ;;  %v372_v55 = vadd.f32 1.0, %v5599_v37  ;;  %v269_v57 = vpop.f32.mrb[15].mxu0  ;;  %v336_v62 = vadd.f32 %v322_v11, %v6175_v44  ;;  %v384_v0 = vmul.f32 %v370_v41, %v272_v29  ;;  %v1242_v30 = vld [vmem:[#allocation8 + $0xa8] sm:$0xff] }
 0x15c   :  { %v298_v59 = vmul.f32 0.044715, %v6205_v45  ;;  %v385_v61 = vmul.f32 %v371_v46, %v273_v9  ;;  %v338_v63 = vadd.f32 %v324_v34, %v6187_v56  ;;  %v335_v54 = vadd.f32 %v321_v32, %v6169_v36 }
 0x15d   :  { %v311_v27 = vmul.f32 %v297_v52, %v6201_v35  ;;  %v386_v2 = vmul.f32 %v372_v55, %v274_v8  ;;  %v350_v6 = vmul.f32 0.7978846, %v336_v62  ;;  %v278_v10 = vmul.f32 0.5, %v6144_v1 }
 0x15e   :  { %v312_v31 = vmul.f32 %v298_v59, %v6205_v45  ;;  %v397_v3 = vpack.c.bf16 %v385_v61, %v383_v26  ;;  %v352_v7 = vmul.f32 0.7978846, %v338_v63  ;;  %v337_v9 = vadd.f32 %v323_v51, %v6181_v49  ;;  %v1250_v61 = vld [vmem:[#allocation8 + $0xe8] sm:$0xff] }
 0x15f   :  { %v398_v39 = vpack.c.bf16 %v386_v2, %v384_v0  ;;  %v349_v20 = vmul.f32 0.7978846, %v335_v54  ;;  %v275_v21 = vmul.f32 0.5, %v6126_v50  ;;  %5608 = vtanh.f32 %v350_v6 }
 0x160   :  { %v5601_v11 = vpop.eup %5600  ;;  %v326_v29 = vmul.f32 %v312_v31, %v6205_v45  ;;  %v325_v8 = vmul.f32 %v311_v27, %v6201_v35  ;;  %v277_v41 = vmul.f32 0.5, %v6139_v60  ;;  %5610 = vtanh.f32 %v352_v7  ;;  %v1253_v27 = vld [vmem:[#allocation8 + $0x100] sm:$0xff] }
 0x161   :  { %v5603_v32 = vpop.eup %5602  ;;  %843 = vmatprep.mubr.bf16.mxu1 %v398_v39  ;;  %914 = vmatprep.mubr.bf16.mxu0 %v398_v39  ;;  %v374_v38 = vadd.f32 1.0, %v5601_v11  ;;  %v351_v1 = vmul.f32 0.7978846, %v337_v9  ;;  %5612 = vtanh.f32 %v349_v20  ;;  %v4803_v60 = vcombine.high %v1238_v28, %v1242_v30  ;;  %v1265_v11 = vld [vmem:[#allocation8 + $0x160] sm:$0xff] }
 0x162   :  { %v5605_v37 = vpop.eup %5604  ;;  %844 = vmatmul.mubr.bf16.vlgmr.msra.gmra.mrb[0].mxu1 %v397_v3  ;;  %915 = vmatmul.mubr.bf16.vlgmr.msra.gmra.mrb[16].mxu0 %v397_v3  ;;  %v373_v34 = vadd.f32 1.0, %v5603_v32  ;;  %v340_v50 = vadd.f32 %v326_v29, %v6205_v45  ;;  %v339_v46 = vadd.f32 %v325_v8, %v6201_v35  ;;  %v281_v44 = vmul.f32 0.5, %v6181_v49 }
 0x163   :  { %v5607_v48 = vpop.eup %5606  ;;  %v376_v51 = vadd.f32 1.0, %v5605_v37  ;;  %v388_v52 = vmul.f32 %v374_v38, %v276_v47  ;;  %5614 = vtanh.f32 %v351_v1  ;;  %2800 = vmatpush1.bf16.msra.mxu1 %v4784_v16  ;;  %2942 = vmatpush1.bf16.msra.mxu0 %v4786_v19  ;;  %v1245_v47 = vld [vmem:[#allocation8 + $0xc0] sm:$0xff]  ;;  %v1246_v16 = vld [vmem:[#allocation8 + $0xc8] sm:$0xff]  ;;  %v4800_v19 = vcombine.low %v6155_v12, %v6157_v17 }
 0x164   :  { %v375_v55 = vadd.f32 1.0, %v5607_v48  ;;  %v387_v26 = vmul.f32 %v373_v34, %v275_v21  ;;  %v354_v57 = vmul.f32 0.7978846, %v340_v50  ;;  %v353_v59 = vmul.f32 0.7978846, %v339_v46  ;;  %2801 = vmatprep.subr.bf16.mxu1 %v4793_v58  ;;  %2943 = vmatprep.subr.bf16.mxu0 %v4795_v33  ;;  %v1266_v21 = vld [vmem:[#allocation8 + $0x168] sm:$0xff] }
 0x165   :  { %v390_v13 = vmul.f32 %v376_v51, %v278_v10  ;;  %v4802_v58 = vcombine.low %v1238_v28, %v1242_v30  ;;  %v4809_v62 = vcombine.high %v1245_v47, %v1249_v14  ;;  %v4811_v63 = vcombine.high %v1246_v16, %v1250_v61  ;;  %v1269_v46 = vld [vmem:[#allocation8 + $0x180] sm:$0xff] }
 0x166   :  { %v389_v15 = vmul.f32 %v375_v55, %v277_v41  ;;  %5616 = vtanh.f32 %v354_v57  ;;  %v279_v12 = vmul.f32 0.5, %v6169_v36  ;;  %v4808_v17 = vcombine.low %v1245_v47, %v1249_v14  ;;  %v1262_v36 = vld [vmem:[#allocation8 + $0x148] sm:$0xff]  ;;  %v1273_v51 = vld [vmem:[#allocation8 + $0x1a0] sm:$0xff] }
 0x167   :  { %v400_v18 = vpack.c.bf16 %v390_v13, %v388_v52  ;;  %5618 = vtanh.f32 %v353_v59  ;;  %2802 = vmatpush1.bf16.msra.mxu1 %v4792_v53  ;;  %2944 = vmatpush1.bf16.msra.mxu0 %v4794_v24  ;;  %v1254_v53 = vld [vmem:[#allocation8 + $0x108] sm:$0xff]  ;;  %v282_v24 = vmul.f32 0.5, %v6187_v56  ;;  %v4817_v3 = vcombine.high %v1253_v27, %v1257_v43  ;;  %v1261_v56 = vld [vmem:[#allocation8 + $0x140] sm:$0xff] }
 0x168   :  { %v399_v33 = vpack.c.bf16 %v389_v15, %v387_v26  ;;  %2803 = vmatprep.subr.bf16.mxu1 %v4801_v40  ;;  %2945 = vmatprep.subr.bf16.mxu0 %v4803_v60  ;;  %v4810_v40 = vcombine.low %v1246_v16, %v1250_v61  ;;  %v4819_v6 = vcombine.high %v1254_v53, %v1258_v4  ;;  %v284_v8 = vmul.f32 0.5, %v6205_v45  ;;  %v1270_v52 = vld [vmem:[#allocation8 + $0x188] sm:$0xff]  ;;  %v1277_v14 = vld [vmem:[#allocation8 + $0x1c0] sm:$0xff] }
 0x169   :  { %853 = vmatprep.mubr.bf16.mxu1 %v400_v18  ;;  %924 = vmatprep.mubr.bf16.mxu0 %v400_v18  ;;  %v5609_v5 = vpop.eup %5608  ;;  %v4816_v28 = vcombine.low %v1253_v27, %v1257_v43  ;;  %v4818_v49 = vcombine.low %v1254_v53, %v1258_v4  ;;  %v283_v41 = vmul.f32 0.5, %v6201_v35  ;;  %v4825_v34 = vcombine.high %v1261_v56, %v1265_v11  ;;  %v1274_v60 = vld [vmem:[#allocation8 + $0x1a8] sm:$0xff]  ;;  %v1281_v16 = vld [vmem:[#allocation8 + $0x1e0] sm:$0xff] }
 0x16a   :  { %854 = vmatmul.mubr.bf16.gmra.mrb[4].mxu1 %v399_v33  ;;  %925 = vmatmul.mubr.bf16.gmra.mrb[20].mxu0 %v399_v33  ;;  %v5611_v0 = vpop.eup %5610  ;;  %v378_v2 = vadd.f32 1.0, %v5609_v5  ;;  %v4827_v50 = vcombine.high %v1262_v36, %v1266_v21  ;;  %v4824_v26 = vcombine.low %v1261_v56, %v1265_v11  ;;  %v4826_v57 = vcombine.low %v1262_v36, %v1266_v21  ;;  %v1278_v61 = vld [vmem:[#allocation8 + $0x1c8] sm:$0xff]  ;;  %v1289_v43 = vld [vmem:[#allocation8 + $0x220] sm:$0xff] }
 0x16b   :  { %2804 = vmatpush1.bf16.msra.mxu1 %v4800_v19  ;;  %2946 = vmatpush1.bf16.msra.mxu0 %v4802_v58  ;;  %v5613_v54 = vpop.eup %5612  ;;  %v380_v31 = vadd.f32 1.0, %v5611_v0  ;;  %v4833_v47 = vcombine.high %v1269_v46, %v1273_v51  ;;  %v4835_v13 = vcombine.high %v1270_v52, %v1274_v60  ;;  %v1282_v15 = vld [vmem:[#allocation8 + $0x1e8] sm:$0xff]  ;;  %v4832_v19 = vcombine.low %v1269_v46, %v1273_v51  ;;  %v1309_v21 = vld [vmem:[#allocation8 + $0x2c0] sm:$0xff] }
 0x16c   :  { %2805 = vmatprep.subr.bf16.mxu1 %v4809_v62  ;;  %2947 = vmatprep.subr.bf16.mxu0 %v4811_v63  ;;  %v392_v39 = vmul.f32 %v378_v2, %v280_v42  ;;  %v377_v10 = vadd.f32 1.0, %v5613_v54  ;;  %v4834_v58 = vcombine.low %v1270_v52, %v1274_v60  ;;  %v4841_v33 = vcombine.high %v1277_v14, %v1281_v16  ;;  %v1285_v42 = vld [vmem:[#allocation8 + $0x200] sm:$0xff]  ;;  %v1286_v53 = vld [vmem:[#allocation8 + $0x208] sm:$0xff] }
 0x16d   :  { %v5615_v7 = vpop.eup %5614  ;;  %v394_v9 = vmul.f32 %v380_v31, %v282_v24  ;;  %v4843_v62 = vcombine.high %v1278_v61, %v1282_v15  ;;  %v4840_v63 = vcombine.low %v1277_v14, %v1281_v16  ;;  %v4842_v27 = vcombine.low %v1278_v61, %v1282_v15  ;;  %v1290_v5 = vld [vmem:[#allocation8 + $0x228] sm:$0xff]  ;;  %v1325_v51 = vld [vmem:[#allocation8 + $0x340] sm:$0xff] }
 0x16e   :  { %v379_v20 = vadd.f32 1.0, %v5615_v7  ;;  %v391_v29 = vmul.f32 %v377_v10, %v279_v12  ;;  %v4849_v4 = vcombine.high %v1285_v42, %v1289_v43  ;;  %v4848_v24 = vcombine.low %v1285_v42, %v1289_v43  ;;  %v1293_v12 = vld [vmem:[#allocation8 + $0x240] sm:$0xff]  ;;  %v1298_v31 = vld [vmem:[#allocation8 + $0x268] sm:$0xff] }
 0x16f   :  { %2806 = vmatpush1.bf16.msra.mxu1 %v4808_v17  ;;  %2948 = vmatpush1.bf16.msra.mxu0 %v4810_v40  ;;  %v402_v32 = vpack.c.bf16 %v394_v9, %v392_v39  ;;  %v4850_v0 = vcombine.low %v1286_v53, %v1290_v5  ;;  %v4851_v2 = vcombine.high %v1286_v53, %v1290_v5  ;;  %v1297_v17 = vld [vmem:[#allocation8 + $0x260] sm:$0xff]  ;;  %v1294_v40 = vld [vmem:[#allocation8 + $0x248] sm:$0xff] }
 0x170   :  { %v5617_v30 = vpop.eup %5616  ;;  %v393_v38 = vmul.f32 %v379_v20, %v281_v44  ;;  %2807 = vmatprep.subr.bf16.mxu1 %v4817_v3  ;;  %2949 = vmatprep.subr.bf16.mxu0 %v4819_v6  ;;  %v4857_v54 = vcombine.high %v1293_v12, %v1297_v17  ;;  %v4856_v44 = vcombine.low %v1293_v12, %v1297_v17  ;;  %v1301_v7 = vld [vmem:[#allocation8 + $0x280] sm:$0xff]  ;;  %v1302_v10 = vld [vmem:[#allocation8 + $0x288] sm:$0xff] }
 0x171   :  { %v5619_v1 = vpop.eup %5618  ;;  %v382_v37 = vadd.f32 1.0, %v5617_v30  ;;  %863 = vmatprep.mubr.bf16.mxu1 %v402_v32  ;;  %934 = vmatprep.mubr.bf16.mxu0 %v402_v32  ;;  %v4858_v3 = vcombine.low %v1294_v40, %v1298_v31  ;;  %v4859_v6 = vcombine.high %v1294_v40, %v1298_v31  ;;  %v1305_v39 = vld [vmem:[#allocation8 + $0x2a0] sm:$0xff]  ;;  %v1306_v9 = vld [vmem:[#allocation8 + $0x2a8] sm:$0xff] }
 0x172   :  { %v401_v48 = vpack.c.bf16 %v393_v38, %v391_v29  ;;  %v381_v45 = vadd.f32 1.0, %v5619_v1  ;;  %v4865_v56 = vcombine.high %v1301_v7, %v1305_v39  ;;  %v4864_v20 = vcombine.low %v1301_v7, %v1305_v39  ;;  %v1313_v29 = vld [vmem:[#allocation8 + $0x2e0] sm:$0xff]  ;;  %v1326_v60 = vld [vmem:[#allocation8 + $0x348] sm:$0xff] }
 0x173   :  { %v396_v55 = vmul.f32 %v382_v37, %v284_v8  ;;  %2808 = vmatpush1.bf16.msra.mxu1 %v4816_v28  ;;  %2950 = vmatpush1.bf16.msra.mxu0 %v4818_v49  ;;  %v4866_v11 = vcombine.low %v1302_v10, %v1306_v9  ;;  %v4867_v36 = vcombine.high %v1302_v10, %v1306_v9  ;;  %v1310_v8 = vld [vmem:[#allocation8 + $0x2c8] sm:$0xff]  ;;  %v1321_v1 = vld [vmem:[#allocation8 + $0x320] sm:$0xff] }
 0x174   :  { %864 = vmatmul.mubr.bf16.gmra.mrb[8].mxu1 %v401_v48  ;;  %935 = vmatmul.mubr.bf16.gmra.mrb[24].mxu0 %v401_v48  ;;  %v395_v35 = vmul.f32 %v381_v45, %v283_v41  ;;  %v4873_v28 = vcombine.high %v1309_v21, %v1313_v29  ;;  %v1314_v49 = vld [vmem:[#allocation8 + $0x2e8] sm:$0xff]  ;;  %v4872_v30 = vcombine.low %v1309_v21, %v1313_v29  ;;  %v1317_v41 = vld [vmem:[#allocation8 + $0x300] sm:$0xff] }
 0x175   :  { %v404_v59 = vpack.c.bf16 %v396_v55, %v396_v55  ;;  %2809 = vmatprep.subr.bf16.mxu1 %v4825_v34  ;;  %2951 = vmatprep.subr.bf16.mxu0 %v4827_v50  ;;  %v4874_v32 = vcombine.low %v1310_v8, %v1314_v49  ;;  %v4875_v38 = vcombine.high %v1310_v8, %v1314_v49  ;;  %v1318_v37 = vld [vmem:[#allocation8 + $0x308] sm:$0xff]  ;;  %v1329_v52 = vld [vmem:[#allocation8 + $0x360] sm:$0xff] }
 0x176   :  { %v403_v18 = vpack.c.bf16 %v395_v35, %v395_v35  ;;  %v4881_v34 = vcombine.high %v1317_v41, %v1321_v1  ;;  %v1322_v50 = vld [vmem:[#allocation8 + $0x328] sm:$0xff]  ;;  %v4880_v46 = vcombine.low %v1317_v41, %v1321_v1  ;;  %v4889_v55 = vcombine.high %v1325_v51, %v1329_v52  ;;  %v6255_v5 = vld [vmem:[#allocation8 + $0x420] sm:$0xff] }
 0x177   :  { %873 = vmatprep.mubr.bf16.mxu1 %v404_v59  ;;  %944 = vmatprep.mubr.bf16.mxu0 %v404_v59  ;;  %v4882_v48 = vcombine.low %v1318_v37, %v1322_v50  ;;  %v4883_v45 = vcombine.high %v1318_v37, %v1322_v50  ;;  %v1330_v35 = vld [vmem:[#allocation8 + $0x368] sm:$0xff]  ;;  %v469_v31 = vld [vmem:[%s7520_s4] sm:$0xf] }
 0x178   :  { %2810 = vmatpush1.bf16.msra.mxu1 %v4824_v26  ;;  %2952 = vmatpush1.bf16.msra.mxu0 %v4826_v57  ;;  %v4888_v26 = vcombine.low %v1325_v51, %v1329_v52  ;;  %v4890_v57 = vcombine.low %v1326_v60, %v1330_v35  ;;  %v4891_v59 = vcombine.high %v1326_v60, %v1330_v35  ;;  %v1334_v14 = vld [vmem:[#allocation8 + $0x388] sm:$0xff]  ;;  %v6288_v10 = vld [vmem:[#allocation8 + $0x440] sm:$0xff] }
 0x179   :  { %2811 = vmatprep.subr.bf16.mxu1 %v4833_v47  ;;  %2953 = vmatprep.subr.bf16.mxu0 %v4835_v13  ;;  %v1333_v47 = vld [vmem:[#allocation8 + $0x380] sm:$0xff]  ;;  %v1338_v61 = vld [vmem:[#allocation8 + $0x3a8] sm:$0xff]  ;;  %v6282_v7 = vrot.slane %v469_v31, %v6095_v25 }
 0x17a   :  { %v1337_v13 = vld [vmem:[#allocation8 + $0x3a0] sm:$0xff]  ;;  %v6263_v12 = vld [vmem:[#allocation8 + $0x428] sm:$0xff] }
 0x17b   :  { %v4897_v16 = vcombine.high %v1333_v47, %v1337_v13  ;;  %v4896_v15 = vcombine.low %v1333_v47, %v1337_v13  ;;  %v6441_v1 = vld [vmem:[#allocation8 + $0x4c0] sm:$0xff] }
 0x17c   :  { %874 = vmatmul.mubr.bf16.gmra.mrb[12].mxu1 %v403_v18  ;;  %945 = vmatmul.mubr.bf16.gmra.mrb[28].mxu0 %v403_v18  ;;  %v4898_v18 = vcombine.low %v1334_v14, %v1338_v61  ;;  %7587 = vst [vmem:[#allocation27_spill] sm:$0xff] %v6441_v1  ;;  %v6443_v17 = vld [vmem:[#allocation8 + $0x4e0] sm:$0xff] }
 0x17d   :  { %2812 = vmatpush1.bf16.msra.mxu1 %v4832_v19  ;;  %2954 = vmatpush1.bf16.msra.mxu0 %v4834_v58  ;;  %v4899_v19 = vcombine.high %v1334_v14, %v1338_v61  ;;  %v1341_v58 = vld [vmem:[#allocation8 + $0x3c0] sm:$0xff]  ;;  %7588 = vst [vmem:[#allocation28_spill] sm:$0xff] %v6443_v17 }
 0x17e   :  { %2813 = vmatprep.subr.bf16.mxu1 %v4841_v33  ;;  %2955 = vmatprep.subr.bf16.mxu0 %v4843_v62  ;;  %v1345_v33 = vld [vmem:[#allocation8 + $0x3e0] sm:$0xff]  ;;  %v1342_v62 = vld [vmem:[#allocation8 + $0x3c8] sm:$0xff] }
 0x17f   :  { %v4904_v42 = vcombine.low %v1341_v58, %v1345_v33 }
 0x181   :  { %2814 = vmatpush1.bf16.msra.mxu1 %v4840_v63  ;;  %2956 = vmatpush1.bf16.msra.mxu0 %v4842_v27  ;;  %v4905_v63 = vcombine.high %v1341_v58, %v1345_v33  ;;  %v1346_v27 = vld [vmem:[#allocation8 + $0x3e8] sm:$0xff] }
 0x182   :  { %2815 = vmatprep.subr.bf16.mxu1 %v4849_v4  ;;  %2957 = vmatprep.subr.bf16.mxu0 %v4851_v2  ;;  %v4906_v43 = vcombine.low %v1342_v62, %v1346_v27  ;;  %v4907_v53 = vcombine.high %v1342_v62, %v1346_v27  ;;  %v6253_v4 = vld [vmem:[#allocation8 + $0x400] sm:$0xff] }
 0x183   :  { %v4913_v2 = vcombine.high %v6253_v4, %v6255_v5 }
 0x185   :  { %2816 = vmatpush1.bf16.msra.mxu1 %v4848_v24  ;;  %2958 = vmatpush1.bf16.msra.mxu0 %v4850_v0  ;;  %v6257_v24 = vld [vmem:[#allocation8 + $0x408] sm:$0xff] }
 0x186   :  { %2817 = vmatprep.subr.bf16.mxu1 %v4857_v54  ;;  %2959 = vmatprep.subr.bf16.mxu0 %v4859_v6  ;;  %v4915_v40 = vcombine.high %v6257_v24, %v6263_v12  ;;  %v7527_v54 = vsub.s32 2, %v6086_v22 }
 0x188   :  { %v6279_v6 = vrot.slane %v469_v31, %v7527_v54 }
 0x189   :  { %2818 = vmatpush1.bf16.msra.mxu1 %v4856_v44  ;;  %2960 = vmatpush1.bf16.msra.mxu0 %v4858_v3  ;;  %v7526_v44 = vsub.s32 3, %v6086_v22  ;;  %v6275_v3 = vrot.slane %v469_v31, %v6089_v23 }
 0x18a   :  { %2819 = vmatprep.subr.bf16.mxu1 %v4865_v56  ;;  %2961 = vmatprep.subr.bf16.mxu0 %v4867_v36  ;;  %7579 = vst [vmem:[#allocation19_spill] sm:$0xff] %v6279_v6  ;;  %v6290_v56 = vld [vmem:[#allocation8 + $0x460] sm:$0xff]  ;;  %v6294_v36 = vld [vmem:[#allocation8 + $0x468] sm:$0xff] }
 0x18b   :  { %v6286_v39 = vrot.slane %v469_v31, %v7526_v44 }
 0x18d   :  { %2820 = vmatpush1.bf16.msra.mxu1 %v4864_v20  ;;  %2962 = vmatpush1.bf16.msra.mxu0 %v4866_v11  ;;  %7580 = vst [vmem:[#allocation20_spill] sm:$0xff] %v6286_v39  ;;  %v6292_v11 = vld [vmem:[#allocation8 + $0x448] sm:$0xff] }
 0x18e   :  { %2821 = vmatprep.subr.bf16.mxu1 %v4873_v28  ;;  %2963 = vmatprep.subr.bf16.mxu0 %v4875_v38 }
 0x191   :  { %2822 = vmatpush1.bf16.msra.mxu1 %v4872_v30  ;;  %2964 = vmatpush1.bf16.msra.mxu0 %v4874_v32 }
 0x192   :  { %2823 = vmatprep.subr.bf16.mxu1 %v4881_v34  ;;  %2965 = vmatprep.subr.bf16.mxu0 %v4883_v45  ;;  %v6320_v45 = vld [vmem:[#allocation8 + $0x4a0] sm:$0xff] }
 0x195   :  { %2824 = vmatpush1.bf16.msra.mxu1 %v4880_v46  ;;  %2966 = vmatpush1.bf16.msra.mxu0 %v4882_v48  ;;  %v6318_v48 = vld [vmem:[#allocation8 + $0x480] sm:$0xff] }
 0x196   :  { %2825 = vmatprep.subr.bf16.mxu1 %v4889_v55  ;;  %2967 = vmatprep.subr.bf16.mxu0 %v4891_v59 }
 0x199   :  { %2826 = vmatpush1.bf16.msra.mxu1 %v4888_v26  ;;  %2968 = vmatpush1.bf16.msra.mxu0 %v4890_v57 }
 0x19a   :  { %2827 = vmatprep.subr.bf16.mxu1 %v4897_v16  ;;  %2969 = vmatprep.subr.bf16.mxu0 %v4899_v19 }
 0x19d   :  { %2828 = vmatpush1.bf16.msra.mxu1 %v4896_v15  ;;  %2970 = vmatpush1.bf16.msra.mxu0 %v4898_v18 }
 0x19e   :  { %2829 = vmatprep.subr.bf16.mxu1 %v4905_v63  ;;  %2971 = vmatprep.subr.bf16.mxu0 %v4907_v53 }
 0x1a1   :  { %2830 = vmatpush1.bf16.msra.mxu1 %v4904_v42  ;;  %2972 = vmatpush1.bf16.msra.mxu0 %v4906_v43 }
 0x1a2   :  { %2870 = vmatprep.subr.bf16.mxu1 %v4913_v2  ;;  %3012 = vmatprep.subr.bf16.mxu0 %v4915_v40 }
 0x235   :  { %v845_v9 = vpop.f32.mrb[0].mxu1  ;;  %v916_v20 = vpop.f32.mrb[16].mxu0 }
 0x236   :  { %v6297_v21 = vadd.f32 %v845_v9, %v6275_v3  ;;  %v6300_v29 = vadd.f32 %v916_v20, %v6279_v6  ;;  %v847_v8 = vpop.f32.mrb[1].mxu1  ;;  %v918_v28 = vpop.f32.mrb[17].mxu0 }
 0x237   :  { %v6303_v49 = vadd.f32 %v847_v8, %v6282_v7  ;;  %v6306_v30 = vadd.f32 %v918_v28, %v6286_v39  ;;  %v849_v32 = vpop.f32.mrb[2].mxu1  ;;  %v920_v38 = vpop.f32.mrb[18].mxu0  ;;  %v6356_v28 = vld [vmem:[#allocation8 + $0x488] sm:$0xff] }
 0x238   :  { %v981_v37 = vmul.f32 0.044715, %v6297_v21  ;;  %v983_v34 = vmul.f32 0.044715, %v6300_v29  ;;  %v6325_v60 = vadd.f32 %v849_v32, %v6275_v3  ;;  %v6328_v55 = vadd.f32 %v920_v38, %v6279_v6  ;;  %v851_v35 = vpop.f32.mrb[3].mxu1  ;;  %v922_v26 = vpop.f32.mrb[19].mxu0 }
 0x239   :  { %v982_v51 = vmul.f32 0.044715, %v6303_v49  ;;  %v984_v52 = vmul.f32 0.044715, %v6306_v30  ;;  %v6333_v47 = vadd.f32 %v851_v35, %v6282_v7  ;;  %v6336_v13 = vadd.f32 %v922_v26, %v6286_v39  ;;  %v6358_v32 = vld [vmem:[#allocation8 + $0x4a8] sm:$0xff] }
 0x23a   :  { %v1009_v57 = vmul.f32 %v981_v37, %v6297_v21  ;;  %v1011_v59 = vmul.f32 %v983_v34, %v6300_v29  ;;  %v985_v61 = vmul.f32 0.044715, %v6325_v60  ;;  %v987_v58 = vmul.f32 0.044715, %v6328_v55  ;;  %7581 = vst [vmem:[#allocation21_spill] sm:$0xff] %v6358_v32 }
 0x23b   :  { %v1010_v14 = vmul.f32 %v982_v51, %v6303_v49  ;;  %v1012_v16 = vmul.f32 %v984_v52, %v6306_v30  ;;  %v986_v42 = vmul.f32 0.044715, %v6333_v47  ;;  %v988_v9 = vmul.f32 0.044715, %v6336_v13 }
 0x23c   :  { %v1037_v18 = vmul.f32 %v1009_v57, %v6297_v21  ;;  %v1039_v19 = vmul.f32 %v1011_v59, %v6300_v29  ;;  %v1013_v27 = vmul.f32 %v985_v61, %v6325_v60  ;;  %v1015_v31 = vmul.f32 %v987_v58, %v6328_v55 }
 0x23d   :  { %v1038_v62 = vmul.f32 %v1010_v14, %v6303_v49  ;;  %v1040_v63 = vmul.f32 %v1012_v16, %v6306_v30  ;;  %v855_v43 = vpop.f32.mrb[4].mxu1  ;;  %v926_v53 = vpop.f32.mrb[20].mxu0  ;;  %v1014_v51 = vmul.f32 %v986_v42, %v6333_v47  ;;  %v1016_v14 = vmul.f32 %v988_v9, %v6336_v13 }
 0x23e   :  { %v1065_v2 = vadd.f32 %v1037_v18, %v6297_v21  ;;  %v1067_v40 = vadd.f32 %v1039_v19, %v6300_v29  ;;  %v857_v20 = vpop.f32.mrb[5].mxu1  ;;  %v928_v8 = vpop.f32.mrb[21].mxu0  ;;  %v1041_v34 = vmul.f32 %v1013_v27, %v6325_v60  ;;  %v1043_v59 = vmul.f32 %v1015_v31, %v6328_v55 }
 0x23f   :  { %v1066_v38 = vadd.f32 %v1038_v62, %v6303_v49  ;;  %v1068_v37 = vadd.f32 %v1040_v63, %v6306_v30  ;;  %v859_v52 = vpop.f32.mrb[6].mxu1  ;;  %v930_v35 = vpop.f32.mrb[22].mxu0  ;;  %v1042_v58 = vmul.f32 %v1014_v51, %v6333_v47  ;;  %v1044_v42 = vmul.f32 %v1016_v14, %v6336_v13 }
 0x240   :  { %v1093_v26 = vmul.f32 0.7978846, %v1065_v2  ;;  %v1095_v57 = vmul.f32 0.7978846, %v1067_v40  ;;  %v861_v16 = vpop.f32.mrb[7].mxu1  ;;  %v932_v61 = vpop.f32.mrb[23].mxu0  ;;  %v1069_v19 = vadd.f32 %v1041_v34, %v6325_v60  ;;  %v1071_v27 = vadd.f32 %v1043_v59, %v6328_v55 }
 0x241   :  { %v1094_v18 = vmul.f32 0.7978846, %v1066_v38  ;;  %v1096_v63 = vmul.f32 0.7978846, %v1068_v37  ;;  %v6373_v2 = vadd.f32 %v855_v43, %v6275_v3  ;;  %v1070_v31 = vadd.f32 %v1042_v58, %v6333_v47 }
 0x242   :  { %5620 = vtanh.f32 %v1093_v26  ;;  %v1097_v40 = vmul.f32 0.7978846, %v1069_v19  ;;  %v6377_v9 = vadd.f32 %v926_v53, %v6279_v6  ;;  %v1072_v38 = vadd.f32 %v1044_v42, %v6336_v13 }
 0x243   :  { %5622 = vtanh.f32 %v1095_v57  ;;  %v989_v34 = vmul.f32 0.044715, %v6373_v2  ;;  %v1099_v51 = vmul.f32 0.7978846, %v1071_v27  ;;  %v6385_v26 = vadd.f32 %v857_v20, %v6282_v7 }
 0x244   :  { %7582 = vst [vmem:[#allocation22_spill] sm:$0xff] %v6377_v9  ;;  %5624 = vtanh.f32 %v1094_v18  ;;  %v991_v43 = vmul.f32 0.044715, %v6377_v9  ;;  %v1098_v59 = vmul.f32 0.7978846, %v1070_v31  ;;  %v6389_v57 = vadd.f32 %v928_v8, %v6286_v39 }
 0x245   :  { %5626 = vtanh.f32 %v1096_v63  ;;  %v1017_v53 = vmul.f32 %v989_v34, %v6373_v2  ;;  %v990_v19 = vmul.f32 0.044715, %v6385_v26  ;;  %v6394_v18 = vadd.f32 %v859_v52, %v6275_v3 }
 0x246   :  { %7583 = vst [vmem:[#allocation23_spill] sm:$0xff] %v6389_v57  ;;  %5628 = vtanh.f32 %v1097_v40  ;;  %v1019_v14 = vmul.f32 %v991_v43, %v6377_v9  ;;  %v1100_v42 = vmul.f32 0.7978846, %v1072_v38  ;;  %v992_v63 = vmul.f32 0.044715, %v6389_v57 }
 0x247   :  { %v865_v58 = vpop.f32.mrb[8].mxu1  ;;  %v936_v27 = vpop.f32.mrb[24].mxu0  ;;  %v1045_v20 = vmul.f32 %v1017_v53, %v6373_v2  ;;  %v6399_v31 = vadd.f32 %v930_v35, %v6279_v6  ;;  %5630 = vtanh.f32 %v1099_v51  ;;  %v1018_v52 = vmul.f32 %v990_v19, %v6385_v26 }
 0x248   :  { %v6401_v8 = vpop.f32.mrb[9].mxu1  ;;  %v6403_v40 = vpop.f32.mrb[25].mxu0  ;;  %v1047_v34 = vmul.f32 %v1019_v14, %v6377_v9  ;;  %v993_v43 = vmul.f32 0.044715, %v6394_v18  ;;  %v1020_v35 = vmul.f32 %v992_v63, %v6389_v57  ;;  %v6416_v62 = vadd.f32 %v861_v16, %v6282_v7 }
 0x249   :  { %7584 = vst [vmem:[#allocation24_spill] sm:$0xff] %v6399_v31  ;;  %v6408_v44 = vpop.f32.mrb[10].mxu1  ;;  %v6410_v38 = vpop.f32.mrb[26].mxu0  ;;  %v1073_v53 = vadd.f32 %v1045_v20, %v6373_v2  ;;  %v995_v54 = vmul.f32 0.044715, %v6399_v31  ;;  %v1046_v15 = vmul.f32 %v1018_v52, %v6385_v26  ;;  %v6426_v33 = vadd.f32 %v932_v61, %v6286_v39 }
 0x24a   :  { %v6418_v51 = vpop.f32.mrb[11].mxu1  ;;  %v6420_v14 = vpop.f32.mrb[27].mxu0  ;;  %v1075_v19 = vadd.f32 %v1047_v34, %v6377_v9  ;;  %v1021_v37 = vmul.f32 %v993_v43, %v6394_v18  ;;  %5632 = vtanh.f32 %v1098_v59  ;;  %v1048_v20 = vmul.f32 %v1020_v35, %v6389_v57 }
 0x24b   :  { %7585 = vst [vmem:[#allocation25_spill] sm:$0xff] %v6426_v33  ;;  %v1023_v63 = vmul.f32 %v995_v54, %v6399_v31  ;;  %v994_v16 = vmul.f32 0.044715, %v6416_v62  ;;  %v1101_v41 = vmul.f32 0.7978846, %v1073_v53  ;;  %v1074_v46 = vadd.f32 %v1046_v15, %v6385_v26 }
 0x24c   :  { %v6431_v50 = vpop.eup %5620  ;;  %v1049_v34 = vmul.f32 %v1021_v37, %v6394_v18  ;;  %v996_v52 = vmul.f32 0.044715, %v6426_v33  ;;  %v1103_v61 = vmul.f32 0.7978846, %v1075_v19  ;;  %v1076_v59 = vadd.f32 %v1048_v20, %v6389_v57 }
 0x24d   :  { %v6436_v43 = vpop.eup %5622  ;;  %v1051_v35 = vmul.f32 %v1023_v63, %v6399_v31  ;;  %v1022_v54 = vmul.f32 %v994_v16, %v6416_v62  ;;  %5634 = vtanh.f32 %v1100_v42  ;;  %v1102_v15 = vmul.f32 0.7978846, %v1074_v46 }
 0x24e   :  { %7586 = vst [vmem:[#allocation26_spill] sm:$0xff] %v6436_v43  ;;  %v6445_v53 = vpop.eup %5624  ;;  %v1077_v37 = vadd.f32 %v1049_v34, %v6394_v18  ;;  %v1024_v0 = vmul.f32 %v996_v52, %v6426_v33  ;;  %v1104_v63 = vmul.f32 0.7978846, %v1076_v59  ;;  %v6458_v23 = vadd.f32 %v865_v58, %v6275_v3 }
 0x24f   :  { %v6449_v25 = vpop.f32.mrb[12].mxu1  ;;  %v6451_v19 = vpop.f32.mrb[28].mxu0  ;;  %v1079_v16 = vadd.f32 %v1051_v35, %v6399_v31  ;;  %v1050_v22 = vmul.f32 %v1022_v54, %v6416_v62  ;;  %5636 = vtanh.f32 %v1101_v41 }
 0x250   :  { %7589 = vst [vmem:[#allocation29_spill] sm:$0xff] %v6451_v19  ;;  %v6453_v20 = vpop.eup %5626  ;;  %v6460_v42 = vpop.f32.mrb[13].mxu1  ;;  %v1105_v52 = vmul.f32 0.7978846, %v1077_v37  ;;  %v6467_v19 = vadd.f32 %v936_v27, %v6279_v6  ;;  %5638 = vtanh.f32 %v1103_v61  ;;  %v1052_v58 = vmul.f32 %v1024_v0, %v6426_v33 }
 0x251   :  { %v6462_v46 = vpop.f32.mrb[29].mxu0  ;;  %v6464_v34 = vpop.eup %5628  ;;  %v997_v54 = vmul.f32 0.044715, %v6458_v23  ;;  %5640 = vtanh.f32 %v1102_v15  ;;  %v1078_v27 = vadd.f32 %v1050_v22, %v6416_v62  ;;  %v6481_v37 = vadd.f32 %v6401_v8, %v6282_v7 }
 0x252   :  { %7590 = vst [vmem:[#allocation30_spill] sm:$0xff] %v6462_v46  ;;  %7591 = vst [vmem:[#allocation31_spill] sm:$0xff] %v6467_v19  ;;  %v879_v9 = vpop.f32.mrb[14].mxu1  ;;  %v950_v59 = vpop.f32.mrb[30].mxu0  ;;  %5642 = vtanh.f32 %v1104_v63  ;;  %v1107_v0 = vmul.f32 0.7978846, %v1079_v16  ;;  %v6492_v22 = vadd.f32 %v6408_v44, %v6275_v3  ;;  %v1080_v8 = vadd.f32 %v1052_v58, %v6426_v33 }
 0x253   :  { %v880_v31 = vpop.f32.mrb[15].mxu1  ;;  %v951_v57 = vpop.f32.mrb[31].mxu0  ;;  %v999_v9 = vmul.f32 0.044715, %v6467_v19  ;;  %v1025_v61 = vmul.f32 %v997_v54, %v6458_v23  ;;  %5644 = vtanh.f32 %v1105_v52  ;;  %v998_v15 = vmul.f32 0.044715, %v6481_v37 }
 0x254   :  { %v6475_v41 = vpop.eup %5630  ;;  %v6486_v57 = vadd.f32 %v6403_v40, %v6286_v39  ;;  %v6501_v40 = vadd.f32 %v6410_v38, %v6279_v6  ;;  %v1106_v52 = vmul.f32 0.7978846, %v1078_v27  ;;  %v1001_v44 = vmul.f32 0.044715, %v6492_v22 }
 0x255   :  { %7592 = vst [vmem:[#allocation32_spill] sm:$0xff] %v6475_v41  ;;  %v1027_v31 = vmul.f32 %v999_v9, %v6467_v19  ;;  %v6494_v59 = vpop.eup %5632  ;;  %v1053_v63 = vmul.f32 %v1025_v61, %v6458_v23  ;;  %v1026_v9 = vmul.f32 %v998_v15, %v6481_v37  ;;  %v6511_v61 = vadd.f32 %v6418_v51, %v6282_v7  ;;  %v6521_v15 = vld [vmem:[#allocation8 + $0x4c8] sm:$0xff] }
 0x256   :  { %v1000_v16 = vmul.f32 0.044715, %v6486_v57  ;;  %7593 = vst [vmem:[#allocation33_spill] sm:$0xff] %v6501_v40  ;;  %v1003_v58 = vmul.f32 0.044715, %v6501_v40  ;;  %5646 = vtanh.f32 %v1107_v0  ;;  %v1029_v27 = vmul.f32 %v1001_v44, %v6492_v22 }
 0x257   :  { %v1055_v54 = vmul.f32 %v1027_v31, %v6467_v19  ;;  %v1081_v35 = vadd.f32 %v1053_v63, %v6458_v23  ;;  %v6513_v17 = vpop.eup %5634  ;;  %v1054_v38 = vmul.f32 %v1026_v9, %v6481_v37  ;;  %v6519_v31 = vadd.f32 %v6420_v14, %v6286_v39  ;;  %v6523_v63 = vld [vmem:[#allocation8 + $0x4e8] sm:$0xff] }
 0x258   :  { %v1028_v46 = vmul.f32 %v1000_v16, %v6486_v57  ;;  %v1031_v6 = vmul.f32 %v1003_v58, %v6501_v40  ;;  %v1002_v0 = vmul.f32 0.044715, %v6511_v61  ;;  %v1057_v14 = vmul.f32 %v1029_v27, %v6492_v22  ;;  %v6554_v58 = vld [vmem:[#allocation8 + $0x500] sm:$0xff] }
 0x259   :  { %v1083_v16 = vadd.f32 %v1055_v54, %v6467_v19  ;;  %v6529_v1 = vpop.eup %5636  ;;  %v1109_v9 = vmul.f32 0.7978846, %v1081_v35  ;;  %v1082_v44 = vadd.f32 %v1054_v38, %v6481_v37  ;;  %v1004_v39 = vmul.f32 0.044715, %v6519_v31 }
 0x25a   :  { %v1056_v51 = vmul.f32 %v1028_v46, %v6486_v57  ;;  %v6534_v33 = vpop.eup %5638  ;;  %5648 = vtanh.f32 %v1106_v52  ;;  %v1059_v54 = vmul.f32 %v1031_v6, %v6501_v40  ;;  %v1030_v46 = vmul.f32 %v1002_v0, %v6511_v61 }
 0x25b   :  { %7594 = vst [vmem:[#allocation34_spill] sm:$0xff] %v6534_v33  ;;  %v5641_v19 = vpop.eup %5640  ;;  %v1110_v41 = vmul.f32 0.7978846, %v1082_v44  ;;  %v1085_v38 = vadd.f32 %v1057_v14, %v6492_v22  ;;  %v1032_v27 = vmul.f32 %v1004_v39, %v6519_v31  ;;  %v1108_v32 = vmul.f32 0.7978846, %v1080_v8  ;;  %v6556_v39 = vld [vmem:[#allocation8 + $0x520] sm:$0xff] }
 0x25c   :  { %v1084_v35 = vadd.f32 %v1056_v51, %v6486_v57  ;;  %v6543_v43 = vpop.eup %5642  ;;  %v1111_v33 = vmul.f32 0.7978846, %v1083_v16  ;;  %v1058_v52 = vmul.f32 %v1030_v46, %v6511_v61  ;;  %v6548_v6 = vadd.f32 %v6449_v25, %v6275_v3  ;;  %v6562_v3 = vld [vmem:[#allocation8 + $0x508] sm:$0xff] }
 0x25d   :  { %v6550_v0 = vpop.eup %5644  ;;  %5650 = vtanh.f32 %v1109_v9  ;;  %v1113_v44 = vmul.f32 0.7978846, %v1085_v38  ;;  %v1087_v51 = vadd.f32 %v1059_v54, %v6501_v40  ;;  %v1060_v14 = vmul.f32 %v1032_v27, %v6519_v31  ;;  %7595 = vst [vmem:[#allocation35_spill] sm:$0xff] %v6562_v3  ;;  %v6564_v9 = vld [vmem:[#allocation8 + $0x528] sm:$0xff] }
 0x25e   :  { %5652 = vtanh.f32 %v1110_v41  ;;  %v1086_v8 = vadd.f32 %v1058_v52, %v6511_v61  ;;  %v1005_v16 = vmul.f32 0.044715, %v6548_v6  ;;  %7596 = vst [vmem:[#allocation36_spill] sm:$0xff] %v6564_v9  ;;  %v1112_v46 = vmul.f32 0.7978846, %v1084_v35 }
 0x25f   :  { %5654 = vtanh.f32 %v1113_v44  ;;  %v1088_v54 = vadd.f32 %v1060_v14, %v6519_v31  ;;  %v6569_v38 = vadd.f32 %v6460_v42, %v6282_v7  ;;  %v1115_v40 = vmul.f32 0.7978846, %v1087_v51 }
 0x260   :  { %5656 = vtanh.f32 %v1108_v32  ;;  %v1114_v41 = vmul.f32 0.7978846, %v1086_v8  ;;  %v1033_v27 = vmul.f32 %v1005_v16, %v6548_v6  ;;  %v6574_v25 = vpop.eup %5646  ;;  %v953_v14 = vmul.f32 0.5, %v6297_v21 }
 0x261   :  { %5658 = vtanh.f32 %v1111_v33  ;;  %v1006_v35 = vmul.f32 0.044715, %v6569_v38  ;;  %v1116_v7 = vmul.f32 0.7978846, %v1088_v54  ;;  %v6582_v42 = vmul.f32 0.5, %v6300_v29 }
 0x262   :  { %5660 = vtanh.f32 %v1114_v41  ;;  %v1061_v32 = vmul.f32 %v1033_v27, %v6548_v6  ;;  %v1150_v33 = vadd.f32 1.0, %v6445_v53  ;;  %v954_v16 = vmul.f32 0.5, %v6303_v49 }
 0x263   :  { %5662 = vtanh.f32 %v1112_v46  ;;  %v1034_v8 = vmul.f32 %v1006_v35, %v6569_v38  ;;  %v958_v52 = vmul.f32 0.5, %v6333_v47  ;;  %v1154_v44 = vadd.f32 1.0, %v6494_v59 }
 0x264   :  { %v5649_v51 = vpop.eup %5648  ;;  %v1149_v21 = vadd.f32 1.0, %v6431_v50  ;;  %v957_v54 = vmul.f32 0.5, %v6325_v60  ;;  %5664 = vtanh.f32 %v1115_v40  ;;  %v1153_v46 = vadd.f32 1.0, %v6464_v34 }
 0x265   :  { %v1062_v29 = vmul.f32 %v1034_v8, %v6569_v38  ;;  %5666 = vtanh.f32 %v1116_v7  ;;  %v1089_v41 = vadd.f32 %v1061_v32, %v6548_v6  ;;  %v1178_v53 = vmul.f32 %v1150_v33, %v954_v16 }
 0x266   :  { %v1182_v27 = vmul.f32 %v1154_v44, %v958_v52  ;;  %v1177_v49 = vmul.f32 %v1149_v21, %v953_v14  ;;  %v1181_v3 = vmul.f32 %v1153_v46, %v957_v54  ;;  %v962_v47 = vmul.f32 0.5, %v6385_v26 }
 0x267   :  { %v5651_v35 = vpop.eup %5650  ;;  %v1158_v59 = vadd.f32 1.0, %v5641_v19  ;;  %v1090_v50 = vadd.f32 %v1062_v29, %v6569_v38  ;;  %v966_v40 = vmul.f32 0.5, %v6416_v62  ;;  %v1162_v8 = vadd.f32 1.0, %v5649_v51 }
 0x268   :  { %v5653_v9 = vpop.eup %5652  ;;  %v6596_v60 = vpack.c.bf16 %v1182_v27, %v1178_v53  ;;  %v6599_v7 = vpack.c.bf16 %v1181_v3, %v1177_v49  ;;  %v961_v52 = vmul.f32 0.5, %v6373_v2  ;;  %v1157_v44 = vadd.f32 1.0, %v6529_v1 }
 0x269   :  { %v5655_v34 = vpop.eup %5654  ;;  %v1186_v32 = vmul.f32 %v1158_v59, %v962_v47  ;;  %v1190_v26 = vmul.f32 %v1162_v8, %v966_v40  ;;  %v965_v19 = vmul.f32 0.5, %v6394_v18  ;;  %v1161_v33 = vadd.f32 1.0, %v6550_v0 }
 0x26a   :  { %v5657_v14 = vpop.eup %5656  ;;  %2831 = vmatprep.mubr.bf16.mxu1 %v6596_v60  ;;  %2973 = vmatprep.mubr.bf16.mxu0 %v6596_v60  ;;  %v970_v62 = vmul.f32 0.5, %v6481_v37  ;;  %v1185_v2 = vmul.f32 %v1157_v44, %v961_v52  ;;  %v1166_v1 = vadd.f32 1.0, %v5653_v9  ;;  %v969_v3 = vmul.f32 0.5, %v6458_v23 }
 0x26b   :  { %v6608_v51 = vpop.eup %5658  ;;  %2832 = vmatmul.mubr.bf16.vlgmr.msra.gmra.mrb[16].mxu1 %v6599_v7  ;;  %2974 = vmatmul.mubr.bf16.vlgmr.msra.gmra.mrb[32].mxu0 %v6599_v7  ;;  %v973_v16 = vmul.f32 0.5, %v6492_v22  ;;  %v7597_v18 = vcombine.low %v6253_v4, %v6255_v5  ;;  %v7598_v37 = vcombine.low %v6257_v24, %v6263_v12  ;;  %v6620_v0 = vpack.c.bf16 %v1190_v26, %v1186_v32  ;;  %v7607_v26 = vld [vmem:[#allocation32_spill] sm:$0xff] }
 0x26c   :  { %v5661_v21 = vpop.eup %5660  ;;  %v1189_v54 = vmul.f32 %v1161_v33, %v965_v19  ;;  %v1165_v29 = vadd.f32 1.0, %v5651_v35  ;;  %v1169_v46 = vadd.f32 1.0, %v5655_v34  ;;  %v7599_v23 = vcombine.high %v6288_v10, %v6290_v56 }
 0x26d   :  { %2871 = vmatpush1.bf16.msra.mxu1 %v7597_v18  ;;  %3013 = vmatpush1.bf16.msra.mxu0 %v7598_v37  ;;  %v5663_v53 = vpop.eup %5662  ;;  %v7600_v22 = vcombine.high %v6292_v11, %v6294_v36  ;;  %v974_v4 = vmul.f32 0.5, %v6511_v61  ;;  %v1170_v5 = vadd.f32 1.0, %v5661_v21  ;;  %v1194_v9 = vmul.f32 %v1166_v1, %v970_v62 }
 0x26e   :  { %2872 = vmatprep.subr.bf16.mxu1 %v7599_v23  ;;  %v1118_v24 = vmul.f32 0.7978846, %v1090_v50  ;;  %v959_v12 = vmul.f32 0.5, %v6328_v55  ;;  %2841 = vmatprep.mubr.bf16.mxu1 %v6620_v0  ;;  %v6632_v27 = vpack.c.bf16 %v1189_v54, %v1185_v2  ;;  %v1193_v35 = vmul.f32 %v1165_v29, %v969_v3  ;;  %v6634_v47 = vpop.eup %5664  ;;  %v6670_v54 = vld [vmem:[#allocation8 + $0x540] sm:$0xff] }
 0x26f   :  { %3014 = vmatprep.subr.bf16.mxu0 %v7600_v22  ;;  %2983 = vmatprep.mubr.bf16.mxu0 %v6620_v0  ;;  %v1197_v49 = vmul.f32 %v1169_v46, %v973_v16  ;;  %v1198_v59 = vmul.f32 %v1170_v5, %v974_v4  ;;  %v1117_v40 = vmul.f32 0.7978846, %v1089_v41  ;;  %v956_v61 = vmul.f32 0.5, %v6306_v30  ;;  %v5667_v8 = vpop.eup %5666  ;;  %v7604_v41 = vld [vmem:[#allocation21_spill] sm:$0xff]  ;;  %v7612_v46 = vld [vmem:[#allocation22_spill] sm:$0xff]  ;;  %v7613_v22 = vld [vmem:[#allocation24_spill] sm:$0xff] }
 0x270   :  { %5668 = vtanh.f32 %v1118_v24  ;;  %v7601_v50 = vcombine.low %v6288_v10, %v6290_v56  ;;  %v7602_v55 = vcombine.low %v6292_v11, %v6294_v36  ;;  %v960_v32 = vmul.f32 0.5, %v6336_v13  ;;  %v7606_v11 = vld [vmem:[#allocation26_spill] sm:$0xff] }
 0x271   :  { %v6643_v34 = vpack.c.bf16 %v1197_v49, %v1193_v35  ;;  %v1152_v52 = vadd.f32 1.0, %v6453_v20  ;;  %v1156_v44 = vadd.f32 1.0, %v6513_v17  ;;  %v7603_v30 = vcombine.high %v6318_v48, %v6320_v45  ;;  %v7608_v20 = vld [vmem:[#allocation23_spill] sm:$0xff]  ;;  %v7609_v17 = vld [vmem:[#allocation25_spill] sm:$0xff]  ;;  %v7614_v4 = vld [vmem:[#allocation34_spill] sm:$0xff] }
 0x272   :  { %2873 = vmatpush1.bf16.msra.mxu1 %v7601_v50  ;;  %3015 = vmatpush1.bf16.msra.mxu0 %v7602_v55  ;;  %v7605_v10 = vcombine.high %v6356_v28, %v7604_v41  ;;  %v6654_v56 = vpack.c.bf16 %v1198_v59, %v1194_v9  ;;  %5670 = vtanh.f32 %v1117_v40  ;;  %v1151_v36 = vadd.f32 1.0, %v7606_v11  ;;  %v1394_v24 = vld [vmem:[#allocation8 + $0x568] sm:$0xff]  ;;  %v7622_v11 = vld [vmem:[#allocation35_spill] sm:$0xff] }
 0x273   :  { %2874 = vmatprep.subr.bf16.mxu1 %v7603_v30  ;;  %v1155_v19 = vadd.f32 1.0, %v7607_v26  ;;  %v1180_v13 = vmul.f32 %v1152_v52, %v956_v61  ;;  %v1184_v33 = vmul.f32 %v1156_v44, %v960_v32  ;;  %v964_v62 = vmul.f32 0.5, %v7608_v20  ;;  %2842 = vmatmul.mubr.bf16.gmra.mrb[20].mxu1 %v6632_v27 }
 0x274   :  { %3016 = vmatprep.subr.bf16.mxu0 %v7605_v10  ;;  %v968_v2 = vmul.f32 0.5, %v7609_v17  ;;  %2984 = vmatmul.mubr.bf16.gmra.mrb[36].mxu0 %v6632_v27  ;;  %v1179_v1 = vmul.f32 %v1151_v36, %v6582_v42  ;;  %v1160_v16 = vadd.f32 1.0, %v6543_v43  ;;  %v1164_v21 = vadd.f32 1.0, %v5657_v14  ;;  %v7615_v43 = vld [vmem:[#allocation27_spill] sm:$0xff]  ;;  %v7616_v14 = vld [vmem:[#allocation28_spill] sm:$0xff]  ;;  %v1397_v17 = vld [vmem:[#allocation8 + $0x580] sm:$0xff] }
 0x275   :  { %v1183_v3 = vmul.f32 %v1155_v19, %v959_v12  ;;  %v7610_v18 = vcombine.low %v6318_v48, %v6320_v45  ;;  %v7611_v37 = vcombine.low %v6356_v28, %v7604_v41  ;;  %v6672_v29 = vpack.c.bf16 %v1184_v33, %v1180_v13  ;;  %v1393_v45 = vld [vmem:[#allocation8 + $0x560] sm:$0xff]  ;;  %v1390_v28 = vld [vmem:[#allocation8 + $0x548] sm:$0xff]  ;;  %2851 = vmatprep.mubr.bf16.mxu1 %v6654_v56  ;;  %v7621_v10 = vld [vmem:[#allocation36_spill] sm:$0xff] }
 0x276   :  { %v963_v23 = vmul.f32 0.5, %v7612_v46  ;;  %v967_v42 = vmul.f32 0.5, %v7613_v22  ;;  %v1159_v5 = vadd.f32 1.0, %v7614_v4  ;;  %v7617_v9 = vcombine.high %v7615_v43, %v7616_v14  ;;  %2993 = vmatprep.mubr.bf16.mxu0 %v6654_v56  ;;  %v7625_v33 = vld [vmem:[#allocation31_spill] sm:$0xff] }
 0x277   :  { %2875 = vmatpush1.bf16.msra.mxu1 %v7610_v18  ;;  %3017 = vmatpush1.bf16.msra.mxu0 %v7611_v37  ;;  %v7618_v48 = vcombine.high %v6521_v15, %v6523_v63  ;;  %v6683_v12 = vpack.c.bf16 %v1183_v3, %v1179_v1  ;;  %v1188_v35 = vmul.f32 %v1160_v16, %v964_v62  ;;  %v1163_v59 = vadd.f32 1.0, %v6574_v25  ;;  %v7626_v1 = vld [vmem:[#allocation33_spill] sm:$0xff]  ;;  %v1398_v18 = vld [vmem:[#allocation8 + $0x588] sm:$0xff] }
 0x278   :  { %2876 = vmatprep.subr.bf16.mxu1 %v7617_v9  ;;  %v1192_v49 = vmul.f32 %v1164_v21, %v968_v2  ;;  %v4944_v40 = vcombine.low %v6554_v58, %v6556_v39  ;;  %v1187_v61 = vmul.f32 %v1159_v5, %v963_v23  ;;  %v972_v50 = vmul.f32 0.5, %v6486_v57  ;;  %v1401_v2 = vld [vmem:[#allocation8 + $0x5a0] sm:$0xff]  ;;  %v1402_v37 = vld [vmem:[#allocation8 + $0x5a8] sm:$0xff] }
 0x279   :  { %3018 = vmatprep.subr.bf16.mxu0 %v7618_v48  ;;  %v1168_v55 = vadd.f32 1.0, %v5663_v53  ;;  %v1191_v52 = vmul.f32 %v1163_v59, %v967_v42  ;;  %v976_v44 = vmul.f32 0.5, %v6519_v31  ;;  %v1172_v30 = vadd.f32 1.0, %v5667_v8  ;;  %v1409_v48 = vld [vmem:[#allocation8 + $0x5e0] sm:$0xff] }
 0x27a   :  { %v6691_v32 = vpack.c.bf16 %v1192_v49, %v1188_v35  ;;  %v7619_v25 = vcombine.low %v7615_v43, %v7616_v14  ;;  %v7620_v41 = vcombine.low %v6521_v15, %v6523_v63  ;;  %v4946_v36 = vcombine.low %v7622_v11, %v7621_v10  ;;  %v5669_v19 = vpop.eup %5668  ;;  %v1405_v14 = vld [vmem:[#allocation8 + $0x5c0] sm:$0xff] }
 0x27b   :  { %v4953_v57 = vcombine.high %v6670_v54, %v1393_v45  ;;  %v4955_v53 = vcombine.high %v1390_v28, %v1394_v24  ;;  %v978_v26 = vmul.f32 0.5, %v6569_v38  ;;  %v7623_v31 = vcombine.high %v6554_v58, %v6556_v39  ;;  %2852 = vmatmul.mubr.bf16.gmra.mrb[24].mxu1 %v6643_v34  ;;  %v1413_v49 = vld [vmem:[#allocation8 + $0x600] sm:$0xff] }
 0x27c   :  { %2877 = vmatpush1.bf16.msra.mxu1 %v7619_v25  ;;  %3019 = vmatpush1.bf16.msra.mxu0 %v7620_v41  ;;  %v7624_v8 = vcombine.high %v7622_v11, %v7621_v10  ;;  %v6710_v13 = vpack.c.bf16 %v1191_v52, %v1187_v61  ;;  %v1196_v15 = vmul.f32 %v1168_v55, %v972_v50  ;;  %v971_v20 = vmul.f32 0.5, %v7625_v33  ;;  %v5671_v39 = vpop.eup %5670  ;;  %v1417_v61 = vld [vmem:[#allocation8 + $0x620] sm:$0xff]  ;;  %v1414_v50 = vld [vmem:[#allocation8 + $0x608] sm:$0xff] }
 0x27d   :  { %2878 = vmatprep.subr.bf16.mxu1 %v7623_v31  ;;  %v1200_v63 = vmul.f32 %v1172_v30, %v976_v44  ;;  %v1174_v62 = vadd.f32 1.0, %v5669_v19  ;;  %v975_v38 = vmul.f32 0.5, %v7626_v1  ;;  %v1167_v3 = vadd.f32 1.0, %v6608_v51  ;;  %2994 = vmatmul.mubr.bf16.gmra.mrb[40].mxu0 %v6643_v34  ;;  %v1418_v55 = vld [vmem:[#allocation8 + $0x628] sm:$0xff]  ;;  %v1421_v41 = vld [vmem:[#allocation8 + $0x640] sm:$0xff] }
 0x27e   :  { %3020 = vmatprep.subr.bf16.mxu0 %v7624_v8  ;;  %v1171_v58 = vadd.f32 1.0, %v6634_v47  ;;  %v4952_v16 = vcombine.low %v6670_v54, %v1393_v45  ;;  %v4954_v21 = vcombine.low %v1390_v28, %v1394_v24  ;;  %v977_v46 = vmul.f32 0.5, %v6548_v6  ;;  %v1406_v6 = vld [vmem:[#allocation8 + $0x5c8] sm:$0xff]  ;;  %v1425_v10 = vld [vmem:[#allocation8 + $0x660] sm:$0xff] }
 0x27f   :  { %v6720_v23 = vpack.c.bf16 %v1200_v63, %v1196_v15  ;;  %v1202_v22 = vmul.f32 %v1174_v62, %v978_v26  ;;  %v1173_v51 = vadd.f32 1.0, %v5671_v39  ;;  %v1195_v42 = vmul.f32 %v1167_v3, %v971_v20  ;;  %v1410_v45 = vld [vmem:[#allocation8 + $0x5e8] sm:$0xff]  ;;  %v1429_v31 = vld [vmem:[#allocation8 + $0x680] sm:$0xff]  ;;  %v7627_v62 = vld [vmem:[#allocation20_spill] sm:$0xff] }
 0x280   :  { %2879 = vmatpush1.bf16.msra.mxu1 %v4944_v40  ;;  %3021 = vmatpush1.bf16.msra.mxu0 %v4946_v36  ;;  %v1199_v47 = vmul.f32 %v1171_v58, %v975_v38  ;;  %v4961_v4 = vcombine.high %v1397_v17, %v1401_v2  ;;  %v4963_v43 = vcombine.high %v1398_v18, %v1402_v37  ;;  %v1422_v11 = vld [vmem:[#allocation8 + $0x648] sm:$0xff]  ;;  %v1433_v8 = vld [vmem:[#allocation8 + $0x6a0] sm:$0xff] }
 0x281   :  { %2880 = vmatprep.subr.bf16.mxu1 %v4953_v57  ;;  %3022 = vmatprep.subr.bf16.mxu0 %v4955_v53  ;;  %v6722_v5 = vpack.c.bf16 %v1202_v22, %v1202_v22  ;;  %v1201_v54 = vmul.f32 %v1173_v51, %v977_v46  ;;  %v4960_v28 = vcombine.low %v1397_v17, %v1401_v2  ;;  %v1426_v36 = vld [vmem:[#allocation8 + $0x668] sm:$0xff]  ;;  %v1437_v3 = vld [vmem:[#allocation8 + $0x6c0] sm:$0xff] }
 0x282   :  { %v6724_v9 = vpack.c.bf16 %v1199_v47, %v1195_v42  ;;  %v4962_v24 = vcombine.low %v1398_v18, %v1402_v37  ;;  %v4969_v59 = vcombine.high %v1405_v14, %v1409_v48  ;;  %v4971_v40 = vcombine.high %v1406_v6, %v1410_v45  ;;  %v1430_v15 = vld [vmem:[#allocation8 + $0x688] sm:$0xff]  ;;  %v1441_v58 = vld [vmem:[#allocation8 + $0x6e0] sm:$0xff] }
 0x283   :  { %2861 = vmatprep.mubr.bf16.mxu1 %v6722_v5  ;;  %3003 = vmatprep.mubr.bf16.mxu0 %v6722_v5  ;;  %v6728_v35 = vpack.c.bf16 %v1201_v54, %v1201_v54  ;;  %v4968_v52 = vcombine.low %v1405_v14, %v1409_v48  ;;  %v4970_v44 = vcombine.low %v1406_v6, %v1410_v45  ;;  %v1434_v63 = vld [vmem:[#allocation8 + $0x6a8] sm:$0xff]  ;;  %v1445_v51 = vld [vmem:[#allocation8 + $0x700] sm:$0xff] }
 0x284   :  { %2881 = vmatpush1.bf16.msra.mxu1 %v4952_v16  ;;  %3023 = vmatpush1.bf16.msra.mxu0 %v4954_v21  ;;  %v4977_v30 = vcombine.high %v1413_v49, %v1417_v61  ;;  %v4979_v25 = vcombine.high %v1414_v50, %v1418_v55  ;;  %v4976_v57 = vcombine.low %v1413_v49, %v1417_v61  ;;  %v7628_v17 = vld [vmem:[#allocation30_spill] sm:$0xff]  ;;  %v1449_v42 = vld [vmem:[#allocation8 + $0x720] sm:$0xff] }
 0x285   :  { %2882 = vmatprep.subr.bf16.mxu1 %v4961_v4  ;;  %3024 = vmatprep.subr.bf16.mxu0 %v4963_v43  ;;  %v4978_v53 = vcombine.low %v1414_v50, %v1418_v55  ;;  %v4985_v26 = vcombine.high %v1421_v41, %v1425_v10  ;;  %v4987_v19 = vcombine.high %v1422_v11, %v1426_v36  ;;  %v1438_v39 = vld [vmem:[#allocation8 + $0x6c8] sm:$0xff]  ;;  %v7629_v43 = vld [vmem:[#allocation19_spill] sm:$0xff]  ;;  %v7630_v54 = vld [vmem:[#allocation29_spill] sm:$0xff] }
 0x286   :  { %2862 = vmatmul.mubr.bf16.gmra.mrb[28].mxu1 %v6728_v35  ;;  %3004 = vmatmul.mubr.bf16.gmra.mrb[44].mxu0 %v6728_v35  ;;  %v4984_v33 = vcombine.low %v1421_v41, %v1425_v10  ;;  %v4986_v20 = vcombine.low %v1422_v11, %v1426_v36  ;;  %v6736_v2 = vadd.f32 %v7628_v17, %v7627_v62  ;;  %v1442_v16 = vld [vmem:[#allocation8 + $0x6e8] sm:$0xff]  ;;  %v1453_v49 = vld [vmem:[#allocation8 + $0x740] sm:$0xff] }
 0x287   :  { %2902 = vmatprep.mubr.bf16.mxu1 %v6672_v29  ;;  %3044 = vmatprep.mubr.bf16.mxu0 %v6672_v29  ;;  %v4993_v1 = vcombine.high %v1429_v31, %v1433_v8  ;;  %v4995_v38 = vcombine.high %v1430_v15, %v1434_v63  ;;  %v4992_v21 = vcombine.low %v1429_v31, %v1433_v8  ;;  %v1446_v47 = vld [vmem:[#allocation8 + $0x708] sm:$0xff]  ;;  %v1461_v41 = vld [vmem:[#allocation8 + $0x780] sm:$0xff] }
 0x288   :  { %2883 = vmatpush1.bf16.msra.mxu1 %v4960_v28  ;;  %3025 = vmatpush1.bf16.msra.mxu0 %v4962_v24  ;;  %v4994_v18 = vcombine.low %v1430_v15, %v1434_v63  ;;  %v1008_v37 = vmul.f32 0.044715, %v6736_v2  ;;  %v5001_v46 = vcombine.high %v1437_v3, %v1441_v58  ;;  %v5003_v22 = vcombine.high %v1438_v39, %v1442_v16  ;;  %v1450_v4 = vld [vmem:[#allocation8 + $0x728] sm:$0xff]  ;;  %v1465_v10 = vld [vmem:[#allocation8 + $0x7a0] sm:$0xff] }
 0x289   :  { %2884 = vmatprep.subr.bf16.mxu1 %v4969_v59  ;;  %3026 = vmatprep.subr.bf16.mxu0 %v4971_v40  ;;  %v6741_v14 = vadd.f32 %v7630_v54, %v7629_v43  ;;  %v5000_v48 = vcombine.low %v1437_v3, %v1441_v58  ;;  %v5002_v6 = vcombine.low %v1438_v39, %v1442_v16  ;;  %v1457_v59 = vld [vmem:[#allocation8 + $0x760] sm:$0xff]  ;;  %v1454_v40 = vld [vmem:[#allocation8 + $0x748] sm:$0xff]  ;;  %v1223_v58 = vld [vmem:[#allocation8 + $0x10] sm:$0xff] }
 0x28a   :  { %v1036_v45 = vmul.f32 %v1008_v37, %v6736_v2  ;;  %v5009_v28 = vcombine.high %v1445_v51, %v1449_v42  ;;  %v5011_v24 = vcombine.high %v1446_v47, %v1450_v4  ;;  %v1458_v61 = vld [vmem:[#allocation8 + $0x768] sm:$0xff]  ;;  %v5008_v55 = vcombine.low %v1445_v51, %v1449_v42  ;;  %v1469_v15 = vld [vmem:[#allocation8 + $0x7c0] sm:$0xff]  ;;  %v1227_v16 = vld [vmem:[#allocation8 + $0x30] sm:$0xff] }
 0x28b   :  { %v1007_v50 = vmul.f32 0.044715, %v6741_v14  ;;  %v1462_v11 = vld [vmem:[#allocation8 + $0x788] sm:$0xff]  ;;  %v5025_v31 = vcombine.high %v1461_v41, %v1465_v10  ;;  %v1473_v63 = vld [vmem:[#allocation8 + $0x7e0] sm:$0xff]  ;;  %v5024_v17 = vcombine.low %v1461_v41, %v1465_v10  ;;  %v4789_v51 = vcombine.high %v1223_v58, %v1227_v16  ;;  %v1232_v43 = vld [vmem:[#allocation8 + $0x58] sm:$0xff] }
 0x28c   :  { %2885 = vmatpush1.bf16.msra.mxu1 %v4968_v52  ;;  %3027 = vmatpush1.bf16.msra.mxu0 %v4970_v44  ;;  %v5010_v52 = vcombine.low %v1446_v47, %v1450_v4  ;;  %v1064_v44 = vmul.f32 %v1036_v45, %v6736_v2  ;;  %v1466_v36 = vld [vmem:[#allocation8 + $0x7a8] sm:$0xff]  ;;  %v1231_v47 = vld [vmem:[#allocation8 + $0x50] sm:$0xff]  ;;  %v1236_v54 = vld [vmem:[#allocation8 + $0x78] sm:$0xff] }
 0x28d   :  { %2886 = vmatprep.subr.bf16.mxu1 %v4977_v30  ;;  %3028 = vmatprep.subr.bf16.mxu0 %v4979_v25  ;;  %v5017_v30 = vcombine.high %v1453_v49, %v1457_v59  ;;  %v5019_v25 = vcombine.high %v1454_v40, %v1458_v61  ;;  %v5027_v8 = vcombine.high %v1462_v11, %v1466_v36  ;;  %v1235_v4 = vld [vmem:[#allocation8 + $0x70] sm:$0xff]  ;;  %v1248_v10 = vld [vmem:[#allocation8 + $0xd8] sm:$0xff] }
 0x28e   :  { %v1251_v41 = vld [vmem:[#allocation8 + $0xf0] sm:$0xff] }
 0x290   :  { %2887 = vmatpush1.bf16.msra.mxu1 %v4976_v57  ;;  %3029 = vmatpush1.bf16.msra.mxu0 %v4978_v53  ;;  %v1035_v57 = vmul.f32 %v1007_v50, %v6741_v14  ;;  %v5016_v53 = vcombine.low %v1453_v49, %v1457_v59  ;;  %v1239_v49 = vld [vmem:[#allocation8 + $0x90] sm:$0xff]  ;;  %v4796_v50 = vcombine.low %v1231_v47, %v1235_v4 }
 0x291   :  { %2888 = vmatprep.subr.bf16.mxu1 %v4985_v26  ;;  %3030 = vmatprep.subr.bf16.mxu0 %v4987_v19  ;;  %v5018_v26 = vcombine.low %v1454_v40, %v1458_v61  ;;  %v1092_v19 = vadd.f32 %v1064_v44, %v6736_v2  ;;  %v1243_v59 = vld [vmem:[#allocation8 + $0xb0] sm:$0xff]  ;;  %v1240_v40 = vld [vmem:[#allocation8 + $0x98] sm:$0xff] }
 0x292   :  { %v1063_v62 = vmul.f32 %v1035_v57, %v6741_v14  ;;  %v1244_v61 = vld [vmem:[#allocation8 + $0xb8] sm:$0xff] }
 0x293   :  { %v1120_v39 = vmul.f32 0.7978846, %v1092_v19  ;;  %v4807_v44 = vcombine.high %v1240_v40, %v1244_v61  ;;  %v4806_v57 = vcombine.low %v1240_v40, %v1244_v61  ;;  %v1255_v19 = vld [vmem:[#allocation8 + $0x110] sm:$0xff]  ;;  %v1280_v40 = vld [vmem:[#allocation8 + $0x1d8] sm:$0xff] }
 0x294   :  { %2889 = vmatpush1.bf16.msra.mxu1 %v4984_v33  ;;  %3031 = vmatpush1.bf16.msra.mxu0 %v4986_v20  ;;  %v1470_v33 = vld [vmem:[#allocation8 + $0x7c8] sm:$0xff]  ;;  %v1091_v37 = vadd.f32 %v1063_v62, %v6741_v14 }
 0x295   :  { %2890 = vmatprep.subr.bf16.mxu1 %v4993_v1  ;;  %3032 = vmatprep.subr.bf16.mxu0 %v4995_v38  ;;  %v1474_v20 = vld [vmem:[#allocation8 + $0x7e8] sm:$0xff]  ;;  %v5026_v1 = vcombine.low %v1462_v11, %v1466_v36  ;;  %v5033_v38 = vcombine.high %v1469_v15, %v1473_v63  ;;  %5672 = vtanh.f32 %v1120_v39  ;;  %v1252_v11 = vld [vmem:[#allocation8 + $0xf8] sm:$0xff]  ;;  %v4804_v36 = vcombine.low %v1239_v49, %v1243_v59  ;;  %v1267_v39 = vld [vmem:[#allocation8 + $0x170] sm:$0xff] }
 0x296   :  { %v5035_v3 = vcombine.high %v1470_v33, %v1474_v20  ;;  %v4814_v62 = vcombine.low %v1248_v10, %v1252_v11 }
 0x298   :  { %2891 = vmatpush1.bf16.msra.mxu1 %v4992_v21  ;;  %3033 = vmatpush1.bf16.msra.mxu0 %v4994_v18  ;;  %v1224_v21 = vld [vmem:[#allocation8 + $0x18] sm:$0xff] }
 0x299   :  { %2892 = vmatprep.subr.bf16.mxu1 %v5001_v46  ;;  %3034 = vmatprep.subr.bf16.mxu0 %v5003_v22  ;;  %v1228_v18 = vld [vmem:[#allocation8 + $0x38] sm:$0xff]  ;;  %v5032_v46 = vcombine.low %v1469_v15, %v1473_v63  ;;  %v5034_v22 = vcombine.low %v1470_v33, %v1474_v20  ;;  %v980_v33 = vmul.f32 0.5, %v6736_v2 }
 0x29a   :  { %v4791_v42 = vcombine.high %v1224_v21, %v1228_v18  ;;  %v4790_v45 = vcombine.low %v1224_v21, %v1228_v18  ;;  %v1256_v15 = vld [vmem:[#allocation8 + $0x118] sm:$0xff] }
 0x29b   :  { %v1260_v63 = vld [vmem:[#allocation8 + $0x138] sm:$0xff] }
 0x29c   :  { %2893 = vmatpush1.bf16.msra.mxu1 %v5000_v48  ;;  %3035 = vmatpush1.bf16.msra.mxu0 %v5002_v6  ;;  %v1119_v48 = vmul.f32 0.7978846, %v1091_v37  ;;  %v4788_v6 = vcombine.low %v1223_v58, %v1227_v16  ;;  %v1263_v58 = vld [vmem:[#allocation8 + $0x150] sm:$0xff]  ;;  %v1264_v16 = vld [vmem:[#allocation8 + $0x158] sm:$0xff]  ;;  %v4822_v37 = vcombine.low %v1256_v15, %v1260_v63 }
 0x29d   :  { %2894 = vmatprep.subr.bf16.mxu1 %v5009_v28  ;;  %3036 = vmatprep.subr.bf16.mxu0 %v5011_v24  ;;  %v4797_v28 = vcombine.high %v1231_v47, %v1235_v4  ;;  %v4799_v24 = vcombine.high %v1232_v43, %v1236_v54  ;;  %v1268_v21 = vld [vmem:[#allocation8 + $0x178] sm:$0xff]  ;;  %v979_v47 = vmul.f32 0.5, %v6741_v14  ;;  %v1275_v4 = vld [vmem:[#allocation8 + $0x1b0] sm:$0xff] }
 0x29e   :  { %5674 = vtanh.f32 %v1119_v48  ;;  %v4828_v48 = vcombine.low %v1263_v58, %v1267_v39  ;;  %v1284_v14 = vld [vmem:[#allocation8 + $0x1f8] sm:$0xff] }
 0x2a0   :  { %2895 = vmatpush1.bf16.msra.mxu1 %v5008_v55  ;;  %3037 = vmatpush1.bf16.msra.mxu0 %v5010_v52  ;;  %v4798_v55 = vcombine.low %v1232_v43, %v1236_v54  ;;  %v4805_v52 = vcombine.high %v1239_v49, %v1243_v59  ;;  %v1272_v43 = vld [vmem:[#allocation8 + $0x198] sm:$0xff]  ;;  %v1279_v49 = vld [vmem:[#allocation8 + $0x1d0] sm:$0xff] }
 0x2a1   :  { %2896 = vmatprep.subr.bf16.mxu1 %v5017_v30  ;;  %3038 = vmatprep.subr.bf16.mxu0 %v5019_v25  ;;  %v1247_v30 = vld [vmem:[#allocation8 + $0xd0] sm:$0xff]  ;;  %v5673_v25 = vpop.eup %5672  ;;  %v1276_v54 = vld [vmem:[#allocation8 + $0x1b8] sm:$0xff] }
 0x2a2   :  { %v4812_v20 = vcombine.low %v1247_v30, %v1251_v41  ;;  %v1283_v59 = vld [vmem:[#allocation8 + $0x1f0] sm:$0xff] }
 0x2a4   :  { %2897 = vmatpush1.bf16.msra.mxu1 %v5016_v53  ;;  %3039 = vmatpush1.bf16.msra.mxu0 %v5018_v26  ;;  %v4813_v53 = vcombine.high %v1247_v30, %v1251_v41  ;;  %v4815_v26 = vcombine.high %v1248_v10, %v1252_v11  ;;  %v1287_v30 = vld [vmem:[#allocation8 + $0x210] sm:$0xff]  ;;  %v1288_v41 = vld [vmem:[#allocation8 + $0x218] sm:$0xff]  ;;  %v4844_v11 = vcombine.low %v1279_v49, %v1283_v59 }
 0x2a5   :  { %2898 = vmatprep.subr.bf16.mxu1 %v5025_v31  ;;  %3040 = vmatprep.subr.bf16.mxu0 %v5027_v8  ;;  %v1176_v31 = vadd.f32 1.0, %v5673_v25  ;;  %v1259_v8 = vld [vmem:[#allocation8 + $0x130] sm:$0xff]  ;;  %v1292_v10 = vld [vmem:[#allocation8 + $0x238] sm:$0xff] }
 0x2a6   :  { %v4820_v18 = vcombine.low %v1255_v19, %v1259_v8  ;;  %v1291_v25 = vld [vmem:[#allocation8 + $0x230] sm:$0xff] }
 0x2a8   :  { %2899 = vmatpush1.bf16.msra.mxu1 %v5024_v17  ;;  %3041 = vmatpush1.bf16.msra.mxu0 %v5026_v1  ;;  %v5675_v17 = vpop.eup %5674  ;;  %v4821_v1 = vcombine.high %v1255_v19, %v1259_v8  ;;  %v1299_v19 = vld [vmem:[#allocation8 + $0x270] sm:$0xff]  ;;  %v1300_v8 = vld [vmem:[#allocation8 + $0x278] sm:$0xff] }
 0x2a9   :  { %2900 = vmatprep.subr.bf16.mxu1 %v5033_v38  ;;  %3042 = vmatprep.subr.bf16.mxu0 %v5035_v3  ;;  %v4823_v38 = vcombine.high %v1256_v15, %v1260_v63  ;;  %v1204_v3 = vmul.f32 %v1176_v31, %v980_v33  ;;  %v1296_v31 = vld [vmem:[#allocation8 + $0x258] sm:$0xff]  ;;  %v4852_v15 = vcombine.low %v1287_v30, %v1291_v25 }
 0x2aa   :  { %v4854_v63 = vcombine.low %v1288_v41, %v1292_v10 }
 0x2ab   :  { %v6759_v2 = vpack.c.bf16 %v1204_v3, %v1204_v3  ;;  %v4862_v3 = vcombine.low %v1296_v31, %v1300_v8 }
 0x2ac   :  { %2901 = vmatpush1.bf16.msra.mxu1 %v5032_v46  ;;  %3043 = vmatpush1.bf16.msra.mxu0 %v5034_v22  ;;  %v1175_v46 = vadd.f32 1.0, %v5675_v17  ;;  %v4829_v22 = vcombine.high %v1263_v58, %v1267_v39  ;;  %v1304_v17 = vld [vmem:[#allocation8 + $0x298] sm:$0xff] }
 0x2ad   :  { %3083 = vmatprep.subr.bf16.mxu1 %v4789_v51  ;;  %3225 = vmatprep.subr.bf16.mxu0 %v4791_v42  ;;  %v4831_v51 = vcombine.high %v1264_v16, %v1268_v21  ;;  %v1271_v42 = vld [vmem:[#allocation8 + $0x190] sm:$0xff] }
 0x2af   :  { %2903 = vmatmul.mubr.bf16.vlgmr.msra.gmra.mrb[16].mxu1 %v6683_v12  ;;  %3045 = vmatmul.mubr.bf16.vlgmr.msra.gmra.mrb[32].mxu0 %v6683_v12 }
 0x2b0   :  { %2912 = vmatprep.mubr.bf16.mxu1 %v6691_v32  ;;  %3054 = vmatprep.mubr.bf16.mxu0 %v6691_v32 }
 0x2b1   :  { %3084 = vmatpush1.bf16.msra.mxu1 %v4788_v6  ;;  %3226 = vmatpush1.bf16.msra.mxu0 %v4790_v45  ;;  %v4830_v6 = vcombine.low %v1264_v16, %v1268_v21  ;;  %v1203_v45 = vmul.f32 %v1175_v46, %v979_v47  ;;  %v1311_v16 = vld [vmem:[#allocation8 + $0x2d0] sm:$0xff] }
 0x2b2   :  { %3085 = vmatprep.subr.bf16.mxu1 %v4797_v28  ;;  %3227 = vmatprep.subr.bf16.mxu0 %v4799_v24  ;;  %v4837_v28 = vcombine.high %v1271_v42, %v1275_v4  ;;  %v4839_v24 = vcombine.high %v1272_v43, %v1276_v54  ;;  %v1315_v21 = vld [vmem:[#allocation8 + $0x2f0] sm:$0xff] }
 0x2b3   :  { %v6766_v61 = vpack.c.bf16 %v1203_v45, %v1203_v45  ;;  %v1319_v47 = vld [vmem:[#allocation8 + $0x310] sm:$0xff] }
 0x2b5   :  { %3086 = vmatpush1.bf16.msra.mxu1 %v4796_v50  ;;  %3228 = vmatpush1.bf16.msra.mxu0 %v4798_v55  ;;  %v4836_v50 = vcombine.low %v1271_v42, %v1275_v4  ;;  %v4838_v55 = vcombine.low %v1272_v43, %v1276_v54  ;;  %v1323_v4 = vld [vmem:[#allocation8 + $0x330] sm:$0xff]  ;;  %v1320_v43 = vld [vmem:[#allocation8 + $0x318] sm:$0xff] }
 0x2b6   :  { %3087 = vmatprep.subr.bf16.mxu1 %v4805_v52  ;;  %3229 = vmatprep.subr.bf16.mxu0 %v4807_v44  ;;  %v4845_v52 = vcombine.high %v1279_v49, %v1283_v59  ;;  %v4847_v44 = vcombine.high %v1280_v40, %v1284_v14  ;;  %v1324_v54 = vld [vmem:[#allocation8 + $0x338] sm:$0xff]  ;;  %v4885_v45 = vcombine.high %v1319_v47, %v1323_v4  ;;  %v1331_v49 = vld [vmem:[#allocation8 + $0x370] sm:$0xff] }
 0x2b7   :  { %2913 = vmatmul.mubr.bf16.gmra.mrb[20].mxu1 %v6710_v13  ;;  %3055 = vmatmul.mubr.bf16.gmra.mrb[36].mxu0 %v6710_v13  ;;  %v1328_v59 = vld [vmem:[#allocation8 + $0x358] sm:$0xff] }
 0x2b8   :  { %2922 = vmatprep.mubr.bf16.mxu1 %v6720_v23  ;;  %3064 = vmatprep.mubr.bf16.mxu0 %v6720_v23 }
 0x2b9   :  { %3088 = vmatpush1.bf16.msra.mxu1 %v4804_v36  ;;  %3230 = vmatpush1.bf16.msra.mxu0 %v4806_v57  ;;  %v4846_v36 = vcombine.low %v1280_v40, %v1284_v14  ;;  %v4853_v57 = vcombine.high %v1287_v30, %v1291_v25  ;;  %v1332_v40 = vld [vmem:[#allocation8 + $0x378] sm:$0xff]  ;;  %v4884_v14 = vcombine.low %v1319_v47, %v1323_v4  ;;  %v1339_v30 = vld [vmem:[#allocation8 + $0x3b0] sm:$0xff] }
 0x2ba   :  { %3089 = vmatprep.subr.bf16.mxu1 %v4813_v53  ;;  %3231 = vmatprep.subr.bf16.mxu0 %v4815_v26  ;;  %v4855_v53 = vcombine.high %v1288_v41, %v1292_v10  ;;  %v1295_v26 = vld [vmem:[#allocation8 + $0x250] sm:$0xff]  ;;  %v1336_v25 = vld [vmem:[#allocation8 + $0x398] sm:$0xff] }
 0x2bb   :  { %v4861_v33 = vcombine.high %v1295_v26, %v1299_v19  ;;  %v1340_v41 = vld [vmem:[#allocation8 + $0x3b8] sm:$0xff]  ;;  %v1371_v47 = vld [vmem:[#allocation8 + $0x4b0] sm:$0xff] }
 0x2bc   :  { %v1368_v4 = vld [vmem:[#allocation8 + $0x498] sm:$0xff] }
 0x2bd   :  { %3090 = vmatpush1.bf16.msra.mxu1 %v4812_v20  ;;  %3232 = vmatpush1.bf16.msra.mxu0 %v4814_v62  ;;  %v1303_v20 = vld [vmem:[#allocation8 + $0x290] sm:$0xff] }
 0x2be   :  { %3091 = vmatprep.subr.bf16.mxu1 %v4821_v1  ;;  %3233 = vmatprep.subr.bf16.mxu0 %v4823_v38  ;;  %v1307_v62 = vld [vmem:[#allocation8 + $0x2b0] sm:$0xff]  ;;  %v1308_v1 = vld [vmem:[#allocation8 + $0x2b8] sm:$0xff]  ;;  %v4860_v38 = vcombine.low %v1295_v26, %v1299_v19 }
 0x2bf   :  { %2923 = vmatmul.mubr.bf16.gmra.mrb[24].mxu1 %v6724_v9  ;;  %3065 = vmatmul.mubr.bf16.gmra.mrb[40].mxu0 %v6724_v9  ;;  %v4869_v58 = vcombine.high %v1303_v20, %v1307_v62  ;;  %v4871_v39 = vcombine.high %v1304_v17, %v1308_v1  ;;  %v4868_v46 = vcombine.low %v1303_v20, %v1307_v62  ;;  %v1347_v26 = vld [vmem:[#allocation8 + $0x3f0] sm:$0xff]  ;;  %v1344_v19 = vld [vmem:[#allocation8 + $0x3d8] sm:$0xff] }
 0x2c0   :  { %2932 = vmatprep.mubr.bf16.mxu1 %v6759_v2  ;;  %3074 = vmatprep.mubr.bf16.mxu0 %v6759_v2  ;;  %v1355_v20 = vld [vmem:[#allocation8 + $0x430] sm:$0xff]  ;;  %v1352_v62 = vld [vmem:[#allocation8 + $0x418] sm:$0xff] }
 0x2c1   :  { %3092 = vmatpush1.bf16.msra.mxu1 %v4820_v18  ;;  %3234 = vmatpush1.bf16.msra.mxu0 %v4822_v37  ;;  %v1312_v18 = vld [vmem:[#allocation8 + $0x2d8] sm:$0xff] }
 0x2c2   :  { %3093 = vmatprep.subr.bf16.mxu1 %v4829_v22  ;;  %3235 = vmatprep.subr.bf16.mxu0 %v4831_v51  ;;  %v1316_v37 = vld [vmem:[#allocation8 + $0x2f8] sm:$0xff]  ;;  %v4870_v22 = vcombine.low %v1304_v17, %v1308_v1  ;;  %v4877_v51 = vcombine.high %v1311_v16, %v1315_v21 }
 0x2c3   :  { %v4879_v42 = vcombine.high %v1312_v18, %v1316_v37  ;;  %v1356_v17 = vld [vmem:[#allocation8 + $0x438] sm:$0xff] }
 0x2c5   :  { %3094 = vmatpush1.bf16.msra.mxu1 %v4828_v48  ;;  %3236 = vmatpush1.bf16.msra.mxu0 %v4830_v6  ;;  %v4876_v48 = vcombine.low %v1311_v16, %v1315_v21  ;;  %v4878_v6 = vcombine.low %v1312_v18, %v1316_v37  ;;  %v1363_v16 = vld [vmem:[#allocation8 + $0x470] sm:$0xff]  ;;  %v1360_v21 = vld [vmem:[#allocation8 + $0x458] sm:$0xff] }
 0x2c6   :  { %3095 = vmatprep.subr.bf16.mxu1 %v4837_v28  ;;  %3237 = vmatprep.subr.bf16.mxu0 %v4839_v24  ;;  %v4887_v28 = vcombine.high %v1320_v43, %v1324_v54  ;;  %v1327_v24 = vld [vmem:[#allocation8 + $0x350] sm:$0xff]  ;;  %v1364_v18 = vld [vmem:[#allocation8 + $0x478] sm:$0xff] }
 0x2c7   :  { %2933 = vmatmul.mubr.bf16.gmra.mrb[28].mxu1 %v6766_v61  ;;  %3075 = vmatmul.mubr.bf16.gmra.mrb[44].mxu0 %v6766_v61  ;;  %v4892_v10 = vcombine.low %v1327_v24, %v1331_v49 }
 0x2c8   :  { %3115 = vmatprep.mubr.bf16.mxu1 %v6596_v60  ;;  %3257 = vmatprep.mubr.bf16.mxu0 %v6596_v60  ;;  %v4863_v60 = vcombine.high %v1296_v31, %v1300_v8  ;;  %v1348_v31 = vld [vmem:[#allocation8 + $0x3f8] sm:$0xff] }
 0x2c9   :  { %3096 = vmatpush1.bf16.msra.mxu1 %v4836_v50  ;;  %3238 = vmatpush1.bf16.msra.mxu0 %v4838_v55  ;;  %v4886_v50 = vcombine.low %v1320_v43, %v1324_v54  ;;  %v4893_v55 = vcombine.high %v1327_v24, %v1331_v49  ;;  %v1372_v43 = vld [vmem:[#allocation8 + $0x4b8] sm:$0xff]  ;;  %v1379_v24 = vld [vmem:[#allocation8 + $0x4f0] sm:$0xff] }
 0x2ca   :  { %3097 = vmatprep.subr.bf16.mxu1 %v4845_v52  ;;  %3239 = vmatprep.subr.bf16.mxu0 %v4847_v44  ;;  %v4895_v52 = vcombine.high %v1328_v59, %v1332_v40  ;;  %v1335_v44 = vld [vmem:[#allocation8 + $0x390] sm:$0xff]  ;;  %v1376_v49 = vld [vmem:[#allocation8 + $0x4d8] sm:$0xff] }
 0x2cb   :  { %v4900_v8 = vcombine.low %v1335_v44, %v1339_v30 }
 0x2cd   :  { %3098 = vmatpush1.bf16.msra.mxu1 %v4844_v11  ;;  %3240 = vmatpush1.bf16.msra.mxu0 %v4846_v36  ;;  %v4894_v11 = vcombine.low %v1328_v59, %v1332_v40  ;;  %v4901_v36 = vcombine.high %v1335_v44, %v1339_v30  ;;  %v1380_v59 = vld [vmem:[#allocation8 + $0x4f8] sm:$0xff]  ;;  %v4934_v40 = vcombine.low %v1368_v4, %v1372_v43 }
 0x2ce   :  { %3099 = vmatprep.subr.bf16.mxu1 %v4853_v57  ;;  %3241 = vmatprep.subr.bf16.mxu0 %v4855_v53  ;;  %v4903_v57 = vcombine.high %v1336_v25, %v1340_v41  ;;  %v1343_v53 = vld [vmem:[#allocation8 + $0x3d0] sm:$0xff]  ;;  %v1388_v44 = vld [vmem:[#allocation8 + $0x538] sm:$0xff] }
 0x2cf   :  { %v4908_v1 = vcombine.low %v1343_v53, %v1347_v26 }
 0x2d1   :  { %3100 = vmatpush1.bf16.msra.mxu1 %v4852_v15  ;;  %3242 = vmatpush1.bf16.msra.mxu0 %v4854_v63  ;;  %v4902_v15 = vcombine.low %v1336_v25, %v1340_v41  ;;  %v4909_v63 = vcombine.high %v1343_v53, %v1347_v26  ;;  %v4942_v25 = vcombine.low %v1376_v49, %v1380_v59  ;;  %v1396_v53 = vld [vmem:[#allocation8 + $0x578] sm:$0xff] }
 0x2d2   :  { %3101 = vmatprep.subr.bf16.mxu1 %v4861_v33  ;;  %3243 = vmatprep.subr.bf16.mxu0 %v4863_v60  ;;  %v4911_v33 = vcombine.high %v1344_v19, %v1348_v31  ;;  %v1351_v60 = vld [vmem:[#allocation8 + $0x410] sm:$0xff] }
 0x2d3   :  { %v4916_v37 = vcombine.low %v1351_v60, %v1355_v20 }
 0x2d5   :  { %3102 = vmatpush1.bf16.msra.mxu1 %v4860_v38  ;;  %3244 = vmatpush1.bf16.msra.mxu0 %v4862_v3  ;;  %v4910_v38 = vcombine.low %v1344_v19, %v1348_v31  ;;  %v4917_v3 = vcombine.high %v1351_v60, %v1355_v20 }
 0x2d6   :  { %3103 = vmatprep.subr.bf16.mxu1 %v4869_v58  ;;  %3245 = vmatprep.subr.bf16.mxu0 %v4871_v39  ;;  %v4919_v58 = vcombine.high %v1352_v62, %v1356_v17  ;;  %v1359_v39 = vld [vmem:[#allocation8 + $0x450] sm:$0xff] }
 0x2d7   :  { %v4924_v54 = vcombine.low %v1359_v39, %v1363_v16 }
 0x2d9   :  { %3104 = vmatpush1.bf16.msra.mxu1 %v4868_v46  ;;  %3246 = vmatpush1.bf16.msra.mxu0 %v4870_v22  ;;  %v4918_v46 = vcombine.low %v1352_v62, %v1356_v17  ;;  %v4925_v22 = vcombine.high %v1359_v39, %v1363_v16  ;;  %v1407_v17 = vld [vmem:[#allocation8 + $0x5d0] sm:$0xff] }
 0x2da   :  { %3105 = vmatprep.subr.bf16.mxu1 %v4877_v51  ;;  %3247 = vmatprep.subr.bf16.mxu0 %v4879_v42  ;;  %v4927_v51 = vcombine.high %v1360_v21, %v1364_v18  ;;  %v1367_v42 = vld [vmem:[#allocation8 + $0x490] sm:$0xff] }
 0x2dd   :  { %3106 = vmatpush1.bf16.msra.mxu1 %v4876_v48  ;;  %3248 = vmatpush1.bf16.msra.mxu0 %v4878_v6  ;;  %v4926_v48 = vcombine.low %v1360_v21, %v1364_v18  ;;  %v4933_v6 = vcombine.high %v1367_v42, %v1371_v47  ;;  %v1415_v21 = vld [vmem:[#allocation8 + $0x610] sm:$0xff]  ;;  %v1416_v18 = vld [vmem:[#allocation8 + $0x618] sm:$0xff] }
 0x2de   :  { %3107 = vmatprep.subr.bf16.mxu1 %v4885_v45  ;;  %3249 = vmatprep.subr.bf16.mxu0 %v4887_v28  ;;  %v4935_v45 = vcombine.high %v1368_v4, %v1372_v43  ;;  %v1375_v28 = vld [vmem:[#allocation8 + $0x4d0] sm:$0xff]  ;;  %v1424_v43 = vld [vmem:[#allocation8 + $0x658] sm:$0xff] }
 0x2df   :  { %v4940_v30 = vcombine.low %v1375_v28, %v1379_v24  ;;  %v1427_v4 = vld [vmem:[#allocation8 + $0x670] sm:$0xff] }
 0x2e1   :  { %3108 = vmatpush1.bf16.msra.mxu1 %v4884_v14  ;;  %3250 = vmatpush1.bf16.msra.mxu0 %v4886_v50  ;;  %v4941_v14 = vcombine.high %v1375_v28, %v1379_v24  ;;  %v4943_v50 = vcombine.high %v1376_v49, %v1380_v59  ;;  %v1431_v28 = vld [vmem:[#allocation8 + $0x690] sm:$0xff]  ;;  %v1436_v49 = vld [vmem:[#allocation8 + $0x6b8] sm:$0xff] }
 0x2e2   :  { %3109 = vmatprep.subr.bf16.mxu1 %v4893_v55  ;;  %3251 = vmatprep.subr.bf16.mxu0 %v4895_v52  ;;  %v1383_v55 = vld [vmem:[#allocation8 + $0x510] sm:$0xff]  ;;  %v1384_v52 = vld [vmem:[#allocation8 + $0x518] sm:$0xff] }
 0x2e3   :  { %v4950_v26 = vcombine.low %v1384_v52, %v1388_v44  ;;  %v1435_v24 = vld [vmem:[#allocation8 + $0x6b0] sm:$0xff] }
 0x2e5   :  { %3110 = vmatpush1.bf16.msra.mxu1 %v4892_v10  ;;  %3252 = vmatpush1.bf16.msra.mxu0 %v4894_v11  ;;  %v4951_v10 = vcombine.high %v1384_v52, %v1388_v44  ;;  %v1391_v11 = vld [vmem:[#allocation8 + $0x550] sm:$0xff]  ;;  %v1444_v52 = vld [vmem:[#allocation8 + $0x6f8] sm:$0xff]  ;;  %v4996_v44 = vcombine.low %v1431_v28, %v1435_v24 }
 0x2e6   :  { %3111 = vmatprep.subr.bf16.mxu1 %v4901_v36  ;;  %3253 = vmatprep.subr.bf16.mxu0 %v4903_v57  ;;  %v1395_v36 = vld [vmem:[#allocation8 + $0x570] sm:$0xff]  ;;  %v1392_v57 = vld [vmem:[#allocation8 + $0x558] sm:$0xff] }
 0x2e7   :  { %v4957_v19 = vcombine.high %v1391_v11, %v1395_v36  ;;  %v4959_v31 = vcombine.high %v1392_v57, %v1396_v53  ;;  %v4958_v60 = vcombine.low %v1392_v57, %v1396_v53  ;;  %v1452_v57 = vld [vmem:[#allocation8 + $0x738] sm:$0xff] }
 0x2e9   :  { %3112 = vmatpush1.bf16.msra.mxu1 %v4900_v8  ;;  %3254 = vmatpush1.bf16.msra.mxu0 %v4902_v15  ;;  %v1399_v8 = vld [vmem:[#allocation8 + $0x590] sm:$0xff]  ;;  %v1400_v15 = vld [vmem:[#allocation8 + $0x598] sm:$0xff] }
 0x2ea   :  { %3113 = vmatprep.subr.bf16.mxu1 %v4909_v63  ;;  %3255 = vmatprep.subr.bf16.mxu0 %v4911_v33  ;;  %v1404_v63 = vld [vmem:[#allocation8 + $0x5b8] sm:$0xff]  ;;  %v4956_v33 = vcombine.low %v1391_v11, %v1395_v36  ;;  %v1451_v11 = vld [vmem:[#allocation8 + $0x730] sm:$0xff] }
 0x2eb   :  { %v4967_v62 = vcombine.high %v1400_v15, %v1404_v63  ;;  %v1448_v36 = vld [vmem:[#allocation8 + $0x718] sm:$0xff] }
 0x2ed   :  { %3114 = vmatpush1.bf16.msra.mxu1 %v4908_v1  ;;  %3256 = vmatpush1.bf16.msra.mxu0 %v4910_v38  ;;  %v1411_v1 = vld [vmem:[#allocation8 + $0x5f0] sm:$0xff]  ;;  %v1408_v38 = vld [vmem:[#allocation8 + $0x5d8] sm:$0xff] }
 0x2ee   :  { %3154 = vmatprep.subr.bf16.mxu1 %v4917_v3  ;;  %3296 = vmatprep.subr.bf16.mxu0 %v4919_v58  ;;  %v1412_v3 = vld [vmem:[#allocation8 + $0x5f8] sm:$0xff]  ;;  %v4966_v58 = vcombine.low %v1400_v15, %v1404_v63  ;;  %v4973_v39 = vcombine.high %v1407_v17, %v1411_v1 }
 0x2ef   :  { %v4975_v16 = vcombine.high %v1408_v38, %v1412_v3  ;;  %v1460_v15 = vld [vmem:[#allocation8 + $0x778] sm:$0xff] }
 0x2f0   :  { %3116 = vmatmul.mubr.bf16.vlgmr.msra.gmra.mrb[32].mxu1 %v6599_v7  ;;  %3258 = vmatmul.mubr.bf16.vlgmr.msra.gmra.mrb[48].mxu0 %v6599_v7  ;;  %v4932_v7 = vcombine.low %v1367_v42, %v1371_v47  ;;  %v1423_v47 = vld [vmem:[#allocation8 + $0x650] sm:$0xff] }
 0x2f1   :  { %3125 = vmatprep.mubr.bf16.mxu1 %v6620_v0  ;;  %3155 = vmatpush1.bf16.msra.mxu1 %v4916_v37  ;;  %v1420_v37 = vld [vmem:[#allocation8 + $0x638] sm:$0xff]  ;;  %v4988_v59 = vcombine.low %v1423_v47, %v1427_v4 }
 0x2f2   :  { %3267 = vmatprep.mubr.bf16.mxu0 %v6620_v0  ;;  %3297 = vmatpush1.bf16.msra.mxu0 %v4918_v46  ;;  %v1387_v0 = vld [vmem:[#allocation8 + $0x530] sm:$0xff]  ;;  %v4972_v46 = vcombine.low %v1407_v17, %v1411_v1  ;;  %v4983_v42 = vcombine.high %v1416_v18, %v1420_v37  ;;  %v1464_v1 = vld [vmem:[#allocation8 + $0x798] sm:$0xff] }
 0x2f3   :  { %3156 = vmatprep.subr.bf16.mxu1 %v4925_v22  ;;  %3298 = vmatprep.subr.bf16.mxu0 %v4927_v51  ;;  %v4949_v41 = vcombine.high %v1383_v55, %v1387_v0  ;;  %v4974_v22 = vcombine.low %v1408_v38, %v1412_v3  ;;  %v1467_v17 = vld [vmem:[#allocation8 + $0x7b0] sm:$0xff]  ;;  %v1468_v38 = vld [vmem:[#allocation8 + $0x7b8] sm:$0xff] }
 0x2f5   :  { %3157 = vmatpush1.bf16.msra.mxu1 %v4924_v54  ;;  %v1428_v54 = vld [vmem:[#allocation8 + $0x678] sm:$0xff] }
 0x2f6   :  { %3299 = vmatpush1.bf16.msra.mxu0 %v4926_v48  ;;  %3158 = vmatprep.subr.bf16.mxu1 %v4933_v6  ;;  %v4982_v48 = vcombine.low %v1416_v18, %v1420_v37  ;;  %v4989_v6 = vcombine.high %v1423_v47, %v1427_v4  ;;  %v1476_v18 = vld [vmem:[#allocation8 + $0x7f8] sm:$0xff]  ;;  %v5528_v4 = vld [vmem:[#allocation10 + $0x40] sm:$0xff]  }
 0x2f7   :  { %3300 = vmatprep.subr.bf16.mxu0 %v4935_v45  ;;  %v4991_v45 = vcombine.high %v1424_v43, %v1428_v54 }
 0x2f8   :  { %3126 = vmatmul.mubr.bf16.gmra.mrb[36].mxu1 %v6632_v27  ;;  %3268 = vmatmul.mubr.bf16.gmra.mrb[52].mxu0 %v6632_v27  ;;  %v4948_v27 = vcombine.low %v1383_v55, %v1387_v0  ;;  %v1443_v55 = vld [vmem:[#allocation8 + $0x6f0] sm:$0xff]  ;;  %v1440_v0 = vld [vmem:[#allocation8 + $0x6d8] sm:$0xff] }
 0x2f9   :  { %3135 = vmatprep.mubr.bf16.mxu1 %v6654_v56  ;;  %3159 = vmatpush1.bf16.msra.mxu1 %v4932_v7  ;;  %v4990_v7 = vcombine.low %v1424_v43, %v1428_v54  ;;  %v5529_v43 = vld [vmem:[#allocation10 + $0xc0] sm:$0xff]  }
 0x2fa   :  { %3277 = vmatprep.mubr.bf16.mxu0 %v6654_v56  ;;  %3301 = vmatpush1.bf16.msra.mxu0 %v4934_v40  ;;  %v1403_v56 = vld [vmem:[#allocation8 + $0x5b0] sm:$0xff]  ;;  %v4997_v40 = vcombine.high %v1431_v28, %v1435_v24  ;;  %v5530_v54 = vld [vmem:[#allocation10] sm:$0xff]   ;;  %v5535_v28 = vld [vmem:[#allocation10 + $0x88] sm:$0xff]  }
 0x2fb   :  { %3160 = vmatprep.subr.bf16.mxu1 %v4941_v14  ;;  %3302 = vmatprep.subr.bf16.mxu0 %v4943_v50  ;;  %v4965_v20 = vcombine.high %v1399_v8, %v1403_v56  ;;  %v1439_v50 = vld [vmem:[#allocation8 + $0x6d0] sm:$0xff] }
 0x2fc   :  { %v5004_v53 = vcombine.low %v1439_v50, %v1443_v55  ;;  %v5536_v24 = vld [vmem:[#allocation10 + $0x50] sm:$0xff]  }
 0x2fd   :  { %3161 = vmatpush1.bf16.msra.mxu1 %v4940_v30 }
 0x2fe   :  { %3303 = vmatpush1.bf16.msra.mxu0 %v4942_v25  ;;  %3162 = vmatprep.subr.bf16.mxu1 %v4949_v41  ;;  %v5005_v25 = vcombine.high %v1439_v50, %v1443_v55  ;;  %v5007_v41 = vcombine.high %v1440_v0, %v1444_v52  ;;  %v5545_v50 = vld [vmem:[#allocation10 + $0xe0] sm:$0xff]  }
 0x2ff   :  { %3304 = vmatprep.subr.bf16.mxu0 %v4951_v10  ;;  %v1447_v10 = vld [vmem:[#allocation8 + $0x710] sm:$0xff]  ;;  %v5546_v55 = vld [vmem:[#allocation10 + $0x20] sm:$0xff]  }
 0x300   :  { %3136 = vmatmul.mubr.bf16.gmra.mrb[40].mxu1 %v6643_v34  ;;  %3278 = vmatmul.mubr.bf16.gmra.mrb[56].mxu0 %v6643_v34  ;;  %v4964_v34 = vcombine.low %v1399_v8, %v1403_v56  ;;  %v1459_v8 = vld [vmem:[#allocation8 + $0x770] sm:$0xff]  ;;  %v1456_v56 = vld [vmem:[#allocation8 + $0x758] sm:$0xff]  ;;  %v5012_v63 = vcombine.low %v1447_v10, %v1451_v11 }
 0x301   :  { %3145 = vmatprep.mubr.bf16.mxu1 %v6722_v5  ;;  %3163 = vmatpush1.bf16.msra.mxu1 %v4948_v27  ;;  %v5006_v27 = vcombine.low %v1440_v0, %v1444_v52  ;;  %v5547_v0 = vld [vmem:[#allocation10 + $0xa0] sm:$0xff]   ;;  %v5548_v52 = vld [vmem:[#allocation10 + $0x68] sm:$0xff]  }
 0x302   :  { %3287 = vmatprep.mubr.bf16.mxu0 %v6722_v5  ;;  %3305 = vmatpush1.bf16.msra.mxu0 %v4950_v26  ;;  %v1419_v5 = vld [vmem:[#allocation8 + $0x630] sm:$0xff]  ;;  %v5013_v26 = vcombine.high %v1447_v10, %v1451_v11  ;;  %v5556_v11 = vld [vmem:[#allocation10 + $0x78] sm:$0xff]  }
 0x303   :  { %3164 = vmatprep.subr.bf16.mxu1 %v4957_v19  ;;  %3306 = vmatprep.subr.bf16.mxu0 %v4959_v31  ;;  %v4981_v51 = vcombine.high %v1415_v21, %v1419_v5  ;;  %v5015_v19 = vcombine.high %v1448_v36, %v1452_v57  ;;  %v1455_v31 = vld [vmem:[#allocation8 + $0x750] sm:$0xff] }
 0x304   :  { %v5020_v3 = vcombine.low %v1455_v31, %v1459_v8  ;;  %v5555_v10 = vld [vmem:[#allocation10 + $0xb0] sm:$0xff]  }
 0x305   :  { %3165 = vmatpush1.bf16.msra.mxu1 %v4956_v33  ;;  %v5014_v33 = vcombine.low %v1448_v36, %v1452_v57  ;;  %v5559_v36 = vld [vmem:[#allocation10 + $0xb8] sm:$0xff]   ;;  %v6805_v57 = vld [vmem:[%s7522_s6] sm:$0xff] }
 0x306   :  { %3307 = vmatpush1.bf16.msra.mxu0 %v4958_v60  ;;  %3166 = vmatprep.subr.bf16.mxu1 %v4965_v20  ;;  %v5021_v60 = vcombine.high %v1455_v31, %v1459_v8  ;;  %v5023_v20 = vcombine.high %v1456_v56, %v1460_v15  ;;  %7631 = vst [vmem:[#allocation21_spill] sm:$0xff] %v6805_v57  ;;  %v7635_v31 = vld [vmem:[#allocation18_spill] sm:$0xff] }
 0x307   :  { %3308 = vmatprep.subr.bf16.mxu0 %v4967_v62  ;;  %v1463_v62 = vld [vmem:[#allocation8 + $0x790] sm:$0xff]  ;;  %v6818_v8 = vrot.slane %v6805_v57, %v7635_v31 }
 0x308   :  { %3146 = vmatmul.mubr.bf16.gmra.mrb[44].mxu1 %v6728_v35  ;;  %3288 = vmatmul.mubr.bf16.gmra.mrb[60].mxu0 %v6728_v35  ;;  %v4980_v35 = vcombine.low %v1415_v21, %v1419_v5  ;;  %v1475_v21 = vld [vmem:[#allocation8 + $0x7f0] sm:$0xff]  ;;  %v1472_v5 = vld [vmem:[#allocation8 + $0x7d8] sm:$0xff]  ;;  %v5028_v37 = vcombine.low %v1463_v62, %v1467_v17 }
 0x309   :  { %3167 = vmatpush1.bf16.msra.mxu1 %v4964_v34  ;;  %3186 = vmatprep.mubr.bf16.mxu1 %v6672_v29  ;;  %v5022_v34 = vcombine.low %v1456_v56, %v1460_v15  ;;  %v5038_v47 = vcombine.low %v1472_v5, %v1476_v18 }
 0x30a   :  { %3309 = vmatpush1.bf16.msra.mxu0 %v4966_v58  ;;  %3328 = vmatprep.mubr.bf16.mxu0 %v6672_v29  ;;  %v1432_v29 = vld [vmem:[#allocation8 + $0x698] sm:$0xff]  ;;  %v5029_v58 = vcombine.high %v1463_v62, %v1467_v17 }
 0x30b   :  { %3168 = vmatprep.subr.bf16.mxu1 %v4973_v39  ;;  %3310 = vmatprep.subr.bf16.mxu0 %v4975_v16  ;;  %v4999_v14 = vcombine.high %v1432_v29, %v1436_v49  ;;  %v4998_v30 = vcombine.low %v1432_v29, %v1436_v49  ;;  %v5031_v39 = vcombine.high %v1464_v1, %v1468_v38  ;;  %v1471_v16 = vld [vmem:[#allocation8 + $0x7d0] sm:$0xff] }
 0x30c   :  { %v5537_v29 = vld [vmem:[#allocation10 + $0xd0] sm:$0xff]  }
 0x30d   :  { %3169 = vmatpush1.bf16.msra.mxu1 %v4972_v46  ;;  %v5030_v46 = vcombine.low %v1464_v1, %v1468_v38  ;;  %v5538_v49 = vld [vmem:[#allocation10 + $0x10] sm:$0xff]  }
 0x30e   :  { %3311 = vmatpush1.bf16.msra.mxu0 %v4974_v22  ;;  %3170 = vmatprep.subr.bf16.mxu1 %v4981_v51  ;;  %v5037_v22 = vcombine.high %v1471_v16, %v1475_v21  ;;  %v5039_v51 = vcombine.high %v1472_v5, %v1476_v18 }
 0x30f   :  { %3312 = vmatprep.subr.bf16.mxu0 %v4983_v42  ;;  %v5036_v42 = vcombine.low %v1471_v16, %v1475_v21 }
 0x311   :  { %3171 = vmatpush1.bf16.msra.mxu1 %v4980_v35  ;;  %v5531_v35 = vld [vmem:[#allocation10 + $0x80] sm:$0xff]  }
 0x312   :  { %3313 = vmatpush1.bf16.msra.mxu0 %v4982_v48  ;;  %3172 = vmatprep.subr.bf16.mxu1 %v4989_v6  ;;  %v5532_v48 = vld [vmem:[#allocation10 + $0x48] sm:$0xff]  }
 0x313   :  { %3314 = vmatprep.subr.bf16.mxu0 %v4991_v45  ;;  %v5533_v6 = vld [vmem:[#allocation10 + $0xc8] sm:$0xff]  }
 0x314   :  { %v5534_v45 = vld [vmem:[#allocation10 + $0x8] sm:$0xff]  }
 0x315   :  { %3173 = vmatpush1.bf16.msra.mxu1 %v4988_v59  ;;  %v5539_v59 = vld [vmem:[#allocation10 + $0x90] sm:$0xff]  }
 0x316   :  { %3315 = vmatpush1.bf16.msra.mxu0 %v4990_v7  ;;  %3174 = vmatprep.subr.bf16.mxu1 %v4997_v40  ;;  %v5540_v7 = vld [vmem:[#allocation10 + $0x58] sm:$0xff]  }
 0x317   :  { %3316 = vmatprep.subr.bf16.mxu0 %v4999_v14  ;;  %v5543_v40 = vld [vmem:[#allocation10 + $0x98] sm:$0xff]   ;;  %v5544_v14 = vld [vmem:[#allocation10 + $0x60] sm:$0xff]  }
 0x319   :  { %3175 = vmatpush1.bf16.msra.mxu1 %v4996_v44  ;;  %v5551_v44 = vld [vmem:[#allocation10 + $0xa8] sm:$0xff]  }
 0x31a   :  { %3317 = vmatpush1.bf16.msra.mxu0 %v4998_v30  ;;  %3176 = vmatprep.subr.bf16.mxu1 %v5005_v25  ;;  %v5552_v30 = vld [vmem:[#allocation10 + $0x70] sm:$0xff]  }
 0x31b   :  { %3318 = vmatprep.subr.bf16.mxu0 %v5007_v41  ;;  %v5553_v25 = vld [vmem:[#allocation10 + $0xf0] sm:$0xff]  }
 0x31c   :  { %v5554_v41 = vld [vmem:[#allocation10 + $0x30] sm:$0xff]  }
 0x31d   :  { %3177 = vmatpush1.bf16.msra.mxu1 %v5004_v53  ;;  %v7632_v53 = vld [vmem:[#allocation17_spill] sm:$0xff] }
 0x31e   :  { %3319 = vmatpush1.bf16.msra.mxu0 %v5006_v27  ;;  %3178 = vmatprep.subr.bf16.mxu1 %v5013_v26  ;;  %v6809_v27 = vrot.slane %v6805_v57, %v7632_v53  ;;  %v7633_v26 = vld [vmem:[#allocation16_spill] sm:$0xff] }
 0x31f   :  { %3320 = vmatprep.subr.bf16.mxu0 %v5015_v19  ;;  %v7634_v19 = vsub.s32 2, %v7633_v26  ;;  %v7636_v56 = vsub.s32 3, %v7633_v26 }
 0x321   :  { %3179 = vmatpush1.bf16.msra.mxu1 %v5012_v63  ;;  %v6823_v15 = vrot.slane %v6805_v57, %v7636_v56 }
 0x322   :  { %3321 = vmatpush1.bf16.msra.mxu0 %v5014_v33  ;;  %3180 = vmatprep.subr.bf16.mxu1 %v5021_v60 }
 0x323   :  { %3322 = vmatprep.subr.bf16.mxu0 %v5023_v20 }
 0x325   :  { %3181 = vmatpush1.bf16.msra.mxu1 %v5020_v3 }
 0x326   :  { %3323 = vmatpush1.bf16.msra.mxu0 %v5022_v34  ;;  %3182 = vmatprep.subr.bf16.mxu1 %v5029_v58 }
 0x327   :  { %3324 = vmatprep.subr.bf16.mxu0 %v5031_v39 }
 0x329   :  { %3183 = vmatpush1.bf16.msra.mxu1 %v5028_v37 }
 0x32a   :  { %3325 = vmatpush1.bf16.msra.mxu0 %v5030_v46  ;;  %3184 = vmatprep.subr.bf16.mxu1 %v5037_v22 }
 0x32b   :  { %3326 = vmatprep.subr.bf16.mxu0 %v5039_v51 }
 0x32d   :  { %3185 = vmatpush1.bf16.msra.mxu1 %v5036_v42 }
 0x32e   :  { %3327 = vmatpush1.bf16.msra.mxu0 %v5038_v47  ;;  %5105 = vmatprep.subr.bf16.mxu1 %v5528_v4 }
 0x32f   :  { %5145 = vmatprep.subr.bf16.mxu0 %v5529_v43 }
 0x330   :  { %3187 = vmatmul.mubr.bf16.vlgmr.msra.gmra.mrb[32].mxu1 %v6683_v12 }
 0x331   :  { %3329 = vmatmul.mubr.bf16.vlgmr.msra.gmra.mrb[48].mxu0 %v6683_v12  ;;  %3196 = vmatprep.mubr.bf16.mxu1 %v6691_v32  ;;  %v5541_v12 = vld [vmem:[#allocation10 + $0xd8] sm:$0xff]  }
 0x332   :  { %3338 = vmatprep.mubr.bf16.mxu0 %v6691_v32  ;;  %5106 = vmatpush3.bf16.msra.mxu1 %v5530_v54  ;;  %v5542_v32 = vld [vmem:[#allocation10 + $0x18] sm:$0xff]  }
 0x333   :  { %5146 = vmatpush3.bf16.msra.mxu0 %v5531_v35  ;;  %5107 = vmatprep.subr.bf16.mxu1 %v5532_v48 }
 0x334   :  { %5147 = vmatprep.subr.bf16.mxu0 %v5533_v6 }
 0x336   :  { %5108 = vmatpush3.bf16.msra.mxu1 %v5534_v45 }
 0x337   :  { %5148 = vmatpush3.bf16.msra.mxu0 %v5535_v28  ;;  %5109 = vmatprep.subr.bf16.mxu1 %v5536_v24 }
 0x338   :  { %3197 = vmatmul.mubr.bf16.gmra.mrb[36].mxu1 %v6710_v13  ;;  %5149 = vmatprep.subr.bf16.mxu0 %v5537_v29 }
 0x339   :  { %3339 = vmatmul.mubr.bf16.gmra.mrb[52].mxu0 %v6710_v13  ;;  %3206 = vmatprep.mubr.bf16.mxu1 %v6720_v23  ;;  %v5549_v13 = vld [vmem:[#allocation10 + $0xe8] sm:$0xff]  }
 0x33a   :  { %3348 = vmatprep.mubr.bf16.mxu0 %v6720_v23  ;;  %5110 = vmatpush3.bf16.msra.mxu1 %v5538_v49  ;;  %v5550_v23 = vld [vmem:[#allocation10 + $0x28] sm:$0xff]  }
 0x33b   :  { %5150 = vmatpush3.bf16.msra.mxu0 %v5539_v59  ;;  %5111 = vmatprep.subr.bf16.mxu1 %v5540_v7 }
 0x33c   :  { %5151 = vmatprep.subr.bf16.mxu0 %v5541_v12 }
 0x33e   :  { %5112 = vmatpush3.bf16.msra.mxu1 %v5542_v32 }
 0x33f   :  { %5152 = vmatpush3.bf16.msra.mxu0 %v5543_v40  ;;  %5113 = vmatprep.subr.bf16.mxu1 %v5544_v14 }
 0x340   :  { %3207 = vmatmul.mubr.bf16.gmra.mrb[40].mxu1 %v6724_v9  ;;  %5153 = vmatprep.subr.bf16.mxu0 %v5545_v50 }
 0x341   :  { %3349 = vmatmul.mubr.bf16.gmra.mrb[56].mxu0 %v6724_v9  ;;  %3216 = vmatprep.mubr.bf16.mxu1 %v6759_v2  ;;  %v5557_v9 = vld [vmem:[#allocation10 + $0xf8] sm:$0xff]  }
 0x342   :  { %3358 = vmatprep.mubr.bf16.mxu0 %v6759_v2  ;;  %5114 = vmatpush3.bf16.msra.mxu1 %v5546_v55  ;;  %v5558_v2 = vld [vmem:[#allocation10 + $0x38] sm:$0xff]  }
 0x343   :  { %5154 = vmatpush3.bf16.msra.mxu0 %v5547_v0  ;;  %5115 = vmatprep.subr.bf16.mxu1 %v5548_v52 }
 0x344   :  { %5155 = vmatprep.subr.bf16.mxu0 %v5549_v13 }
 0x346   :  { %5116 = vmatpush3.bf16.msra.mxu1 %v5550_v23 }
 0x347   :  { %5156 = vmatpush3.bf16.msra.mxu0 %v5551_v44  ;;  %5117 = vmatprep.subr.bf16.mxu1 %v5552_v30 }
 0x348   :  { %3217 = vmatmul.mubr.bf16.gmra.mrb[44].mxu1 %v6766_v61  ;;  %5157 = vmatprep.subr.bf16.mxu0 %v5553_v25 }
 0x349   :  { %3359 = vmatmul.mubr.bf16.gmra.mrb[60].mxu0 %v6766_v61  ;;  %v6814_v61 = vrot.slane %v6805_v57, %v7634_v19 }
 0x34a   :  { %5118 = vmatpush3.bf16.msra.mxu1 %v5554_v41 }
 0x34b   :  { %5158 = vmatpush3.bf16.msra.mxu0 %v5555_v10  ;;  %5119 = vmatprep.subr.bf16.mxu1 %v5556_v11 }
 0x34c   :  { %5159 = vmatprep.subr.bf16.mxu0 %v5557_v9 }
 0x34e   :  { %5120 = vmatpush3.bf16.msra.mxu1 %v5558_v2 }
 0x34f   :  { %5160 = vmatpush3.bf16.msra.mxu0 %v5559_v36 }
 0x382   :  { %v2904_v63 = vpop.f32.mrb[16].mxu1  ;;  %v3046_v33 = vpop.f32.mrb[32].mxu0 }
 0x383   :  { %v5281_v60 = vadd.f32 %v2904_v63, %v6809_v27  ;;  %v5295_v20 = vadd.f32 %v3046_v33, %v6814_v61  ;;  %v2906_v62 = vpop.f32.mrb[17].mxu1  ;;  %v3048_v17 = vpop.f32.mrb[33].mxu0 }
 0x384   :  { %v6828_v1 = vadd.f32 %v2906_v62, %v6818_v8  ;;  %v6831_v38 = vadd.f32 %v3048_v17, %v6823_v15  ;;  %v2908_v3 = vpop.f32.mrb[18].mxu1  ;;  %v3050_v34 = vpop.f32.mrb[34].mxu0 }
 0x385   :  { %v3423_v58 = vmul.f32 0.044715, %v5281_v60  ;;  %v3425_v39 = vmul.f32 0.044715, %v5295_v20  ;;  %v5283_v21 = vadd.f32 %v2908_v3, %v6809_v27  ;;  %v5297_v5 = vadd.f32 %v3050_v34, %v6814_v61  ;;  %v2910_v18 = vpop.f32.mrb[19].mxu1  ;;  %v3052_v37 = vpop.f32.mrb[35].mxu0 }
 0x386   :  { %v3424_v16 = vmul.f32 0.044715, %v6828_v1  ;;  %v3426_v51 = vmul.f32 0.044715, %v6831_v38  ;;  %v6838_v42 = vadd.f32 %v2910_v18, %v6818_v8  ;;  %v6841_v4 = vadd.f32 %v3052_v37, %v6823_v15  ;;  %v5560_v34 = vld [vmem:[#allocation10 + $0x140] sm:$0xff]  }
 0x387   :  { %v3479_v46 = vmul.f32 %v5281_v60, %v3423_v58  ;;  %v3481_v22 = vmul.f32 %v5295_v20, %v3425_v39  ;;  %v3431_v47 = vmul.f32 0.044715, %v5283_v21  ;;  %v3433_v35 = vmul.f32 0.044715, %v5297_v5  ;;  %5185 = vmatprep.subr.bf16.mxu1 %v5560_v34 }
 0x388   :  { %v3480_v48 = vmul.f32 %v6828_v1, %v3424_v16  ;;  %v3432_v45 = vmul.f32 0.044715, %v6838_v42  ;;  %v3482_v59 = vmul.f32 %v6831_v38, %v3426_v51  ;;  %v3434_v14 = vmul.f32 0.044715, %v6841_v4 }
 0x389   :  { %v3535_v43 = vmul.f32 %v5281_v60, %v3479_v46  ;;  %v3537_v54 = vmul.f32 %v5295_v20, %v3481_v22  ;;  %v3487_v6 = vmul.f32 %v5283_v21, %v3431_v47  ;;  %v3489_v7 = vmul.f32 %v5297_v5, %v3433_v35 }
 0x38a   :  { %v2914_v28 = vpop.f32.mrb[20].mxu1  ;;  %v3056_v24 = vpop.f32.mrb[36].mxu0  ;;  %v6853_v13 = vmul.f32 0.5, %v5281_v60  ;;  %v6855_v23 = vmul.f32 0.5, %v5295_v20  ;;  %v3488_v30 = vmul.f32 %v6838_v42, %v3432_v45  ;;  %v6858_v11 = vmul.f32 0.5, %v5283_v21 }
 0x38b   :  { %v3591_v29 = vadd.f32 %v5281_v60, %v3535_v43  ;;  %v3593_v49 = vadd.f32 %v5295_v20, %v3537_v54  ;;  %v2916_v12 = vpop.f32.mrb[21].mxu1  ;;  %v3058_v32 = vpop.f32.mrb[37].mxu0  ;;  %v3543_v40 = vmul.f32 %v5283_v21, %v3487_v6  ;;  %v6848_v50 = vadd.f32 %v2914_v28, %v6809_v27  ;;  %v6901_v28 = vld [vmem:[#allocation10 + $0x1c0] sm:$0xff]  }
 0x38c   :  { %v6851_v55 = vadd.f32 %v3056_v24, %v6814_v61  ;;  %v2918_v0 = vpop.f32.mrb[22].mxu1  ;;  %v3060_v52 = vpop.f32.mrb[38].mxu0  ;;  %v3545_v44 = vmul.f32 %v5297_v5, %v3489_v7  ;;  %v6861_v36 = vmul.f32 0.5, %v5297_v5  ;;  %v6865_v31 = vadd.f32 %v2916_v12, %v6818_v8  ;;  %7637 = vst [vmem:[#allocation26_spill] sm:$0xff] %v6901_v28  ;;  %5225 = vmatprep.subr.bf16.mxu0 %v6901_v28 }
 0x38d   :  { %v2920_v25 = vpop.f32.mrb[23].mxu1  ;;  %v3062_v41 = vpop.f32.mrb[39].mxu0  ;;  %v3647_v10 = vmul.f32 0.7978846, %v3591_v29  ;;  %v3599_v9 = vadd.f32 %v5283_v21, %v3543_v40  ;;  %v3439_v2 = vmul.f32 0.044715, %v6848_v50  ;;  %v6868_v63 = vmul.f32 %v6828_v1, %v3480_v48 }
 0x38e   :  { %v3601_v53 = vadd.f32 %v5297_v5, %v3545_v44  ;;  %v3441_v19 = vmul.f32 0.044715, %v6851_v55  ;;  %v3649_v56 = vmul.f32 0.7978846, %v3593_v49  ;;  %v6871_v33 = vmul.f32 %v6831_v38, %v3482_v59 }
 0x38f   :  { %v3490_v60 = vmul.f32 %v6841_v4, %v3434_v14  ;;  %v6875_v20 = vmul.f32 %v6838_v42, %v3488_v30  ;;  %v3440_v62 = vmul.f32 0.044715, %v6865_v31  ;;  %v6879_v17 = vadd.f32 %v3058_v32, %v6823_v15 }
 0x390   :  { %v6882_v3 = vadd.f32 %v2918_v0, %v6809_v27  ;;  %5676 = vtanh.f32 %v3647_v10  ;;  %v3655_v58 = vmul.f32 0.7978846, %v3599_v9  ;;  %v3495_v39 = vmul.f32 %v6848_v50, %v3439_v2 }
 0x391   :  { %v6886_v16 = vadd.f32 %v3060_v52, %v6814_v61  ;;  %v3657_v18 = vmul.f32 0.7978846, %v3601_v53  ;;  %v3497_v37 = vmul.f32 %v6851_v55, %v3441_v19  ;;  %v3496_v46 = vmul.f32 %v6865_v31, %v3440_v62 }
 0x392   :  { %v2924_v21 = vpop.f32.mrb[24].mxu1  ;;  %v3066_v5 = vpop.f32.mrb[40].mxu0  ;;  %v3442_v22 = vmul.f32 0.044715, %v6879_v17  ;;  %v3447_v43 = vmul.f32 0.044715, %v6882_v3  ;;  %v6893_v54 = vadd.f32 %v2920_v25, %v6818_v8  ;;  %v6896_v35 = vadd.f32 %v3062_v41, %v6823_v15 }
 0x393   :  { %v2926_v51 = vpop.f32.mrb[25].mxu1  ;;  %v3068_v47 = vpop.f32.mrb[41].mxu0  ;;  %v6899_v48 = vadd.f32 %v2924_v21, %v6809_v27  ;;  %5678 = vtanh.f32 %v3649_v56  ;;  %v6904_v24 = vmul.f32 %v6841_v4, %v3490_v60  ;;  %v3449_v29 = vmul.f32 0.044715, %v6886_v16 }
 0x394   :  { %v2928_v6 = vpop.f32.mrb[26].mxu1  ;;  %v3070_v45 = vpop.f32.mrb[42].mxu0  ;;  %v6908_v49 = vadd.f32 %v3066_v5, %v6814_v61  ;;  %5680 = vtanh.f32 %v3655_v58  ;;  %v3498_v12 = vmul.f32 %v6879_v17, %v3442_v22  ;;  %v3448_v32 = vmul.f32 0.044715, %v6893_v54 }
 0x395   :  { %v2930_v59 = vpop.f32.mrb[27].mxu1  ;;  %v3072_v7 = vpop.f32.mrb[43].mxu0  ;;  %v3450_v40 = vmul.f32 0.044715, %v6896_v35  ;;  %v6915_v14 = vmul.f32 %v6848_v50, %v3495_v39  ;;  %v3455_v0 = vmul.f32 0.044715, %v6899_v48  ;;  %v6920_v44 = vadd.f32 %v2926_v51, %v6818_v8 }
 0x396   :  { %v3457_v52 = vmul.f32 0.044715, %v6908_v49  ;;  %5682 = vtanh.f32 %v3657_v18  ;;  %v6923_v30 = vmul.f32 %v6851_v55, %v3497_v37  ;;  %v6926_v25 = vmul.f32 %v6865_v31, %v3496_v46 }
 0x397   :  { %v3503_v41 = vmul.f32 %v6882_v3, %v3447_v43  ;;  %v3505_v10 = vmul.f32 %v6886_v16, %v3449_v29  ;;  %v3456_v9 = vmul.f32 0.044715, %v6920_v44  ;;  %v6932_v2 = vadd.f32 %v3068_v47, %v6823_v15 }
 0x398   :  { %v6935_v53 = vadd.f32 %v2928_v6, %v6809_v27  ;;  %v6938_v19 = vmul.f32 %v6879_v17, %v3498_v12  ;;  %v3504_v56 = vmul.f32 %v6893_v54, %v3448_v32  ;;  %v3506_v60 = vmul.f32 %v6896_v35, %v3450_v40 }
 0x399   :  { %v6943_v62 = vadd.f32 %v3070_v45, %v6814_v61  ;;  %v3511_v39 = vmul.f32 %v6899_v48, %v3455_v0  ;;  %v3513_v21 = vmul.f32 %v6908_v49, %v3457_v52  ;;  %v3458_v5 = vmul.f32 0.044715, %v6932_v2 }
 0x39a   :  { %v2934_v34 = vpop.f32.mrb[28].mxu1  ;;  %v3076_v58 = vpop.f32.mrb[44].mxu0  ;;  %v3463_v18 = vmul.f32 0.044715, %v6935_v53  ;;  %v6951_v47 = vadd.f32 %v2930_v59, %v6818_v8  ;;  %v6954_v43 = vadd.f32 %v3072_v7, %v6823_v15  ;;  %v3512_v12 = vmul.f32 %v6920_v44, %v3456_v9 }
 0x39b   :  { %v2936_v37 = vpop.f32.mrb[29].mxu1  ;;  %v3078_v46 = vpop.f32.mrb[45].mxu0  ;;  %v3465_v51 = vmul.f32 0.044715, %v6943_v62  ;;  %v6957_v6 = vadd.f32 %v2934_v34, %v6809_v27  ;;  %v3514_v32 = vmul.f32 %v6932_v2, %v3458_v5  ;;  %v6963_v0 = vadd.f32 %v3076_v58, %v6814_v61 }
 0x39c   :  { %v5677_v22 = vpop.eup %5676  ;;  %v2938_v45 = vpop.f32.mrb[30].mxu1  ;;  %v3519_v40 = vmul.f32 %v6935_v53, %v3463_v18  ;;  %v3464_v7 = vmul.f32 0.044715, %v6951_v47  ;;  %v3466_v27 = vmul.f32 0.044715, %v6954_v43  ;;  %v3559_v9 = vmul.f32 %v6882_v3, %v3503_v41 }
 0x39d   :  { %7638 = vst [vmem:[#allocation32_spill] sm:$0xff] %v6957_v6  ;;  %v3080_v29 = vpop.f32.mrb[46].mxu0  ;;  %7639 = vst [vmem:[#allocation23_spill] sm:$0xff] %v6963_v0  ;;  %v2939_v52 = vpop.f32.mrb[31].mxu1  ;;  %v3521_v57 = vmul.f32 %v6943_v62, %v3465_v51  ;;  %v3471_v34 = vmul.f32 0.044715, %v6957_v6  ;;  %v6971_v5 = vmul.f32 %v6886_v16, %v3505_v10  ;;  %v6975_v61 = vadd.f32 %v2936_v37, %v6818_v8 }
 0x39e   :  { %v3081_v59 = vpop.f32.mrb[47].mxu0  ;;  %v5679_v45 = vpop.eup %5678  ;;  %v3473_v18 = vmul.f32 0.044715, %v6963_v0  ;;  %v3560_v51 = vmul.f32 %v6893_v54, %v3504_v56  ;;  %v3562_v29 = vmul.f32 %v6896_v35, %v3506_v60  ;;  %v6980_v52 = vmul.f32 %v6899_v48, %v3511_v39 }
 0x39f   :  { %v5681_v58 = vpop.eup %5680  ;;  %v6983_v59 = vmul.f32 %v6908_v49, %v3513_v21  ;;  %v6986_v41 = vmul.f32 %v6920_v44, %v3512_v12  ;;  %v6989_v10 = vmul.f32 %v6932_v2, %v3514_v32  ;;  %v6992_v8 = vmul.f32 %v6935_v53, %v3519_v40 }
 0x3a0   :  { %v3520_v37 = vmul.f32 %v6951_v47, %v3464_v7  ;;  %v5683_v56 = vpop.eup %5682  ;;  %v6996_v60 = vmul.f32 %v6943_v62, %v3521_v57  ;;  %v3522_v39 = vmul.f32 %v6954_v43, %v3466_v27  ;;  %v7000_v21 = vmul.f32 %v6957_v6, %v3471_v34 }
 0x3a1   :  { %v3592_v12 = vadd.f32 %v6828_v1, %v6868_v63  ;;  %v7005_v32 = vmul.f32 %v6963_v0, %v3473_v18  ;;  %v3472_v40 = vmul.f32 0.044715, %v6975_v61  ;;  %v7009_v26 = vadd.f32 %v3078_v46, %v6823_v15 }
 0x3a2   :  { %v3600_v57 = vadd.f32 %v6838_v42, %v6875_v20  ;;  %v7014_v7 = vmul.f32 0.5, %v6828_v1  ;;  %v3594_v34 = vadd.f32 %v6831_v38, %v6871_v33  ;;  %v3602_v63 = vadd.f32 %v6841_v4, %v6904_v24 }
 0x3a3   :  { %7640 = vst [vmem:[#allocation25_spill] sm:$0xff] %v7005_v32  ;;  %v3648_v27 = vmul.f32 0.7978846, %v3592_v12  ;;  %v3576_v18 = vmul.f32 %v6951_v47, %v3520_v37  ;;  %v3759_v0 = vadd.f32 1.0, %v5677_v22  ;;  %v3767_v32 = vadd.f32 1.0, %v5681_v58 }
 0x3a4   :  { %v3656_v28 = vmul.f32 0.7978846, %v3600_v57  ;;  %v3650_v15 = vmul.f32 0.7978846, %v3594_v34  ;;  %v3658_v46 = vmul.f32 0.7978846, %v3602_v63  ;;  %v3578_v12 = vmul.f32 %v6954_v43, %v3522_v39 }
 0x3a5   :  { %5684 = vtanh.f32 %v3648_v27  ;;  %v3761_v6 = vadd.f32 1.0, %v5679_v45  ;;  %v7022_v1 = vmul.f32 %v3759_v0, %v6853_v13  ;;  %v7025_v20 = vmul.f32 %v3767_v32, %v6858_v11 }
 0x3a6   :  { %5686 = vtanh.f32 %v3656_v28  ;;  %v3769_v33 = vadd.f32 1.0, %v5683_v56  ;;  %v3474_v24 = vmul.f32 0.044715, %v7009_v26  ;;  %v3608_v13 = vadd.f32 %v6865_v31, %v6926_v25 }
 0x3a7   :  { %5688 = vtanh.f32 %v3650_v15  ;;  %v7030_v22 = vmul.f32 %v3761_v6, %v6855_v23  ;;  %v3871_v45 = vpack.c.bf16 %v7025_v20, %v7022_v1  ;;  %v7040_v11 = vmul.f32 %v6975_v61, %v3472_v40 }
 0x3a8   :  { %5690 = vtanh.f32 %v3658_v46  ;;  %v7035_v28 = vmul.f32 %v3769_v33, %v6861_v36  ;;  %v3376_v0 = vmul.f32 0.5, %v6838_v42  ;;  %v3616_v58 = vadd.f32 %v6893_v54, %v3560_v51 }
 0x3a9   :  { %v3610_v23 = vadd.f32 %v6879_v17, %v6938_v19  ;;  %v3370_v6 = vmul.f32 0.5, %v6831_v38  ;;  %v3664_v36 = vmul.f32 0.7978846, %v3608_v13  ;;  %v3618_v56 = vadd.f32 %v6896_v35, %v3562_v29 }
 0x3aa   :  { %v3873_v37 = vpack.c.bf16 %v7035_v28, %v7030_v22  ;;  %v3378_v25 = vmul.f32 0.5, %v6841_v4  ;;  %v3672_v39 = vmul.f32 0.7978846, %v3616_v58  ;;  %v3607_v42 = vadd.f32 %v6848_v50, %v6915_v14  ;;  %v7117_v22 = vld [vmem:[#allocation10 + $0x188] sm:$0xff]  }
 0x3ab   :  { %v3666_v32 = vmul.f32 0.7978846, %v3610_v23  ;;  %v7054_v51 = vmul.f32 %v7009_v26, %v3474_v24  ;;  %5692 = vtanh.f32 %v3664_v36  ;;  %v3674_v19 = vmul.f32 0.7978846, %v3618_v56  ;;  %7642 = vst [vmem:[#allocation24_spill] sm:$0xff] %v7117_v22 }
 0x3ac   :  { %v3615_v38 = vadd.f32 %v6882_v3, %v3559_v9  ;;  %v7058_v40 = vmul.f32 0.5, %v6865_v31  ;;  %5694 = vtanh.f32 %v3672_v39  ;;  %v3663_v57 = vmul.f32 0.7978846, %v3607_v42 }
 0x3ad   :  { %v3609_v4 = vadd.f32 %v6851_v55, %v6923_v30  ;;  %v7063_v29 = vmul.f32 0.5, %v6893_v54  ;;  %5696 = vtanh.f32 %v3666_v32  ;;  %v3617_v27 = vadd.f32 %v6886_v16, %v6971_v5 }
 0x3ae   :  { %v3671_v14 = vmul.f32 0.7978846, %v3615_v38  ;;  %v7068_v63 = vmul.f32 0.5, %v6879_v17  ;;  %5698 = vtanh.f32 %v3674_v19  ;;  %v3624_v9 = vadd.f32 %v6920_v44, %v6986_v41  ;;  %v5561_v38 = vld [vmem:[#allocation10 + $0x100] sm:$0xff]  }
 0x3af   :  { %v5685_v34 = vpop.eup %5684  ;;  %v3665_v31 = vmul.f32 0.7978846, %v3609_v4  ;;  %5700 = vtanh.f32 %v3663_v57  ;;  %v3673_v30 = vmul.f32 0.7978846, %v3617_v27  ;;  %v3632_v54 = vadd.f32 %v6951_v47, %v3576_v18 }
 0x3b0   :  { %v5687_v15 = vpop.eup %5686  ;;  %v3760_v46 = vadd.f32 1.0, %v5685_v34  ;;  %v7074_v13 = vmul.f32 0.5, %v6896_v35  ;;  %5702 = vtanh.f32 %v3671_v14  ;;  %v3680_v5 = vmul.f32 0.7978846, %v3624_v9  ;;  %v5564_v14 = vld [vmem:[#allocation10 + $0x148] sm:$0xff]  }
 0x3b1   :  { %v5689_v33 = vpop.eup %5688  ;;  %v3768_v24 = vadd.f32 1.0, %v5687_v15  ;;  %v7077_v23 = vmul.f32 0.5, %v6848_v50  ;;  %5704 = vtanh.f32 %v3665_v31  ;;  %v3688_v41 = vmul.f32 0.7978846, %v3632_v54  ;;  %v7104_v15 = vld [vmem:[#allocation10 + $0x1c8] sm:$0xff]  }
 0x3b2   :  { %v5691_v17 = vpop.eup %5690  ;;  %v3762_v58 = vadd.f32 1.0, %v5689_v33  ;;  %v3816_v36 = vmul.f32 %v3760_v46, %v7014_v7  ;;  %5706 = vtanh.f32 %v3673_v30  ;;  %v7081_v18 = vmul.f32 0.5, %v6882_v3  ;;  %7641 = vst [vmem:[#allocation22_spill] sm:$0xff] %v7104_v15  ;;  %v5565_v54 = vld [vmem:[#allocation10 + $0x108] sm:$0xff]  }
 0x3b3   :  { %v3824_v56 = vmul.f32 %v3768_v24, %v3376_v0  ;;  %v3770_v39 = vadd.f32 1.0, %v5691_v17  ;;  %5708 = vtanh.f32 %v3680_v5  ;;  %v3626_v35 = vadd.f32 %v6932_v2, %v6989_v10 }
 0x3b4   :  { %v3634_v32 = vadd.f32 %v6954_v43, %v3578_v12  ;;  %v3818_v19 = vmul.f32 %v3762_v58, %v3370_v6  ;;  %5710 = vtanh.f32 %v3688_v41  ;;  %v7087_v7 = vmul.f32 0.5, %v6851_v55  ;;  %v7121_v41 = vld [vmem:[#allocation10 + $0x1d0] sm:$0xff]  }
 0x3b5   :  { %v3872_v42 = vpack.c.bf16 %v3824_v56, %v3816_v36  ;;  %v3826_v50 = vmul.f32 %v3770_v39, %v3378_v25  ;;  %v5693_v57 = vpop.eup %5692  ;;  %v3682_v0 = vmul.f32 0.7978846, %v3626_v35  ;;  %v3623_v3 = vadd.f32 %v6899_v48, %v6980_v52  ;;  %v7096_v25 = vld [vmem:[#allocation10 + $0x180] sm:$0xff]   ;;  %7643 = vst [vmem:[#allocation34_spill] sm:$0xff] %v7121_v41  ;;  %v5569_v35 = vld [vmem:[#allocation10 + $0x110] sm:$0xff]  }
 0x3b6   :  { %v3690_v4 = vmul.f32 0.7978846, %v3634_v32  ;;  %v5695_v27 = vpop.eup %5694  ;;  %v3776_v34 = vadd.f32 1.0, %v5693_v57  ;;  %v7092_v12 = vmul.f32 0.5, %v6886_v16  ;;  %v3631_v6 = vadd.f32 %v6935_v53, %v6992_v8 }
 0x3b7   :  { %4454 = vmatprep.mubr.bf16.mxu1 %v3872_v42  ;;  %v3874_v10 = vpack.c.bf16 %v3826_v50, %v3818_v19  ;;  %v5697_v55 = vpop.eup %5696  ;;  %v3784_v31 = vadd.f32 1.0, %v5695_v27  ;;  %v7102_v52 = vmul.f32 0.5, %v6920_v44  ;;  %5712 = vtanh.f32 %v3682_v0  ;;  %v5572_v50 = vld [vmem:[#allocation10 + $0x158] sm:$0xff]  }
 0x3b8   :  { %4455 = vmatmul.mubr.bf16.vlgmr.msra.gmra.mrb[48].mxu1 %v3871_v45  ;;  %v3679_v9 = vmul.f32 0.7978846, %v3623_v3  ;;  %v5699_v16 = vpop.eup %5698  ;;  %v3832_v46 = vmul.f32 %v3776_v34, %v7058_v40  ;;  %v3778_v8 = vadd.f32 1.0, %v5697_v55  ;;  %5714 = vtanh.f32 %v3690_v4  ;;  %v5568_v45 = vld [vmem:[#allocation10 + $0x150] sm:$0xff]   ;;  %v7135_v27 = vld [vmem:[#allocation10 + $0x1d8] sm:$0xff]  }
 0x3b9   :  { %4518 = vmatprep.mubr.bf16.mxu0 %v3874_v10  ;;  %v3687_v30 = vmul.f32 0.7978846, %v3631_v6  ;;  %5186 = vmatpush3.bf16.msra.mxu1 %v5561_v38  ;;  %v5701_v33 = vpop.eup %5700  ;;  %v3840_v44 = vmul.f32 %v3784_v31, %v7063_v29  ;;  %v3786_v1 = vadd.f32 1.0, %v5699_v16  ;;  %v3625_v20 = vadd.f32 %v6908_v49, %v6983_v59  ;;  %7645 = vst [vmem:[#allocation28_spill] sm:$0xff] %v7135_v27  ;;  %v5573_v6 = vld [vmem:[#allocation10 + $0x118] sm:$0xff]  }
 0x3ba   :  { %4519 = vmatmul.mubr.bf16.vlgmr.msra.gmra.mrb[64].mxu0 %v3873_v37  ;;  %5716 = vtanh.f32 %v3679_v9  ;;  %5187 = vmatprep.subr.bf16.mxu1 %v5564_v14  ;;  %v5703_v40 = vpop.eup %5702  ;;  %v3834_v24 = vmul.f32 %v3778_v8, %v7068_v63  ;;  %v3775_v5 = vadd.f32 1.0, %v5701_v33  ;;  %v3633_v17 = vadd.f32 %v6943_v62, %v6996_v60  ;;  %v7646_v9 = vld [vmem:[#allocation32_spill] sm:$0xff] }
 0x3bb   :  { %5718 = vtanh.f32 %v3687_v30  ;;  %5226 = vmatpush3.bf16.msra.mxu0 %v7096_v25  ;;  %v5705_v28 = vpop.eup %5704  ;;  %v3880_v37 = vpack.c.bf16 %v3840_v44, %v3832_v46  ;;  %v3842_v29 = vmul.f32 %v3786_v1, %v7074_v13  ;;  %v3783_v58 = vadd.f32 1.0, %v5703_v40  ;;  %v7149_v44 = vld [vmem:[#allocation10 + $0x198] sm:$0xff]   ;;  %v7154_v40 = vld [vmem:[#allocation10 + $0x1e0] sm:$0xff]  }
 0x3bc   :  { %v3681_v59 = vmul.f32 0.7978846, %v3625_v20  ;;  %5227 = vmatprep.subr.bf16.mxu0 %v7104_v15  ;;  %v5707_v63 = vpop.eup %5706  ;;  %v3831_v36 = vmul.f32 %v3775_v5, %v7077_v23  ;;  %v3777_v56 = vadd.f32 1.0, %v5705_v28  ;;  %v3408_v60 = vmul.f32 0.5, %v6951_v47  ;;  %v7130_v23 = vld [vmem:[#allocation10 + $0x190] sm:$0xff]   ;;  %7649 = vst [vmem:[#allocation36_spill] sm:$0xff] %v7149_v44 }
 0x3bd   :  { %v3689_v39 = vmul.f32 0.7978846, %v3633_v17  ;;  %5188 = vmatpush3.bf16.msra.mxu1 %v5565_v54  ;;  %v5709_v32 = vpop.eup %5708  ;;  %4462 = vmatprep.mubr.bf16.mxu1 %v3880_v37  ;;  %v3882_v42 = vpack.c.bf16 %v3842_v29, %v3834_v24  ;;  %v3839_v13 = vmul.f32 %v3783_v58, %v7081_v18  ;;  %v3785_v19 = vadd.f32 1.0, %v5707_v63  ;;  %7644 = vst [vmem:[#allocation27_spill] sm:$0xff] %v7130_v23  ;;  %v7647_v54 = vld [vmem:[#allocation25_spill] sm:$0xff] }
 0x3be   :  { %5720 = vtanh.f32 %v3681_v59  ;;  %5189 = vmatprep.subr.bf16.mxu1 %v5568_v45  ;;  %v5711_v38 = vpop.eup %5710  ;;  %v3792_v57 = vadd.f32 1.0, %v5709_v32  ;;  %v3402_v0 = vmul.f32 0.5, %v6932_v2  ;;  %v3584_v47 = vmul.f32 %v6975_v61, %v7040_v11  ;;  %7650 = vst [vmem:[#allocation35_spill] sm:$0xff] %v7154_v40  ;;  %v5577_v37 = vld [vmem:[#allocation10 + $0x120] sm:$0xff]  }
 0x3bf   :  { %5722 = vtanh.f32 %v3689_v39  ;;  %5228 = vmatpush3.bf16.msra.mxu0 %v7117_v22  ;;  %4526 = vmatprep.mubr.bf16.mxu0 %v3882_v42  ;;  %v3879_v4 = vpack.c.bf16 %v3839_v13, %v3831_v36  ;;  %v3833_v18 = vmul.f32 %v3777_v56, %v7087_v7  ;;  %v3841_v3 = vmul.f32 %v3785_v19, %v7092_v12  ;;  %v7158_v56 = vld [vmem:[#allocation10 + $0x1a0] sm:$0xff]   ;;  %v7161_v42 = vld [vmem:[#allocation10 + $0x1e8] sm:$0xff]  }
 0x3c0   :  { %v3800_v14 = vadd.f32 1.0, %v5711_v38  ;;  %5229 = vmatprep.subr.bf16.mxu0 %v7121_v41  ;;  %v3848_v2 = vmul.f32 %v3792_v57, %v7102_v52  ;;  %v3410_v10 = vmul.f32 0.5, %v6954_v43  ;;  %v3640_v11 = vadd.f32 %v6975_v61, %v3584_v47  ;;  %v5576_v52 = vld [vmem:[#allocation10 + $0x160] sm:$0xff]   ;;  %7651 = vst [vmem:[#allocation31_spill] sm:$0xff] %v7158_v56  ;;  %7652 = vst [vmem:[#allocation33_spill] sm:$0xff] %v7161_v42  ;;  %v5581_v38 = vld [vmem:[#allocation10 + $0x128] sm:$0xff]  }
 0x3c1   :  { %v3586_v34 = vmul.f32 %v7009_v26, %v7054_v51  ;;  %5190 = vmatpush3.bf16.msra.mxu1 %v5569_v35  ;;  %v5713_v55 = vpop.eup %5712  ;;  %v3881_v7 = vpack.c.bf16 %v3841_v3, %v3833_v18  ;;  %v3399_v31 = vmul.f32 0.5, %v6899_v48  ;;  %v3583_v16 = vmul.f32 %v7646_v9, %v7000_v21  ;;  %v7648_v51 = vld [vmem:[#allocation23_spill] sm:$0xff]  ;;  %v7166_v18 = vld [vmem:[#allocation10 + $0x1a8] sm:$0xff]  }
 0x3c2   :  { %4463 = vmatmul.mubr.bf16.gmra.mrb[52].mxu1 %v3879_v4  ;;  %v3856_v12 = vmul.f32 %v3800_v14, %v3408_v60  ;;  %5191 = vmatprep.subr.bf16.mxu1 %v5572_v50  ;;  %v5715_v46 = vpop.eup %5714  ;;  %v3794_v43 = vadd.f32 1.0, %v5713_v55  ;;  %v3696_v8 = vmul.f32 0.7978846, %v3640_v11  ;;  %v3585_v33 = vmul.f32 %v7648_v51, %v7647_v54  ;;  %v5584_v4 = vld [vmem:[#allocation10 + $0x170] sm:$0xff]   ;;  %7653 = vst [vmem:[#allocation20_spill] sm:$0xff] %v7166_v18 }
 0x3c3   :  { %v3642_v30 = vadd.f32 %v7009_v26, %v3586_v34  ;;  %5230 = vmatpush3.bf16.msra.mxu0 %v7130_v23  ;;  %v3802_v20 = vadd.f32 1.0, %v5715_v46  ;;  %v3407_v21 = vmul.f32 0.5, %v6935_v53  ;;  %v3639_v45 = vadd.f32 %v7646_v9, %v3583_v16  ;;  %v5580_v53 = vld [vmem:[#allocation10 + $0x168] sm:$0xff]   ;;  %v7172_v34 = vld [vmem:[#allocation10 + $0x1b0] sm:$0xff]  }
 0x3c4   :  { %v5717_v1 = vpop.eup %5716  ;;  %4527 = vmatmul.mubr.bf16.gmra.mrb[68].mxu0 %v3881_v7  ;;  %v3888_v48 = vpack.c.bf16 %v3856_v12, %v3848_v2  ;;  %5231 = vmatprep.subr.bf16.mxu0 %v7135_v27  ;;  %v3850_v5 = vmul.f32 %v3794_v43, %v3402_v0  ;;  %5724 = vtanh.f32 %v3696_v8  ;;  %v3641_v63 = vadd.f32 %v7648_v51, %v3585_v33  ;;  %v5585_v2 = vld [vmem:[#allocation10 + $0x130] sm:$0xff]   ;;  %v7176_v7 = vld [vmem:[#allocation10 + $0x1f8] sm:$0xff]  }
 0x3c5   :  { %v5719_v24 = vpop.eup %5718  ;;  %v3791_v17 = vadd.f32 1.0, %v5717_v1  ;;  %v3698_v28 = vmul.f32 0.7978846, %v3642_v30  ;;  %5192 = vmatpush3.bf16.msra.mxu1 %v5573_v6  ;;  %v3858_v29 = vmul.f32 %v3802_v20, %v3410_v10  ;;  %v3695_v59 = vmul.f32 0.7978846, %v3639_v45  ;;  %7655 = vst [vmem:[#allocation19_spill] sm:$0xff] %v7172_v34 }
 0x3c6   :  { %4470 = vmatprep.mubr.bf16.mxu1 %v3888_v48  ;;  %v3799_v58 = vadd.f32 1.0, %v5719_v24  ;;  %5193 = vmatprep.subr.bf16.mxu1 %v5576_v52  ;;  %v3697_v32 = vmul.f32 0.7978846, %v3641_v63  ;;  %v3401_v19 = vmul.f32 0.5, %v6908_v49  ;;  %v3409_v0 = vmul.f32 0.5, %v6943_v62  ;;  %v7169_v49 = vld [vmem:[#allocation10 + $0x1f0] sm:$0xff]  }
 0x3c7   :  { %v3847_v36 = vmul.f32 %v3791_v17, %v3399_v31  ;;  %5726 = vtanh.f32 %v3698_v28  ;;  %5232 = vmatpush3.bf16.msra.mxu0 %v7149_v44  ;;  %v3890_v39 = vpack.c.bf16 %v3858_v29, %v3850_v5  ;;  %7654 = vst [vmem:[#allocation30_spill] sm:$0xff] %v7169_v49  ;;  %v5588_v62 = vld [vmem:[#allocation10 + $0x178] sm:$0xff]   ;;  %v3416_v6 = vmul.f32 0.5, %v6975_v61  ;;  %7656 = vst [vmem:[#allocation29_spill] sm:$0xff] %v7176_v7  ;;  %v7658_v45 = vld [vmem:[#allocation26_spill] sm:$0xff] }
 0x3c8   :  { %v5721_v60 = vpop.eup %5720  ;;  %v3855_v35 = vmul.f32 %v3799_v58, %v3407_v21  ;;  %5728 = vtanh.f32 %v3695_v59  ;;  %5233 = vmatprep.subr.bf16.mxu0 %v7154_v40  ;;  %v5589_v31 = vld [vmem:[#allocation10 + $0x138] sm:$0xff]   ;;  %v3418_v46 = vmul.f32 0.5, %v7009_v26  ;;  %v3415_v8 = vmul.f32 0.5, %v7646_v9  ;;  %v7660_v29 = vld [vmem:[#allocation21_spill] sm:$0xff] }
 0x3c9   :  { %v5723_v13 = vpop.eup %5722  ;;  %v3793_v50 = vadd.f32 1.0, %v5721_v60  ;;  %5194 = vmatpush3.bf16.msra.mxu1 %v5577_v37  ;;  %4534 = vmatprep.mubr.bf16.mxu0 %v3890_v39  ;;  %5730 = vtanh.f32 %v3697_v32  ;;  %v7181_v61 = vld [vmem:[#allocation10 + $0x1b8] sm:$0xff]   ;;  %v3417_v20 = vmul.f32 0.5, %v7648_v51 }
 0x3ca   :  { %v3887_v57 = vpack.c.bf16 %v3855_v35, %v3847_v36  ;;  %v3801_v47 = vadd.f32 1.0, %v5723_v13  ;;  %5195 = vmatprep.subr.bf16.mxu1 %v5580_v53  ;;  %7657 = vst [vmem:[#allocation17_spill] sm:$0xff] %v7181_v61  ;;  %v7659_v17 = vld [vmem:[#allocation16_spill] sm:$0xff] }
 0x3cb   :  { %5234 = vmatpush3.bf16.msra.mxu0 %v7158_v56  ;;  %v3849_v3 = vmul.f32 %v3793_v50, %v3401_v19  ;;  %v1497_v28 = vsub.s32 4, %v7659_v17  ;;  %v1505_v37 = vsub.s32 6, %v7659_v17  ;;  %v1501_v51 = vsub.s32 5, %v7659_v17 }
 0x3cc   :  { %4471 = vmatmul.mubr.bf16.gmra.mrb[56].mxu1 %v3887_v57  ;;  %v3857_v14 = vmul.f32 %v3801_v47, %v3409_v0  ;;  %5235 = vmatprep.subr.bf16.mxu0 %v7161_v42  ;;  %v1509_v63 = vsub.s32 7, %v7659_v17 }
 0x3cd   :  { %5196 = vmatpush3.bf16.msra.mxu1 %v5581_v38  ;;  %v7191_v58 = vrot.slane %v7660_v29, %v1497_v28  ;;  %v7194_v59 = vrot.slane %v7660_v29, %v1505_v37  ;;  %v7198_v53 = vrot.slane %v7660_v29, %v1501_v51 }
 0x3ce   :  { %v3889_v10 = vpack.c.bf16 %v3857_v14, %v3849_v3  ;;  %5197 = vmatprep.subr.bf16.mxu1 %v5584_v4  ;;  %v5725_v11 = vpop.eup %5724  ;;  %v7203_v13 = vrot.slane %v7660_v29, %v1509_v63 }
 0x3cf   :  { %5236 = vmatpush3.bf16.msra.mxu0 %v7166_v18  ;;  %v3808_v55 = vadd.f32 1.0, %v5725_v11 }
 0x3d0   :  { %4535 = vmatmul.mubr.bf16.gmra.mrb[72].mxu0 %v3889_v10  ;;  %5237 = vmatprep.subr.bf16.mxu0 %v7169_v49 }
 0x3d1   :  { %v5727_v12 = vpop.eup %5726  ;;  %5198 = vmatpush3.bf16.msra.mxu1 %v5585_v2  ;;  %v3864_v52 = vmul.f32 %v3808_v55, %v3416_v6 }
 0x3d2   :  { %v5729_v16 = vpop.eup %5728  ;;  %v3810_v43 = vadd.f32 1.0, %v5727_v12  ;;  %5199 = vmatprep.subr.bf16.mxu1 %v5588_v62 }
 0x3d3   :  { %v3807_v30 = vadd.f32 1.0, %v5729_v16  ;;  %5238 = vmatpush3.bf16.msra.mxu0 %v7172_v34  ;;  %v5731_v54 = vpop.eup %5730  ;;  %v3896_v33 = vpack.c.bf16 %v3864_v52, %v3864_v52 }
 0x3d4   :  { %v3866_v1 = vmul.f32 %v3810_v43, %v3418_v46  ;;  %5239 = vmatprep.subr.bf16.mxu0 %v7176_v7  ;;  %v3809_v21 = vadd.f32 1.0, %v5731_v54 }
 0x3d5   :  { %v3863_v48 = vmul.f32 %v3807_v30, %v3415_v8  ;;  %5200 = vmatpush3.bf16.msra.mxu1 %v5589_v31  ;;  %4478 = vmatprep.mubr.bf16.mxu1 %v3896_v33 }
 0x3d6   :  { %v3898_v26 = vpack.c.bf16 %v3866_v1, %v3866_v1  ;;  %5265 = vmatprep.subr.bf16.mxu1 %v7658_v45  ;;  %v3865_v24 = vmul.f32 %v3809_v21, %v3417_v20 }
 0x3d7   :  { %v3895_v9 = vpack.c.bf16 %v3863_v48, %v3863_v48  ;;  %5240 = vmatpush3.bf16.msra.mxu0 %v7181_v61 }
 0x3d8   :  { %4542 = vmatprep.mubr.bf16.mxu0 %v3898_v26  ;;  %v3897_v5 = vpack.c.bf16 %v3865_v24, %v3865_v24 }
 0x3d9   :  { %4479 = vmatmul.mubr.bf16.gmra.mrb[60].mxu1 %v3895_v9 }
 0x3da   :  { %4543 = vmatmul.mubr.bf16.gmra.mrb[76].mxu0 %v3897_v5 }
 0x403   :  { %v3188_v36 = vpop.f32.mrb[32].mxu1 }
 0x404   :  { %v5309_v60 = vadd.f32 %v3188_v36, %v7191_v58  ;;  %v3330_v39 = vpop.f32.mrb[48].mxu0  ;;  %v3190_v35 = vpop.f32.mrb[33].mxu1 }
 0x405   :  { %v5323_v32 = vadd.f32 %v3330_v39, %v7194_v59  ;;  %v3332_v19 = vpop.f32.mrb[49].mxu0  ;;  %v3192_v50 = vpop.f32.mrb[34].mxu1  ;;  %v7206_v57 = vadd.f32 %v3190_v35, %v7198_v53 }
 0x406   :  { %v3427_v38 = vmul.f32 0.044715, %v5309_v60  ;;  %v5311_v0 = vadd.f32 %v3192_v50, %v7191_v58  ;;  %v3334_v47 = vpop.f32.mrb[50].mxu0  ;;  %v3194_v4 = vpop.f32.mrb[35].mxu1  ;;  %v7211_v6 = vadd.f32 %v3332_v19, %v7203_v13  ;;  %v7228_v51 = vmul.f32 0.5, %v5309_v60 }
 0x407   :  { %v3429_v3 = vmul.f32 0.044715, %v5323_v32  ;;  %v5325_v14 = vadd.f32 %v3334_v47, %v7194_v59  ;;  %v3336_v2 = vpop.f32.mrb[51].mxu0  ;;  %v3428_v31 = vmul.f32 0.044715, %v7206_v57  ;;  %v7215_v43 = vadd.f32 %v3194_v4, %v7198_v53 }
 0x408   :  { %v3483_v10 = vmul.f32 %v5309_v60, %v3427_v38  ;;  %v3435_v62 = vmul.f32 0.044715, %v5311_v0  ;;  %v7218_v8 = vadd.f32 %v3336_v2, %v7203_v13  ;;  %v3430_v20 = vmul.f32 0.044715, %v7211_v6 }
 0x409   :  { %v3485_v11 = vmul.f32 %v5323_v32, %v3429_v3  ;;  %v3437_v55 = vmul.f32 0.044715, %v5325_v14  ;;  %v3484_v5 = vmul.f32 %v7206_v57, %v3428_v31  ;;  %v3436_v63 = vmul.f32 0.044715, %v7215_v43 }
 0x40a   :  { %v3539_v12 = vmul.f32 %v5309_v60, %v3483_v10  ;;  %v3491_v16 = vmul.f32 %v5311_v0, %v3435_v62  ;;  %v3438_v36 = vmul.f32 0.044715, %v7218_v8  ;;  %v7232_v19 = vmul.f32 0.5, %v5323_v32 }
 0x40b   :  { %v3541_v52 = vmul.f32 %v5323_v32, %v3485_v11  ;;  %v3493_v46 = vmul.f32 %v5325_v14, %v3437_v55  ;;  %v3198_v30 = vpop.f32.mrb[36].mxu1  ;;  %v3486_v47 = vmul.f32 %v7211_v6, %v3430_v20  ;;  %v7236_v4 = vmul.f32 0.5, %v5311_v0 }
 0x40c   :  { %v3595_v54 = vadd.f32 %v5309_v60, %v3539_v12  ;;  %v3547_v33 = vmul.f32 %v5311_v0, %v3491_v16  ;;  %v3340_v1 = vpop.f32.mrb[52].mxu0  ;;  %v3200_v48 = vpop.f32.mrb[37].mxu1  ;;  %v7222_v26 = vadd.f32 %v3198_v30, %v7191_v58  ;;  %v7238_v3 = vmul.f32 0.5, %v5325_v14 }
 0x40d   :  { %v3549_v21 = vmul.f32 %v5325_v14, %v3493_v46  ;;  %v3342_v45 = vpop.f32.mrb[53].mxu0  ;;  %v3202_v9 = vpop.f32.mrb[38].mxu1  ;;  %v3597_v24 = vadd.f32 %v5323_v32, %v3541_v52  ;;  %v7226_v17 = vadd.f32 %v3340_v1, %v7194_v59  ;;  %v7242_v10 = vmul.f32 %v7206_v57, %v3484_v5 }
 0x40e   :  { %v3344_v28 = vpop.f32.mrb[54].mxu0  ;;  %v3204_v37 = vpop.f32.mrb[39].mxu1  ;;  %v3603_v29 = vadd.f32 %v5311_v0, %v3547_v33  ;;  %v3651_v35 = vmul.f32 0.7978846, %v3595_v54  ;;  %v3443_v38 = vmul.f32 0.044715, %v7222_v26  ;;  %v7245_v62 = vadd.f32 %v3200_v48, %v7198_v53 }
 0x40f   :  { %v3346_v39 = vpop.f32.mrb[55].mxu0  ;;  %v3605_v50 = vadd.f32 %v5325_v14, %v3549_v21  ;;  %v3445_v60 = vmul.f32 0.044715, %v7226_v17  ;;  %v3653_v2 = vmul.f32 0.7978846, %v3597_v24  ;;  %v7248_v32 = vadd.f32 %v3342_v45, %v7203_v13 }
 0x410   :  { %v3659_v11 = vmul.f32 0.7978846, %v3603_v29  ;;  %v3492_v55 = vmul.f32 %v7215_v43, %v3436_v63  ;;  %v3494_v0 = vmul.f32 %v7218_v8, %v3438_v36  ;;  %v7253_v14 = vadd.f32 %v3202_v9, %v7191_v58 }
 0x411   :  { %5732 = vtanh.f32 %v3651_v35  ;;  %v3661_v31 = vmul.f32 0.7978846, %v3605_v50  ;;  %v3499_v16 = vmul.f32 %v7222_v26, %v3443_v38  ;;  %v7257_v52 = vadd.f32 %v3344_v28, %v7194_v59 }
 0x412   :  { %v3501_v54 = vmul.f32 %v7226_v17, %v3445_v60  ;;  %v3444_v33 = vmul.f32 0.044715, %v7245_v62  ;;  %v3446_v1 = vmul.f32 0.044715, %v7248_v32  ;;  %v7263_v48 = vadd.f32 %v3204_v37, %v7198_v53 }
 0x413   :  { %v3208_v12 = vpop.f32.mrb[40].mxu1  ;;  %5734 = vtanh.f32 %v3653_v2  ;;  %v7266_v45 = vmul.f32 %v7211_v6, %v3486_v47  ;;  %v7269_v9 = vadd.f32 %v3346_v39, %v7203_v13  ;;  %v7275_v29 = vmul.f32 %v7215_v43, %v3492_v55 }
 0x414   :  { %v3350_v46 = vpop.f32.mrb[56].mxu0  ;;  %v3210_v30 = vpop.f32.mrb[41].mxu1  ;;  %v7272_v24 = vadd.f32 %v3208_v12, %v7191_v58  ;;  %5736 = vtanh.f32 %v3659_v11  ;;  %v3451_v37 = vmul.f32 0.044715, %v7253_v14  ;;  %v7282_v35 = vmul.f32 %v7218_v8, %v3494_v0 }
 0x415   :  { %v3352_v20 = vpop.f32.mrb[57].mxu0  ;;  %v3212_v21 = vpop.f32.mrb[42].mxu1  ;;  %v7279_v63 = vadd.f32 %v3350_v46, %v7194_v59  ;;  %5738 = vtanh.f32 %v3661_v31  ;;  %v7285_v39 = vmul.f32 %v7222_v26, %v3499_v16  ;;  %v3453_v50 = vmul.f32 0.044715, %v7257_v52 }
 0x416   :  { %v3354_v5 = vpop.f32.mrb[58].mxu0  ;;  %v3214_v28 = vpop.f32.mrb[43].mxu1  ;;  %v7289_v38 = vmul.f32 %v7226_v17, %v3501_v54  ;;  %v3500_v47 = vmul.f32 %v7245_v62, %v3444_v33  ;;  %v3502_v60 = vmul.f32 %v7248_v32, %v3446_v1  ;;  %v3452_v2 = vmul.f32 0.044715, %v7263_v48 }
 0x417   :  { %v3356_v36 = vpop.f32.mrb[59].mxu0  ;;  %v3454_v11 = vmul.f32 0.044715, %v7269_v9  ;;  %v3459_v55 = vmul.f32 0.044715, %v7272_v24  ;;  %v7297_v0 = vadd.f32 %v3210_v30, %v7198_v53  ;;  %v7300_v12 = vadd.f32 %v3352_v20, %v7203_v13 }
 0x418   :  { %v3507_v31 = vmul.f32 %v7253_v14, %v3451_v37  ;;  %v3461_v16 = vmul.f32 0.044715, %v7279_v63  ;;  %v7305_v46 = vadd.f32 %v3212_v21, %v7191_v58  ;;  %v7308_v54 = vadd.f32 %v3354_v5, %v7194_v59 }
 0x419   :  { %v3509_v1 = vmul.f32 %v7257_v52, %v3453_v50  ;;  %v3460_v61 = vmul.f32 0.044715, %v7297_v0  ;;  %v3462_v30 = vmul.f32 0.044715, %v7300_v12  ;;  %v7314_v20 = vadd.f32 %v3214_v28, %v7198_v53 }
 0x41a   :  { %7661 = vst [vmem:[#allocation18_spill] sm:$0xff] %v7308_v54  ;;  %v3467_v34 = vmul.f32 0.044715, %v7305_v46  ;;  %v3469_v21 = vmul.f32 0.044715, %v7308_v54  ;;  %v7319_v49 = vadd.f32 %v3356_v36, %v7203_v13  ;;  %v3508_v56 = vmul.f32 %v7263_v48, %v3452_v2 }
 0x41b   :  { %v3218_v33 = vpop.f32.mrb[44].mxu1  ;;  %v5733_v42 = vpop.eup %5732  ;;  %v3510_v28 = vmul.f32 %v7269_v9, %v3454_v11  ;;  %v3515_v40 = vmul.f32 %v7272_v24, %v3459_v55  ;;  %v3468_v44 = vmul.f32 0.044715, %v7314_v20  ;;  %v3556_v41 = vmul.f32 %v7245_v62, %v3500_v47 }
 0x41c   :  { %v3360_v7 = vpop.f32.mrb[60].mxu0  ;;  %v3220_v37 = vpop.f32.mrb[45].mxu1  ;;  %v7322_v5 = vadd.f32 %v3218_v33, %v7191_v58  ;;  %v3517_v36 = vmul.f32 %v7279_v63, %v3461_v16  ;;  %v3516_v58 = vmul.f32 %v7297_v0, %v3460_v61  ;;  %v3518_v33 = vmul.f32 %v7300_v12, %v3462_v30 }
 0x41d   :  { %v3362_v50 = vpop.f32.mrb[61].mxu0  ;;  %v3222_v18 = vpop.f32.mrb[46].mxu1  ;;  %v3558_v2 = vmul.f32 %v7248_v32, %v3502_v60  ;;  %v3523_v11 = vmul.f32 %v7305_v46, %v3467_v34  ;;  %v3525_v55 = vmul.f32 %v7308_v54, %v3469_v21  ;;  %v3470_v15 = vmul.f32 0.044715, %v7319_v49 }
 0x41e   :  { %7662 = vst [vmem:[#allocation32_spill] sm:$0xff] %v7322_v5  ;;  %v3364_v27 = vpop.f32.mrb[62].mxu0  ;;  %v3223_v23 = vpop.f32.mrb[47].mxu1  ;;  %v7338_v47 = vmul.f32 %v7257_v52, %v3509_v1  ;;  %v3524_v61 = vmul.f32 %v7314_v20, %v3468_v44  ;;  %v3475_v16 = vmul.f32 0.044715, %v7322_v5  ;;  %v3566_v60 = vmul.f32 %v7269_v9, %v3510_v28 }
 0x41f   :  { %v3365_v18 = vpop.f32.mrb[63].mxu0  ;;  %v5735_v22 = vpop.eup %5734  ;;  %v3563_v23 = vmul.f32 %v7253_v14, %v3507_v31  ;;  %v7345_v34 = vmul.f32 %v7272_v24, %v3515_v40  ;;  %v7348_v21 = vadd.f32 %v3360_v7, %v7194_v59  ;;  %v7351_v31 = vmul.f32 %v7279_v63, %v3517_v36 }
 0x420   :  { %v5737_v27 = vpop.eup %5736  ;;  %v3564_v18 = vmul.f32 %v7263_v48, %v3508_v56  ;;  %v7354_v1 = vmul.f32 %v7297_v0, %v3516_v58  ;;  %v7357_v44 = vmul.f32 %v7300_v12, %v3518_v33  ;;  %v3596_v56 = vadd.f32 %v7206_v57, %v7242_v10 }
 0x421   :  { %v5739_v30 = vpop.eup %5738  ;;  %v7362_v28 = vmul.f32 %v7305_v46, %v3523_v11  ;;  %v7365_v40 = vmul.f32 %v7308_v54, %v3525_v55  ;;  %v3526_v7 = vmul.f32 %v7319_v49, %v3470_v15  ;;  %v3604_v59 = vadd.f32 %v7215_v43, %v7275_v29 }
 0x422   :  { %v7371_v36 = vmul.f32 %v7314_v20, %v3524_v61  ;;  %v7374_v58 = vmul.f32 %v7322_v5, %v3475_v16  ;;  %v3652_v33 = vmul.f32 0.7978846, %v3596_v56  ;;  %v3598_v10 = vadd.f32 %v7211_v6, %v7266_v45 }
 0x423   :  { %v3477_v11 = vmul.f32 0.044715, %v7348_v21  ;;  %v7380_v55 = vadd.f32 %v3220_v37, %v7198_v53  ;;  %v7383_v15 = vadd.f32 %v3362_v50, %v7203_v13  ;;  %v3660_v54 = vmul.f32 0.7978846, %v3604_v59 }
 0x424   :  { %7663 = vst [vmem:[#allocation25_spill] sm:$0xff] %v7374_v58  ;;  %5740 = vtanh.f32 %v3652_v33  ;;  %v3606_v29 = vadd.f32 %v7218_v8, %v7282_v35  ;;  %v3654_v61 = vmul.f32 0.7978846, %v3598_v10  ;;  %v3763_v16 = vadd.f32 1.0, %v5733_v42 }
 0x425   :  { %v7388_v56 = vmul.f32 %v7319_v49, %v3526_v7  ;;  %5742 = vtanh.f32 %v3660_v54  ;;  %v3771_v45 = vadd.f32 1.0, %v5737_v27  ;;  %v3765_v5 = vadd.f32 1.0, %v5735_v22 }
 0x426   :  { %v3372_v58 = vmul.f32 0.5, %v7206_v57  ;;  %v3662_v53 = vmul.f32 0.7978846, %v3606_v29  ;;  %5744 = vtanh.f32 %v3654_v61  ;;  %v3773_v37 = vadd.f32 1.0, %v5739_v30 }
 0x427   :  { %v3533_v13 = vmul.f32 %v7348_v21, %v3477_v11  ;;  %v3380_v50 = vmul.f32 0.5, %v7215_v43  ;;  %v7394_v59 = vmul.f32 %v3763_v16, %v7228_v51  ;;  %v7397_v42 = vmul.f32 %v3771_v45, %v7236_v4 }
 0x428   :  { %5746 = vtanh.f32 %v3662_v53  ;;  %v7400_v35 = vmul.f32 %v3765_v5, %v7232_v19  ;;  %v7403_v22 = vmul.f32 %v3773_v37, %v7238_v3  ;;  %v3612_v57 = vadd.f32 %v7245_v62, %v3556_v41 }
 0x429   :  { %v3476_v54 = vmul.f32 0.044715, %v7380_v55  ;;  %v3478_v27 = vmul.f32 0.044715, %v7383_v15  ;;  %v3875_v43 = vpack.c.bf16 %v7397_v42, %v7394_v59  ;;  %v3620_v51 = vadd.f32 %v7263_v48, %v3564_v18 }
 0x42a   :  { %v3374_v4 = vmul.f32 0.5, %v7211_v6  ;;  %v3877_v19 = vpack.c.bf16 %v7403_v22, %v7400_v35  ;;  %v3668_v5 = vmul.f32 0.7978846, %v3612_v57  ;;  %v3614_v3 = vadd.f32 %v7248_v32, %v3558_v2  ;;  %v7666_v22 = vld [vmem:[#allocation34_spill] sm:$0xff] }
 0x42b   :  { %v3589_v30 = vmul.f32 %v7348_v21, %v3533_v13  ;;  %v3382_v41 = vmul.f32 0.5, %v7218_v8  ;;  %v3676_v7 = vmul.f32 0.7978846, %v3620_v51  ;;  %v3622_v33 = vadd.f32 %v7269_v9, %v3566_v60 }
 0x42c   :  { %5748 = vtanh.f32 %v3668_v5  ;;  %v3670_v10 = vmul.f32 0.7978846, %v3614_v3  ;;  %v3611_v18 = vadd.f32 %v7222_v26, %v7285_v39  ;;  %v3619_v6 = vadd.f32 %v7253_v14, %v3563_v23 }
 0x42d   :  { %v7422_v11 = vmul.f32 %v7380_v55, %v3476_v54  ;;  %v7425_v29 = vmul.f32 %v7383_v15, %v3478_v27  ;;  %5750 = vtanh.f32 %v3676_v7  ;;  %v3678_v2 = vmul.f32 0.7978846, %v3622_v33 }
 0x42e   :  { %v5741_v61 = vpop.eup %5740  ;;  %5752 = vtanh.f32 %v3670_v10  ;;  %v3667_v8 = vmul.f32 0.7978846, %v3611_v18  ;;  %v3675_v16 = vmul.f32 0.7978846, %v3619_v6  ;;  %v3613_v60 = vadd.f32 %v7226_v17, %v7289_v38 }
 0x42f   :  { %v5743_v45 = vpop.eup %5742  ;;  %v7430_v39 = vadd.f32 %v7348_v21, %v3589_v30  ;;  %v3764_v23 = vadd.f32 1.0, %v5741_v61  ;;  %5754 = vtanh.f32 %v3678_v2  ;;  %v3621_v53 = vadd.f32 %v7257_v52, %v7338_v47 }
 0x430   :  { %v5745_v37 = vpop.eup %5744  ;;  %v3772_v13 = vadd.f32 1.0, %v5743_v45  ;;  %v3388_v59 = vmul.f32 0.5, %v7245_v62  ;;  %5756 = vtanh.f32 %v3667_v8  ;;  %v3669_v42 = vmul.f32 0.7978846, %v3613_v60 }
 0x431   :  { %v3820_v57 = vmul.f32 %v3764_v23, %v3372_v58  ;;  %v3766_v54 = vadd.f32 1.0, %v5745_v37  ;;  %5758 = vtanh.f32 %v3675_v16  ;;  %v3677_v27 = vmul.f32 0.7978846, %v3621_v53 }
 0x432   :  { %v5747_v38 = vpop.eup %5746  ;;  %v3828_v51 = vmul.f32 %v3772_v13, %v3380_v50  ;;  %5760 = vtanh.f32 %v3669_v42  ;;  %v3628_v5 = vadd.f32 %v7297_v0, %v7354_v1  ;;  %v3636_v3 = vadd.f32 %v7314_v20, %v7371_v36 }
 0x433   :  { %v3774_v47 = vadd.f32 1.0, %v5747_v38  ;;  %v3396_v30 = vmul.f32 0.5, %v7263_v48  ;;  %v3390_v62 = vmul.f32 0.5, %v7248_v32  ;;  %5762 = vtanh.f32 %v3677_v27 }
 0x434   :  { %v3876_v7 = vpack.c.bf16 %v3828_v51, %v3820_v57  ;;  %v3398_v58 = vmul.f32 0.5, %v7269_v9  ;;  %v3684_v33 = vmul.f32 0.7978846, %v3628_v5  ;;  %v3692_v10 = vmul.f32 0.7978846, %v3636_v3  ;;  %v7667_v5 = vld [vmem:[#allocation18_spill] sm:$0xff] }
 0x435   :  { %v3822_v18 = vmul.f32 %v3766_v54, %v3374_v4  ;;  %v3830_v50 = vmul.f32 %v3774_v47, %v3382_v41  ;;  %v3630_v6 = vadd.f32 %v7300_v12, %v7357_v44  ;;  %v3638_v1 = vadd.f32 %v7319_v49, %v7388_v56 }
 0x436   :  { %v5749_v36 = vpop.eup %5748  ;;  %4582 = vmatprep.mubr.bf16.mxu1 %v3876_v7  ;;  %v3387_v48 = vmul.f32 0.5, %v7222_v26  ;;  %5764 = vtanh.f32 %v3684_v33  ;;  %v3627_v32 = vadd.f32 %v7272_v24, %v7345_v34  ;;  %v3635_v9 = vadd.f32 %v7305_v46, %v7362_v28  ;;  %v7664_v34 = vld [vmem:[#allocation22_spill] sm:$0xff] }
 0x437   :  { %v5751_v2 = vpop.eup %5750  ;;  %v3878_v4 = vpack.c.bf16 %v3830_v50, %v3822_v18  ;;  %4583 = vmatmul.mubr.bf16.vlgmr.msra.gmra.mrb[64].mxu1 %v3875_v43  ;;  %v3780_v41 = vadd.f32 1.0, %v5749_v36  ;;  %5766 = vtanh.f32 %v3692_v10  ;;  %v3686_v44 = vmul.f32 0.7978846, %v3630_v6  ;;  %v7670_v36 = vld [vmem:[#allocation32_spill] sm:$0xff] }
 0x438   :  { %v5753_v61 = vpop.eup %5752  ;;  %5273 = vmatpush3.bf16.msra.mxu1 %v7096_v25  ;;  %v3788_v56 = vadd.f32 1.0, %v5751_v2  ;;  %v3395_v8 = vmul.f32 0.5, %v7253_v14  ;;  %v3694_v26 = vmul.f32 0.7978846, %v3638_v1  ;;  %v3683_v16 = vmul.f32 0.7978846, %v3627_v32 }
 0x439   :  { %v5755_v60 = vpop.eup %5754  ;;  %4646 = vmatprep.mubr.bf16.mxu0 %v3878_v4  ;;  %5266 = vmatprep.subr.bf16.mxu1 %v7664_v34  ;;  %v3782_v45 = vadd.f32 1.0, %v5753_v61  ;;  %v3389_v28 = vmul.f32 0.5, %v7226_v17  ;;  %5768 = vtanh.f32 %v3686_v44  ;;  %v3691_v43 = vmul.f32 0.7978846, %v3635_v9  ;;  %v7665_v17 = vld [vmem:[#allocation24_spill] sm:$0xff]  ;;  %v7669_v1 = vld [vmem:[#allocation25_spill] sm:$0xff] }
 0x43a   :  { %v5757_v23 = vpop.eup %5756  ;;  %4647 = vmatmul.mubr.bf16.vlgmr.msra.gmra.mrb[80].mxu0 %v3877_v19  ;;  %v3836_v25 = vmul.f32 %v3780_v41, %v3388_v59  ;;  %v3844_v53 = vmul.f32 %v3788_v56, %v3396_v30  ;;  %v3790_v37 = vadd.f32 1.0, %v5755_v60  ;;  %5770 = vtanh.f32 %v3694_v26  ;;  %v7671_v9 = vld [vmem:[#allocation28_spill] sm:$0xff] }
 0x43b   :  { %v5759_v14 = vpop.eup %5758  ;;  %v3838_v13 = vmul.f32 %v3782_v45, %v3390_v62  ;;  %v3779_v42 = vadd.f32 1.0, %v5757_v23  ;;  %5772 = vtanh.f32 %v3683_v16  ;;  %v3629_v57 = vadd.f32 %v7279_v63, %v7351_v31  ;;  %v7672_v34 = vld [vmem:[#allocation36_spill] sm:$0xff] }
 0x43c   :  { %v5761_v54 = vpop.eup %5760  ;;  %5274 = vmatpush3.bf16.msra.mxu1 %v7665_v17  ;;  %v3884_v27 = vpack.c.bf16 %v3844_v53, %v3836_v25  ;;  %v3846_v38 = vmul.f32 %v3790_v37, %v3398_v58  ;;  %v3787_v51 = vadd.f32 1.0, %v5759_v14  ;;  %5774 = vtanh.f32 %v3691_v43  ;;  %v7673_v53 = vld [vmem:[#allocation35_spill] sm:$0xff] }
 0x43d   :  { %v5763_v35 = vpop.eup %5762  ;;  %5267 = vmatprep.subr.bf16.mxu1 %v7666_v22  ;;  %v3397_v19 = vmul.f32 0.5, %v7257_v52  ;;  %v3781_v59 = vadd.f32 1.0, %v5761_v54  ;;  %v3637_v3 = vadd.f32 %v7667_v5, %v7365_v40  ;;  %v3685_v47 = vmul.f32 0.7978846, %v3629_v57  ;;  %v7668_v52 = vld [vmem:[#allocation27_spill] sm:$0xff] }
 0x43e   :  { %4590 = vmatprep.mubr.bf16.mxu1 %v3884_v27  ;;  %v3886_v30 = vpack.c.bf16 %v3846_v38, %v3838_v13  ;;  %v3835_v31 = vmul.f32 %v3779_v42, %v3387_v48  ;;  %v3843_v62 = vmul.f32 %v3787_v51, %v3395_v8  ;;  %v3789_v7 = vadd.f32 1.0, %v5763_v35  ;;  %v7674_v38 = vld [vmem:[#allocation31_spill] sm:$0xff] }
 0x43f   :  { %v3837_v33 = vmul.f32 %v3781_v59, %v3389_v28  ;;  %v3693_v10 = vmul.f32 0.7978846, %v3637_v3  ;;  %5776 = vtanh.f32 %v3685_v47  ;;  %v3588_v58 = vmul.f32 %v7380_v55, %v7422_v11 }
 0x440   :  { %v5765_v18 = vpop.eup %5764  ;;  %4654 = vmatprep.mubr.bf16.mxu0 %v3886_v30  ;;  %v3883_v50 = vpack.c.bf16 %v3843_v62, %v3835_v31  ;;  %5275 = vmatpush3.bf16.msra.mxu1 %v7668_v52  ;;  %v3845_v6 = vmul.f32 %v3789_v7, %v3397_v19  ;;  %v3404_v40 = vmul.f32 0.5, %v7297_v0  ;;  %v3587_v32 = vmul.f32 %v7670_v36, %v7669_v1  ;;  %v7676_v31 = vld [vmem:[#allocation20_spill] sm:$0xff]  ;;  %v7677_v62 = vld [vmem:[#allocation30_spill] sm:$0xff] }
 0x441   :  { %v5767_v48 = vpop.eup %5766  ;;  %5268 = vmatprep.subr.bf16.mxu1 %v7671_v9  ;;  %v3412_v2 = vmul.f32 0.5, %v7314_v20  ;;  %v3796_v4 = vadd.f32 1.0, %v5765_v18  ;;  %5778 = vtanh.f32 %v3693_v10  ;;  %v3644_v11 = vadd.f32 %v7380_v55, %v3588_v58 }
 0x442   :  { %4591 = vmatmul.mubr.bf16.gmra.mrb[68].mxu1 %v3883_v50  ;;  %v3885_v41 = vpack.c.bf16 %v3845_v6, %v3837_v33  ;;  %v3804_v44 = vadd.f32 1.0, %v5767_v48  ;;  %v3643_v61 = vadd.f32 %v7670_v36, %v3587_v32  ;;  %v3590_v0 = vmul.f32 %v7383_v15, %v7425_v29  ;;  %v7678_v6 = vld [vmem:[#allocation19_spill] sm:$0xff] }
 0x443   :  { %v5769_v56 = vpop.eup %5768  ;;  %v3701_v8 = vmul.f32 0.7978846, %v7430_v39  ;;  %v3852_v26 = vmul.f32 %v3796_v4, %v3404_v40  ;;  %v3406_v16 = vmul.f32 0.5, %v7300_v12  ;;  %v3700_v60 = vmul.f32 0.7978846, %v3644_v11 }
 0x444   :  { %v5771_v20 = vpop.eup %5770  ;;  %4655 = vmatmul.mubr.bf16.gmra.mrb[84].mxu0 %v3885_v41  ;;  %5276 = vmatpush3.bf16.msra.mxu1 %v7672_v34  ;;  %v3860_v45 = vmul.f32 %v3804_v44, %v3412_v2  ;;  %v3798_v28 = vadd.f32 1.0, %v5769_v56  ;;  %v3699_v43 = vmul.f32 0.7978846, %v3643_v61  ;;  %v3646_v23 = vadd.f32 %v7383_v15, %v3590_v0  ;;  %v7680_v41 = vld [vmem:[#allocation17_spill] sm:$0xff] }
 0x445   :  { %v5773_v25 = vpop.eup %5772  ;;  %5269 = vmatprep.subr.bf16.mxu1 %v7673_v53  ;;  %v3414_v29 = vmul.f32 0.5, %v7319_v49  ;;  %v3806_v37 = vadd.f32 1.0, %v5771_v20  ;;  %v3403_v39 = vmul.f32 0.5, %v7272_v24  ;;  %5780 = vtanh.f32 %v3700_v60  ;;  %v7675_v24 = vld [vmem:[#allocation33_spill] sm:$0xff] }
 0x446   :  { %v5775_v12 = vpop.eup %5774  ;;  %v3892_v14 = vpack.c.bf16 %v3860_v45, %v3852_v26  ;;  %v3411_v13 = vmul.f32 0.5, %v7305_v46  ;;  %v3795_v42 = vadd.f32 1.0, %v5773_v25  ;;  %5782 = vtanh.f32 %v3699_v43 }
 0x447   :  { %v3854_v57 = vmul.f32 %v3798_v28, %v3406_v16  ;;  %v3862_v54 = vmul.f32 %v3806_v37, %v3414_v29  ;;  %v3803_v17 = vadd.f32 1.0, %v5775_v12  ;;  %v3702_v27 = vmul.f32 0.7978846, %v3646_v23 }
 0x448   :  { %5784 = vtanh.f32 %v3701_v8  ;;  %4598 = vmatprep.mubr.bf16.mxu1 %v3892_v14  ;;  %5277 = vmatpush3.bf16.msra.mxu1 %v7674_v38  ;;  %v3851_v35 = vmul.f32 %v3795_v42, %v3403_v39  ;;  %v3405_v3 = vmul.f32 0.5, %v7279_v63  ;;  %v3413_v47 = vmul.f32 0.5, %v7667_v5  ;;  %v7679_v5 = vld [vmem:[#allocation29_spill] sm:$0xff] }
 0x449   :  { %v5777_v51 = vpop.eup %5776  ;;  %v3894_v49 = vpack.c.bf16 %v3862_v54, %v3854_v57  ;;  %v3859_v22 = vmul.f32 %v3803_v17, %v3411_v13  ;;  %5270 = vmatprep.subr.bf16.mxu1 %v7675_v24  ;;  %5786 = vtanh.f32 %v3702_v27  ;;  %v3420_v50 = vmul.f32 0.5, %v7380_v55 }
 0x44a   :  { %v3797_v19 = vadd.f32 1.0, %v5777_v51  ;;  %v3419_v63 = vmul.f32 0.5, %v7670_v36  ;;  %v3422_v4 = vmul.f32 0.5, %v7383_v15  ;;  %v3421_v36 = vmul.f32 0.5, %v7348_v21  ;;  %v5040_v15 = vld [vmem:[%s7524_s8] ss:$0 sm:$0xff] }
 0x44b   :  { %v5779_v59 = vpop.eup %5778  ;;  %4662 = vmatprep.mubr.bf16.mxu0 %v3894_v49  ;;  %v3891_v46 = vpack.c.bf16 %v3859_v22, %v3851_v35  ;;  %s5942_s8 = smov [#allocation11]  }
 0x44c   :  { %v3805_v30 = vadd.f32 1.0, %v5779_v59  ;;  %5278 = vmatpush3.bf16.msra.mxu1 %v7676_v31  ;;  %v3853_v7 = vmul.f32 %v3797_v19, %v3405_v3  ;;  %s4690_s15 = sshll.u32 %s5942_s8, 4  ;;  %s4691_s15 = int_to_ptr.vmem [resolvable:$true] %s4690_s15 }
 0x44d   :  { %4599 = vmatmul.mubr.bf16.gmra.mrb[72].mxu1 %v3891_v46  ;;  %5271 = vmatprep.subr.bf16.mxu1 %v7677_v62  ;;  %s5898_s17 = scalar_lea.vmem %s4691_s15, 896  ;;  %p5903_p13 = scmp.lt.s32.totalorder %s4691_s15, %s4691_s15 }
 0x44e   :  { %v3861_v33 = vmul.f32 %v3805_v30, %v3413_v47  ;;  %p5899_p12 = scmp.ne.s32.totalorder %s4691_s15, %s5898_s17  ;;  %p5904_p0 = scmp.lt.s32.totalorder %s5898_s17, %s5898_s17 }
 0x44f   :  { %v5781_v10 = vpop.eup %5780 }
 0x450   :  { %v5783_v58 = vpop.eup %5782  ;;  %v3893_v18 = vpack.c.bf16 %v3861_v33, %v3853_v7  ;;  %v3812_v52 = vadd.f32 1.0, %v5781_v10  ;;  %5279 = vmatpush3.bf16.msra.mxu1 %v7678_v6  ;;  %p5905_p1 = por %p5904_p0, %p5903_p13 }
 0x451   :  { %v3811_v40 = vadd.f32 1.0, %v5783_v58  ;;  %5272 = vmatprep.subr.bf16.mxu1 %v7679_v5 }
 0x452   :  { %v5785_v1 = vpop.eup %5784  ;;  %4663 = vmatmul.mubr.bf16.gmra.mrb[88].mxu0 %v3893_v18  ;;  %v3868_v32 = vmul.f32 %v3812_v52, %v3420_v50  ;;  %p5906_p2 = pnand %p5905_p1, %p5899_p12 }
 0x453   :  { %v5787_v48 = vpop.eup %5786  ;;  %v3867_v9 = vmul.f32 %v3811_v40, %v3419_v63  ;;  %v3813_v44 = vadd.f32 1.0, %v5785_v1 }
 0x454   :  { %v3900_v2 = vpack.c.bf16 %v3868_v32, %v3868_v32  ;;  %v3814_v11 = vadd.f32 1.0, %v5787_v48  ;;  %5280 = vmatpush3.bf16.msra.mxu1 %v7680_v41 }
 0x455   :  { %v3899_v55 = vpack.c.bf16 %v3867_v9, %v3867_v9  ;;  %v3869_v56 = vmul.f32 %v3813_v44, %v3421_v36 }
 0x456   :  { %4606 = vmatprep.mubr.bf16.mxu1 %v3900_v2  ;;  %v3870_v61 = vmul.f32 %v3814_v11, %v3422_v4 }
 0x457   :  { %4607 = vmatmul.mubr.bf16.gmra.mrb[76].mxu1 %v3899_v55  ;;  %v3901_v8 = vpack.c.bf16 %v3869_v56, %v3869_v56 }
 0x458   :  { %v3902_v0 = vpack.c.bf16 %v3870_v61, %v3870_v61 }
 0x45a   :  { %4670 = vmatprep.mubr.bf16.mxu1 %v3902_v0 }
 0x45f   :  { %4671 = vmatmul.mubr.bf16.vlgmr.msra.gmra.mrb[80].mxu1 %v3901_v8 }
 0x48b   :  { %v5121_v26 = vpop.f32.mrb[48].mxu1 }
 0x48c   :  { %v5122_v16 = vpop.f32.mrb[49].mxu1 }
 0x48d   :  { %v5161_v60 = vpop.f32.mrb[64].mxu0  ;;  %v5123_v20 = vadd.f32 %v5122_v16, %v5121_v26  ;;  %v5124_v34 = vpop.f32.mrb[50].mxu1 }
 0x48e   :  { %v5162_v45 = vpop.f32.mrb[65].mxu0  ;;  %v5125_v28 = vpop.f32.mrb[51].mxu1 }
 0x48f   :  { %v4457_v43 = vadd.f32 %v5123_v20, %v5040_v15  ;;  %v5163_v23 = vadd.f32 %v5162_v45, %v5161_v60  ;;  %v5164_v21 = vpop.f32.mrb[66].mxu0  ;;  %v5126_v25 = vadd.f32 %v5125_v28, %v5124_v34 }
 0x490   :  { %v5165_v53 = vpop.f32.mrb[67].mxu0 }
 0x491   :  { %v4521_v29 = vadd.f32 %v5163_v23, %v4457_v43  ;;  %v4460_v37 = vadd.f32 %v5126_v25, %v5040_v15  ;;  %v5166_v39 = vadd.f32 %v5165_v53, %v5164_v21 }
 0x493   :  { %v4524_v12 = vadd.f32 %v5166_v39, %v4460_v37 }
 0x495   :  { %v5127_v14 = vpop.f32.mrb[52].mxu1 }
 0x496   :  { %v5128_v13 = vpop.f32.mrb[53].mxu1 }
 0x497   :  { %v5167_v42 = vpop.f32.mrb[68].mxu0  ;;  %v5129_v57 = vadd.f32 %v5128_v13, %v5127_v14  ;;  %v5130_v54 = vpop.f32.mrb[54].mxu1 }
 0x498   :  { %v5168_v17 = vpop.f32.mrb[69].mxu0  ;;  %v5131_v27 = vpop.f32.mrb[55].mxu1 }
 0x499   :  { %v4465_v38 = vadd.f32 %v5129_v57, %v5040_v15  ;;  %v5169_v51 = vadd.f32 %v5168_v17, %v5167_v42  ;;  %v5170_v49 = vpop.f32.mrb[70].mxu0  ;;  %v5132_v35 = vadd.f32 %v5131_v27, %v5130_v54 }
 0x49a   :  { %v5171_v22 = vpop.f32.mrb[71].mxu0 }
 0x49b   :  { %v4529_v24 = vadd.f32 %v5169_v51, %v4465_v38  ;;  %v4468_v19 = vadd.f32 %v5132_v35, %v5040_v15  ;;  %v5172_v59 = vadd.f32 %v5171_v22, %v5170_v49 }
 0x49d   :  { %v4532_v46 = vadd.f32 %v5172_v59, %v4468_v19 }
 0x49f   :  { %v5133_v3 = vpop.f32.mrb[56].mxu1 }
 0x4a0   :  { %v5134_v47 = vpop.f32.mrb[57].mxu1 }
 0x4a1   :  { %v5135_v30 = vadd.f32 %v5134_v47, %v5133_v3  ;;  %v5136_v31 = vpop.f32.mrb[58].mxu1 }
 0x4a2   :  { %v5137_v62 = vpop.f32.mrb[59].mxu1 }
 0x4a3   :  { %v5173_v7 = vpop.f32.mrb[72].mxu0  ;;  %v4473_v33 = vadd.f32 %v5135_v30, %v5040_v15  ;;  %v5138_v10 = vadd.f32 %v5137_v62, %v5136_v31 }
 0x4a4   :  { %v5174_v58 = vpop.f32.mrb[73].mxu0 }
 0x4a5   :  { %v5175_v18 = vadd.f32 %v5174_v58, %v5173_v7  ;;  %v5176_v50 = vpop.f32.mrb[74].mxu0  ;;  %v4476_v52 = vadd.f32 %v5138_v10, %v5040_v15 }
 0x4a6   :  { %v5177_v6 = vpop.f32.mrb[75].mxu0 }
 0x4a7   :  { %v4537_v63 = vadd.f32 %v5175_v18, %v4473_v33  ;;  %v5178_v40 = vadd.f32 %v5177_v6, %v5176_v50 }
 0x4a9   :  { %v4540_v5 = vadd.f32 %v5178_v40, %v4476_v52 }
 0x4ac   :  { %v5139_v1 = vpop.f32.mrb[60].mxu1 }
 0x4ad   :  { %v5140_v32 = vpop.f32.mrb[61].mxu1  ;;  %v5179_v48 = vpop.f32.mrb[76].mxu0 }
 0x4ae   :  { %v5141_v9 = vadd.f32 %v5140_v32, %v5139_v1  ;;  %v5142_v2 = vpop.f32.mrb[62].mxu1  ;;  %v5180_v4 = vpop.f32.mrb[77].mxu0 }
 0x4af   :  { %v5143_v11 = vpop.f32.mrb[63].mxu1  ;;  %v5181_v55 = vadd.f32 %v5180_v4, %v5179_v48  ;;  %v5182_v44 = vpop.f32.mrb[78].mxu0 }
 0x4b0   :  { %v4481_v41 = vadd.f32 %v5141_v9, %v5040_v15  ;;  %v5183_v61 = vpop.f32.mrb[79].mxu0 }
 0x4b2   :  { %v4545_v36 = vadd.f32 %v5181_v55, %v4481_v41 }
 0x50a   :  { %v5201_v0 = vpop.f32.mrb[64].mxu1 }
 0x50b   :  { %v5202_v56 = vpop.f32.mrb[65].mxu1 }
 0x50c   :  { %v5203_v8 = vadd.f32 %v5202_v56, %v5201_v0  ;;  %v5204_v26 = vpop.f32.mrb[66].mxu1 }
 0x50d   :  { %v5241_v16 = vpop.f32.mrb[80].mxu0  ;;  %v5205_v60 = vpop.f32.mrb[67].mxu1 }
 0x50e   :  { %v4585_v20 = vadd.f32 %v5203_v8, %v4521_v29  ;;  %v5242_v34 = vpop.f32.mrb[81].mxu0  ;;  %v5206_v45 = vadd.f32 %v5205_v60, %v5204_v26 }
 0x50f   :  { %v5243_v28 = vadd.f32 %v5242_v34, %v5241_v16  ;;  %v5244_v43 = vpop.f32.mrb[82].mxu0 }
 0x510   :  { %v4588_v23 = vadd.f32 %v5206_v45, %v4524_v12  ;;  %v5245_v21 = vpop.f32.mrb[83].mxu0 }
 0x511   :  { %v4649_v25 = vadd.f32 %v5243_v28, %v4585_v20  ;;  %v5246_v53 = vadd.f32 %v5245_v21, %v5244_v43 }
 0x513   :  { %4678 = vst [vmem:[#allocation11] sm:$0xff] %v4649_v25  ;;  %v4652_v15 = vadd.f32 %v5246_v53, %v4588_v23 }
 0x515   :  { %4679 = vst [vmem:[#allocation11 + $0x8] sm:$0xff] %v4652_v15  ;;  %v5207_v37 = vpop.f32.mrb[68].mxu1 }
 0x516   :  { %v5208_v39 = vpop.f32.mrb[69].mxu1 }
 0x517   :  { %v5247_v14 = vpop.f32.mrb[84].mxu0  ;;  %v5209_v13 = vadd.f32 %v5208_v39, %v5207_v37  ;;  %v5210_v42 = vpop.f32.mrb[70].mxu1 }
 0x518   :  { %v5248_v57 = vpop.f32.mrb[85].mxu0  ;;  %v5211_v54 = vpop.f32.mrb[71].mxu1 }
 0x519   :  { %v4593_v17 = vadd.f32 %v5209_v13, %v4529_v24  ;;  %v5249_v29 = vadd.f32 %v5248_v57, %v5247_v14  ;;  %v5250_v27 = vpop.f32.mrb[86].mxu0  ;;  %v5212_v38 = vadd.f32 %v5211_v54, %v5210_v42 }
 0x51a   :  { %v5251_v51 = vpop.f32.mrb[87].mxu0 }
 0x51b   :  { %v4657_v49 = vadd.f32 %v5249_v29, %v4593_v17  ;;  %v4596_v12 = vadd.f32 %v5212_v38, %v4532_v46  ;;  %v5252_v35 = vadd.f32 %v5251_v51, %v5250_v27 }
 0x51d   :  { %4680 = vst [vmem:[#allocation11 + $0x10] sm:$0xff] %v4657_v49  ;;  %v4660_v22 = vadd.f32 %v5252_v35, %v4596_v12 }
 0x51f   :  { %4681 = vst [vmem:[#allocation11 + $0x18] sm:$0xff] %v4660_v22 }
 0x520   :  { %v5213_v19 = vpop.f32.mrb[72].mxu1 }
 0x521   :  { %v5214_v59 = vpop.f32.mrb[73].mxu1 }
 0x522   :  { %v5215_v3 = vadd.f32 %v5214_v59, %v5213_v19  ;;  %v5216_v47 = vpop.f32.mrb[74].mxu1 }
 0x523   :  { %v5217_v30 = vpop.f32.mrb[75].mxu1 }
 0x524   :  { %v4601_v31 = vadd.f32 %v5215_v3, %v4537_v63  ;;  %v5218_v62 = vadd.f32 %v5217_v30, %v5216_v47 }
 0x525   :  { %v5253_v7 = vpop.f32.mrb[88].mxu0 }
 0x526   :  { %v5254_v33 = vpop.f32.mrb[89].mxu0  ;;  %v4604_v24 = vadd.f32 %v5218_v62, %v4540_v5 }
 0x527   :  { %v5255_v10 = vadd.f32 %v5254_v33, %v5253_v7  ;;  %v5256_v58 = vpop.f32.mrb[90].mxu0 }
 0x528   :  { %v5257_v18 = vpop.f32.mrb[91].mxu0 }
 0x529   :  { %v4665_v50 = vadd.f32 %v5255_v10, %v4601_v31  ;;  %v5258_v52 = vadd.f32 %v5257_v18, %v5256_v58 }
 0x52a   :  { %v5219_v46 = vpop.f32.mrb[76].mxu1 }
 0x52b   :  { %4682 = vst [vmem:[#allocation11 + $0x20] sm:$0xff] %v4665_v50  ;;  %v4668_v6 = vadd.f32 %v5258_v52, %v4604_v24  ;;  %v5220_v40 = vpop.f32.mrb[77].mxu1 }
 0x52c   :  { %v5221_v1 = vadd.f32 %v5220_v40, %v5219_v46  ;;  %v5222_v32 = vpop.f32.mrb[78].mxu1 }
 0x52d   :  { %4683 = vst [vmem:[#allocation11 + $0x28] sm:$0xff] %v4668_v6  ;;  %v5223_v48 = vpop.f32.mrb[79].mxu1 }
 0x52e   :  { %v4609_v9 = vadd.f32 %v5221_v1, %v4545_v36 }
 0x532   :  { %v5259_v2 = vpop.f32.mrb[80].mxu1 }
 0x533   :  { %v5260_v63 = vpop.f32.mrb[81].mxu1 }
 0x534   :  { %v5261_v4 = vadd.f32 %v5260_v63, %v5259_v2  ;;  %v5262_v5 = vpop.f32.mrb[82].mxu1 }
 0x535   :  { %v5263_v11 = vpop.f32.mrb[83].mxu1 }
 0x536   :  { %v4673_v41 = vadd.f32 %v5261_v4, %v4609_v9 }
 0x538   :  { %4684 = vst [vmem:[#allocation11 + $0x30] sm:$0xff] %v4673_v41 }
 0x539   :  { %5909 = shalt.err (!%p5906_p2)
}
 0x53a   :  { %s5910_s16 = scalar_lea.hbm %s7525_s9, 896 }
 0x53b   :  { %p5911_p3 = scmp.ne.s32.totalorder %s7525_s9, %s5910_s16  ;;  %p5914_p4 = scmp.lt.u32.totalorder %s5910_s16, %s7525_s9 }
 0x53d   :  { %p5916_p5 = pnand %p5914_p4, %p5911_p3 }
 0x53f   :  { %5919 = shalt.err (!%p5916_p5)
}
 0x540   :  { %4696 = dma.vmem_to_hbm [thread:$0]  %s4691_s15, 896, %s7525_s9, [#allocation4], %s5929_s19, %s5929_s19, %s5930_s20  }
 0x541   :  { %5926 = dma.done.wait [#allocation4], 896  }
 0x542   :  { %5927 = vsyncadd [#allocation4], 4294966400 }
 0x543   :  { %4700 = vsyncpa [#allocation3], 1 }
 0x544   :  { %4701 = vsyncpa [#allocation6], 1 }
 0x545   :  { %4702 = vsyncpa [#allocation9], 1 }
 0x546   :  { %4703 = vsyncpa [#allocation4], 1 }

// kernel: tpu_custom_call.1
= control target key start
LH: loop header
LB: loop body
LE: loop exit
PB: predicated region body
PF: predicated region fallthrough
CT: control target
= control target key end

     0   :  { %14 = vsyncpa [#allocation3], 0  ;;  %s7516_s0 = inlined_call_operand.hbm [shape: bf16[56,64], index: 0, kind: input, shape index: {}]   ;;  %s7517_s1 = inlined_call_operand.hbm [shape: bf16[64,256], index: 1, kind: input, shape index: {}]   ;;  %s7518_s2 = inlined_call_operand.vmem [shape: f32[1,256], index: 2, kind: input, shape index: {}]   ;;  %s7519_s3 = inlined_call_operand.hbm [shape: bf16[256,512], index: 3, kind: input, shape index: {}]   ;;  %s7520_s4 = inlined_call_operand.vmem [shape: f32[1,512], index: 4, kind: input, shape index: {}]   ;;  %s7521_s5 = inlined_call_operand.hbm [shape: bf16[512,1024], index: 5, kind: input, shape index: {}]   ;;  %s7522_s6 = inlined_call_operand.vmem [shape: f32[1,1024], index: 6, kind: input, shape index: {}]   ;;  %s7523_s7 = inlined_call_operand.hbm [shape: bf16[1024,128], index: 7, kind: input, shape index: {}]   ;;  %s7524_s8 = inlined_call_operand.vmem [shape: f32[1,128], index: 8, kind: input, shape index: {}]   ;;  %s7525_s9 = inlined_call_operand.hbm [shape: f32[56,128], index: 9, kind: output, shape index: {}]  }
   0x1   :  { %15 = vsyncpa [#allocation6], 0 }
   0x2   :  { %16 = vsyncpa [#allocation9], 0 }
   0x3   :  { %17 = vsyncpa [#allocation4], 0  ;;  %s5928_s30 = smov [#allocation5]   ;;  %s5788_s13 = scalar_lea.hbm %s7517_s1, 1024 }
   0x4   :  { %s35_s10 = sshll.u32 %s5928_s30, 4  ;;  %p5789_p0 = scmp.ne.s32.totalorder %s7517_s1, %s5788_s13  ;;  %s36_s10 = int_to_ptr.vmem [resolvable:$true] %s35_s10 }
   0x5   :  { %p5792_p1 = scmp.lt.u32.totalorder %s5788_s13, %s7517_s1 }
   0x7   :  { %p5794_p2 = pnand %p5792_p1, %p5789_p0 }
   0x9   :  { %5797 = shalt.err (!%p5794_p2)
}
   0xa   :  { %s5798_s18 = scalar_lea.vmem %s36_s10, 1024  ;;  %p5803_p4 = scmp.lt.s32.totalorder %s36_s10, %s36_s10 }
   0xb   :  { %p5799_p3 = scmp.ne.s32.totalorder %s36_s10, %s5798_s18  ;;  %p5804_p5 = scmp.lt.s32.totalorder %s5798_s18, %s5798_s18 }
   0xd   :  { %p5805_p6 = por %p5804_p5, %p5803_p4 }
   0xf   :  { %p5806_p7 = pnand %p5805_p6, %p5799_p3 }
  0x11   :  { %5809 = shalt.err (!%p5806_p7)
}
  0x12   :  { %s5929_s19 = smov 128   ;;  %s5930_s20 = smov 8  }
  0x13   :  { %41 = dma.hbm_to_vmem [thread:$0]  %s7517_s1, 1024, %s36_s10, [#allocation6], %s5929_s19, %s5929_s19, %s5930_s20  }
  0x14   :  { %s5931_s23 = smov [#allocation8]   ;;  %s5810_s27 = scalar_lea.hbm %s7521_s5, 32768 }
  0x15   :  { %s63_s24 = sshll.u32 %s5931_s23, 4  ;;  %p5811_p8 = scmp.ne.s32.totalorder %s7521_s5, %s5810_s27  ;;  %s64_s24 = int_to_ptr.vmem [resolvable:$true] %s63_s24 }
  0x16   :  { %p5814_p9 = scmp.lt.u32.totalorder %s5810_s27, %s7521_s5 }
  0x18   :  { %p5816_p10 = pnand %p5814_p9, %p5811_p8 }
  0x1a   :  { %5819 = shalt.err (!%p5816_p10)
}
  0x1b   :  { %s5820_s12 = scalar_lea.vmem %s64_s24, 32768  ;;  %p5825_p12 = scmp.lt.s32.totalorder %s64_s24, %s64_s24 }
  0x1c   :  { %p5821_p11 = scmp.ne.s32.totalorder %s64_s24, %s5820_s12  ;;  %p5826_p13 = scmp.lt.s32.totalorder %s5820_s12, %s5820_s12 }
  0x1e   :  { %p5827_p0 = por %p5826_p13, %p5825_p12 }
  0x20   :  { %p5828_p1 = pnand %p5827_p0, %p5821_p11 }
  0x22   :  { %5831 = shalt.err (!%p5828_p1)
}
  0x23   :  { %s5932_s1 = smov 512   ;;  %s5933_s10 = smov 32  }
  0x24   :  { %69 = dma.hbm_to_vmem [thread:$0]  %s7521_s5, 32768, %s64_s24, [#allocation9], %s5932_s1, %s5932_s1, %s5933_s10  }
  0x25   :  { %s5934_s15 = smov [#allocation2]   ;;  %s5832_s21 = scalar_lea.hbm %s7516_s0, 448 }
  0x26   :  { %s23_s16 = sshll.u32 %s5934_s15, 4  ;;  %p5833_p2 = scmp.ne.s32.totalorder %s7516_s0, %s5832_s21  ;;  %s24_s16 = int_to_ptr.vmem [resolvable:$true] %s23_s16 }
  0x27   :  { %p5836_p3 = scmp.lt.u32.totalorder %s5832_s21, %s7516_s0 }
  0x29   :  { %p5838_p4 = pnand %p5836_p3, %p5833_p2 }
  0x2b   :  { %5841 = shalt.err (!%p5838_p4)
}
  0x2c   :  { %s5842_s27 = scalar_lea.vmem %s24_s16, 448  ;;  %p5847_p6 = scmp.lt.s32.totalorder %s24_s16, %s24_s16 }
  0x2d   :  { %p5843_p5 = scmp.ne.s32.totalorder %s24_s16, %s5842_s27  ;;  %p5848_p7 = scmp.lt.s32.totalorder %s5842_s27, %s5842_s27 }
  0x2f   :  { %p5849_p8 = por %p5848_p7, %p5847_p6 }
  0x31   :  { %p5850_p9 = pnand %p5849_p8, %p5843_p5 }
  0x33   :  { %5853 = shalt.err (!%p5850_p9)
}
  0x34   :  { %s5935_s5 = smov 64   ;;  %s5936_s24 = smov 4  }
  0x35   :  { %29 = dma.hbm_to_vmem [thread:$0]  %s7516_s0, 448, %s24_s16, [#allocation3], %s5935_s5, %s5935_s5, %s5936_s24  }
  0x36   :  { %s5937_s30 = smov [#allocation7]   ;;  %s5854_s10 = scalar_lea.hbm %s7519_s3, 8192 }
  0x37   :  { %s49_s11 = sshll.u32 %s5937_s30, 4  ;;  %p5855_p10 = scmp.ne.s32.totalorder %s7519_s3, %s5854_s10  ;;  %s50_s11 = int_to_ptr.vmem [resolvable:$true] %s49_s11 }
  0x38   :  { %p5858_p11 = scmp.lt.u32.totalorder %s5854_s10, %s7519_s3 }
  0x3a   :  { %p5860_p12 = pnand %p5858_p11, %p5855_p10 }
  0x3c   :  { %5863 = shalt.err (!%p5860_p12)
}
  0x3d   :  { %s5864_s18 = scalar_lea.vmem %s50_s11, 8192  ;;  %p5869_p0 = scmp.lt.s32.totalorder %s50_s11, %s50_s11 }
  0x3e   :  { %p5865_p13 = scmp.ne.s32.totalorder %s50_s11, %s5864_s18  ;;  %p5870_p1 = scmp.lt.s32.totalorder %s5864_s18, %s5864_s18 }
  0x40   :  { %p5871_p2 = por %p5870_p1, %p5869_p0 }
  0x42   :  { %p5872_p3 = pnand %p5871_p2, %p5865_p13 }
  0x44   :  { %5875 = shalt.err (!%p5872_p3)
}
  0x45   :  { %s5938_s0 = smov 256   ;;  %s5939_s16 = smov 16  }
  0x46   :  { %55 = dma.hbm_to_vmem [thread:$0]  %s7519_s3, 8192, %s50_s11, [#allocation6], %s5938_s0, %s5938_s0, %s5939_s16  }
  0x47   :  { %s5940_s23 = smov [#allocation10]   ;;  %s5876_s28 = scalar_lea.hbm %s7523_s7, 8192 }
  0x48   :  { %s77_s25 = sshll.u32 %s5940_s23, 4  ;;  %p5877_p4 = scmp.ne.s32.totalorder %s7523_s7, %s5876_s28  ;;  %s78_s25 = int_to_ptr.vmem [resolvable:$true] %s77_s25 }
  0x49   :  { %p5880_p5 = scmp.lt.u32.totalorder %s5876_s28, %s7523_s7 }
  0x4b   :  { %p5882_p6 = pnand %p5880_p5, %p5877_p4 }
  0x4d   :  { %5885 = shalt.err (!%p5882_p6)
}
  0x4e   :  { %s5886_s10 = scalar_lea.vmem %s78_s25, 8192  ;;  %p5891_p8 = scmp.lt.s32.totalorder %s78_s25, %s78_s25 }
  0x4f   :  { %p5887_p7 = scmp.ne.s32.totalorder %s78_s25, %s5886_s10  ;;  %p5892_p9 = scmp.lt.s32.totalorder %s5886_s10, %s5886_s10 }
  0x51   :  { %p5893_p10 = por %p5892_p9, %p5891_p8 }
  0x53   :  { %p5894_p11 = pnand %p5893_p10, %p5887_p7 }
  0x55   :  { %5897 = shalt.err (!%p5894_p11)
}
  0x56   :  { %83 = dma.hbm_to_vmem [thread:$0]  %s7523_s7, 8192, %s78_s25, [#allocation9], %s5935_s5, %s5935_s5, %s5936_s24  }
  0x57   :  { %5920 = dma.done.wait [#allocation3], 448  }
  0x58   :  { %5921 = vsyncadd [#allocation3], 4294966848 }
  0x59   :  { %5922 = dma.done.wait [#allocation6], 9216  }
  0x5a   :  { %5923 = vsyncadd [#allocation6], 4294958080 }
  0x5b   :  { %5924 = dma.done.wait [#allocation9], 40960  }
  0x5c   :  { %5925 = vsyncadd [#allocation9], 4294926336  ;;  %v5941_v0 = vmov 0   ;;  %v5416_v1 = vld [vmem:[#allocation5 + $0x4] ss:$8 sps:$4 sm:$0xff]   ;;  %vm187_vm0 = vcmask 523264  }
  0x5d   :  { %232 = vmatprep.mubr.bf16.mxu0 %v5941_v0  ;;  %v5418_v2 = vld [vmem:[#allocation5] ss:$8 sps:$4 sm:$0xff]   ;;  %200 = vmatprep.subr.bf16.mxu0 %v5416_v1  ;;  %v5419_v3 = vld [vmem:[#allocation5 + $0x14] ss:$8 sps:$4 sm:$0xff]   ;;  %v5421_v4 = vld [vmem:[#allocation5 + $0x10] ss:$8 sps:$4 sm:$0xff]  }
  0x5e   :  { %201 = vmatpush1.bf16.msra.mxu0 %v5418_v2  ;;  %v5422_v5 = vld [vmem:[#allocation5 + $0x24] ss:$8 sps:$4 sm:$0xff]   ;;  %v5424_v6 = vld [vmem:[#allocation5 + $0x20] ss:$8 sps:$4 sm:$0xff]   ;;  %v5425_v7 = vld [vmem:[#allocation5 + $0x34] ss:$8 sps:$4 sm:$0xff]  }
  0x5f   :  { %202 = vmatprep.subr.bf16.mxu0 %v5419_v3  ;;  %v5432_v8 = vld [vmem:[#allocation7 + $0x4] ss:$16 sps:$4 sm:$0xff]   ;;  %v5427_v9 = vld [vmem:[#allocation5 + $0x30] ss:$8 sps:$4 sm:$0xff]   ;;  %v5436_v10 = vld [vmem:[#allocation7 + $0xc] ss:$16 sps:$4 sm:$0xff]  }
  0x60   :  { %811 = vmatprep.subr.bf16.mxu1 %v5432_v8  ;;  %v5437_v11 = vld [vmem:[#allocation7] ss:$16 sps:$4 sm:$0xff]   ;;  %v5438_v12 = vld [vmem:[#allocation7 + $0x24] ss:$16 sps:$4 sm:$0xff]   ;;  %v5434_v14 = vld [vmem:[#allocation7 + $0x8] ss:$16 sps:$4 sm:$0xff]  }
  0x61   :  { %v5428_v13 = vld [vmem:[#allocation2] sm:$0xff]   ;;  %812 = vmatpush1.bf16.msra.mxu1 %v5437_v11  ;;  %v5443_v15 = vld [vmem:[#allocation7 + $0x20] ss:$16 sps:$4 sm:$0xff]   ;;  %v5442_v17 = vld [vmem:[#allocation7 + $0x2c] ss:$16 sps:$4 sm:$0xff]  }
  0x62   :  { %203 = vmatpush1.bf16.msra.mxu0 %v5421_v4  ;;  %813 = vmatprep.subr.bf16.mxu1 %v5438_v12  ;;  %v5444_v16 = vld [vmem:[#allocation7 + $0x44] ss:$16 sps:$4 sm:$0xff]   ;;  %v5449_v18 = vld [vmem:[#allocation7 + $0x40] ss:$16 sps:$4 sm:$0xff]   ;;  %v5440_v20 = vld [vmem:[#allocation7 + $0x28] ss:$16 sps:$4 sm:$0xff]  }
  0x63   :  { %204 = vmatprep.subr.bf16.mxu0 %v5422_v5  ;;  %v5450_v19 = vld [vmem:[#allocation7 + $0x64] ss:$16 sps:$4 sm:$0xff]   ;;  %v5448_v21 = vld [vmem:[#allocation7 + $0x4c] ss:$16 sps:$4 sm:$0xff]   ;;  %v5455_v23 = vld [vmem:[#allocation7 + $0x60] ss:$16 sps:$4 sm:$0xff]  }
  0x64   :  { %v5429_v22 = vld [vmem:[#allocation2 + $0x8] sm:$0xff]   ;;  %v5456_v24 = vld [vmem:[#allocation7 + $0x84] ss:$16 sps:$4 sm:$0xff]   ;;  %v5446_v25 = vld [vmem:[#allocation7 + $0x48] ss:$16 sps:$4 sm:$0xff]  }
  0x65   :  { %814 = vmatpush1.bf16.msra.mxu1 %v5443_v15  ;;  %v5454_v26 = vld [vmem:[#allocation7 + $0x6c] ss:$16 sps:$4 sm:$0xff]   ;;  %v5461_v27 = vld [vmem:[#allocation7 + $0x80] ss:$16 sps:$4 sm:$0xff]   ;;  %v5462_v28 = vld [vmem:[#allocation7 + $0xa4] ss:$16 sps:$4 sm:$0xff]  }
  0x66   :  { %205 = vmatpush1.bf16.msra.mxu0 %v5424_v6  ;;  %815 = vmatprep.subr.bf16.mxu1 %v5444_v16  ;;  %v5452_v29 = vld [vmem:[#allocation7 + $0x68] ss:$16 sps:$4 sm:$0xff]   ;;  %v5460_v31 = vld [vmem:[#allocation7 + $0x8c] ss:$16 sps:$4 sm:$0xff]   ;;  %v5467_v33 = vld [vmem:[#allocation7 + $0xa0] ss:$16 sps:$4 sm:$0xff]  }
  0x67   :  { %206 = vmatprep.subr.bf16.mxu0 %v5425_v7  ;;  %v5430_v30 = vld [vmem:[#allocation2 + $0x10] sm:$0xff]   ;;  %v5466_v34 = vld [vmem:[#allocation7 + $0xac] ss:$16 sps:$4 sm:$0xff]   ;;  %v5473_v36 = vld [vmem:[#allocation7 + $0xc0] ss:$16 sps:$4 sm:$0xff]  }
  0x68   :  { %v5458_v32 = vld [vmem:[#allocation7 + $0x88] ss:$16 sps:$4 sm:$0xff]   ;;  %v5468_v35 = vld [vmem:[#allocation7 + $0xc4] ss:$16 sps:$4 sm:$0xff]   ;;  %v5472_v39 = vld [vmem:[#allocation7 + $0xcc] ss:$16 sps:$4 sm:$0xff]  }
  0x69   :  { %816 = vmatpush1.bf16.msra.mxu1 %v5449_v18  ;;  %v5474_v37 = vld [vmem:[#allocation7 + $0xe4] ss:$16 sps:$4 sm:$0xff]   ;;  %v5464_v38 = vld [vmem:[#allocation7 + $0xa8] ss:$16 sps:$4 sm:$0xff]   ;;  %v5479_v40 = vld [vmem:[#allocation7 + $0xe0] ss:$16 sps:$4 sm:$0xff]  }
  0x6a   :  { %207 = vmatpush1.bf16.msra.mxu0 %v5427_v9  ;;  %817 = vmatprep.subr.bf16.mxu1 %v5450_v19  ;;  %v5431_v41 = vld [vmem:[#allocation2 + $0x18] ss:$0 sps:$4 sm:$0xff]   ;;  %v5470_v42 = vld [vmem:[#allocation7 + $0xc8] ss:$16 sps:$4 sm:$0xff]   ;;  %v5480_v45 = vld [vmem:[#allocation7 + $0x104] ss:$16 sps:$4 sm:$0xff]  }
  0x6b   :  { %882 = vmatprep.subr.bf16.mxu0 %v5436_v10  ;;  %v5478_v43 = vld [vmem:[#allocation7 + $0xec] ss:$16 sps:$4 sm:$0xff]   ;;  %v5476_v44 = vld [vmem:[#allocation7 + $0xe8] ss:$16 sps:$4 sm:$0xff]   ;;  %v5485_v48 = vld [vmem:[#allocation7 + $0x100] ss:$16 sps:$4 sm:$0xff]  }
  0x6c   :  { %v5484_v46 = vld [vmem:[#allocation7 + $0x10c] ss:$16 sps:$4 sm:$0xff]   ;;  %v5482_v47 = vld [vmem:[#allocation7 + $0x108] ss:$16 sps:$4 sm:$0xff]   ;;  %v5486_v49 = vld [vmem:[#allocation7 + $0x124] ss:$16 sps:$4 sm:$0xff]  }
  0x6d   :  { %4716 = vmatmul.mubr.msk.bf16.vlgmr.msra.gmra.mrb[0].mxu0 %vm187_vm0, %v5428_v13  ;;  %818 = vmatpush1.bf16.msra.mxu1 %v5455_v23  ;;  %v5490_v50 = vld [vmem:[#allocation7 + $0x12c] ss:$16 sps:$4 sm:$0xff]   ;;  %v5488_v51 = vld [vmem:[#allocation7 + $0x128] ss:$16 sps:$4 sm:$0xff]   ;;  %v5491_v52 = vld [vmem:[#allocation7 + $0x120] ss:$16 sps:$4 sm:$0xff]  }
  0x6e   :  { %242 = vmatprep.mubr.bf16.mxu0 %v5941_v0  ;;  %883 = vmatpush1.bf16.msra.mxu0 %v5434_v14  ;;  %v5492_v53 = vld [vmem:[#allocation7 + $0x144] ss:$16 sps:$4 sm:$0xff]   ;;  %v5496_v54 = vld [vmem:[#allocation7 + $0x14c] ss:$16 sps:$4 sm:$0xff]   ;;  %v5494_v55 = vld [vmem:[#allocation7 + $0x148] ss:$16 sps:$4 sm:$0xff]  }
  0x6f   :  { %884 = vmatprep.subr.bf16.mxu0 %v5442_v17  ;;  %819 = vmatprep.subr.bf16.mxu1 %v5456_v24  ;;  %v5497_v56 = vld [vmem:[#allocation7 + $0x140] ss:$16 sps:$4 sm:$0xff]   ;;  %v5498_v57 = vld [vmem:[#allocation7 + $0x164] ss:$16 sps:$4 sm:$0xff]   ;;  %v5502_v58 = vld [vmem:[#allocation7 + $0x16c] ss:$16 sps:$4 sm:$0xff]  }
  0x70   :  { %v5500_v59 = vld [vmem:[#allocation7 + $0x168] ss:$16 sps:$4 sm:$0xff]   ;;  %v5503_v60 = vld [vmem:[#allocation7 + $0x160] ss:$16 sps:$4 sm:$0xff]   ;;  %v5504_v61 = vld [vmem:[#allocation7 + $0x184] ss:$16 sps:$4 sm:$0xff]  }
  0x71   :  { %820 = vmatpush1.bf16.msra.mxu1 %v5461_v27  ;;  %v5508_v62 = vld [vmem:[#allocation7 + $0x18c] ss:$16 sps:$4 sm:$0xff]   ;;  %v5506_v63 = vld [vmem:[#allocation7 + $0x188] ss:$16 sps:$4 sm:$0xff]   ;;  %v5510_v1 = vld [vmem:[#allocation7 + $0x1a4] ss:$16 sps:$4 sm:$0xff]  }
  0x72   :  { %885 = vmatpush1.bf16.msra.mxu0 %v5440_v20  ;;  %821 = vmatprep.subr.bf16.mxu1 %v5462_v28  ;;  %v5514_v2 = vld [vmem:[#allocation7 + $0x1ac] ss:$16 sps:$4 sm:$0xff]   ;;  %v5512_v3 = vld [vmem:[#allocation7 + $0x1a8] ss:$16 sps:$4 sm:$0xff]   ;;  %v5515_v4 = vld [vmem:[#allocation7 + $0x1a0] ss:$16 sps:$4 sm:$0xff]  }
  0x73   :  { %886 = vmatprep.subr.bf16.mxu0 %v5448_v21  ;;  %v5516_v5 = vld [vmem:[#allocation7 + $0x1c4] ss:$16 sps:$4 sm:$0xff]   ;;  %v5520_v6 = vld [vmem:[#allocation7 + $0x1cc] ss:$16 sps:$4 sm:$0xff]   ;;  %v5518_v7 = vld [vmem:[#allocation7 + $0x1c8] ss:$16 sps:$4 sm:$0xff]   ;;  %v119_v21 = vlaneseq }
  0x74   :  { %v5521_v8 = vld [vmem:[#allocation7 + $0x1c0] ss:$16 sps:$4 sm:$0xff]   ;;  %v5522_v9 = vld [vmem:[#allocation7 + $0x1e4] ss:$16 sps:$4 sm:$0xff]   ;;  %v5526_v10 = vld [vmem:[#allocation7 + $0x1ec] ss:$16 sps:$4 sm:$0xff]  }
  0x75   :  { %4717 = vmatmul.mubr.msk.bf16.gmra.mrb[4].mxu0 %vm187_vm0, %v5429_v22  ;;  %822 = vmatpush1.bf16.msra.mxu1 %v5467_v33  ;;  %v5524_v11 = vld [vmem:[#allocation7 + $0x1e8] ss:$16 sps:$4 sm:$0xff]   ;;  %v5527_v12 = vld [vmem:[#allocation7 + $0x1e0] ss:$16 sps:$4 sm:$0xff]   ;;  %v6086_v22 = vshrl.u32 %v119_v21, 7 }
  0x76   :  { %252 = vmatprep.mubr.bf16.mxu0 %v5941_v0  ;;  %887 = vmatpush1.bf16.msra.mxu0 %v5446_v25  ;;  %v6070_v13 = vld [vmem:[#allocation8] sm:$0xff]  ;;  %v6074_v15 = vld [vmem:[#allocation8 + $0x8] sm:$0xff] }
  0x77   :  { %888 = vmatprep.subr.bf16.mxu0 %v5454_v26  ;;  %823 = vmatprep.subr.bf16.mxu1 %v5468_v35  ;;  %v6072_v14 = vld [vmem:[#allocation8 + $0x20] sm:$0xff]  ;;  %v6080_v18 = vld [vmem:[#allocation8 + $0x28] sm:$0xff]  ;;  %7576 = vst [vmem:[#allocation16_spill] sm:$0xff] %v6086_v22  ;;  %v6089_v23 = vsub.s32 0, %v6086_v22  ;;  %v6095_v25 = vsub.s32 1, %v6086_v22 }
  0x78   :  { %v4784_v16 = vcombine.low %v6070_v13, %v6072_v14  ;;  %v4785_v17 = vcombine.high %v6070_v13, %v6072_v14  ;;  %v4786_v19 = vcombine.low %v6074_v15, %v6080_v18  ;;  %v4787_v20 = vcombine.high %v6074_v15, %v6080_v18  ;;  %v117_v24 = vld [vmem:[%s7518_s2] sm:$0x3] }
  0x79   :  { %824 = vmatpush1.bf16.msra.mxu1 %v5473_v36  ;;  %7577 = vst [vmem:[#allocation17_spill] sm:$0xff] %v6089_v23  ;;  %7578 = vst [vmem:[#allocation18_spill] sm:$0xff] %v6095_v25  ;;  %v6098_v26 = vrot.slane %v117_v24, %v6089_v23  ;;  %v6101_v27 = vrot.slane %v117_v24, %v6095_v25  ;;  %v1249_v14 = vld [vmem:[#allocation8 + $0xe0] sm:$0xff] }
  0x7a   :  { %889 = vmatpush1.bf16.msra.mxu0 %v5452_v29  ;;  %825 = vmatprep.subr.bf16.mxu1 %v5474_v37 }
  0x7b   :  { %890 = vmatprep.subr.bf16.mxu0 %v5460_v31 }
  0x7d   :  { %4718 = vmatmul.mubr.msk.bf16.gmra.mrb[8].mxu0 %vm187_vm0, %v5430_v30  ;;  %826 = vmatpush1.bf16.msra.mxu1 %v5479_v40 }
  0x7e   :  { %262 = vmatprep.mubr.bf16.mxu0 %v5941_v0  ;;  %891 = vmatpush1.bf16.msra.mxu0 %v5458_v32  ;;  %v5509_v0 = vld [vmem:[#allocation7 + $0x180] ss:$16 sps:$4 sm:$0xff]  }
  0x7f   :  { %892 = vmatprep.subr.bf16.mxu0 %v5466_v34  ;;  %827 = vmatprep.subr.bf16.mxu1 %v5480_v45 }
  0x81   :  { %828 = vmatpush1.bf16.msra.mxu1 %v5485_v48 }
  0x82   :  { %893 = vmatpush1.bf16.msra.mxu0 %v5464_v38  ;;  %829 = vmatprep.subr.bf16.mxu1 %v5486_v49 }
  0x83   :  { %894 = vmatprep.subr.bf16.mxu0 %v5472_v39 }
  0x85   :  { %4719 = vmatmul.mubr.msk.bf16.gmra.mrb[12].mxu0 %vm187_vm0, %v5431_v41  ;;  %830 = vmatpush1.bf16.msra.mxu1 %v5491_v52 }
  0x86   :  { %895 = vmatpush1.bf16.msra.mxu0 %v5470_v42  ;;  %831 = vmatprep.subr.bf16.mxu1 %v5492_v53  ;;  %v6117_v42 = vld [vmem:[#allocation8 + $0x40] sm:$0xff] }
  0x87   :  { %896 = vmatprep.subr.bf16.mxu0 %v5478_v43  ;;  %v6119_v43 = vld [vmem:[#allocation8 + $0x60] sm:$0xff] }
  0x88   :  { %v4792_v53 = vcombine.low %v6117_v42, %v6119_v43 }
  0x89   :  { %832 = vmatpush1.bf16.msra.mxu1 %v5497_v56 }
  0x8a   :  { %897 = vmatpush1.bf16.msra.mxu0 %v5476_v44  ;;  %833 = vmatprep.subr.bf16.mxu1 %v5498_v57 }
  0x8b   :  { %898 = vmatprep.subr.bf16.mxu0 %v5484_v46 }
  0x8d   :  { %834 = vmatpush1.bf16.msra.mxu1 %v5503_v60 }
  0x8e   :  { %899 = vmatpush1.bf16.msra.mxu0 %v5482_v47  ;;  %835 = vmatprep.subr.bf16.mxu1 %v5504_v61 }
  0x8f   :  { %900 = vmatprep.subr.bf16.mxu0 %v5490_v50 }
  0x91   :  { %836 = vmatpush1.bf16.msra.mxu1 %v5509_v0 }
  0x92   :  { %901 = vmatpush1.bf16.msra.mxu0 %v5488_v51  ;;  %837 = vmatprep.subr.bf16.mxu1 %v5510_v1 }
  0x93   :  { %902 = vmatprep.subr.bf16.mxu0 %v5496_v54 }
  0x95   :  { %838 = vmatpush1.bf16.msra.mxu1 %v5515_v4  ;;  %v6147_v4 = vld [vmem:[#allocation8 + $0x48] sm:$0xff] }
  0x96   :  { %903 = vmatpush1.bf16.msra.mxu0 %v5494_v55  ;;  %839 = vmatprep.subr.bf16.mxu1 %v5516_v5  ;;  %v6149_v5 = vld [vmem:[#allocation8 + $0x68] sm:$0xff] }
  0x97   :  { %904 = vmatprep.subr.bf16.mxu0 %v5502_v58  ;;  %v4793_v58 = vcombine.high %v6117_v42, %v6119_v43  ;;  %v4794_v24 = vcombine.low %v6147_v4, %v6149_v5  ;;  %v1257_v43 = vld [vmem:[#allocation8 + $0x120] sm:$0xff] }
  0x99   :  { %840 = vmatpush1.bf16.msra.mxu1 %v5521_v8 }
  0x9a   :  { %905 = vmatpush1.bf16.msra.mxu0 %v5500_v59  ;;  %841 = vmatprep.subr.bf16.mxu1 %v5522_v9 }
  0x9b   :  { %906 = vmatprep.subr.bf16.mxu0 %v5508_v62 }
  0x9d   :  { %842 = vmatpush1.bf16.msra.mxu1 %v5527_v12  ;;  %v6155_v12 = vld [vmem:[#allocation8 + $0x80] sm:$0xff] }
  0x9e   :  { %907 = vmatpush1.bf16.msra.mxu0 %v5506_v63  ;;  %2799 = vmatprep.subr.bf16.mxu1 %v4785_v17  ;;  %v6157_v17 = vld [vmem:[#allocation8 + $0xa0] sm:$0xff] }
  0x9f   :  { %908 = vmatprep.subr.bf16.mxu0 %v5514_v2 }
  0xa2   :  { %909 = vmatpush1.bf16.msra.mxu0 %v5512_v3 }
  0xa3   :  { %910 = vmatprep.subr.bf16.mxu0 %v5520_v6 }
  0xa6   :  { %911 = vmatpush1.bf16.msra.mxu0 %v5518_v7 }
  0xa7   :  { %912 = vmatprep.subr.bf16.mxu0 %v5526_v10 }
  0xaa   :  { %913 = vmatpush1.bf16.msra.mxu0 %v5524_v11 }
  0xab   :  { %2941 = vmatprep.subr.bf16.mxu0 %v4787_v20 }
 0x140   :  { %v234_v28 = vpop.f32.mrb[0].mxu0 }
 0x141   :  { %v235_v29 = vadd.f32 %v234_v28, %v6098_v26  ;;  %v236_v30 = vpop.f32.mrb[1].mxu0 }
 0x142   :  { %v6105_v31 = vadd.f32 %v236_v30, %v6101_v27  ;;  %v238_v32 = vpop.f32.mrb[2].mxu0 }
 0x143   :  { %v285_v33 = vmul.f32 0.044715, %v235_v29  ;;  %v6108_v34 = vadd.f32 %v238_v32, %v6098_v26  ;;  %v240_v35 = vpop.f32.mrb[3].mxu0 }
 0x144   :  { %v286_v36 = vmul.f32 0.044715, %v6105_v31  ;;  %v6112_v37 = vadd.f32 %v240_v35, %v6101_v27 }
 0x145   :  { %v299_v38 = vmul.f32 %v285_v33, %v235_v29  ;;  %v287_v39 = vmul.f32 0.044715, %v6108_v34  ;;  %v4795_v33 = vcombine.high %v6147_v4, %v6149_v5  ;;  %v1258_v4 = vld [vmem:[#allocation8 + $0x128] sm:$0xff] }
 0x146   :  { %v300_v40 = vmul.f32 %v286_v36, %v6105_v31  ;;  %v288_v41 = vmul.f32 0.044715, %v6112_v37 }
 0x147   :  { %v313_v44 = vmul.f32 %v299_v38, %v235_v29  ;;  %v301_v45 = vmul.f32 %v287_v39, %v6108_v34  ;;  %v271_v39 = vmul.f32 0.5, %v235_v29 }
 0x148   :  { %v302_v46 = vmul.f32 %v288_v41, %v6112_v37  ;;  %v244_v47 = vpop.f32.mrb[4].mxu0  ;;  %v314_v48 = vmul.f32 %v300_v40, %v6105_v31  ;;  %v4801_v40 = vcombine.high %v6155_v12, %v6157_v17 }
 0x149   :  { %v315_v49 = vmul.f32 %v301_v45, %v6108_v34  ;;  %v6126_v50 = vadd.f32 %v244_v47, %v6098_v26  ;;  %v246_v51 = vpop.f32.mrb[5].mxu0  ;;  %v327_v52 = vadd.f32 %v313_v44, %v235_v29  ;;  %v272_v29 = vmul.f32 0.5, %v6105_v31 }
 0x14a   :  { %v6131_v54 = vadd.f32 %v246_v51, %v6101_v27  ;;  %v248_v55 = vpop.f32.mrb[6].mxu0  ;;  %v316_v56 = vmul.f32 %v302_v46, %v6112_v37  ;;  %v328_v57 = vadd.f32 %v314_v48, %v6105_v31 }
 0x14b   :  { %v289_v59 = vmul.f32 0.044715, %v6126_v50  ;;  %v6139_v60 = vadd.f32 %v248_v55, %v6098_v26  ;;  %v250_v61 = vpop.f32.mrb[7].mxu0  ;;  %v329_v62 = vadd.f32 %v315_v49, %v6108_v34  ;;  %v341_v63 = vmul.f32 0.7978846, %v327_v52 }
 0x14c   :  { %v290_v0 = vmul.f32 0.044715, %v6131_v54  ;;  %v6144_v1 = vadd.f32 %v250_v61, %v6101_v27  ;;  %v330_v2 = vadd.f32 %v316_v56, %v6112_v37  ;;  %v342_v3 = vmul.f32 0.7978846, %v328_v57 }
 0x14d   :  { %v303_v6 = vmul.f32 %v289_v59, %v6126_v50  ;;  %v291_v7 = vmul.f32 0.044715, %v6139_v60  ;;  %v343_v8 = vmul.f32 0.7978846, %v329_v62  ;;  %5592 = vtanh.f32 %v341_v63 }
 0x14e   :  { %v304_v9 = vmul.f32 %v290_v0, %v6131_v54  ;;  %v292_v10 = vmul.f32 0.044715, %v6144_v1  ;;  %v344_v11 = vmul.f32 0.7978846, %v330_v2  ;;  %5594 = vtanh.f32 %v342_v3 }
 0x14f   :  { %v317_v20 = vmul.f32 %v303_v6, %v6126_v50  ;;  %v305_v21 = vmul.f32 %v291_v7, %v6139_v60  ;;  %5596 = vtanh.f32 %v343_v8  ;;  %v274_v8 = vmul.f32 0.5, %v6112_v37 }
 0x150   :  { %v318_v28 = vmul.f32 %v304_v9, %v6131_v54  ;;  %v306_v30 = vmul.f32 %v292_v10, %v6144_v1  ;;  %v254_v32 = vpop.f32.mrb[8].mxu0  ;;  %5598 = vtanh.f32 %v344_v11  ;;  %v273_v9 = vmul.f32 0.5, %v6108_v34 }
 0x151   :  { %v319_v35 = vmul.f32 %v305_v21, %v6139_v60  ;;  %v6169_v36 = vadd.f32 %v254_v32, %v6098_v26  ;;  %v256_v38 = vpop.f32.mrb[9].mxu0  ;;  %v331_v47 = vadd.f32 %v317_v20, %v6126_v50 }
 0x152   :  { %v320_v41 = vmul.f32 %v306_v30, %v6144_v1  ;;  %v6175_v44 = vadd.f32 %v256_v38, %v6101_v27  ;;  %v258_v45 = vpop.f32.mrb[10].mxu0  ;;  %v332_v46 = vadd.f32 %v318_v28, %v6131_v54 }
 0x153   :  { %v293_v48 = vmul.f32 0.044715, %v6169_v36  ;;  %v6181_v49 = vadd.f32 %v258_v45, %v6098_v26  ;;  %v260_v51 = vpop.f32.mrb[11].mxu0  ;;  %v333_v52 = vadd.f32 %v319_v35, %v6139_v60  ;;  %v345_v63 = vmul.f32 0.7978846, %v331_v47 }
 0x154   :  { %v294_v55 = vmul.f32 0.044715, %v6175_v44  ;;  %v6187_v56 = vadd.f32 %v260_v51, %v6101_v27  ;;  %v334_v57 = vadd.f32 %v320_v41, %v6144_v1  ;;  %v346_v59 = vmul.f32 0.7978846, %v332_v46 }
 0x155   :  { %v307_v61 = vmul.f32 %v293_v48, %v6169_v36  ;;  %v295_v62 = vmul.f32 0.044715, %v6181_v49  ;;  %v347_v0 = vmul.f32 0.7978846, %v333_v52  ;;  %v276_v47 = vmul.f32 0.5, %v6131_v54 }
 0x156   :  { %v308_v2 = vmul.f32 %v294_v55, %v6175_v44  ;;  %v296_v31 = vmul.f32 0.044715, %v6187_v56  ;;  %v348_v3 = vmul.f32 0.7978846, %v334_v57  ;;  %5600 = vtanh.f32 %v346_v59 }
 0x157   :  { %v5593_v6 = vpop.eup %5592  ;;  %v309_v7 = vmul.f32 %v295_v62, %v6181_v49  ;;  %5602 = vtanh.f32 %v345_v63  ;;  %v321_v32 = vmul.f32 %v307_v61, %v6169_v36  ;;  %v280_v42 = vmul.f32 0.5, %v6175_v44 }
 0x158   :  { %v5595_v10 = vpop.eup %5594  ;;  %v322_v11 = vmul.f32 %v308_v2, %v6175_v44  ;;  %v310_v20 = vmul.f32 %v296_v31, %v6187_v56  ;;  %v264_v21 = vpop.f32.mrb[12].mxu0  ;;  %v369_v28 = vadd.f32 1.0, %v5593_v6  ;;  %5604 = vtanh.f32 %v348_v3 }
 0x159   :  { %v5597_v30 = vpop.eup %5596  ;;  %v6201_v35 = vadd.f32 %v264_v21, %v6098_v26  ;;  %v266_v38 = vpop.f32.mrb[13].mxu0  ;;  %v370_v41 = vadd.f32 1.0, %v5595_v10  ;;  %5606 = vtanh.f32 %v347_v0  ;;  %v323_v51 = vmul.f32 %v309_v7, %v6181_v49 }
 0x15a   :  { %v5599_v37 = vpop.eup %5598  ;;  %v324_v34 = vmul.f32 %v310_v20, %v6187_v56  ;;  %v6205_v45 = vadd.f32 %v266_v38, %v6101_v27  ;;  %v371_v46 = vadd.f32 1.0, %v5597_v30  ;;  %v268_v48 = vpop.f32.mrb[14].mxu0  ;;  %v383_v26 = vmul.f32 %v369_v28, %v271_v39  ;;  %v1238_v28 = vld [vmem:[#allocation8 + $0x88] sm:$0xff] }
 0x15b   :  { %v297_v52 = vmul.f32 0.044715, %v6201_v35  ;;  %v372_v55 = vadd.f32 1.0, %v5599_v37  ;;  %v269_v57 = vpop.f32.mrb[15].mxu0  ;;  %v336_v62 = vadd.f32 %v322_v11, %v6175_v44  ;;  %v384_v0 = vmul.f32 %v370_v41, %v272_v29  ;;  %v1242_v30 = vld [vmem:[#allocation8 + $0xa8] sm:$0xff] }
 0x15c   :  { %v298_v59 = vmul.f32 0.044715, %v6205_v45  ;;  %v385_v61 = vmul.f32 %v371_v46, %v273_v9  ;;  %v338_v63 = vadd.f32 %v324_v34, %v6187_v56  ;;  %v335_v54 = vadd.f32 %v321_v32, %v6169_v36 }
 0x15d   :  { %v311_v27 = vmul.f32 %v297_v52, %v6201_v35  ;;  %v386_v2 = vmul.f32 %v372_v55, %v274_v8  ;;  %v350_v6 = vmul.f32 0.7978846, %v336_v62  ;;  %v278_v10 = vmul.f32 0.5, %v6144_v1 }
 0x15e   :  { %v312_v31 = vmul.f32 %v298_v59, %v6205_v45  ;;  %v397_v3 = vpack.c.bf16 %v385_v61, %v383_v26  ;;  %v352_v7 = vmul.f32 0.7978846, %v338_v63  ;;  %v337_v9 = vadd.f32 %v323_v51, %v6181_v49  ;;  %v1250_v61 = vld [vmem:[#allocation8 + $0xe8] sm:$0xff] }
 0x15f   :  { %v398_v39 = vpack.c.bf16 %v386_v2, %v384_v0  ;;  %v349_v20 = vmul.f32 0.7978846, %v335_v54  ;;  %v275_v21 = vmul.f32 0.5, %v6126_v50  ;;  %5608 = vtanh.f32 %v350_v6 }
 0x160   :  { %v5601_v11 = vpop.eup %5600  ;;  %v326_v29 = vmul.f32 %v312_v31, %v6205_v45  ;;  %v325_v8 = vmul.f32 %v311_v27, %v6201_v35  ;;  %v277_v41 = vmul.f32 0.5, %v6139_v60  ;;  %5610 = vtanh.f32 %v352_v7  ;;  %v1253_v27 = vld [vmem:[#allocation8 + $0x100] sm:$0xff] }
 0x161   :  { %v5603_v32 = vpop.eup %5602  ;;  %843 = vmatprep.mubr.bf16.mxu1 %v398_v39  ;;  %914 = vmatprep.mubr.bf16.mxu0 %v398_v39  ;;  %v374_v38 = vadd.f32 1.0, %v5601_v11  ;;  %v351_v1 = vmul.f32 0.7978846, %v337_v9  ;;  %5612 = vtanh.f32 %v349_v20  ;;  %v4803_v60 = vcombine.high %v1238_v28, %v1242_v30  ;;  %v1265_v11 = vld [vmem:[#allocation8 + $0x160] sm:$0xff] }
 0x162   :  { %v5605_v37 = vpop.eup %5604  ;;  %844 = vmatmul.mubr.bf16.vlgmr.msra.gmra.mrb[0].mxu1 %v397_v3  ;;  %915 = vmatmul.mubr.bf16.vlgmr.msra.gmra.mrb[16].mxu0 %v397_v3  ;;  %v373_v34 = vadd.f32 1.0, %v5603_v32  ;;  %v340_v50 = vadd.f32 %v326_v29, %v6205_v45  ;;  %v339_v46 = vadd.f32 %v325_v8, %v6201_v35  ;;  %v281_v44 = vmul.f32 0.5, %v6181_v49 }
 0x163   :  { %v5607_v48 = vpop.eup %5606  ;;  %v376_v51 = vadd.f32 1.0, %v5605_v37  ;;  %v388_v52 = vmul.f32 %v374_v38, %v276_v47  ;;  %5614 = vtanh.f32 %v351_v1  ;;  %2800 = vmatpush1.bf16.msra.mxu1 %v4784_v16  ;;  %2942 = vmatpush1.bf16.msra.mxu0 %v4786_v19  ;;  %v1245_v47 = vld [vmem:[#allocation8 + $0xc0] sm:$0xff]  ;;  %v1246_v16 = vld [vmem:[#allocation8 + $0xc8] sm:$0xff]  ;;  %v4800_v19 = vcombine.low %v6155_v12, %v6157_v17 }
 0x164   :  { %v375_v55 = vadd.f32 1.0, %v5607_v48  ;;  %v387_v26 = vmul.f32 %v373_v34, %v275_v21  ;;  %v354_v57 = vmul.f32 0.7978846, %v340_v50  ;;  %v353_v59 = vmul.f32 0.7978846, %v339_v46  ;;  %2801 = vmatprep.subr.bf16.mxu1 %v4793_v58  ;;  %2943 = vmatprep.subr.bf16.mxu0 %v4795_v33  ;;  %v1266_v21 = vld [vmem:[#allocation8 + $0x168] sm:$0xff] }
 0x165   :  { %v390_v13 = vmul.f32 %v376_v51, %v278_v10  ;;  %v4802_v58 = vcombine.low %v1238_v28, %v1242_v30  ;;  %v4809_v62 = vcombine.high %v1245_v47, %v1249_v14  ;;  %v4811_v63 = vcombine.high %v1246_v16, %v1250_v61  ;;  %v1269_v46 = vld [vmem:[#allocation8 + $0x180] sm:$0xff] }
 0x166   :  { %v389_v15 = vmul.f32 %v375_v55, %v277_v41  ;;  %5616 = vtanh.f32 %v354_v57  ;;  %v279_v12 = vmul.f32 0.5, %v6169_v36  ;;  %v4808_v17 = vcombine.low %v1245_v47, %v1249_v14  ;;  %v1262_v36 = vld [vmem:[#allocation8 + $0x148] sm:$0xff]  ;;  %v1273_v51 = vld [vmem:[#allocation8 + $0x1a0] sm:$0xff] }
 0x167   :  { %v400_v18 = vpack.c.bf16 %v390_v13, %v388_v52  ;;  %5618 = vtanh.f32 %v353_v59  ;;  %2802 = vmatpush1.bf16.msra.mxu1 %v4792_v53  ;;  %2944 = vmatpush1.bf16.msra.mxu0 %v4794_v24  ;;  %v1254_v53 = vld [vmem:[#allocation8 + $0x108] sm:$0xff]  ;;  %v282_v24 = vmul.f32 0.5, %v6187_v56  ;;  %v4817_v3 = vcombine.high %v1253_v27, %v1257_v43  ;;  %v1261_v56 = vld [vmem:[#allocation8 + $0x140] sm:$0xff] }
 0x168   :  { %v399_v33 = vpack.c.bf16 %v389_v15, %v387_v26  ;;  %2803 = vmatprep.subr.bf16.mxu1 %v4801_v40  ;;  %2945 = vmatprep.subr.bf16.mxu0 %v4803_v60  ;;  %v4810_v40 = vcombine.low %v1246_v16, %v1250_v61  ;;  %v4819_v6 = vcombine.high %v1254_v53, %v1258_v4  ;;  %v284_v8 = vmul.f32 0.5, %v6205_v45  ;;  %v1270_v52 = vld [vmem:[#allocation8 + $0x188] sm:$0xff]  ;;  %v1277_v14 = vld [vmem:[#allocation8 + $0x1c0] sm:$0xff] }
 0x169   :  { %853 = vmatprep.mubr.bf16.mxu1 %v400_v18  ;;  %924 = vmatprep.mubr.bf16.mxu0 %v400_v18  ;;  %v5609_v5 = vpop.eup %5608  ;;  %v4816_v28 = vcombine.low %v1253_v27, %v1257_v43  ;;  %v4818_v49 = vcombine.low %v1254_v53, %v1258_v4  ;;  %v283_v41 = vmul.f32 0.5, %v6201_v35  ;;  %v4825_v34 = vcombine.high %v1261_v56, %v1265_v11  ;;  %v1274_v60 = vld [vmem:[#allocation8 + $0x1a8] sm:$0xff]  ;;  %v1281_v16 = vld [vmem:[#allocation8 + $0x1e0] sm:$0xff] }
 0x16a   :  { %854 = vmatmul.mubr.bf16.gmra.mrb[4].mxu1 %v399_v33  ;;  %925 = vmatmul.mubr.bf16.gmra.mrb[20].mxu0 %v399_v33  ;;  %v5611_v0 = vpop.eup %5610  ;;  %v378_v2 = vadd.f32 1.0, %v5609_v5  ;;  %v4827_v50 = vcombine.high %v1262_v36, %v1266_v21  ;;  %v4824_v26 = vcombine.low %v1261_v56, %v1265_v11  ;;  %v4826_v57 = vcombine.low %v1262_v36, %v1266_v21  ;;  %v1278_v61 = vld [vmem:[#allocation8 + $0x1c8] sm:$0xff]  ;;  %v1289_v43 = vld [vmem:[#allocation8 + $0x220] sm:$0xff] }
 0x16b   :  { %2804 = vmatpush1.bf16.msra.mxu1 %v4800_v19  ;;  %2946 = vmatpush1.bf16.msra.mxu0 %v4802_v58  ;;  %v5613_v54 = vpop.eup %5612  ;;  %v380_v31 = vadd.f32 1.0, %v5611_v0  ;;  %v4833_v47 = vcombine.high %v1269_v46, %v1273_v51  ;;  %v4835_v13 = vcombine.high %v1270_v52, %v1274_v60  ;;  %v1282_v15 = vld [vmem:[#allocation8 + $0x1e8] sm:$0xff]  ;;  %v4832_v19 = vcombine.low %v1269_v46, %v1273_v51  ;;  %v1309_v21 = vld [vmem:[#allocation8 + $0x2c0] sm:$0xff] }
 0x16c   :  { %2805 = vmatprep.subr.bf16.mxu1 %v4809_v62  ;;  %2947 = vmatprep.subr.bf16.mxu0 %v4811_v63  ;;  %v392_v39 = vmul.f32 %v378_v2, %v280_v42  ;;  %v377_v10 = vadd.f32 1.0, %v5613_v54  ;;  %v4834_v58 = vcombine.low %v1270_v52, %v1274_v60  ;;  %v4841_v33 = vcombine.high %v1277_v14, %v1281_v16  ;;  %v1285_v42 = vld [vmem:[#allocation8 + $0x200] sm:$0xff]  ;;  %v1286_v53 = vld [vmem:[#allocation8 + $0x208] sm:$0xff] }
 0x16d   :  { %v5615_v7 = vpop.eup %5614  ;;  %v394_v9 = vmul.f32 %v380_v31, %v282_v24  ;;  %v4843_v62 = vcombine.high %v1278_v61, %v1282_v15  ;;  %v4840_v63 = vcombine.low %v1277_v14, %v1281_v16  ;;  %v4842_v27 = vcombine.low %v1278_v61, %v1282_v15  ;;  %v1290_v5 = vld [vmem:[#allocation8 + $0x228] sm:$0xff]  ;;  %v1325_v51 = vld [vmem:[#allocation8 + $0x340] sm:$0xff] }
 0x16e   :  { %v379_v20 = vadd.f32 1.0, %v5615_v7  ;;  %v391_v29 = vmul.f32 %v377_v10, %v279_v12  ;;  %v4849_v4 = vcombine.high %v1285_v42, %v1289_v43  ;;  %v4848_v24 = vcombine.low %v1285_v42, %v1289_v43  ;;  %v1293_v12 = vld [vmem:[#allocation8 + $0x240] sm:$0xff]  ;;  %v1298_v31 = vld [vmem:[#allocation8 + $0x268] sm:$0xff] }
 0x16f   :  { %2806 = vmatpush1.bf16.msra.mxu1 %v4808_v17  ;;  %2948 = vmatpush1.bf16.msra.mxu0 %v4810_v40  ;;  %v402_v32 = vpack.c.bf16 %v394_v9, %v392_v39  ;;  %v4850_v0 = vcombine.low %v1286_v53, %v1290_v5  ;;  %v4851_v2 = vcombine.high %v1286_v53, %v1290_v5  ;;  %v1297_v17 = vld [vmem:[#allocation8 + $0x260] sm:$0xff]  ;;  %v1294_v40 = vld [vmem:[#allocation8 + $0x248] sm:$0xff] }
 0x170   :  { %v5617_v30 = vpop.eup %5616  ;;  %v393_v38 = vmul.f32 %v379_v20, %v281_v44  ;;  %2807 = vmatprep.subr.bf16.mxu1 %v4817_v3  ;;  %2949 = vmatprep.subr.bf16.mxu0 %v4819_v6  ;;  %v4857_v54 = vcombine.high %v1293_v12, %v1297_v17  ;;  %v4856_v44 = vcombine.low %v1293_v12, %v1297_v17  ;;  %v1301_v7 = vld [vmem:[#allocation8 + $0x280] sm:$0xff]  ;;  %v1302_v10 = vld [vmem:[#allocation8 + $0x288] sm:$0xff] }
 0x171   :  { %v5619_v1 = vpop.eup %5618  ;;  %v382_v37 = vadd.f32 1.0, %v5617_v30  ;;  %863 = vmatprep.mubr.bf16.mxu1 %v402_v32  ;;  %934 = vmatprep.mubr.bf16.mxu0 %v402_v32  ;;  %v4858_v3 = vcombine.low %v1294_v40, %v1298_v31  ;;  %v4859_v6 = vcombine.high %v1294_v40, %v1298_v31  ;;  %v1305_v39 = vld [vmem:[#allocation8 + $0x2a0] sm:$0xff]  ;;  %v1306_v9 = vld [vmem:[#allocation8 + $0x2a8] sm:$0xff] }
 0x172   :  { %v401_v48 = vpack.c.bf16 %v393_v38, %v391_v29  ;;  %v381_v45 = vadd.f32 1.0, %v5619_v1  ;;  %v4865_v56 = vcombine.high %v1301_v7, %v1305_v39  ;;  %v4864_v20 = vcombine.low %v1301_v7, %v1305_v39  ;;  %v1313_v29 = vld [vmem:[#allocation8 + $0x2e0] sm:$0xff]  ;;  %v1326_v60 = vld [vmem:[#allocation8 + $0x348] sm:$0xff] }
 0x173   :  { %v396_v55 = vmul.f32 %v382_v37, %v284_v8  ;;  %2808 = vmatpush1.bf16.msra.mxu1 %v4816_v28  ;;  %2950 = vmatpush1.bf16.msra.mxu0 %v4818_v49  ;;  %v4866_v11 = vcombine.low %v1302_v10, %v1306_v9  ;;  %v4867_v36 = vcombine.high %v1302_v10, %v1306_v9  ;;  %v1310_v8 = vld [vmem:[#allocation8 + $0x2c8] sm:$0xff]  ;;  %v1321_v1 = vld [vmem:[#allocation8 + $0x320] sm:$0xff] }
 0x174   :  { %864 = vmatmul.mubr.bf16.gmra.mrb[8].mxu1 %v401_v48  ;;  %935 = vmatmul.mubr.bf16.gmra.mrb[24].mxu0 %v401_v48  ;;  %v395_v35 = vmul.f32 %v381_v45, %v283_v41  ;;  %v4873_v28 = vcombine.high %v1309_v21, %v1313_v29  ;;  %v1314_v49 = vld [vmem:[#allocation8 + $0x2e8] sm:$0xff]  ;;  %v4872_v30 = vcombine.low %v1309_v21, %v1313_v29  ;;  %v1317_v41 = vld [vmem:[#allocation8 + $0x300] sm:$0xff] }
 0x175   :  { %v404_v59 = vpack.c.bf16 %v396_v55, %v396_v55  ;;  %2809 = vmatprep.subr.bf16.mxu1 %v4825_v34  ;;  %2951 = vmatprep.subr.bf16.mxu0 %v4827_v50  ;;  %v4874_v32 = vcombine.low %v1310_v8, %v1314_v49  ;;  %v4875_v38 = vcombine.high %v1310_v8, %v1314_v49  ;;  %v1318_v37 = vld [vmem:[#allocation8 + $0x308] sm:$0xff]  ;;  %v1329_v52 = vld [vmem:[#allocation8 + $0x360] sm:$0xff] }
 0x176   :  { %v403_v18 = vpack.c.bf16 %v395_v35, %v395_v35  ;;  %v4881_v34 = vcombine.high %v1317_v41, %v1321_v1  ;;  %v1322_v50 = vld [vmem:[#allocation8 + $0x328] sm:$0xff]  ;;  %v4880_v46 = vcombine.low %v1317_v41, %v1321_v1  ;;  %v4889_v55 = vcombine.high %v1325_v51, %v1329_v52  ;;  %v6255_v5 = vld [vmem:[#allocation8 + $0x420] sm:$0xff] }
 0x177   :  { %873 = vmatprep.mubr.bf16.mxu1 %v404_v59  ;;  %944 = vmatprep.mubr.bf16.mxu0 %v404_v59  ;;  %v4882_v48 = vcombine.low %v1318_v37, %v1322_v50  ;;  %v4883_v45 = vcombine.high %v1318_v37, %v1322_v50  ;;  %v1330_v35 = vld [vmem:[#allocation8 + $0x368] sm:$0xff]  ;;  %v469_v31 = vld [vmem:[%s7520_s4] sm:$0xf] }
 0x178   :  { %2810 = vmatpush1.bf16.msra.mxu1 %v4824_v26  ;;  %2952 = vmatpush1.bf16.msra.mxu0 %v4826_v57  ;;  %v4888_v26 = vcombine.low %v1325_v51, %v1329_v52  ;;  %v4890_v57 = vcombine.low %v1326_v60, %v1330_v35  ;;  %v4891_v59 = vcombine.high %v1326_v60, %v1330_v35  ;;  %v1334_v14 = vld [vmem:[#allocation8 + $0x388] sm:$0xff]  ;;  %v6288_v10 = vld [vmem:[#allocation8 + $0x440] sm:$0xff] }
 0x179   :  { %2811 = vmatprep.subr.bf16.mxu1 %v4833_v47  ;;  %2953 = vmatprep.subr.bf16.mxu0 %v4835_v13  ;;  %v1333_v47 = vld [vmem:[#allocation8 + $0x380] sm:$0xff]  ;;  %v1338_v61 = vld [vmem:[#allocation8 + $0x3a8] sm:$0xff]  ;;  %v6282_v7 = vrot.slane %v469_v31, %v6095_v25 }
 0x17a   :  { %v1337_v13 = vld [vmem:[#allocation8 + $0x3a0] sm:$0xff]  ;;  %v6263_v12 = vld [vmem:[#allocation8 + $0x428] sm:$0xff] }
 0x17b   :  { %v4897_v16 = vcombine.high %v1333_v47, %v1337_v13  ;;  %v4896_v15 = vcombine.low %v1333_v47, %v1337_v13  ;;  %v6441_v1 = vld [vmem:[#allocation8 + $0x4c0] sm:$0xff] }
 0x17c   :  { %874 = vmatmul.mubr.bf16.gmra.mrb[12].mxu1 %v403_v18  ;;  %945 = vmatmul.mubr.bf16.gmra.mrb[28].mxu0 %v403_v18  ;;  %v4898_v18 = vcombine.low %v1334_v14, %v1338_v61  ;;  %7587 = vst [vmem:[#allocation27_spill] sm:$0xff] %v6441_v1  ;;  %v6443_v17 = vld [vmem:[#allocation8 + $0x4e0] sm:$0xff] }
 0x17d   :  { %2812 = vmatpush1.bf16.msra.mxu1 %v4832_v19  ;;  %2954 = vmatpush1.bf16.msra.mxu0 %v4834_v58  ;;  %v4899_v19 = vcombine.high %v1334_v14, %v1338_v61  ;;  %v1341_v58 = vld [vmem:[#allocation8 + $0x3c0] sm:$0xff]  ;;  %7588 = vst [vmem:[#allocation28_spill] sm:$0xff] %v6443_v17 }
 0x17e   :  { %2813 = vmatprep.subr.bf16.mxu1 %v4841_v33  ;;  %2955 = vmatprep.subr.bf16.mxu0 %v4843_v62  ;;  %v1345_v33 = vld [vmem:[#allocation8 + $0x3e0] sm:$0xff]  ;;  %v1342_v62 = vld [vmem:[#allocation8 + $0x3c8] sm:$0xff] }
 0x17f   :  { %v4904_v42 = vcombine.low %v1341_v58, %v1345_v33 }
 0x181   :  { %2814 = vmatpush1.bf16.msra.mxu1 %v4840_v63  ;;  %2956 = vmatpush1.bf16.msra.mxu0 %v4842_v27  ;;  %v4905_v63 = vcombine.high %v1341_v58, %v1345_v33  ;;  %v1346_v27 = vld [vmem:[#allocation8 + $0x3e8] sm:$0xff] }
 0x182   :  { %2815 = vmatprep.subr.bf16.mxu1 %v4849_v4  ;;  %2957 = vmatprep.subr.bf16.mxu0 %v4851_v2  ;;  %v4906_v43 = vcombine.low %v1342_v62, %v1346_v27  ;;  %v4907_v53 = vcombine.high %v1342_v62, %v1346_v27  ;;  %v6253_v4 = vld [vmem:[#allocation8 + $0x400] sm:$0xff] }
 0x183   :  { %v4913_v2 = vcombine.high %v6253_v4, %v6255_v5 }
 0x185   :  { %2816 = vmatpush1.bf16.msra.mxu1 %v4848_v24  ;;  %2958 = vmatpush1.bf16.msra.mxu0 %v4850_v0  ;;  %v6257_v24 = vld [vmem:[#allocation8 + $0x408] sm:$0xff] }
 0x186   :  { %2817 = vmatprep.subr.bf16.mxu1 %v4857_v54  ;;  %2959 = vmatprep.subr.bf16.mxu0 %v4859_v6  ;;  %v4915_v40 = vcombine.high %v6257_v24, %v6263_v12  ;;  %v7527_v54 = vsub.s32 2, %v6086_v22 }
 0x188   :  { %v6279_v6 = vrot.slane %v469_v31, %v7527_v54 }
 0x189   :  { %2818 = vmatpush1.bf16.msra.mxu1 %v4856_v44  ;;  %2960 = vmatpush1.bf16.msra.mxu0 %v4858_v3  ;;  %v7526_v44 = vsub.s32 3, %v6086_v22  ;;  %v6275_v3 = vrot.slane %v469_v31, %v6089_v23 }
 0x18a   :  { %2819 = vmatprep.subr.bf16.mxu1 %v4865_v56  ;;  %2961 = vmatprep.subr.bf16.mxu0 %v4867_v36  ;;  %7579 = vst [vmem:[#allocation19_spill] sm:$0xff] %v6279_v6  ;;  %v6290_v56 = vld [vmem:[#allocation8 + $0x460] sm:$0xff]  ;;  %v6294_v36 = vld [vmem:[#allocation8 + $0x468] sm:$0xff] }
 0x18b   :  { %v6286_v39 = vrot.slane %v469_v31, %v7526_v44 }
 0x18d   :  { %2820 = vmatpush1.bf16.msra.mxu1 %v4864_v20  ;;  %2962 = vmatpush1.bf16.msra.mxu0 %v4866_v11  ;;  %7580 = vst [vmem:[#allocation20_spill] sm:$0xff] %v6286_v39  ;;  %v6292_v11 = vld [vmem:[#allocation8 + $0x448] sm:$0xff] }
 0x18e   :  { %2821 = vmatprep.subr.bf16.mxu1 %v4873_v28  ;;  %2963 = vmatprep.subr.bf16.mxu0 %v4875_v38 }
 0x191   :  { %2822 = vmatpush1.bf16.msra.mxu1 %v4872_v30  ;;  %2964 = vmatpush1.bf16.msra.mxu0 %v4874_v32 }
 0x192   :  { %2823 = vmatprep.subr.bf16.mxu1 %v4881_v34  ;;  %2965 = vmatprep.subr.bf16.mxu0 %v4883_v45  ;;  %v6320_v45 = vld [vmem:[#allocation8 + $0x4a0] sm:$0xff] }
 0x195   :  { %2824 = vmatpush1.bf16.msra.mxu1 %v4880_v46  ;;  %2966 = vmatpush1.bf16.msra.mxu0 %v4882_v48  ;;  %v6318_v48 = vld [vmem:[#allocation8 + $0x480] sm:$0xff] }
 0x196   :  { %2825 = vmatprep.subr.bf16.mxu1 %v4889_v55  ;;  %2967 = vmatprep.subr.bf16.mxu0 %v4891_v59 }
 0x199   :  { %2826 = vmatpush1.bf16.msra.mxu1 %v4888_v26  ;;  %2968 = vmatpush1.bf16.msra.mxu0 %v4890_v57 }
 0x19a   :  { %2827 = vmatprep.subr.bf16.mxu1 %v4897_v16  ;;  %2969 = vmatprep.subr.bf16.mxu0 %v4899_v19 }
 0x19d   :  { %2828 = vmatpush1.bf16.msra.mxu1 %v4896_v15  ;;  %2970 = vmatpush1.bf16.msra.mxu0 %v4898_v18 }
 0x19e   :  { %2829 = vmatprep.subr.bf16.mxu1 %v4905_v63  ;;  %2971 = vmatprep.subr.bf16.mxu0 %v4907_v53 }
 0x1a1   :  { %2830 = vmatpush1.bf16.msra.mxu1 %v4904_v42  ;;  %2972 = vmatpush1.bf16.msra.mxu0 %v4906_v43 }
 0x1a2   :  { %2870 = vmatprep.subr.bf16.mxu1 %v4913_v2  ;;  %3012 = vmatprep.subr.bf16.mxu0 %v4915_v40 }
 0x235   :  { %v845_v9 = vpop.f32.mrb[0].mxu1  ;;  %v916_v20 = vpop.f32.mrb[16].mxu0 }
 0x236   :  { %v6297_v21 = vadd.f32 %v845_v9, %v6275_v3  ;;  %v6300_v29 = vadd.f32 %v916_v20, %v6279_v6  ;;  %v847_v8 = vpop.f32.mrb[1].mxu1  ;;  %v918_v28 = vpop.f32.mrb[17].mxu0 }
 0x237   :  { %v6303_v49 = vadd.f32 %v847_v8, %v6282_v7  ;;  %v6306_v30 = vadd.f32 %v918_v28, %v6286_v39  ;;  %v849_v32 = vpop.f32.mrb[2].mxu1  ;;  %v920_v38 = vpop.f32.mrb[18].mxu0  ;;  %v6356_v28 = vld [vmem:[#allocation8 + $0x488] sm:$0xff] }
 0x238   :  { %v981_v37 = vmul.f32 0.044715, %v6297_v21  ;;  %v983_v34 = vmul.f32 0.044715, %v6300_v29  ;;  %v6325_v60 = vadd.f32 %v849_v32, %v6275_v3  ;;  %v6328_v55 = vadd.f32 %v920_v38, %v6279_v6  ;;  %v851_v35 = vpop.f32.mrb[3].mxu1  ;;  %v922_v26 = vpop.f32.mrb[19].mxu0 }
 0x239   :  { %v982_v51 = vmul.f32 0.044715, %v6303_v49  ;;  %v984_v52 = vmul.f32 0.044715, %v6306_v30  ;;  %v6333_v47 = vadd.f32 %v851_v35, %v6282_v7  ;;  %v6336_v13 = vadd.f32 %v922_v26, %v6286_v39  ;;  %v6358_v32 = vld [vmem:[#allocation8 + $0x4a8] sm:$0xff] }
 0x23a   :  { %v1009_v57 = vmul.f32 %v981_v37, %v6297_v21  ;;  %v1011_v59 = vmul.f32 %v983_v34, %v6300_v29  ;;  %v985_v61 = vmul.f32 0.044715, %v6325_v60  ;;  %v987_v58 = vmul.f32 0.044715, %v6328_v55  ;;  %7581 = vst [vmem:[#allocation21_spill] sm:$0xff] %v6358_v32 }
 0x23b   :  { %v1010_v14 = vmul.f32 %v982_v51, %v6303_v49  ;;  %v1012_v16 = vmul.f32 %v984_v52, %v6306_v30  ;;  %v986_v42 = vmul.f32 0.044715, %v6333_v47  ;;  %v988_v9 = vmul.f32 0.044715, %v6336_v13 }
 0x23c   :  { %v1037_v18 = vmul.f32 %v1009_v57, %v6297_v21  ;;  %v1039_v19 = vmul.f32 %v1011_v59, %v6300_v29  ;;  %v1013_v27 = vmul.f32 %v985_v61, %v6325_v60  ;;  %v1015_v31 = vmul.f32 %v987_v58, %v6328_v55 }
 0x23d   :  { %v1038_v62 = vmul.f32 %v1010_v14, %v6303_v49  ;;  %v1040_v63 = vmul.f32 %v1012_v16, %v6306_v30  ;;  %v855_v43 = vpop.f32.mrb[4].mxu1  ;;  %v926_v53 = vpop.f32.mrb[20].mxu0  ;;  %v1014_v51 = vmul.f32 %v986_v42, %v6333_v47  ;;  %v1016_v14 = vmul.f32 %v988_v9, %v6336_v13 }
 0x23e   :  { %v1065_v2 = vadd.f32 %v1037_v18, %v6297_v21  ;;  %v1067_v40 = vadd.f32 %v1039_v19, %v6300_v29  ;;  %v857_v20 = vpop.f32.mrb[5].mxu1  ;;  %v928_v8 = vpop.f32.mrb[21].mxu0  ;;  %v1041_v34 = vmul.f32 %v1013_v27, %v6325_v60  ;;  %v1043_v59 = vmul.f32 %v1015_v31, %v6328_v55 }
 0x23f   :  { %v1066_v38 = vadd.f32 %v1038_v62, %v6303_v49  ;;  %v1068_v37 = vadd.f32 %v1040_v63, %v6306_v30  ;;  %v859_v52 = vpop.f32.mrb[6].mxu1  ;;  %v930_v35 = vpop.f32.mrb[22].mxu0  ;;  %v1042_v58 = vmul.f32 %v1014_v51, %v6333_v47  ;;  %v1044_v42 = vmul.f32 %v1016_v14, %v6336_v13 }
 0x240   :  { %v1093_v26 = vmul.f32 0.7978846, %v1065_v2  ;;  %v1095_v57 = vmul.f32 0.7978846, %v1067_v40  ;;  %v861_v16 = vpop.f32.mrb[7].mxu1  ;;  %v932_v61 = vpop.f32.mrb[23].mxu0  ;;  %v1069_v19 = vadd.f32 %v1041_v34, %v6325_v60  ;;  %v1071_v27 = vadd.f32 %v1043_v59, %v6328_v55 }
 0x241   :  { %v1094_v18 = vmul.f32 0.7978846, %v1066_v38  ;;  %v1096_v63 = vmul.f32 0.7978846, %v1068_v37  ;;  %v6373_v2 = vadd.f32 %v855_v43, %v6275_v3  ;;  %v1070_v31 = vadd.f32 %v1042_v58, %v6333_v47 }
 0x242   :  { %5620 = vtanh.f32 %v1093_v26  ;;  %v1097_v40 = vmul.f32 0.7978846, %v1069_v19  ;;  %v6377_v9 = vadd.f32 %v926_v53, %v6279_v6  ;;  %v1072_v38 = vadd.f32 %v1044_v42, %v6336_v13 }
 0x243   :  { %5622 = vtanh.f32 %v1095_v57  ;;  %v989_v34 = vmul.f32 0.044715, %v6373_v2  ;;  %v1099_v51 = vmul.f32 0.7978846, %v1071_v27  ;;  %v6385_v26 = vadd.f32 %v857_v20, %v6282_v7 }
 0x244   :  { %7582 = vst [vmem:[#allocation22_spill] sm:$0xff] %v6377_v9  ;;  %5624 = vtanh.f32 %v1094_v18  ;;  %v991_v43 = vmul.f32 0.044715, %v6377_v9  ;;  %v1098_v59 = vmul.f32 0.7978846, %v1070_v31  ;;  %v6389_v57 = vadd.f32 %v928_v8, %v6286_v39 }
 0x245   :  { %5626 = vtanh.f32 %v1096_v63  ;;  %v1017_v53 = vmul.f32 %v989_v34, %v6373_v2  ;;  %v990_v19 = vmul.f32 0.044715, %v6385_v26  ;;  %v6394_v18 = vadd.f32 %v859_v52, %v6275_v3 }
 0x246   :  { %7583 = vst [vmem:[#allocation23_spill] sm:$0xff] %v6389_v57  ;;  %5628 = vtanh.f32 %v1097_v40  ;;  %v1019_v14 = vmul.f32 %v991_v43, %v6377_v9  ;;  %v1100_v42 = vmul.f32 0.7978846, %v1072_v38  ;;  %v992_v63 = vmul.f32 0.044715, %v6389_v57 }
 0x247   :  { %v865_v58 = vpop.f32.mrb[8].mxu1  ;;  %v936_v27 = vpop.f32.mrb[24].mxu0  ;;  %v1045_v20 = vmul.f32 %v1017_v53, %v6373_v2  ;;  %v6399_v31 = vadd.f32 %v930_v35, %v6279_v6  ;;  %5630 = vtanh.f32 %v1099_v51  ;;  %v1018_v52 = vmul.f32 %v990_v19, %v6385_v26 }
 0x248   :  { %v6401_v8 = vpop.f32.mrb[9].mxu1  ;;  %v6403_v40 = vpop.f32.mrb[25].mxu0  ;;  %v1047_v34 = vmul.f32 %v1019_v14, %v6377_v9  ;;  %v993_v43 = vmul.f32 0.044715, %v6394_v18  ;;  %v1020_v35 = vmul.f32 %v992_v63, %v6389_v57  ;;  %v6416_v62 = vadd.f32 %v861_v16, %v6282_v7 }
 0x249   :  { %7584 = vst [vmem:[#allocation24_spill] sm:$0xff] %v6399_v31  ;;  %v6408_v44 = vpop.f32.mrb[10].mxu1  ;;  %v6410_v38 = vpop.f32.mrb[26].mxu0  ;;  %v1073_v53 = vadd.f32 %v1045_v20, %v6373_v2  ;;  %v995_v54 = vmul.f32 0.044715, %v6399_v31  ;;  %v1046_v15 = vmul.f32 %v1018_v52, %v6385_v26  ;;  %v6426_v33 = vadd.f32 %v932_v61, %v6286_v39 }
 0x24a   :  { %v6418_v51 = vpop.f32.mrb[11].mxu1  ;;  %v6420_v14 = vpop.f32.mrb[27].mxu0  ;;  %v1075_v19 = vadd.f32 %v1047_v34, %v6377_v9  ;;  %v1021_v37 = vmul.f32 %v993_v43, %v6394_v18  ;;  %5632 = vtanh.f32 %v1098_v59  ;;  %v1048_v20 = vmul.f32 %v1020_v35, %v6389_v57 }
 0x24b   :  { %7585 = vst [vmem:[#allocation25_spill] sm:$0xff] %v6426_v33  ;;  %v1023_v63 = vmul.f32 %v995_v54, %v6399_v31  ;;  %v994_v16 = vmul.f32 0.044715, %v6416_v62  ;;  %v1101_v41 = vmul.f32 0.7978846, %v1073_v53  ;;  %v1074_v46 = vadd.f32 %v1046_v15, %v6385_v26 }
 0x24c   :  { %v6431_v50 = vpop.eup %5620  ;;  %v1049_v34 = vmul.f32 %v1021_v37, %v6394_v18  ;;  %v996_v52 = vmul.f32 0.044715, %v6426_v33  ;;  %v1103_v61 = vmul.f32 0.7978846, %v1075_v19  ;;  %v1076_v59 = vadd.f32 %v1048_v20, %v6389_v57 }
 0x24d   :  { %v6436_v43 = vpop.eup %5622  ;;  %v1051_v35 = vmul.f32 %v1023_v63, %v6399_v31  ;;  %v1022_v54 = vmul.f32 %v994_v16, %v6416_v62  ;;  %5634 = vtanh.f32 %v1100_v42  ;;  %v1102_v15 = vmul.f32 0.7978846, %v1074_v46 }
 0x24e   :  { %7586 = vst [vmem:[#allocation26_spill] sm:$0xff] %v6436_v43  ;;  %v6445_v53 = vpop.eup %5624  ;;  %v1077_v37 = vadd.f32 %v1049_v34, %v6394_v18  ;;  %v1024_v0 = vmul.f32 %v996_v52, %v6426_v33  ;;  %v1104_v63 = vmul.f32 0.7978846, %v1076_v59  ;;  %v6458_v23 = vadd.f32 %v865_v58, %v6275_v3 }
 0x24f   :  { %v6449_v25 = vpop.f32.mrb[12].mxu1  ;;  %v6451_v19 = vpop.f32.mrb[28].mxu0  ;;  %v1079_v16 = vadd.f32 %v1051_v35, %v6399_v31  ;;  %v1050_v22 = vmul.f32 %v1022_v54, %v6416_v62  ;;  %5636 = vtanh.f32 %v1101_v41 }
 0x250   :  { %7589 = vst [vmem:[#allocation29_spill] sm:$0xff] %v6451_v19  ;;  %v6453_v20 = vpop.eup %5626  ;;  %v6460_v42 = vpop.f32.mrb[13].mxu1  ;;  %v1105_v52 = vmul.f32 0.7978846, %v1077_v37  ;;  %v6467_v19 = vadd.f32 %v936_v27, %v6279_v6  ;;  %5638 = vtanh.f32 %v1103_v61  ;;  %v1052_v58 = vmul.f32 %v1024_v0, %v6426_v33 }
 0x251   :  { %v6462_v46 = vpop.f32.mrb[29].mxu0  ;;  %v6464_v34 = vpop.eup %5628  ;;  %v997_v54 = vmul.f32 0.044715, %v6458_v23  ;;  %5640 = vtanh.f32 %v1102_v15  ;;  %v1078_v27 = vadd.f32 %v1050_v22, %v6416_v62  ;;  %v6481_v37 = vadd.f32 %v6401_v8, %v6282_v7 }
 0x252   :  { %7590 = vst [vmem:[#allocation30_spill] sm:$0xff] %v6462_v46  ;;  %7591 = vst [vmem:[#allocation31_spill] sm:$0xff] %v6467_v19  ;;  %v879_v9 = vpop.f32.mrb[14].mxu1  ;;  %v950_v59 = vpop.f32.mrb[30].mxu0  ;;  %5642 = vtanh.f32 %v1104_v63  ;;  %v1107_v0 = vmul.f32 0.7978846, %v1079_v16  ;;  %v6492_v22 = vadd.f32 %v6408_v44, %v6275_v3  ;;  %v1080_v8 = vadd.f32 %v1052_v58, %v6426_v33 }
 0x253   :  { %v880_v31 = vpop.f32.mrb[15].mxu1  ;;  %v951_v57 = vpop.f32.mrb[31].mxu0  ;;  %v999_v9 = vmul.f32 0.044715, %v6467_v19  ;;  %v1025_v61 = vmul.f32 %v997_v54, %v6458_v23  ;;  %5644 = vtanh.f32 %v1105_v52  ;;  %v998_v15 = vmul.f32 0.044715, %v6481_v37 }
 0x254   :  { %v6475_v41 = vpop.eup %5630  ;;  %v6486_v57 = vadd.f32 %v6403_v40, %v6286_v39  ;;  %v6501_v40 = vadd.f32 %v6410_v38, %v6279_v6  ;;  %v1106_v52 = vmul.f32 0.7978846, %v1078_v27  ;;  %v1001_v44 = vmul.f32 0.044715, %v6492_v22 }
 0x255   :  { %7592 = vst [vmem:[#allocation32_spill] sm:$0xff] %v6475_v41  ;;  %v1027_v31 = vmul.f32 %v999_v9, %v6467_v19  ;;  %v6494_v59 = vpop.eup %5632  ;;  %v1053_v63 = vmul.f32 %v1025_v61, %v6458_v23  ;;  %v1026_v9 = vmul.f32 %v998_v15, %v6481_v37  ;;  %v6511_v61 = vadd.f32 %v6418_v51, %v6282_v7  ;;  %v6521_v15 = vld [vmem:[#allocation8 + $0x4c8] sm:$0xff] }
 0x256   :  { %v1000_v16 = vmul.f32 0.044715, %v6486_v57  ;;  %7593 = vst [vmem:[#allocation33_spill] sm:$0xff] %v6501_v40  ;;  %v1003_v58 = vmul.f32 0.044715, %v6501_v40  ;;  %5646 = vtanh.f32 %v1107_v0  ;;  %v1029_v27 = vmul.f32 %v1001_v44, %v6492_v22 }
 0x257   :  { %v1055_v54 = vmul.f32 %v1027_v31, %v6467_v19  ;;  %v1081_v35 = vadd.f32 %v1053_v63, %v6458_v23  ;;  %v6513_v17 = vpop.eup %5634  ;;  %v1054_v38 = vmul.f32 %v1026_v9, %v6481_v37  ;;  %v6519_v31 = vadd.f32 %v6420_v14, %v6286_v39  ;;  %v6523_v63 = vld [vmem:[#allocation8 + $0x4e8] sm:$0xff] }
 0x258   :  { %v1028_v46 = vmul.f32 %v1000_v16, %v6486_v57  ;;  %v1031_v6 = vmul.f32 %v1003_v58, %v6501_v40  ;;  %v1002_v0 = vmul.f32 0.044715, %v6511_v61  ;;  %v1057_v14 = vmul.f32 %v1029_v27, %v6492_v22  ;;  %v6554_v58 = vld [vmem:[#allocation8 + $0x500] sm:$0xff] }
 0x259   :  { %v1083_v16 = vadd.f32 %v1055_v54, %v6467_v19  ;;  %v6529_v1 = vpop.eup %5636  ;;  %v1109_v9 = vmul.f32 0.7978846, %v1081_v35  ;;  %v1082_v44 = vadd.f32 %v1054_v38, %v6481_v37  ;;  %v1004_v39 = vmul.f32 0.044715, %v6519_v31 }
 0x25a   :  { %v1056_v51 = vmul.f32 %v1028_v46, %v6486_v57  ;;  %v6534_v33 = vpop.eup %5638  ;;  %5648 = vtanh.f32 %v1106_v52  ;;  %v1059_v54 = vmul.f32 %v1031_v6, %v6501_v40  ;;  %v1030_v46 = vmul.f32 %v1002_v0, %v6511_v61 }
 0x25b   :  { %7594 = vst [vmem:[#allocation34_spill] sm:$0xff] %v6534_v33  ;;  %v5641_v19 = vpop.eup %5640  ;;  %v1110_v41 = vmul.f32 0.7978846, %v1082_v44  ;;  %v1085_v38 = vadd.f32 %v1057_v14, %v6492_v22  ;;  %v1032_v27 = vmul.f32 %v1004_v39, %v6519_v31  ;;  %v1108_v32 = vmul.f32 0.7978846, %v1080_v8  ;;  %v6556_v39 = vld [vmem:[#allocation8 + $0x520] sm:$0xff] }
 0x25c   :  { %v1084_v35 = vadd.f32 %v1056_v51, %v6486_v57  ;;  %v6543_v43 = vpop.eup %5642  ;;  %v1111_v33 = vmul.f32 0.7978846, %v1083_v16  ;;  %v1058_v52 = vmul.f32 %v1030_v46, %v6511_v61  ;;  %v6548_v6 = vadd.f32 %v6449_v25, %v6275_v3  ;;  %v6562_v3 = vld [vmem:[#allocation8 + $0x508] sm:$0xff] }
 0x25d   :  { %v6550_v0 = vpop.eup %5644  ;;  %5650 = vtanh.f32 %v1109_v9  ;;  %v1113_v44 = vmul.f32 0.7978846, %v1085_v38  ;;  %v1087_v51 = vadd.f32 %v1059_v54, %v6501_v40  ;;  %v1060_v14 = vmul.f32 %v1032_v27, %v6519_v31  ;;  %7595 = vst [vmem:[#allocation35_spill] sm:$0xff] %v6562_v3  ;;  %v6564_v9 = vld [vmem:[#allocation8 + $0x528] sm:$0xff] }
 0x25e   :  { %5652 = vtanh.f32 %v1110_v41  ;;  %v1086_v8 = vadd.f32 %v1058_v52, %v6511_v61  ;;  %v1005_v16 = vmul.f32 0.044715, %v6548_v6  ;;  %7596 = vst [vmem:[#allocation36_spill] sm:$0xff] %v6564_v9  ;;  %v1112_v46 = vmul.f32 0.7978846, %v1084_v35 }
 0x25f   :  { %5654 = vtanh.f32 %v1113_v44  ;;  %v1088_v54 = vadd.f32 %v1060_v14, %v6519_v31  ;;  %v6569_v38 = vadd.f32 %v6460_v42, %v6282_v7  ;;  %v1115_v40 = vmul.f32 0.7978846, %v1087_v51 }
 0x260   :  { %5656 = vtanh.f32 %v1108_v32  ;;  %v1114_v41 = vmul.f32 0.7978846, %v1086_v8  ;;  %v1033_v27 = vmul.f32 %v1005_v16, %v6548_v6  ;;  %v6574_v25 = vpop.eup %5646  ;;  %v953_v14 = vmul.f32 0.5, %v6297_v21 }
 0x261   :  { %5658 = vtanh.f32 %v1111_v33  ;;  %v1006_v35 = vmul.f32 0.044715, %v6569_v38  ;;  %v1116_v7 = vmul.f32 0.7978846, %v1088_v54  ;;  %v6582_v42 = vmul.f32 0.5, %v6300_v29 }
 0x262   :  { %5660 = vtanh.f32 %v1114_v41  ;;  %v1061_v32 = vmul.f32 %v1033_v27, %v6548_v6  ;;  %v1150_v33 = vadd.f32 1.0, %v6445_v53  ;;  %v954_v16 = vmul.f32 0.5, %v6303_v49 }
 0x263   :  { %5662 = vtanh.f32 %v1112_v46  ;;  %v1034_v8 = vmul.f32 %v1006_v35, %v6569_v38  ;;  %v958_v52 = vmul.f32 0.5, %v6333_v47  ;;  %v1154_v44 = vadd.f32 1.0, %v6494_v59 }
 0x264   :  { %v5649_v51 = vpop.eup %5648  ;;  %v1149_v21 = vadd.f32 1.0, %v6431_v50  ;;  %v957_v54 = vmul.f32 0.5, %v6325_v60  ;;  %5664 = vtanh.f32 %v1115_v40  ;;  %v1153_v46 = vadd.f32 1.0, %v6464_v34 }
 0x265   :  { %v1062_v29 = vmul.f32 %v1034_v8, %v6569_v38  ;;  %5666 = vtanh.f32 %v1116_v7  ;;  %v1089_v41 = vadd.f32 %v1061_v32, %v6548_v6  ;;  %v1178_v53 = vmul.f32 %v1150_v33, %v954_v16 }
 0x266   :  { %v1182_v27 = vmul.f32 %v1154_v44, %v958_v52  ;;  %v1177_v49 = vmul.f32 %v1149_v21, %v953_v14  ;;  %v1181_v3 = vmul.f32 %v1153_v46, %v957_v54  ;;  %v962_v47 = vmul.f32 0.5, %v6385_v26 }
 0x267   :  { %v5651_v35 = vpop.eup %5650  ;;  %v1158_v59 = vadd.f32 1.0, %v5641_v19  ;;  %v1090_v50 = vadd.f32 %v1062_v29, %v6569_v38  ;;  %v966_v40 = vmul.f32 0.5, %v6416_v62  ;;  %v1162_v8 = vadd.f32 1.0, %v5649_v51 }
 0x268   :  { %v5653_v9 = vpop.eup %5652  ;;  %v6596_v60 = vpack.c.bf16 %v1182_v27, %v1178_v53  ;;  %v6599_v7 = vpack.c.bf16 %v1181_v3, %v1177_v49  ;;  %v961_v52 = vmul.f32 0.5, %v6373_v2  ;;  %v1157_v44 = vadd.f32 1.0, %v6529_v1 }
 0x269   :  { %v5655_v34 = vpop.eup %5654  ;;  %v1186_v32 = vmul.f32 %v1158_v59, %v962_v47  ;;  %v1190_v26 = vmul.f32 %v1162_v8, %v966_v40  ;;  %v965_v19 = vmul.f32 0.5, %v6394_v18  ;;  %v1161_v33 = vadd.f32 1.0, %v6550_v0 }
 0x26a   :  { %v5657_v14 = vpop.eup %5656  ;;  %2831 = vmatprep.mubr.bf16.mxu1 %v6596_v60  ;;  %2973 = vmatprep.mubr.bf16.mxu0 %v6596_v60  ;;  %v970_v62 = vmul.f32 0.5, %v6481_v37  ;;  %v1185_v2 = vmul.f32 %v1157_v44, %v961_v52  ;;  %v1166_v1 = vadd.f32 1.0, %v5653_v9  ;;  %v969_v3 = vmul.f32 0.5, %v6458_v23 }
 0x26b   :  { %v6608_v51 = vpop.eup %5658  ;;  %2832 = vmatmul.mubr.bf16.vlgmr.msra.gmra.mrb[16].mxu1 %v6599_v7  ;;  %2974 = vmatmul.mubr.bf16.vlgmr.msra.gmra.mrb[32].mxu0 %v6599_v7  ;;  %v973_v16 = vmul.f32 0.5, %v6492_v22  ;;  %v7597_v18 = vcombine.low %v6253_v4, %v6255_v5  ;;  %v7598_v37 = vcombine.low %v6257_v24, %v6263_v12  ;;  %v6620_v0 = vpack.c.bf16 %v1190_v26, %v1186_v32  ;;  %v7607_v26 = vld [vmem:[#allocation32_spill] sm:$0xff] }
 0x26c   :  { %v5661_v21 = vpop.eup %5660  ;;  %v1189_v54 = vmul.f32 %v1161_v33, %v965_v19  ;;  %v1165_v29 = vadd.f32 1.0, %v5651_v35  ;;  %v1169_v46 = vadd.f32 1.0, %v5655_v34  ;;  %v7599_v23 = vcombine.high %v6288_v10, %v6290_v56 }
 0x26d   :  { %2871 = vmatpush1.bf16.msra.mxu1 %v7597_v18  ;;  %3013 = vmatpush1.bf16.msra.mxu0 %v7598_v37  ;;  %v5663_v53 = vpop.eup %5662  ;;  %v7600_v22 = vcombine.high %v6292_v11, %v6294_v36  ;;  %v974_v4 = vmul.f32 0.5, %v6511_v61  ;;  %v1170_v5 = vadd.f32 1.0, %v5661_v21  ;;  %v1194_v9 = vmul.f32 %v1166_v1, %v970_v62 }
 0x26e   :  { %2872 = vmatprep.subr.bf16.mxu1 %v7599_v23  ;;  %v1118_v24 = vmul.f32 0.7978846, %v1090_v50  ;;  %v959_v12 = vmul.f32 0.5, %v6328_v55  ;;  %2841 = vmatprep.mubr.bf16.mxu1 %v6620_v0  ;;  %v6632_v27 = vpack.c.bf16 %v1189_v54, %v1185_v2  ;;  %v1193_v35 = vmul.f32 %v1165_v29, %v969_v3  ;;  %v6634_v47 = vpop.eup %5664  ;;  %v6670_v54 = vld [vmem:[#allocation8 + $0x540] sm:$0xff] }
 0x26f   :  { %3014 = vmatprep.subr.bf16.mxu0 %v7600_v22  ;;  %2983 = vmatprep.mubr.bf16.mxu0 %v6620_v0  ;;  %v1197_v49 = vmul.f32 %v1169_v46, %v973_v16  ;;  %v1198_v59 = vmul.f32 %v1170_v5, %v974_v4  ;;  %v1117_v40 = vmul.f32 0.7978846, %v1089_v41  ;;  %v956_v61 = vmul.f32 0.5, %v6306_v30  ;;  %v5667_v8 = vpop.eup %5666  ;;  %v7604_v41 = vld [vmem:[#allocation21_spill] sm:$0xff]  ;;  %v7612_v46 = vld [vmem:[#allocation22_spill] sm:$0xff]  ;;  %v7613_v22 = vld [vmem:[#allocation24_spill] sm:$0xff] }
 0x270   :  { %5668 = vtanh.f32 %v1118_v24  ;;  %v7601_v50 = vcombine.low %v6288_v10, %v6290_v56  ;;  %v7602_v55 = vcombine.low %v6292_v11, %v6294_v36  ;;  %v960_v32 = vmul.f32 0.5, %v6336_v13  ;;  %v7606_v11 = vld [vmem:[#allocation26_spill] sm:$0xff] }
 0x271   :  { %v6643_v34 = vpack.c.bf16 %v1197_v49, %v1193_v35  ;;  %v1152_v52 = vadd.f32 1.0, %v6453_v20  ;;  %v1156_v44 = vadd.f32 1.0, %v6513_v17  ;;  %v7603_v30 = vcombine.high %v6318_v48, %v6320_v45  ;;  %v7608_v20 = vld [vmem:[#allocation23_spill] sm:$0xff]  ;;  %v7609_v17 = vld [vmem:[#allocation25_spill] sm:$0xff]  ;;  %v7614_v4 = vld [vmem:[#allocation34_spill] sm:$0xff] }
 0x272   :  { %2873 = vmatpush1.bf16.msra.mxu1 %v7601_v50  ;;  %3015 = vmatpush1.bf16.msra.mxu0 %v7602_v55  ;;  %v7605_v10 = vcombine.high %v6356_v28, %v7604_v41  ;;  %v6654_v56 = vpack.c.bf16 %v1198_v59, %v1194_v9  ;;  %5670 = vtanh.f32 %v1117_v40  ;;  %v1151_v36 = vadd.f32 1.0, %v7606_v11  ;;  %v1394_v24 = vld [vmem:[#allocation8 + $0x568] sm:$0xff]  ;;  %v7622_v11 = vld [vmem:[#allocation35_spill] sm:$0xff] }
 0x273   :  { %2874 = vmatprep.subr.bf16.mxu1 %v7603_v30  ;;  %v1155_v19 = vadd.f32 1.0, %v7607_v26  ;;  %v1180_v13 = vmul.f32 %v1152_v52, %v956_v61  ;;  %v1184_v33 = vmul.f32 %v1156_v44, %v960_v32  ;;  %v964_v62 = vmul.f32 0.5, %v7608_v20  ;;  %2842 = vmatmul.mubr.bf16.gmra.mrb[20].mxu1 %v6632_v27 }
 0x274   :  { %3016 = vmatprep.subr.bf16.mxu0 %v7605_v10  ;;  %v968_v2 = vmul.f32 0.5, %v7609_v17  ;;  %2984 = vmatmul.mubr.bf16.gmra.mrb[36].mxu0 %v6632_v27  ;;  %v1179_v1 = vmul.f32 %v1151_v36, %v6582_v42  ;;  %v1160_v16 = vadd.f32 1.0, %v6543_v43  ;;  %v1164_v21 = vadd.f32 1.0, %v5657_v14  ;;  %v7615_v43 = vld [vmem:[#allocation27_spill] sm:$0xff]  ;;  %v7616_v14 = vld [vmem:[#allocation28_spill] sm:$0xff]  ;;  %v1397_v17 = vld [vmem:[#allocation8 + $0x580] sm:$0xff] }
 0x275   :  { %v1183_v3 = vmul.f32 %v1155_v19, %v959_v12  ;;  %v7610_v18 = vcombine.low %v6318_v48, %v6320_v45  ;;  %v7611_v37 = vcombine.low %v6356_v28, %v7604_v41  ;;  %v6672_v29 = vpack.c.bf16 %v1184_v33, %v1180_v13  ;;  %v1393_v45 = vld [vmem:[#allocation8 + $0x560] sm:$0xff]  ;;  %v1390_v28 = vld [vmem:[#allocation8 + $0x548] sm:$0xff]  ;;  %2851 = vmatprep.mubr.bf16.mxu1 %v6654_v56  ;;  %v7621_v10 = vld [vmem:[#allocation36_spill] sm:$0xff] }
 0x276   :  { %v963_v23 = vmul.f32 0.5, %v7612_v46  ;;  %v967_v42 = vmul.f32 0.5, %v7613_v22  ;;  %v1159_v5 = vadd.f32 1.0, %v7614_v4  ;;  %v7617_v9 = vcombine.high %v7615_v43, %v7616_v14  ;;  %2993 = vmatprep.mubr.bf16.mxu0 %v6654_v56  ;;  %v7625_v33 = vld [vmem:[#allocation31_spill] sm:$0xff] }
 0x277   :  { %2875 = vmatpush1.bf16.msra.mxu1 %v7610_v18  ;;  %3017 = vmatpush1.bf16.msra.mxu0 %v7611_v37  ;;  %v7618_v48 = vcombine.high %v6521_v15, %v6523_v63  ;;  %v6683_v12 = vpack.c.bf16 %v1183_v3, %v1179_v1  ;;  %v1188_v35 = vmul.f32 %v1160_v16, %v964_v62  ;;  %v1163_v59 = vadd.f32 1.0, %v6574_v25  ;;  %v7626_v1 = vld [vmem:[#allocation33_spill] sm:$0xff]  ;;  %v1398_v18 = vld [vmem:[#allocation8 + $0x588] sm:$0xff] }
 0x278   :  { %2876 = vmatprep.subr.bf16.mxu1 %v7617_v9  ;;  %v1192_v49 = vmul.f32 %v1164_v21, %v968_v2  ;;  %v4944_v40 = vcombine.low %v6554_v58, %v6556_v39  ;;  %v1187_v61 = vmul.f32 %v1159_v5, %v963_v23  ;;  %v972_v50 = vmul.f32 0.5, %v6486_v57  ;;  %v1401_v2 = vld [vmem:[#allocation8 + $0x5a0] sm:$0xff]  ;;  %v1402_v37 = vld [vmem:[#allocation8 + $0x5a8] sm:$0xff] }
 0x279   :  { %3018 = vmatprep.subr.bf16.mxu0 %v7618_v48  ;;  %v1168_v55 = vadd.f32 1.0, %v5663_v53  ;;  %v1191_v52 = vmul.f32 %v1163_v59, %v967_v42  ;;  %v976_v44 = vmul.f32 0.5, %v6519_v31  ;;  %v1172_v30 = vadd.f32 1.0, %v5667_v8  ;;  %v1409_v48 = vld [vmem:[#allocation8 + $0x5e0] sm:$0xff] }
 0x27a   :  { %v6691_v32 = vpack.c.bf16 %v1192_v49, %v1188_v35  ;;  %v7619_v25 = vcombine.low %v7615_v43, %v7616_v14  ;;  %v7620_v41 = vcombine.low %v6521_v15, %v6523_v63  ;;  %v4946_v36 = vcombine.low %v7622_v11, %v7621_v10  ;;  %v5669_v19 = vpop.eup %5668  ;;  %v1405_v14 = vld [vmem:[#allocation8 + $0x5c0] sm:$0xff] }
 0x27b   :  { %v4953_v57 = vcombine.high %v6670_v54, %v1393_v45  ;;  %v4955_v53 = vcombine.high %v1390_v28, %v1394_v24  ;;  %v978_v26 = vmul.f32 0.5, %v6569_v38  ;;  %v7623_v31 = vcombine.high %v6554_v58, %v6556_v39  ;;  %2852 = vmatmul.mubr.bf16.gmra.mrb[24].mxu1 %v6643_v34  ;;  %v1413_v49 = vld [vmem:[#allocation8 + $0x600] sm:$0xff] }
 0x27c   :  { %2877 = vmatpush1.bf16.msra.mxu1 %v7619_v25  ;;  %3019 = vmatpush1.bf16.msra.mxu0 %v7620_v41  ;;  %v7624_v8 = vcombine.high %v7622_v11, %v7621_v10  ;;  %v6710_v13 = vpack.c.bf16 %v1191_v52, %v1187_v61  ;;  %v1196_v15 = vmul.f32 %v1168_v55, %v972_v50  ;;  %v971_v20 = vmul.f32 0.5, %v7625_v33  ;;  %v5671_v39 = vpop.eup %5670  ;;  %v1417_v61 = vld [vmem:[#allocation8 + $0x620] sm:$0xff]  ;;  %v1414_v50 = vld [vmem:[#allocation8 + $0x608] sm:$0xff] }
 0x27d   :  { %2878 = vmatprep.subr.bf16.mxu1 %v7623_v31  ;;  %v1200_v63 = vmul.f32 %v1172_v30, %v976_v44  ;;  %v1174_v62 = vadd.f32 1.0, %v5669_v19  ;;  %v975_v38 = vmul.f32 0.5, %v7626_v1  ;;  %v1167_v3 = vadd.f32 1.0, %v6608_v51  ;;  %2994 = vmatmul.mubr.bf16.gmra.mrb[40].mxu0 %v6643_v34  ;;  %v1418_v55 = vld [vmem:[#allocation8 + $0x628] sm:$0xff]  ;;  %v1421_v41 = vld [vmem:[#allocation8 + $0x640] sm:$0xff] }
 0x27e   :  { %3020 = vmatprep.subr.bf16.mxu0 %v7624_v8  ;;  %v1171_v58 = vadd.f32 1.0, %v6634_v47  ;;  %v4952_v16 = vcombine.low %v6670_v54, %v1393_v45  ;;  %v4954_v21 = vcombine.low %v1390_v28, %v1394_v24  ;;  %v977_v46 = vmul.f32 0.5, %v6548_v6  ;;  %v1406_v6 = vld [vmem:[#allocation8 + $0x5c8] sm:$0xff]  ;;  %v1425_v10 = vld [vmem:[#allocation8 + $0x660] sm:$0xff] }
 0x27f   :  { %v6720_v23 = vpack.c.bf16 %v1200_v63, %v1196_v15  ;;  %v1202_v22 = vmul.f32 %v1174_v62, %v978_v26  ;;  %v1173_v51 = vadd.f32 1.0, %v5671_v39  ;;  %v1195_v42 = vmul.f32 %v1167_v3, %v971_v20  ;;  %v1410_v45 = vld [vmem:[#allocation8 + $0x5e8] sm:$0xff]  ;;  %v1429_v31 = vld [vmem:[#allocation8 + $0x680] sm:$0xff]  ;;  %v7627_v62 = vld [vmem:[#allocation20_spill] sm:$0xff] }
 0x280   :  { %2879 = vmatpush1.bf16.msra.mxu1 %v4944_v40  ;;  %3021 = vmatpush1.bf16.msra.mxu0 %v4946_v36  ;;  %v1199_v47 = vmul.f32 %v1171_v58, %v975_v38  ;;  %v4961_v4 = vcombine.high %v1397_v17, %v1401_v2  ;;  %v4963_v43 = vcombine.high %v1398_v18, %v1402_v37  ;;  %v1422_v11 = vld [vmem:[#allocation8 + $0x648] sm:$0xff]  ;;  %v1433_v8 = vld [vmem:[#allocation8 + $0x6a0] sm:$0xff] }
 0x281   :  { %2880 = vmatprep.subr.bf16.mxu1 %v4953_v57  ;;  %3022 = vmatprep.subr.bf16.mxu0 %v4955_v53  ;;  %v6722_v5 = vpack.c.bf16 %v1202_v22, %v1202_v22  ;;  %v1201_v54 = vmul.f32 %v1173_v51, %v977_v46  ;;  %v4960_v28 = vcombine.low %v1397_v17, %v1401_v2  ;;  %v1426_v36 = vld [vmem:[#allocation8 + $0x668] sm:$0xff]  ;;  %v1437_v3 = vld [vmem:[#allocation8 + $0x6c0] sm:$0xff] }
 0x282   :  { %v6724_v9 = vpack.c.bf16 %v1199_v47, %v1195_v42  ;;  %v4962_v24 = vcombine.low %v1398_v18, %v1402_v37  ;;  %v4969_v59 = vcombine.high %v1405_v14, %v1409_v48  ;;  %v4971_v40 = vcombine.high %v1406_v6, %v1410_v45  ;;  %v1430_v15 = vld [vmem:[#allocation8 + $0x688] sm:$0xff]  ;;  %v1441_v58 = vld [vmem:[#allocation8 + $0x6e0] sm:$0xff] }
 0x283   :  { %2861 = vmatprep.mubr.bf16.mxu1 %v6722_v5  ;;  %3003 = vmatprep.mubr.bf16.mxu0 %v6722_v5  ;;  %v6728_v35 = vpack.c.bf16 %v1201_v54, %v1201_v54  ;;  %v4968_v52 = vcombine.low %v1405_v14, %v1409_v48  ;;  %v4970_v44 = vcombine.low %v1406_v6, %v1410_v45  ;;  %v1434_v63 = vld [vmem:[#allocation8 + $0x6a8] sm:$0xff]  ;;  %v1445_v51 = vld [vmem:[#allocation8 + $0x700] sm:$0xff] }
 0x284   :  { %2881 = vmatpush1.bf16.msra.mxu1 %v4952_v16  ;;  %3023 = vmatpush1.bf16.msra.mxu0 %v4954_v21  ;;  %v4977_v30 = vcombine.high %v1413_v49, %v1417_v61  ;;  %v4979_v25 = vcombine.high %v1414_v50, %v1418_v55  ;;  %v4976_v57 = vcombine.low %v1413_v49, %v1417_v61  ;;  %v7628_v17 = vld [vmem:[#allocation30_spill] sm:$0xff]  ;;  %v1449_v42 = vld [vmem:[#allocation8 + $0x720] sm:$0xff] }
 0x285   :  { %2882 = vmatprep.subr.bf16.mxu1 %v4961_v4  ;;  %3024 = vmatprep.subr.bf16.mxu0 %v4963_v43  ;;  %v4978_v53 = vcombine.low %v1414_v50, %v1418_v55  ;;  %v4985_v26 = vcombine.high %v1421_v41, %v1425_v10  ;;  %v4987_v19 = vcombine.high %v1422_v11, %v1426_v36  ;;  %v1438_v39 = vld [vmem:[#allocation8 + $0x6c8] sm:$0xff]  ;;  %v7629_v43 = vld [vmem:[#allocation19_spill] sm:$0xff]  ;;  %v7630_v54 = vld [vmem:[#allocation29_spill] sm:$0xff] }
 0x286   :  { %2862 = vmatmul.mubr.bf16.gmra.mrb[28].mxu1 %v6728_v35  ;;  %3004 = vmatmul.mubr.bf16.gmra.mrb[44].mxu0 %v6728_v35  ;;  %v4984_v33 = vcombine.low %v1421_v41, %v1425_v10  ;;  %v4986_v20 = vcombine.low %v1422_v11, %v1426_v36  ;;  %v6736_v2 = vadd.f32 %v7628_v17, %v7627_v62  ;;  %v1442_v16 = vld [vmem:[#allocation8 + $0x6e8] sm:$0xff]  ;;  %v1453_v49 = vld [vmem:[#allocation8 + $0x740] sm:$0xff] }
 0x287   :  { %2902 = vmatprep.mubr.bf16.mxu1 %v6672_v29  ;;  %3044 = vmatprep.mubr.bf16.mxu0 %v6672_v29  ;;  %v4993_v1 = vcombine.high %v1429_v31, %v1433_v8  ;;  %v4995_v38 = vcombine.high %v1430_v15, %v1434_v63  ;;  %v4992_v21 = vcombine.low %v1429_v31, %v1433_v8  ;;  %v1446_v47 = vld [vmem:[#allocation8 + $0x708] sm:$0xff]  ;;  %v1461_v41 = vld [vmem:[#allocation8 + $0x780] sm:$0xff] }
 0x288   :  { %2883 = vmatpush1.bf16.msra.mxu1 %v4960_v28  ;;  %3025 = vmatpush1.bf16.msra.mxu0 %v4962_v24  ;;  %v4994_v18 = vcombine.low %v1430_v15, %v1434_v63  ;;  %v1008_v37 = vmul.f32 0.044715, %v6736_v2  ;;  %v5001_v46 = vcombine.high %v1437_v3, %v1441_v58  ;;  %v5003_v22 = vcombine.high %v1438_v39, %v1442_v16  ;;  %v1450_v4 = vld [vmem:[#allocation8 + $0x728] sm:$0xff]  ;;  %v1465_v10 = vld [vmem:[#allocation8 + $0x7a0] sm:$0xff] }
 0x289   :  { %2884 = vmatprep.subr.bf16.mxu1 %v4969_v59  ;;  %3026 = vmatprep.subr.bf16.mxu0 %v4971_v40  ;;  %v6741_v14 = vadd.f32 %v7630_v54, %v7629_v43  ;;  %v5000_v48 = vcombine.low %v1437_v3, %v1441_v58  ;;  %v5002_v6 = vcombine.low %v1438_v39, %v1442_v16  ;;  %v1457_v59 = vld [vmem:[#allocation8 + $0x760] sm:$0xff]  ;;  %v1454_v40 = vld [vmem:[#allocation8 + $0x748] sm:$0xff]  ;;  %v1223_v58 = vld [vmem:[#allocation8 + $0x10] sm:$0xff] }
 0x28a   :  { %v1036_v45 = vmul.f32 %v1008_v37, %v6736_v2  ;;  %v5009_v28 = vcombine.high %v1445_v51, %v1449_v42  ;;  %v5011_v24 = vcombine.high %v1446_v47, %v1450_v4  ;;  %v1458_v61 = vld [vmem:[#allocation8 + $0x768] sm:$0xff]  ;;  %v5008_v55 = vcombine.low %v1445_v51, %v1449_v42  ;;  %v1469_v15 = vld [vmem:[#allocation8 + $0x7c0] sm:$0xff]  ;;  %v1227_v16 = vld [vmem:[#allocation8 + $0x30] sm:$0xff] }
 0x28b   :  { %v1007_v50 = vmul.f32 0.044715, %v6741_v14  ;;  %v1462_v11 = vld [vmem:[#allocation8 + $0x788] sm:$0xff]  ;;  %v5025_v31 = vcombine.high %v1461_v41, %v1465_v10  ;;  %v1473_v63 = vld [vmem:[#allocation8 + $0x7e0] sm:$0xff]  ;;  %v5024_v17 = vcombine.low %v1461_v41, %v1465_v10  ;;  %v4789_v51 = vcombine.high %v1223_v58, %v1227_v16  ;;  %v1232_v43 = vld [vmem:[#allocation8 + $0x58] sm:$0xff] }
 0x28c   :  { %2885 = vmatpush1.bf16.msra.mxu1 %v4968_v52  ;;  %3027 = vmatpush1.bf16.msra.mxu0 %v4970_v44  ;;  %v5010_v52 = vcombine.low %v1446_v47, %v1450_v4  ;;  %v1064_v44 = vmul.f32 %v1036_v45, %v6736_v2  ;;  %v1466_v36 = vld [vmem:[#allocation8 + $0x7a8] sm:$0xff]  ;;  %v1231_v47 = vld [vmem:[#allocation8 + $0x50] sm:$0xff]  ;;  %v1236_v54 = vld [vmem:[#allocation8 + $0x78] sm:$0xff] }
 0x28d   :  { %2886 = vmatprep.subr.bf16.mxu1 %v4977_v30  ;;  %3028 = vmatprep.subr.bf16.mxu0 %v4979_v25  ;;  %v5017_v30 = vcombine.high %v1453_v49, %v1457_v59  ;;  %v5019_v25 = vcombine.high %v1454_v40, %v1458_v61  ;;  %v5027_v8 = vcombine.high %v1462_v11, %v1466_v36  ;;  %v1235_v4 = vld [vmem:[#allocation8 + $0x70] sm:$0xff]  ;;  %v1248_v10 = vld [vmem:[#allocation8 + $0xd8] sm:$0xff] }
 0x28e   :  { %v1251_v41 = vld [vmem:[#allocation8 + $0xf0] sm:$0xff] }
 0x290   :  { %2887 = vmatpush1.bf16.msra.mxu1 %v4976_v57  ;;  %3029 = vmatpush1.bf16.msra.mxu0 %v4978_v53  ;;  %v1035_v57 = vmul.f32 %v1007_v50, %v6741_v14  ;;  %v5016_v53 = vcombine.low %v1453_v49, %v1457_v59  ;;  %v1239_v49 = vld [vmem:[#allocation8 + $0x90] sm:$0xff]  ;;  %v4796_v50 = vcombine.low %v1231_v47, %v1235_v4 }
 0x291   :  { %2888 = vmatprep.subr.bf16.mxu1 %v4985_v26  ;;  %3030 = vmatprep.subr.bf16.mxu0 %v4987_v19  ;;  %v5018_v26 = vcombine.low %v1454_v40, %v1458_v61  ;;  %v1092_v19 = vadd.f32 %v1064_v44, %v6736_v2  ;;  %v1243_v59 = vld [vmem:[#allocation8 + $0xb0] sm:$0xff]  ;;  %v1240_v40 = vld [vmem:[#allocation8 + $0x98] sm:$0xff] }
 0x292   :  { %v1063_v62 = vmul.f32 %v1035_v57, %v6741_v14  ;;  %v1244_v61 = vld [vmem:[#allocation8 + $0xb8] sm:$0xff] }
 0x293   :  { %v1120_v39 = vmul.f32 0.7978846, %v1092_v19  ;;  %v4807_v44 = vcombine.high %v1240_v40, %v1244_v61  ;;  %v4806_v57 = vcombine.low %v1240_v40, %v1244_v61  ;;  %v1255_v19 = vld [vmem:[#allocation8 + $0x110] sm:$0xff]  ;;  %v1280_v40 = vld [vmem:[#allocation8 + $0x1d8] sm:$0xff] }
 0x294   :  { %2889 = vmatpush1.bf16.msra.mxu1 %v4984_v33  ;;  %3031 = vmatpush1.bf16.msra.mxu0 %v4986_v20  ;;  %v1470_v33 = vld [vmem:[#allocation8 + $0x7c8] sm:$0xff]  ;;  %v1091_v37 = vadd.f32 %v1063_v62, %v6741_v14 }
 0x295   :  { %2890 = vmatprep.subr.bf16.mxu1 %v4993_v1  ;;  %3032 = vmatprep.subr.bf16.mxu0 %v4995_v38  ;;  %v1474_v20 = vld [vmem:[#allocation8 + $0x7e8] sm:$0xff]  ;;  %v5026_v1 = vcombine.low %v1462_v11, %v1466_v36  ;;  %v5033_v38 = vcombine.high %v1469_v15, %v1473_v63  ;;  %5672 = vtanh.f32 %v1120_v39  ;;  %v1252_v11 = vld [vmem:[#allocation8 + $0xf8] sm:$0xff]  ;;  %v4804_v36 = vcombine.low %v1239_v49, %v1243_v59  ;;  %v1267_v39 = vld [vmem:[#allocation8 + $0x170] sm:$0xff] }
 0x296   :  { %v5035_v3 = vcombine.high %v1470_v33, %v1474_v20  ;;  %v4814_v62 = vcombine.low %v1248_v10, %v1252_v11 }
 0x298   :  { %2891 = vmatpush1.bf16.msra.mxu1 %v4992_v21  ;;  %3033 = vmatpush1.bf16.msra.mxu0 %v4994_v18  ;;  %v1224_v21 = vld [vmem:[#allocation8 + $0x18] sm:$0xff] }
 0x299   :  { %2892 = vmatprep.subr.bf16.mxu1 %v5001_v46  ;;  %3034 = vmatprep.subr.bf16.mxu0 %v5003_v22  ;;  %v1228_v18 = vld [vmem:[#allocation8 + $0x38] sm:$0xff]  ;;  %v5032_v46 = vcombine.low %v1469_v15, %v1473_v63  ;;  %v5034_v22 = vcombine.low %v1470_v33, %v1474_v20  ;;  %v980_v33 = vmul.f32 0.5, %v6736_v2 }
 0x29a   :  { %v4791_v42 = vcombine.high %v1224_v21, %v1228_v18  ;;  %v4790_v45 = vcombine.low %v1224_v21, %v1228_v18  ;;  %v1256_v15 = vld [vmem:[#allocation8 + $0x118] sm:$0xff] }
 0x29b   :  { %v1260_v63 = vld [vmem:[#allocation8 + $0x138] sm:$0xff] }
 0x29c   :  { %2893 = vmatpush1.bf16.msra.mxu1 %v5000_v48  ;;  %3035 = vmatpush1.bf16.msra.mxu0 %v5002_v6  ;;  %v1119_v48 = vmul.f32 0.7978846, %v1091_v37  ;;  %v4788_v6 = vcombine.low %v1223_v58, %v1227_v16  ;;  %v1263_v58 = vld [vmem:[#allocation8 + $0x150] sm:$0xff]  ;;  %v1264_v16 = vld [vmem:[#allocation8 + $0x158] sm:$0xff]  ;;  %v4822_v37 = vcombine.low %v1256_v15, %v1260_v63 }
 0x29d   :  { %2894 = vmatprep.subr.bf16.mxu1 %v5009_v28  ;;  %3036 = vmatprep.subr.bf16.mxu0 %v5011_v24  ;;  %v4797_v28 = vcombine.high %v1231_v47, %v1235_v4  ;;  %v4799_v24 = vcombine.high %v1232_v43, %v1236_v54  ;;  %v1268_v21 = vld [vmem:[#allocation8 + $0x178] sm:$0xff]  ;;  %v979_v47 = vmul.f32 0.5, %v6741_v14  ;;  %v1275_v4 = vld [vmem:[#allocation8 + $0x1b0] sm:$0xff] }
 0x29e   :  { %5674 = vtanh.f32 %v1119_v48  ;;  %v4828_v48 = vcombine.low %v1263_v58, %v1267_v39  ;;  %v1284_v14 = vld [vmem:[#allocation8 + $0x1f8] sm:$0xff] }
 0x2a0   :  { %2895 = vmatpush1.bf16.msra.mxu1 %v5008_v55  ;;  %3037 = vmatpush1.bf16.msra.mxu0 %v5010_v52  ;;  %v4798_v55 = vcombine.low %v1232_v43, %v1236_v54  ;;  %v4805_v52 = vcombine.high %v1239_v49, %v1243_v59  ;;  %v1272_v43 = vld [vmem:[#allocation8 + $0x198] sm:$0xff]  ;;  %v1279_v49 = vld [vmem:[#allocation8 + $0x1d0] sm:$0xff] }
 0x2a1   :  { %2896 = vmatprep.subr.bf16.mxu1 %v5017_v30  ;;  %3038 = vmatprep.subr.bf16.mxu0 %v5019_v25  ;;  %v1247_v30 = vld [vmem:[#allocation8 + $0xd0] sm:$0xff]  ;;  %v5673_v25 = vpop.eup %5672  ;;  %v1276_v54 = vld [vmem:[#allocation8 + $0x1b8] sm:$0xff] }
 0x2a2   :  { %v4812_v20 = vcombine.low %v1247_v30, %v1251_v41  ;;  %v1283_v59 = vld [vmem:[#allocation8 + $0x1f0] sm:$0xff] }
 0x2a4   :  { %2897 = vmatpush1.bf16.msra.mxu1 %v5016_v53  ;;  %3039 = vmatpush1.bf16.msra.mxu0 %v5018_v26  ;;  %v4813_v53 = vcombine.high %v1247_v30, %v1251_v41  ;;  %v4815_v26 = vcombine.high %v1248_v10, %v1252_v11  ;;  %v1287_v30 = vld [vmem:[#allocation8 + $0x210] sm:$0xff]  ;;  %v1288_v41 = vld [vmem:[#allocation8 + $0x218] sm:$0xff]  ;;  %v4844_v11 = vcombine.low %v1279_v49, %v1283_v59 }
 0x2a5   :  { %2898 = vmatprep.subr.bf16.mxu1 %v5025_v31  ;;  %3040 = vmatprep.subr.bf16.mxu0 %v5027_v8  ;;  %v1176_v31 = vadd.f32 1.0, %v5673_v25  ;;  %v1259_v8 = vld [vmem:[#allocation8 + $0x130] sm:$0xff]  ;;  %v1292_v10 = vld [vmem:[#allocation8 + $0x238] sm:$0xff] }
 0x2a6   :  { %v4820_v18 = vcombine.low %v1255_v19, %v1259_v8  ;;  %v1291_v25 = vld [vmem:[#allocation8 + $0x230] sm:$0xff] }
 0x2a8   :  { %2899 = vmatpush1.bf16.msra.mxu1 %v5024_v17  ;;  %3041 = vmatpush1.bf16.msra.mxu0 %v5026_v1  ;;  %v5675_v17 = vpop.eup %5674  ;;  %v4821_v1 = vcombine.high %v1255_v19, %v1259_v8  ;;  %v1299_v19 = vld [vmem:[#allocation8 + $0x270] sm:$0xff]  ;;  %v1300_v8 = vld [vmem:[#allocation8 + $0x278] sm:$0xff] }
 0x2a9   :  { %2900 = vmatprep.subr.bf16.mxu1 %v5033_v38  ;;  %3042 = vmatprep.subr.bf16.mxu0 %v5035_v3  ;;  %v4823_v38 = vcombine.high %v1256_v15, %v1260_v63  ;;  %v1204_v3 = vmul.f32 %v1176_v31, %v980_v33  ;;  %v1296_v31 = vld [vmem:[#allocation8 + $0x258] sm:$0xff]  ;;  %v4852_v15 = vcombine.low %v1287_v30, %v1291_v25 }
 0x2aa   :  { %v4854_v63 = vcombine.low %v1288_v41, %v1292_v10 }
 0x2ab   :  { %v6759_v2 = vpack.c.bf16 %v1204_v3, %v1204_v3  ;;  %v4862_v3 = vcombine.low %v1296_v31, %v1300_v8 }
 0x2ac   :  { %2901 = vmatpush1.bf16.msra.mxu1 %v5032_v46  ;;  %3043 = vmatpush1.bf16.msra.mxu0 %v5034_v22  ;;  %v1175_v46 = vadd.f32 1.0, %v5675_v17  ;;  %v4829_v22 = vcombine.high %v1263_v58, %v1267_v39  ;;  %v1304_v17 = vld [vmem:[#allocation8 + $0x298] sm:$0xff] }
 0x2ad   :  { %3083 = vmatprep.subr.bf16.mxu1 %v4789_v51  ;;  %3225 = vmatprep.subr.bf16.mxu0 %v4791_v42  ;;  %v4831_v51 = vcombine.high %v1264_v16, %v1268_v21  ;;  %v1271_v42 = vld [vmem:[#allocation8 + $0x190] sm:$0xff] }
 0x2af   :  { %2903 = vmatmul.mubr.bf16.vlgmr.msra.gmra.mrb[16].mxu1 %v6683_v12  ;;  %3045 = vmatmul.mubr.bf16.vlgmr.msra.gmra.mrb[32].mxu0 %v6683_v12 }
 0x2b0   :  { %2912 = vmatprep.mubr.bf16.mxu1 %v6691_v32  ;;  %3054 = vmatprep.mubr.bf16.mxu0 %v6691_v32 }
 0x2b1   :  { %3084 = vmatpush1.bf16.msra.mxu1 %v4788_v6  ;;  %3226 = vmatpush1.bf16.msra.mxu0 %v4790_v45  ;;  %v4830_v6 = vcombine.low %v1264_v16, %v1268_v21  ;;  %v1203_v45 = vmul.f32 %v1175_v46, %v979_v47  ;;  %v1311_v16 = vld [vmem:[#allocation8 + $0x2d0] sm:$0xff] }
 0x2b2   :  { %3085 = vmatprep.subr.bf16.mxu1 %v4797_v28  ;;  %3227 = vmatprep.subr.bf16.mxu0 %v4799_v24  ;;  %v4837_v28 = vcombine.high %v1271_v42, %v1275_v4  ;;  %v4839_v24 = vcombine.high %v1272_v43, %v1276_v54  ;;  %v1315_v21 = vld [vmem:[#allocation8 + $0x2f0] sm:$0xff] }
 0x2b3   :  { %v6766_v61 = vpack.c.bf16 %v1203_v45, %v1203_v45  ;;  %v1319_v47 = vld [vmem:[#allocation8 + $0x310] sm:$0xff] }
 0x2b5   :  { %3086 = vmatpush1.bf16.msra.mxu1 %v4796_v50  ;;  %3228 = vmatpush1.bf16.msra.mxu0 %v4798_v55  ;;  %v4836_v50 = vcombine.low %v1271_v42, %v1275_v4  ;;  %v4838_v55 = vcombine.low %v1272_v43, %v1276_v54  ;;  %v1323_v4 = vld [vmem:[#allocation8 + $0x330] sm:$0xff]  ;;  %v1320_v43 = vld [vmem:[#allocation8 + $0x318] sm:$0xff] }
 0x2b6   :  { %3087 = vmatprep.subr.bf16.mxu1 %v4805_v52  ;;  %3229 = vmatprep.subr.bf16.mxu0 %v4807_v44  ;;  %v4845_v52 = vcombine.high %v1279_v49, %v1283_v59  ;;  %v4847_v44 = vcombine.high %v1280_v40, %v1284_v14  ;;  %v1324_v54 = vld [vmem:[#allocation8 + $0x338] sm:$0xff]  ;;  %v4885_v45 = vcombine.high %v1319_v47, %v1323_v4  ;;  %v1331_v49 = vld [vmem:[#allocation8 + $0x370] sm:$0xff] }
 0x2b7   :  { %2913 = vmatmul.mubr.bf16.gmra.mrb[20].mxu1 %v6710_v13  ;;  %3055 = vmatmul.mubr.bf16.gmra.mrb[36].mxu0 %v6710_v13  ;;  %v1328_v59 = vld [vmem:[#allocation8 + $0x358] sm:$0xff] }
 0x2b8   :  { %2922 = vmatprep.mubr.bf16.mxu1 %v6720_v23  ;;  %3064 = vmatprep.mubr.bf16.mxu0 %v6720_v23 }
 0x2b9   :  { %3088 = vmatpush1.bf16.msra.mxu1 %v4804_v36  ;;  %3230 = vmatpush1.bf16.msra.mxu0 %v4806_v57  ;;  %v4846_v36 = vcombine.low %v1280_v40, %v1284_v14  ;;  %v4853_v57 = vcombine.high %v1287_v30, %v1291_v25  ;;  %v1332_v40 = vld [vmem:[#allocation8 + $0x378] sm:$0xff]  ;;  %v4884_v14 = vcombine.low %v1319_v47, %v1323_v4  ;;  %v1339_v30 = vld [vmem:[#allocation8 + $0x3b0] sm:$0xff] }
 0x2ba   :  { %3089 = vmatprep.subr.bf16.mxu1 %v4813_v53  ;;  %3231 = vmatprep.subr.bf16.mxu0 %v4815_v26  ;;  %v4855_v53 = vcombine.high %v1288_v41, %v1292_v10  ;;  %v1295_v26 = vld [vmem:[#allocation8 + $0x250] sm:$0xff]  ;;  %v1336_v25 = vld [vmem:[#allocation8 + $0x398] sm:$0xff] }
 0x2bb   :  { %v4861_v33 = vcombine.high %v1295_v26, %v1299_v19  ;;  %v1340_v41 = vld [vmem:[#allocation8 + $0x3b8] sm:$0xff]  ;;  %v1371_v47 = vld [vmem:[#allocation8 + $0x4b0] sm:$0xff] }
 0x2bc   :  { %v1368_v4 = vld [vmem:[#allocation8 + $0x498] sm:$0xff] }
 0x2bd   :  { %3090 = vmatpush1.bf16.msra.mxu1 %v4812_v20  ;;  %3232 = vmatpush1.bf16.msra.mxu0 %v4814_v62  ;;  %v1303_v20 = vld [vmem:[#allocation8 + $0x290] sm:$0xff] }
 0x2be   :  { %3091 = vmatprep.subr.bf16.mxu1 %v4821_v1  ;;  %3233 = vmatprep.subr.bf16.mxu0 %v4823_v38  ;;  %v1307_v62 = vld [vmem:[#allocation8 + $0x2b0] sm:$0xff]  ;;  %v1308_v1 = vld [vmem:[#allocation8 + $0x2b8] sm:$0xff]  ;;  %v4860_v38 = vcombine.low %v1295_v26, %v1299_v19 }
 0x2bf   :  { %2923 = vmatmul.mubr.bf16.gmra.mrb[24].mxu1 %v6724_v9  ;;  %3065 = vmatmul.mubr.bf16.gmra.mrb[40].mxu0 %v6724_v9  ;;  %v4869_v58 = vcombine.high %v1303_v20, %v1307_v62  ;;  %v4871_v39 = vcombine.high %v1304_v17, %v1308_v1  ;;  %v4868_v46 = vcombine.low %v1303_v20, %v1307_v62  ;;  %v1347_v26 = vld [vmem:[#allocation8 + $0x3f0] sm:$0xff]  ;;  %v1344_v19 = vld [vmem:[#allocation8 + $0x3d8] sm:$0xff] }
 0x2c0   :  { %2932 = vmatprep.mubr.bf16.mxu1 %v6759_v2  ;;  %3074 = vmatprep.mubr.bf16.mxu0 %v6759_v2  ;;  %v1355_v20 = vld [vmem:[#allocation8 + $0x430] sm:$0xff]  ;;  %v1352_v62 = vld [vmem:[#allocation8 + $0x418] sm:$0xff] }
 0x2c1   :  { %3092 = vmatpush1.bf16.msra.mxu1 %v4820_v18  ;;  %3234 = vmatpush1.bf16.msra.mxu0 %v4822_v37  ;;  %v1312_v18 = vld [vmem:[#allocation8 + $0x2d8] sm:$0xff] }
 0x2c2   :  { %3093 = vmatprep.subr.bf16.mxu1 %v4829_v22  ;;  %3235 = vmatprep.subr.bf16.mxu0 %v4831_v51  ;;  %v1316_v37 = vld [vmem:[#allocation8 + $0x2f8] sm:$0xff]  ;;  %v4870_v22 = vcombine.low %v1304_v17, %v1308_v1  ;;  %v4877_v51 = vcombine.high %v1311_v16, %v1315_v21 }
 0x2c3   :  { %v4879_v42 = vcombine.high %v1312_v18, %v1316_v37  ;;  %v1356_v17 = vld [vmem:[#allocation8 + $0x438] sm:$0xff] }
 0x2c5   :  { %3094 = vmatpush1.bf16.msra.mxu1 %v4828_v48  ;;  %3236 = vmatpush1.bf16.msra.mxu0 %v4830_v6  ;;  %v4876_v48 = vcombine.low %v1311_v16, %v1315_v21  ;;  %v4878_v6 = vcombine.low %v1312_v18, %v1316_v37  ;;  %v1363_v16 = vld [vmem:[#allocation8 + $0x470] sm:$0xff]  ;;  %v1360_v21 = vld [vmem:[#allocation8 + $0x458] sm:$0xff] }
 0x2c6   :  { %3095 = vmatprep.subr.bf16.mxu1 %v4837_v28  ;;  %3237 = vmatprep.subr.bf16.mxu0 %v4839_v24  ;;  %v4887_v28 = vcombine.high %v1320_v43, %v1324_v54  ;;  %v1327_v24 = vld [vmem:[#allocation8 + $0x350] sm:$0xff]  ;;  %v1364_v18 = vld [vmem:[#allocation8 + $0x478] sm:$0xff] }
 0x2c7   :  { %2933 = vmatmul.mubr.bf16.gmra.mrb[28].mxu1 %v6766_v61  ;;  %3075 = vmatmul.mubr.bf16.gmra.mrb[44].mxu0 %v6766_v61  ;;  %v4892_v10 = vcombine.low %v1327_v24, %v1331_v49 }
 0x2c8   :  { %3115 = vmatprep.mubr.bf16.mxu1 %v6596_v60  ;;  %3257 = vmatprep.mubr.bf16.mxu0 %v6596_v60  ;;  %v4863_v60 = vcombine.high %v1296_v31, %v1300_v8  ;;  %v1348_v31 = vld [vmem:[#allocation8 + $0x3f8] sm:$0xff] }
 0x2c9   :  { %3096 = vmatpush1.bf16.msra.mxu1 %v4836_v50  ;;  %3238 = vmatpush1.bf16.msra.mxu0 %v4838_v55  ;;  %v4886_v50 = vcombine.low %v1320_v43, %v1324_v54  ;;  %v4893_v55 = vcombine.high %v1327_v24, %v1331_v49  ;;  %v1372_v43 = vld [vmem:[#allocation8 + $0x4b8] sm:$0xff]  ;;  %v1379_v24 = vld [vmem:[#allocation8 + $0x4f0] sm:$0xff] }
 0x2ca   :  { %3097 = vmatprep.subr.bf16.mxu1 %v4845_v52  ;;  %3239 = vmatprep.subr.bf16.mxu0 %v4847_v44  ;;  %v4895_v52 = vcombine.high %v1328_v59, %v1332_v40  ;;  %v1335_v44 = vld [vmem:[#allocation8 + $0x390] sm:$0xff]  ;;  %v1376_v49 = vld [vmem:[#allocation8 + $0x4d8] sm:$0xff] }
 0x2cb   :  { %v4900_v8 = vcombine.low %v1335_v44, %v1339_v30 }
 0x2cd   :  { %3098 = vmatpush1.bf16.msra.mxu1 %v4844_v11  ;;  %3240 = vmatpush1.bf16.msra.mxu0 %v4846_v36  ;;  %v4894_v11 = vcombine.low %v1328_v59, %v1332_v40  ;;  %v4901_v36 = vcombine.high %v1335_v44, %v1339_v30  ;;  %v1380_v59 = vld [vmem:[#allocation8 + $0x4f8] sm:$0xff]  ;;  %v4934_v40 = vcombine.low %v1368_v4, %v1372_v43 }
 0x2ce   :  { %3099 = vmatprep.subr.bf16.mxu1 %v4853_v57  ;;  %3241 = vmatprep.subr.bf16.mxu0 %v4855_v53  ;;  %v4903_v57 = vcombine.high %v1336_v25, %v1340_v41  ;;  %v1343_v53 = vld [vmem:[#allocation8 + $0x3d0] sm:$0xff]  ;;  %v1388_v44 = vld [vmem:[#allocation8 + $0x538] sm:$0xff] }
 0x2cf   :  { %v4908_v1 = vcombine.low %v1343_v53, %v1347_v26 }
 0x2d1   :  { %3100 = vmatpush1.bf16.msra.mxu1 %v4852_v15  ;;  %3242 = vmatpush1.bf16.msra.mxu0 %v4854_v63  ;;  %v4902_v15 = vcombine.low %v1336_v25, %v1340_v41  ;;  %v4909_v63 = vcombine.high %v1343_v53, %v1347_v26  ;;  %v4942_v25 = vcombine.low %v1376_v49, %v1380_v59  ;;  %v1396_v53 = vld [vmem:[#allocation8 + $0x578] sm:$0xff] }
 0x2d2   :  { %3101 = vmatprep.subr.bf16.mxu1 %v4861_v33  ;;  %3243 = vmatprep.subr.bf16.mxu0 %v4863_v60  ;;  %v4911_v33 = vcombine.high %v1344_v19, %v1348_v31  ;;  %v1351_v60 = vld [vmem:[#allocation8 + $0x410] sm:$0xff] }
 0x2d3   :  { %v4916_v37 = vcombine.low %v1351_v60, %v1355_v20 }
 0x2d5   :  { %3102 = vmatpush1.bf16.msra.mxu1 %v4860_v38  ;;  %3244 = vmatpush1.bf16.msra.mxu0 %v4862_v3  ;;  %v4910_v38 = vcombine.low %v1344_v19, %v1348_v31  ;;  %v4917_v3 = vcombine.high %v1351_v60, %v1355_v20 }
 0x2d6   :  { %3103 = vmatprep.subr.bf16.mxu1 %v4869_v58  ;;  %3245 = vmatprep.subr.bf16.mxu0 %v4871_v39  ;;  %v4919_v58 = vcombine.high %v1352_v62, %v1356_v17  ;;  %v1359_v39 = vld [vmem:[#allocation8 + $0x450] sm:$0xff] }
 0x2d7   :  { %v4924_v54 = vcombine.low %v1359_v39, %v1363_v16 }
 0x2d9   :  { %3104 = vmatpush1.bf16.msra.mxu1 %v4868_v46  ;;  %3246 = vmatpush1.bf16.msra.mxu0 %v4870_v22  ;;  %v4918_v46 = vcombine.low %v1352_v62, %v1356_v17  ;;  %v4925_v22 = vcombine.high %v1359_v39, %v1363_v16  ;;  %v1407_v17 = vld [vmem:[#allocation8 + $0x5d0] sm:$0xff] }
 0x2da   :  { %3105 = vmatprep.subr.bf16.mxu1 %v4877_v51  ;;  %3247 = vmatprep.subr.bf16.mxu0 %v4879_v42  ;;  %v4927_v51 = vcombine.high %v1360_v21, %v1364_v18  ;;  %v1367_v42 = vld [vmem:[#allocation8 + $0x490] sm:$0xff] }
 0x2dd   :  { %3106 = vmatpush1.bf16.msra.mxu1 %v4876_v48  ;;  %3248 = vmatpush1.bf16.msra.mxu0 %v4878_v6  ;;  %v4926_v48 = vcombine.low %v1360_v21, %v1364_v18  ;;  %v4933_v6 = vcombine.high %v1367_v42, %v1371_v47  ;;  %v1415_v21 = vld [vmem:[#allocation8 + $0x610] sm:$0xff]  ;;  %v1416_v18 = vld [vmem:[#allocation8 + $0x618] sm:$0xff] }
 0x2de   :  { %3107 = vmatprep.subr.bf16.mxu1 %v4885_v45  ;;  %3249 = vmatprep.subr.bf16.mxu0 %v4887_v28  ;;  %v4935_v45 = vcombine.high %v1368_v4, %v1372_v43  ;;  %v1375_v28 = vld [vmem:[#allocation8 + $0x4d0] sm:$0xff]  ;;  %v1424_v43 = vld [vmem:[#allocation8 + $0x658] sm:$0xff] }
 0x2df   :  { %v4940_v30 = vcombine.low %v1375_v28, %v1379_v24  ;;  %v1427_v4 = vld [vmem:[#allocation8 + $0x670] sm:$0xff] }
 0x2e1   :  { %3108 = vmatpush1.bf16.msra.mxu1 %v4884_v14  ;;  %3250 = vmatpush1.bf16.msra.mxu0 %v4886_v50  ;;  %v4941_v14 = vcombine.high %v1375_v28, %v1379_v24  ;;  %v4943_v50 = vcombine.high %v1376_v49, %v1380_v59  ;;  %v1431_v28 = vld [vmem:[#allocation8 + $0x690] sm:$0xff]  ;;  %v1436_v49 = vld [vmem:[#allocation8 + $0x6b8] sm:$0xff] }
 0x2e2   :  { %3109 = vmatprep.subr.bf16.mxu1 %v4893_v55  ;;  %3251 = vmatprep.subr.bf16.mxu0 %v4895_v52  ;;  %v1383_v55 = vld [vmem:[#allocation8 + $0x510] sm:$0xff]  ;;  %v1384_v52 = vld [vmem:[#allocation8 + $0x518] sm:$0xff] }
 0x2e3   :  { %v4950_v26 = vcombine.low %v1384_v52, %v1388_v44  ;;  %v1435_v24 = vld [vmem:[#allocation8 + $0x6b0] sm:$0xff] }
 0x2e5   :  { %3110 = vmatpush1.bf16.msra.mxu1 %v4892_v10  ;;  %3252 = vmatpush1.bf16.msra.mxu0 %v4894_v11  ;;  %v4951_v10 = vcombine.high %v1384_v52, %v1388_v44  ;;  %v1391_v11 = vld [vmem:[#allocation8 + $0x550] sm:$0xff]  ;;  %v1444_v52 = vld [vmem:[#allocation8 + $0x6f8] sm:$0xff]  ;;  %v4996_v44 = vcombine.low %v1431_v28, %v1435_v24 }
 0x2e6   :  { %3111 = vmatprep.subr.bf16.mxu1 %v4901_v36  ;;  %3253 = vmatprep.subr.bf16.mxu0 %v4903_v57  ;;  %v1395_v36 = vld [vmem:[#allocation8 + $0x570] sm:$0xff]  ;;  %v1392_v57 = vld [vmem:[#allocation8 + $0x558] sm:$0xff] }
 0x2e7   :  { %v4957_v19 = vcombine.high %v1391_v11, %v1395_v36  ;;  %v4959_v31 = vcombine.high %v1392_v57, %v1396_v53  ;;  %v4958_v60 = vcombine.low %v1392_v57, %v1396_v53  ;;  %v1452_v57 = vld [vmem:[#allocation8 + $0x738] sm:$0xff] }
 0x2e9   :  { %3112 = vmatpush1.bf16.msra.mxu1 %v4900_v8  ;;  %3254 = vmatpush1.bf16.msra.mxu0 %v4902_v15  ;;  %v1399_v8 = vld [vmem:[#allocation8 + $0x590] sm:$0xff]  ;;  %v1400_v15 = vld [vmem:[#allocation8 + $0x598] sm:$0xff] }
 0x2ea   :  { %3113 = vmatprep.subr.bf16.mxu1 %v4909_v63  ;;  %3255 = vmatprep.subr.bf16.mxu0 %v4911_v33  ;;  %v1404_v63 = vld [vmem:[#allocation8 + $0x5b8] sm:$0xff]  ;;  %v4956_v33 = vcombine.low %v1391_v11, %v1395_v36  ;;  %v1451_v11 = vld [vmem:[#allocation8 + $0x730] sm:$0xff] }
 0x2eb   :  { %v4967_v62 = vcombine.high %v1400_v15, %v1404_v63  ;;  %v1448_v36 = vld [vmem:[#allocation8 + $0x718] sm:$0xff] }
 0x2ed   :  { %3114 = vmatpush1.bf16.msra.mxu1 %v4908_v1  ;;  %3256 = vmatpush1.bf16.msra.mxu0 %v4910_v38  ;;  %v1411_v1 = vld [vmem:[#allocation8 + $0x5f0] sm:$0xff]  ;;  %v1408_v38 = vld [vmem:[#allocation8 + $0x5d8] sm:$0xff] }
 0x2ee   :  { %3154 = vmatprep.subr.bf16.mxu1 %v4917_v3  ;;  %3296 = vmatprep.subr.bf16.mxu0 %v4919_v58  ;;  %v1412_v3 = vld [vmem:[#allocation8 + $0x5f8] sm:$0xff]  ;;  %v4966_v58 = vcombine.low %v1400_v15, %v1404_v63  ;;  %v4973_v39 = vcombine.high %v1407_v17, %v1411_v1 }
 0x2ef   :  { %v4975_v16 = vcombine.high %v1408_v38, %v1412_v3  ;;  %v1460_v15 = vld [vmem:[#allocation8 + $0x778] sm:$0xff] }
 0x2f0   :  { %3116 = vmatmul.mubr.bf16.vlgmr.msra.gmra.mrb[32].mxu1 %v6599_v7  ;;  %3258 = vmatmul.mubr.bf16.vlgmr.msra.gmra.mrb[48].mxu0 %v6599_v7  ;;  %v4932_v7 = vcombine.low %v1367_v42, %v1371_v47  ;;  %v1423_v47 = vld [vmem:[#allocation8 + $0x650] sm:$0xff] }
 0x2f1   :  { %3125 = vmatprep.mubr.bf16.mxu1 %v6620_v0  ;;  %3155 = vmatpush1.bf16.msra.mxu1 %v4916_v37  ;;  %v1420_v37 = vld [vmem:[#allocation8 + $0x638] sm:$0xff]  ;;  %v4988_v59 = vcombine.low %v1423_v47, %v1427_v4 }
 0x2f2   :  { %3267 = vmatprep.mubr.bf16.mxu0 %v6620_v0  ;;  %3297 = vmatpush1.bf16.msra.mxu0 %v4918_v46  ;;  %v1387_v0 = vld [vmem:[#allocation8 + $0x530] sm:$0xff]  ;;  %v4972_v46 = vcombine.low %v1407_v17, %v1411_v1  ;;  %v4983_v42 = vcombine.high %v1416_v18, %v1420_v37  ;;  %v1464_v1 = vld [vmem:[#allocation8 + $0x798] sm:$0xff] }
 0x2f3   :  { %3156 = vmatprep.subr.bf16.mxu1 %v4925_v22  ;;  %3298 = vmatprep.subr.bf16.mxu0 %v4927_v51  ;;  %v4949_v41 = vcombine.high %v1383_v55, %v1387_v0  ;;  %v4974_v22 = vcombine.low %v1408_v38, %v1412_v3  ;;  %v1467_v17 = vld [vmem:[#allocation8 + $0x7b0] sm:$0xff]  ;;  %v1468_v38 = vld [vmem:[#allocation8 + $0x7b8] sm:$0xff] }
 0x2f5   :  { %3157 = vmatpush1.bf16.msra.mxu1 %v4924_v54  ;;  %v1428_v54 = vld [vmem:[#allocation8 + $0x678] sm:$0xff] }
 0x2f6   :  { %3299 = vmatpush1.bf16.msra.mxu0 %v4926_v48  ;;  %3158 = vmatprep.subr.bf16.mxu1 %v4933_v6  ;;  %v4982_v48 = vcombine.low %v1416_v18, %v1420_v37  ;;  %v4989_v6 = vcombine.high %v1423_v47, %v1427_v4  ;;  %v1476_v18 = vld [vmem:[#allocation8 + $0x7f8] sm:$0xff]  ;;  %v5528_v4 = vld [vmem:[#allocation10 + $0x40] sm:$0xff]  }
 0x2f7   :  { %3300 = vmatprep.subr.bf16.mxu0 %v4935_v45  ;;  %v4991_v45 = vcombine.high %v1424_v43, %v1428_v54 }
 0x2f8   :  { %3126 = vmatmul.mubr.bf16.gmra.mrb[36].mxu1 %v6632_v27  ;;  %3268 = vmatmul.mubr.bf16.gmra.mrb[52].mxu0 %v6632_v27  ;;  %v4948_v27 = vcombine.low %v1383_v55, %v1387_v0  ;;  %v1443_v55 = vld [vmem:[#allocation8 + $0x6f0] sm:$0xff]  ;;  %v1440_v0 = vld [vmem:[#allocation8 + $0x6d8] sm:$0xff] }
 0x2f9   :  { %3135 = vmatprep.mubr.bf16.mxu1 %v6654_v56  ;;  %3159 = vmatpush1.bf16.msra.mxu1 %v4932_v7  ;;  %v4990_v7 = vcombine.low %v1424_v43, %v1428_v54  ;;  %v5529_v43 = vld [vmem:[#allocation10 + $0xc0] sm:$0xff]  }
 0x2fa   :  { %3277 = vmatprep.mubr.bf16.mxu0 %v6654_v56  ;;  %3301 = vmatpush1.bf16.msra.mxu0 %v4934_v40  ;;  %v1403_v56 = vld [vmem:[#allocation8 + $0x5b0] sm:$0xff]  ;;  %v4997_v40 = vcombine.high %v1431_v28, %v1435_v24  ;;  %v5530_v54 = vld [vmem:[#allocation10] sm:$0xff]   ;;  %v5535_v28 = vld [vmem:[#allocation10 + $0x88] sm:$0xff]  }
 0x2fb   :  { %3160 = vmatprep.subr.bf16.mxu1 %v4941_v14  ;;  %3302 = vmatprep.subr.bf16.mxu0 %v4943_v50  ;;  %v4965_v20 = vcombine.high %v1399_v8, %v1403_v56  ;;  %v1439_v50 = vld [vmem:[#allocation8 + $0x6d0] sm:$0xff] }
 0x2fc   :  { %v5004_v53 = vcombine.low %v1439_v50, %v1443_v55  ;;  %v5536_v24 = vld [vmem:[#allocation10 + $0x50] sm:$0xff]  }
 0x2fd   :  { %3161 = vmatpush1.bf16.msra.mxu1 %v4940_v30 }
 0x2fe   :  { %3303 = vmatpush1.bf16.msra.mxu0 %v4942_v25  ;;  %3162 = vmatprep.subr.bf16.mxu1 %v4949_v41  ;;  %v5005_v25 = vcombine.high %v1439_v50, %v1443_v55  ;;  %v5007_v41 = vcombine.high %v1440_v0, %v1444_v52  ;;  %v5545_v50 = vld [vmem:[#allocation10 + $0xe0] sm:$0xff]  }
 0x2ff   :  { %3304 = vmatprep.subr.bf16.mxu0 %v4951_v10  ;;  %v1447_v10 = vld [vmem:[#allocation8 + $0x710] sm:$0xff]  ;;  %v5546_v55 = vld [vmem:[#allocation10 + $0x20] sm:$0xff]  }
 0x300   :  { %3136 = vmatmul.mubr.bf16.gmra.mrb[40].mxu1 %v6643_v34  ;;  %3278 = vmatmul.mubr.bf16.gmra.mrb[56].mxu0 %v6643_v34  ;;  %v4964_v34 = vcombine.low %v1399_v8, %v1403_v56  ;;  %v1459_v8 = vld [vmem:[#allocation8 + $0x770] sm:$0xff]  ;;  %v1456_v56 = vld [vmem:[#allocation8 + $0x758] sm:$0xff]  ;;  %v5012_v63 = vcombine.low %v1447_v10, %v1451_v11 }
 0x301   :  { %3145 = vmatprep.mubr.bf16.mxu1 %v6722_v5  ;;  %3163 = vmatpush1.bf16.msra.mxu1 %v4948_v27  ;;  %v5006_v27 = vcombine.low %v1440_v0, %v1444_v52  ;;  %v5547_v0 = vld [vmem:[#allocation10 + $0xa0] sm:$0xff]   ;;  %v5548_v52 = vld [vmem:[#allocation10 + $0x68] sm:$0xff]  }
 0x302   :  { %3287 = vmatprep.mubr.bf16.mxu0 %v6722_v5  ;;  %3305 = vmatpush1.bf16.msra.mxu0 %v4950_v26  ;;  %v1419_v5 = vld [vmem:[#allocation8 + $0x630] sm:$0xff]  ;;  %v5013_v26 = vcombine.high %v1447_v10, %v1451_v11  ;;  %v5556_v11 = vld [vmem:[#allocation10 + $0x78] sm:$0xff]  }
 0x303   :  { %3164 = vmatprep.subr.bf16.mxu1 %v4957_v19  ;;  %3306 = vmatprep.subr.bf16.mxu0 %v4959_v31  ;;  %v4981_v51 = vcombine.high %v1415_v21, %v1419_v5  ;;  %v5015_v19 = vcombine.high %v1448_v36, %v1452_v57  ;;  %v1455_v31 = vld [vmem:[#allocation8 + $0x750] sm:$0xff] }
 0x304   :  { %v5020_v3 = vcombine.low %v1455_v31, %v1459_v8  ;;  %v5555_v10 = vld [vmem:[#allocation10 + $0xb0] sm:$0xff]  }
 0x305   :  { %3165 = vmatpush1.bf16.msra.mxu1 %v4956_v33  ;;  %v5014_v33 = vcombine.low %v1448_v36, %v1452_v57  ;;  %v5559_v36 = vld [vmem:[#allocation10 + $0xb8] sm:$0xff]   ;;  %v6805_v57 = vld [vmem:[%s7522_s6] sm:$0xff] }
 0x306   :  { %3307 = vmatpush1.bf16.msra.mxu0 %v4958_v60  ;;  %3166 = vmatprep.subr.bf16.mxu1 %v4965_v20  ;;  %v5021_v60 = vcombine.high %v1455_v31, %v1459_v8  ;;  %v5023_v20 = vcombine.high %v1456_v56, %v1460_v15  ;;  %7631 = vst [vmem:[#allocation21_spill] sm:$0xff] %v6805_v57  ;;  %v7635_v31 = vld [vmem:[#allocation18_spill] sm:$0xff] }
 0x307   :  { %3308 = vmatprep.subr.bf16.mxu0 %v4967_v62  ;;  %v1463_v62 = vld [vmem:[#allocation8 + $0x790] sm:$0xff]  ;;  %v6818_v8 = vrot.slane %v6805_v57, %v7635_v31 }
 0x308   :  { %3146 = vmatmul.mubr.bf16.gmra.mrb[44].mxu1 %v6728_v35  ;;  %3288 = vmatmul.mubr.bf16.gmra.mrb[60].mxu0 %v6728_v35  ;;  %v4980_v35 = vcombine.low %v1415_v21, %v1419_v5  ;;  %v1475_v21 = vld [vmem:[#allocation8 + $0x7f0] sm:$0xff]  ;;  %v1472_v5 = vld [vmem:[#allocation8 + $0x7d8] sm:$0xff]  ;;  %v5028_v37 = vcombine.low %v1463_v62, %v1467_v17 }
 0x309   :  { %3167 = vmatpush1.bf16.msra.mxu1 %v4964_v34  ;;  %3186 = vmatprep.mubr.bf16.mxu1 %v6672_v29  ;;  %v5022_v34 = vcombine.low %v1456_v56, %v1460_v15  ;;  %v5038_v47 = vcombine.low %v1472_v5, %v1476_v18 }
 0x30a   :  { %3309 = vmatpush1.bf16.msra.mxu0 %v4966_v58  ;;  %3328 = vmatprep.mubr.bf16.mxu0 %v6672_v29  ;;  %v1432_v29 = vld [vmem:[#allocation8 + $0x698] sm:$0xff]  ;;  %v5029_v58 = vcombine.high %v1463_v62, %v1467_v17 }
 0x30b   :  { %3168 = vmatprep.subr.bf16.mxu1 %v4973_v39  ;;  %3310 = vmatprep.subr.bf16.mxu0 %v4975_v16  ;;  %v4999_v14 = vcombine.high %v1432_v29, %v1436_v49  ;;  %v4998_v30 = vcombine.low %v1432_v29, %v1436_v49  ;;  %v5031_v39 = vcombine.high %v1464_v1, %v1468_v38  ;;  %v1471_v16 = vld [vmem:[#allocation8 + $0x7d0] sm:$0xff] }
 0x30c   :  { %v5537_v29 = vld [vmem:[#allocation10 + $0xd0] sm:$0xff]  }
 0x30d   :  { %3169 = vmatpush1.bf16.msra.mxu1 %v4972_v46  ;;  %v5030_v46 = vcombine.low %v1464_v1, %v1468_v38  ;;  %v5538_v49 = vld [vmem:[#allocation10 + $0x10] sm:$0xff]  }
 0x30e   :  { %3311 = vmatpush1.bf16.msra.mxu0 %v4974_v22  ;;  %3170 = vmatprep.subr.bf16.mxu1 %v4981_v51  ;;  %v5037_v22 = vcombine.high %v1471_v16, %v1475_v21  ;;  %v5039_v51 = vcombine.high %v1472_v5, %v1476_v18 }
 0x30f   :  { %3312 = vmatprep.subr.bf16.mxu0 %v4983_v42  ;;  %v5036_v42 = vcombine.low %v1471_v16, %v1475_v21 }
 0x311   :  { %3171 = vmatpush1.bf16.msra.mxu1 %v4980_v35  ;;  %v5531_v35 = vld [vmem:[#allocation10 + $0x80] sm:$0xff]  }
 0x312   :  { %3313 = vmatpush1.bf16.msra.mxu0 %v4982_v48  ;;  %3172 = vmatprep.subr.bf16.mxu1 %v4989_v6  ;;  %v5532_v48 = vld [vmem:[#allocation10 + $0x48] sm:$0xff]  }
 0x313   :  { %3314 = vmatprep.subr.bf16.mxu0 %v4991_v45  ;;  %v5533_v6 = vld [vmem:[#allocation10 + $0xc8] sm:$0xff]  }
 0x314   :  { %v5534_v45 = vld [vmem:[#allocation10 + $0x8] sm:$0xff]  }
 0x315   :  { %3173 = vmatpush1.bf16.msra.mxu1 %v4988_v59  ;;  %v5539_v59 = vld [vmem:[#allocation10 + $0x90] sm:$0xff]  }
 0x316   :  { %3315 = vmatpush1.bf16.msra.mxu0 %v4990_v7  ;;  %3174 = vmatprep.subr.bf16.mxu1 %v4997_v40  ;;  %v5540_v7 = vld [vmem:[#allocation10 + $0x58] sm:$0xff]  }
 0x317   :  { %3316 = vmatprep.subr.bf16.mxu0 %v4999_v14  ;;  %v5543_v40 = vld [vmem:[#allocation10 + $0x98] sm:$0xff]   ;;  %v5544_v14 = vld [vmem:[#allocation10 + $0x60] sm:$0xff]  }
 0x319   :  { %3175 = vmatpush1.bf16.msra.mxu1 %v4996_v44  ;;  %v5551_v44 = vld [vmem:[#allocation10 + $0xa8] sm:$0xff]  }
 0x31a   :  { %3317 = vmatpush1.bf16.msra.mxu0 %v4998_v30  ;;  %3176 = vmatprep.subr.bf16.mxu1 %v5005_v25  ;;  %v5552_v30 = vld [vmem:[#allocation10 + $0x70] sm:$0xff]  }
 0x31b   :  { %3318 = vmatprep.subr.bf16.mxu0 %v5007_v41  ;;  %v5553_v25 = vld [vmem:[#allocation10 + $0xf0] sm:$0xff]  }
 0x31c   :  { %v5554_v41 = vld [vmem:[#allocation10 + $0x30] sm:$0xff]  }
 0x31d   :  { %3177 = vmatpush1.bf16.msra.mxu1 %v5004_v53  ;;  %v7632_v53 = vld [vmem:[#allocation17_spill] sm:$0xff] }
 0x31e   :  { %3319 = vmatpush1.bf16.msra.mxu0 %v5006_v27  ;;  %3178 = vmatprep.subr.bf16.mxu1 %v5013_v26  ;;  %v6809_v27 = vrot.slane %v6805_v57, %v7632_v53  ;;  %v7633_v26 = vld [vmem:[#allocation16_spill] sm:$0xff] }
 0x31f   :  { %3320 = vmatprep.subr.bf16.mxu0 %v5015_v19  ;;  %v7634_v19 = vsub.s32 2, %v7633_v26  ;;  %v7636_v56 = vsub.s32 3, %v7633_v26 }
 0x321   :  { %3179 = vmatpush1.bf16.msra.mxu1 %v5012_v63  ;;  %v6823_v15 = vrot.slane %v6805_v57, %v7636_v56 }
 0x322   :  { %3321 = vmatpush1.bf16.msra.mxu0 %v5014_v33  ;;  %3180 = vmatprep.subr.bf16.mxu1 %v5021_v60 }
 0x323   :  { %3322 = vmatprep.subr.bf16.mxu0 %v5023_v20 }
 0x325   :  { %3181 = vmatpush1.bf16.msra.mxu1 %v5020_v3 }
 0x326   :  { %3323 = vmatpush1.bf16.msra.mxu0 %v5022_v34  ;;  %3182 = vmatprep.subr.bf16.mxu1 %v5029_v58 }
 0x327   :  { %3324 = vmatprep.subr.bf16.mxu0 %v5031_v39 }
 0x329   :  { %3183 = vmatpush1.bf16.msra.mxu1 %v5028_v37 }
 0x32a   :  { %3325 = vmatpush1.bf16.msra.mxu0 %v5030_v46  ;;  %3184 = vmatprep.subr.bf16.mxu1 %v5037_v22 }
 0x32b   :  { %3326 = vmatprep.subr.bf16.mxu0 %v5039_v51 }
 0x32d   :  { %3185 = vmatpush1.bf16.msra.mxu1 %v5036_v42 }
 0x32e   :  { %3327 = vmatpush1.bf16.msra.mxu0 %v5038_v47  ;;  %5105 = vmatprep.subr.bf16.mxu1 %v5528_v4 }
 0x32f   :  { %5145 = vmatprep.subr.bf16.mxu0 %v5529_v43 }
 0x330   :  { %3187 = vmatmul.mubr.bf16.vlgmr.msra.gmra.mrb[32].mxu1 %v6683_v12 }
 0x331   :  { %3329 = vmatmul.mubr.bf16.vlgmr.msra.gmra.mrb[48].mxu0 %v6683_v12  ;;  %3196 = vmatprep.mubr.bf16.mxu1 %v6691_v32  ;;  %v5541_v12 = vld [vmem:[#allocation10 + $0xd8] sm:$0xff]  }
 0x332   :  { %3338 = vmatprep.mubr.bf16.mxu0 %v6691_v32  ;;  %5106 = vmatpush3.bf16.msra.mxu1 %v5530_v54  ;;  %v5542_v32 = vld [vmem:[#allocation10 + $0x18] sm:$0xff]  }
 0x333   :  { %5146 = vmatpush3.bf16.msra.mxu0 %v5531_v35  ;;  %5107 = vmatprep.subr.bf16.mxu1 %v5532_v48 }
 0x334   :  { %5147 = vmatprep.subr.bf16.mxu0 %v5533_v6 }
 0x336   :  { %5108 = vmatpush3.bf16.msra.mxu1 %v5534_v45 }
 0x337   :  { %5148 = vmatpush3.bf16.msra.mxu0 %v5535_v28  ;;  %5109 = vmatprep.subr.bf16.mxu1 %v5536_v24 }
 0x338   :  { %3197 = vmatmul.mubr.bf16.gmra.mrb[36].mxu1 %v6710_v13  ;;  %5149 = vmatprep.subr.bf16.mxu0 %v5537_v29 }
 0x339   :  { %3339 = vmatmul.mubr.bf16.gmra.mrb[52].mxu0 %v6710_v13  ;;  %3206 = vmatprep.mubr.bf16.mxu1 %v6720_v23  ;;  %v5549_v13 = vld [vmem:[#allocation10 + $0xe8] sm:$0xff]  }
 0x33a   :  { %3348 = vmatprep.mubr.bf16.mxu0 %v6720_v23  ;;  %5110 = vmatpush3.bf16.msra.mxu1 %v5538_v49  ;;  %v5550_v23 = vld [vmem:[#allocation10 + $0x28] sm:$0xff]  }
 0x33b   :  { %5150 = vmatpush3.bf16.msra.mxu0 %v5539_v59  ;;  %5111 = vmatprep.subr.bf16.mxu1 %v5540_v7 }
 0x33c   :  { %5151 = vmatprep.subr.bf16.mxu0 %v5541_v12 }
 0x33e   :  { %5112 = vmatpush3.bf16.msra.mxu1 %v5542_v32 }
 0x33f   :  { %5152 = vmatpush3.bf16.msra.mxu0 %v5543_v40  ;;  %5113 = vmatprep.subr.bf16.mxu1 %v5544_v14 }
 0x340   :  { %3207 = vmatmul.mubr.bf16.gmra.mrb[40].mxu1 %v6724_v9  ;;  %5153 = vmatprep.subr.bf16.mxu0 %v5545_v50 }
 0x341   :  { %3349 = vmatmul.mubr.bf16.gmra.mrb[56].mxu0 %v6724_v9  ;;  %3216 = vmatprep.mubr.bf16.mxu1 %v6759_v2  ;;  %v5557_v9 = vld [vmem:[#allocation10 + $0xf8] sm:$0xff]  }
 0x342   :  { %3358 = vmatprep.mubr.bf16.mxu0 %v6759_v2  ;;  %5114 = vmatpush3.bf16.msra.mxu1 %v5546_v55  ;;  %v5558_v2 = vld [vmem:[#allocation10 + $0x38] sm:$0xff]  }
 0x343   :  { %5154 = vmatpush3.bf16.msra.mxu0 %v5547_v0  ;;  %5115 = vmatprep.subr.bf16.mxu1 %v5548_v52 }
 0x344   :  { %5155 = vmatprep.subr.bf16.mxu0 %v5549_v13 }
 0x346   :  { %5116 = vmatpush3.bf16.msra.mxu1 %v5550_v23 }
 0x347   :  { %5156 = vmatpush3.bf16.msra.mxu0 %v5551_v44  ;;  %5117 = vmatprep.subr.bf16.mxu1 %v5552_v30 }
 0x348   :  { %3217 = vmatmul.mubr.bf16.gmra.mrb[44].mxu1 %v6766_v61  ;;  %5157 = vmatprep.subr.bf16.mxu0 %v5553_v25 }
 0x349   :  { %3359 = vmatmul.mubr.bf16.gmra.mrb[60].mxu0 %v6766_v61  ;;  %v6814_v61 = vrot.slane %v6805_v57, %v7634_v19 }
 0x34a   :  { %5118 = vmatpush3.bf16.msra.mxu1 %v5554_v41 }
 0x34b   :  { %5158 = vmatpush3.bf16.msra.mxu0 %v5555_v10  ;;  %5119 = vmatprep.subr.bf16.mxu1 %v5556_v11 }
 0x34c   :  { %5159 = vmatprep.subr.bf16.mxu0 %v5557_v9 }
 0x34e   :  { %5120 = vmatpush3.bf16.msra.mxu1 %v5558_v2 }
 0x34f   :  { %5160 = vmatpush3.bf16.msra.mxu0 %v5559_v36 }
 0x382   :  { %v2904_v63 = vpop.f32.mrb[16].mxu1  ;;  %v3046_v33 = vpop.f32.mrb[32].mxu0 }
 0x383   :  { %v5281_v60 = vadd.f32 %v2904_v63, %v6809_v27  ;;  %v5295_v20 = vadd.f32 %v3046_v33, %v6814_v61  ;;  %v2906_v62 = vpop.f32.mrb[17].mxu1  ;;  %v3048_v17 = vpop.f32.mrb[33].mxu0 }
 0x384   :  { %v6828_v1 = vadd.f32 %v2906_v62, %v6818_v8  ;;  %v6831_v38 = vadd.f32 %v3048_v17, %v6823_v15  ;;  %v2908_v3 = vpop.f32.mrb[18].mxu1  ;;  %v3050_v34 = vpop.f32.mrb[34].mxu0 }
 0x385   :  { %v3423_v58 = vmul.f32 0.044715, %v5281_v60  ;;  %v3425_v39 = vmul.f32 0.044715, %v5295_v20  ;;  %v5283_v21 = vadd.f32 %v2908_v3, %v6809_v27  ;;  %v5297_v5 = vadd.f32 %v3050_v34, %v6814_v61  ;;  %v2910_v18 = vpop.f32.mrb[19].mxu1  ;;  %v3052_v37 = vpop.f32.mrb[35].mxu0 }
 0x386   :  { %v3424_v16 = vmul.f32 0.044715, %v6828_v1  ;;  %v3426_v51 = vmul.f32 0.044715, %v6831_v38  ;;  %v6838_v42 = vadd.f32 %v2910_v18, %v6818_v8  ;;  %v6841_v4 = vadd.f32 %v3052_v37, %v6823_v15  ;;  %v5560_v34 = vld [vmem:[#allocation10 + $0x140] sm:$0xff]  }
 0x387   :  { %v3479_v46 = vmul.f32 %v5281_v60, %v3423_v58  ;;  %v3481_v22 = vmul.f32 %v5295_v20, %v3425_v39  ;;  %v3431_v47 = vmul.f32 0.044715, %v5283_v21  ;;  %v3433_v35 = vmul.f32 0.044715, %v5297_v5  ;;  %5185 = vmatprep.subr.bf16.mxu1 %v5560_v34 }
 0x388   :  { %v3480_v48 = vmul.f32 %v6828_v1, %v3424_v16  ;;  %v3432_v45 = vmul.f32 0.044715, %v6838_v42  ;;  %v3482_v59 = vmul.f32 %v6831_v38, %v3426_v51  ;;  %v3434_v14 = vmul.f32 0.044715, %v6841_v4 }
 0x389   :  { %v3535_v43 = vmul.f32 %v5281_v60, %v3479_v46  ;;  %v3537_v54 = vmul.f32 %v5295_v20, %v3481_v22  ;;  %v3487_v6 = vmul.f32 %v5283_v21, %v3431_v47  ;;  %v3489_v7 = vmul.f32 %v5297_v5, %v3433_v35 }
 0x38a   :  { %v2914_v28 = vpop.f32.mrb[20].mxu1  ;;  %v3056_v24 = vpop.f32.mrb[36].mxu0  ;;  %v6853_v13 = vmul.f32 0.5, %v5281_v60  ;;  %v6855_v23 = vmul.f32 0.5, %v5295_v20  ;;  %v3488_v30 = vmul.f32 %v6838_v42, %v3432_v45  ;;  %v6858_v11 = vmul.f32 0.5, %v5283_v21 }
 0x38b   :  { %v3591_v29 = vadd.f32 %v5281_v60, %v3535_v43  ;;  %v3593_v49 = vadd.f32 %v5295_v20, %v3537_v54  ;;  %v2916_v12 = vpop.f32.mrb[21].mxu1  ;;  %v3058_v32 = vpop.f32.mrb[37].mxu0  ;;  %v3543_v40 = vmul.f32 %v5283_v21, %v3487_v6  ;;  %v6848_v50 = vadd.f32 %v2914_v28, %v6809_v27  ;;  %v6901_v28 = vld [vmem:[#allocation10 + $0x1c0] sm:$0xff]  }
 0x38c   :  { %v6851_v55 = vadd.f32 %v3056_v24, %v6814_v61  ;;  %v2918_v0 = vpop.f32.mrb[22].mxu1  ;;  %v3060_v52 = vpop.f32.mrb[38].mxu0  ;;  %v3545_v44 = vmul.f32 %v5297_v5, %v3489_v7  ;;  %v6861_v36 = vmul.f32 0.5, %v5297_v5  ;;  %v6865_v31 = vadd.f32 %v2916_v12, %v6818_v8  ;;  %7637 = vst [vmem:[#allocation26_spill] sm:$0xff] %v6901_v28  ;;  %5225 = vmatprep.subr.bf16.mxu0 %v6901_v28 }
 0x38d   :  { %v2920_v25 = vpop.f32.mrb[23].mxu1  ;;  %v3062_v41 = vpop.f32.mrb[39].mxu0  ;;  %v3647_v10 = vmul.f32 0.7978846, %v3591_v29  ;;  %v3599_v9 = vadd.f32 %v5283_v21, %v3543_v40  ;;  %v3439_v2 = vmul.f32 0.044715, %v6848_v50  ;;  %v6868_v63 = vmul.f32 %v6828_v1, %v3480_v48 }
 0x38e   :  { %v3601_v53 = vadd.f32 %v5297_v5, %v3545_v44  ;;  %v3441_v19 = vmul.f32 0.044715, %v6851_v55  ;;  %v3649_v56 = vmul.f32 0.7978846, %v3593_v49  ;;  %v6871_v33 = vmul.f32 %v6831_v38, %v3482_v59 }
 0x38f   :  { %v3490_v60 = vmul.f32 %v6841_v4, %v3434_v14  ;;  %v6875_v20 = vmul.f32 %v6838_v42, %v3488_v30  ;;  %v3440_v62 = vmul.f32 0.044715, %v6865_v31  ;;  %v6879_v17 = vadd.f32 %v3058_v32, %v6823_v15 }
 0x390   :  { %v6882_v3 = vadd.f32 %v2918_v0, %v6809_v27  ;;  %5676 = vtanh.f32 %v3647_v10  ;;  %v3655_v58 = vmul.f32 0.7978846, %v3599_v9  ;;  %v3495_v39 = vmul.f32 %v6848_v50, %v3439_v2 }
 0x391   :  { %v6886_v16 = vadd.f32 %v3060_v52, %v6814_v61  ;;  %v3657_v18 = vmul.f32 0.7978846, %v3601_v53  ;;  %v3497_v37 = vmul.f32 %v6851_v55, %v3441_v19  ;;  %v3496_v46 = vmul.f32 %v6865_v31, %v3440_v62 }
 0x392   :  { %v2924_v21 = vpop.f32.mrb[24].mxu1  ;;  %v3066_v5 = vpop.f32.mrb[40].mxu0  ;;  %v3442_v22 = vmul.f32 0.044715, %v6879_v17  ;;  %v3447_v43 = vmul.f32 0.044715, %v6882_v3  ;;  %v6893_v54 = vadd.f32 %v2920_v25, %v6818_v8  ;;  %v6896_v35 = vadd.f32 %v3062_v41, %v6823_v15 }
 0x393   :  { %v2926_v51 = vpop.f32.mrb[25].mxu1  ;;  %v3068_v47 = vpop.f32.mrb[41].mxu0  ;;  %v6899_v48 = vadd.f32 %v2924_v21, %v6809_v27  ;;  %5678 = vtanh.f32 %v3649_v56  ;;  %v6904_v24 = vmul.f32 %v6841_v4, %v3490_v60  ;;  %v3449_v29 = vmul.f32 0.044715, %v6886_v16 }
 0x394   :  { %v2928_v6 = vpop.f32.mrb[26].mxu1  ;;  %v3070_v45 = vpop.f32.mrb[42].mxu0  ;;  %v6908_v49 = vadd.f32 %v3066_v5, %v6814_v61  ;;  %5680 = vtanh.f32 %v3655_v58  ;;  %v3498_v12 = vmul.f32 %v6879_v17, %v3442_v22  ;;  %v3448_v32 = vmul.f32 0.044715, %v6893_v54 }
 0x395   :  { %v2930_v59 = vpop.f32.mrb[27].mxu1  ;;  %v3072_v7 = vpop.f32.mrb[43].mxu0  ;;  %v3450_v40 = vmul.f32 0.044715, %v6896_v35  ;;  %v6915_v14 = vmul.f32 %v6848_v50, %v3495_v39  ;;  %v3455_v0 = vmul.f32 0.044715, %v6899_v48  ;;  %v6920_v44 = vadd.f32 %v2926_v51, %v6818_v8 }
 0x396   :  { %v3457_v52 = vmul.f32 0.044715, %v6908_v49  ;;  %5682 = vtanh.f32 %v3657_v18  ;;  %v6923_v30 = vmul.f32 %v6851_v55, %v3497_v37  ;;  %v6926_v25 = vmul.f32 %v6865_v31, %v3496_v46 }
 0x397   :  { %v3503_v41 = vmul.f32 %v6882_v3, %v3447_v43  ;;  %v3505_v10 = vmul.f32 %v6886_v16, %v3449_v29  ;;  %v3456_v9 = vmul.f32 0.044715, %v6920_v44  ;;  %v6932_v2 = vadd.f32 %v3068_v47, %v6823_v15 }
 0x398   :  { %v6935_v53 = vadd.f32 %v2928_v6, %v6809_v27  ;;  %v6938_v19 = vmul.f32 %v6879_v17, %v3498_v12  ;;  %v3504_v56 = vmul.f32 %v6893_v54, %v3448_v32  ;;  %v3506_v60 = vmul.f32 %v6896_v35, %v3450_v40 }
 0x399   :  { %v6943_v62 = vadd.f32 %v3070_v45, %v6814_v61  ;;  %v3511_v39 = vmul.f32 %v6899_v48, %v3455_v0  ;;  %v3513_v21 = vmul.f32 %v6908_v49, %v3457_v52  ;;  %v3458_v5 = vmul.f32 0.044715, %v6932_v2 }
 0x39a   :  { %v2934_v34 = vpop.f32.mrb[28].mxu1  ;;  %v3076_v58 = vpop.f32.mrb[44].mxu0  ;;  %v3463_v18 = vmul.f32 0.044715, %v6935_v53  ;;  %v6951_v47 = vadd.f32 %v2930_v59, %v6818_v8  ;;  %v6954_v43 = vadd.f32 %v3072_v7, %v6823_v15  ;;  %v3512_v12 = vmul.f32 %v6920_v44, %v3456_v9 }
 0x39b   :  { %v2936_v37 = vpop.f32.mrb[29].mxu1  ;;  %v3078_v46 = vpop.f32.mrb[45].mxu0  ;;  %v3465_v51 = vmul.f32 0.044715, %v6943_v62  ;;  %v6957_v6 = vadd.f32 %v2934_v34, %v6809_v27  ;;  %v3514_v32 = vmul.f32 %v6932_v2, %v3458_v5  ;;  %v6963_v0 = vadd.f32 %v3076_v58, %v6814_v61 }
 0x39c   :  { %v5677_v22 = vpop.eup %5676  ;;  %v2938_v45 = vpop.f32.mrb[30].mxu1  ;;  %v3519_v40 = vmul.f32 %v6935_v53, %v3463_v18  ;;  %v3464_v7 = vmul.f32 0.044715, %v6951_v47  ;;  %v3466_v27 = vmul.f32 0.044715, %v6954_v43  ;;  %v3559_v9 = vmul.f32 %v6882_v3, %v3503_v41 }
 0x39d   :  { %7638 = vst [vmem:[#allocation32_spill] sm:$0xff] %v6957_v6  ;;  %v3080_v29 = vpop.f32.mrb[46].mxu0  ;;  %7639 = vst [vmem:[#allocation23_spill] sm:$0xff] %v6963_v0  ;;  %v2939_v52 = vpop.f32.mrb[31].mxu1  ;;  %v3521_v57 = vmul.f32 %v6943_v62, %v3465_v51  ;;  %v3471_v34 = vmul.f32 0.044715, %v6957_v6  ;;  %v6971_v5 = vmul.f32 %v6886_v16, %v3505_v10  ;;  %v6975_v61 = vadd.f32 %v2936_v37, %v6818_v8 }
 0x39e   :  { %v3081_v59 = vpop.f32.mrb[47].mxu0  ;;  %v5679_v45 = vpop.eup %5678  ;;  %v3473_v18 = vmul.f32 0.044715, %v6963_v0  ;;  %v3560_v51 = vmul.f32 %v6893_v54, %v3504_v56  ;;  %v3562_v29 = vmul.f32 %v6896_v35, %v3506_v60  ;;  %v6980_v52 = vmul.f32 %v6899_v48, %v3511_v39 }
 0x39f   :  { %v5681_v58 = vpop.eup %5680  ;;  %v6983_v59 = vmul.f32 %v6908_v49, %v3513_v21  ;;  %v6986_v41 = vmul.f32 %v6920_v44, %v3512_v12  ;;  %v6989_v10 = vmul.f32 %v6932_v2, %v3514_v32  ;;  %v6992_v8 = vmul.f32 %v6935_v53, %v3519_v40 }
 0x3a0   :  { %v3520_v37 = vmul.f32 %v6951_v47, %v3464_v7  ;;  %v5683_v56 = vpop.eup %5682  ;;  %v6996_v60 = vmul.f32 %v6943_v62, %v3521_v57  ;;  %v3522_v39 = vmul.f32 %v6954_v43, %v3466_v27  ;;  %v7000_v21 = vmul.f32 %v6957_v6, %v3471_v34 }
 0x3a1   :  { %v3592_v12 = vadd.f32 %v6828_v1, %v6868_v63  ;;  %v7005_v32 = vmul.f32 %v6963_v0, %v3473_v18  ;;  %v3472_v40 = vmul.f32 0.044715, %v6975_v61  ;;  %v7009_v26 = vadd.f32 %v3078_v46, %v6823_v15 }
 0x3a2   :  { %v3600_v57 = vadd.f32 %v6838_v42, %v6875_v20  ;;  %v7014_v7 = vmul.f32 0.5, %v6828_v1  ;;  %v3594_v34 = vadd.f32 %v6831_v38, %v6871_v33  ;;  %v3602_v63 = vadd.f32 %v6841_v4, %v6904_v24 }
 0x3a3   :  { %7640 = vst [vmem:[#allocation25_spill] sm:$0xff] %v7005_v32  ;;  %v3648_v27 = vmul.f32 0.7978846, %v3592_v12  ;;  %v3576_v18 = vmul.f32 %v6951_v47, %v3520_v37  ;;  %v3759_v0 = vadd.f32 1.0, %v5677_v22  ;;  %v3767_v32 = vadd.f32 1.0, %v5681_v58 }
 0x3a4   :  { %v3656_v28 = vmul.f32 0.7978846, %v3600_v57  ;;  %v3650_v15 = vmul.f32 0.7978846, %v3594_v34  ;;  %v3658_v46 = vmul.f32 0.7978846, %v3602_v63  ;;  %v3578_v12 = vmul.f32 %v6954_v43, %v3522_v39 }
 0x3a5   :  { %5684 = vtanh.f32 %v3648_v27  ;;  %v3761_v6 = vadd.f32 1.0, %v5679_v45  ;;  %v7022_v1 = vmul.f32 %v3759_v0, %v6853_v13  ;;  %v7025_v20 = vmul.f32 %v3767_v32, %v6858_v11 }
 0x3a6   :  { %5686 = vtanh.f32 %v3656_v28  ;;  %v3769_v33 = vadd.f32 1.0, %v5683_v56  ;;  %v3474_v24 = vmul.f32 0.044715, %v7009_v26  ;;  %v3608_v13 = vadd.f32 %v6865_v31, %v6926_v25 }
 0x3a7   :  { %5688 = vtanh.f32 %v3650_v15  ;;  %v7030_v22 = vmul.f32 %v3761_v6, %v6855_v23  ;;  %v3871_v45 = vpack.c.bf16 %v7025_v20, %v7022_v1  ;;  %v7040_v11 = vmul.f32 %v6975_v61, %v3472_v40 }
 0x3a8   :  { %5690 = vtanh.f32 %v3658_v46  ;;  %v7035_v28 = vmul.f32 %v3769_v33, %v6861_v36  ;;  %v3376_v0 = vmul.f32 0.5, %v6838_v42  ;;  %v3616_v58 = vadd.f32 %v6893_v54, %v3560_v51 }
 0x3a9   :  { %v3610_v23 = vadd.f32 %v6879_v17, %v6938_v19  ;;  %v3370_v6 = vmul.f32 0.5, %v6831_v38  ;;  %v3664_v36 = vmul.f32 0.7978846, %v3608_v13  ;;  %v3618_v56 = vadd.f32 %v6896_v35, %v3562_v29 }
 0x3aa   :  { %v3873_v37 = vpack.c.bf16 %v7035_v28, %v7030_v22  ;;  %v3378_v25 = vmul.f32 0.5, %v6841_v4  ;;  %v3672_v39 = vmul.f32 0.7978846, %v3616_v58  ;;  %v3607_v42 = vadd.f32 %v6848_v50, %v6915_v14  ;;  %v7117_v22 = vld [vmem:[#allocation10 + $0x188] sm:$0xff]  }
 0x3ab   :  { %v3666_v32 = vmul.f32 0.7978846, %v3610_v23  ;;  %v7054_v51 = vmul.f32 %v7009_v26, %v3474_v24  ;;  %5692 = vtanh.f32 %v3664_v36  ;;  %v3674_v19 = vmul.f32 0.7978846, %v3618_v56  ;;  %7642 = vst [vmem:[#allocation24_spill] sm:$0xff] %v7117_v22 }
 0x3ac   :  { %v3615_v38 = vadd.f32 %v6882_v3, %v3559_v9  ;;  %v7058_v40 = vmul.f32 0.5, %v6865_v31  ;;  %5694 = vtanh.f32 %v3672_v39  ;;  %v3663_v57 = vmul.f32 0.7978846, %v3607_v42 }
 0x3ad   :  { %v3609_v4 = vadd.f32 %v6851_v55, %v6923_v30  ;;  %v7063_v29 = vmul.f32 0.5, %v6893_v54  ;;  %5696 = vtanh.f32 %v3666_v32  ;;  %v3617_v27 = vadd.f32 %v6886_v16, %v6971_v5 }
 0x3ae   :  { %v3671_v14 = vmul.f32 0.7978846, %v3615_v38  ;;  %v7068_v63 = vmul.f32 0.5, %v6879_v17  ;;  %5698 = vtanh.f32 %v3674_v19  ;;  %v3624_v9 = vadd.f32 %v6920_v44, %v6986_v41  ;;  %v5561_v38 = vld [vmem:[#allocation10 + $0x100] sm:$0xff]  }
 0x3af   :  { %v5685_v34 = vpop.eup %5684  ;;  %v3665_v31 = vmul.f32 0.7978846, %v3609_v4  ;;  %5700 = vtanh.f32 %v3663_v57  ;;  %v3673_v30 = vmul.f32 0.7978846, %v3617_v27  ;;  %v3632_v54 = vadd.f32 %v6951_v47, %v3576_v18 }
 0x3b0   :  { %v5687_v15 = vpop.eup %5686  ;;  %v3760_v46 = vadd.f32 1.0, %v5685_v34  ;;  %v7074_v13 = vmul.f32 0.5, %v6896_v35  ;;  %5702 = vtanh.f32 %v3671_v14  ;;  %v3680_v5 = vmul.f32 0.7978846, %v3624_v9  ;;  %v5564_v14 = vld [vmem:[#allocation10 + $0x148] sm:$0xff]  }
 0x3b1   :  { %v5689_v33 = vpop.eup %5688  ;;  %v3768_v24 = vadd.f32 1.0, %v5687_v15  ;;  %v7077_v23 = vmul.f32 0.5, %v6848_v50  ;;  %5704 = vtanh.f32 %v3665_v31  ;;  %v3688_v41 = vmul.f32 0.7978846, %v3632_v54  ;;  %v7104_v15 = vld [vmem:[#allocation10 + $0x1c8] sm:$0xff]  }
 0x3b2   :  { %v5691_v17 = vpop.eup %5690  ;;  %v3762_v58 = vadd.f32 1.0, %v5689_v33  ;;  %v3816_v36 = vmul.f32 %v3760_v46, %v7014_v7  ;;  %5706 = vtanh.f32 %v3673_v30  ;;  %v7081_v18 = vmul.f32 0.5, %v6882_v3  ;;  %7641 = vst [vmem:[#allocation22_spill] sm:$0xff] %v7104_v15  ;;  %v5565_v54 = vld [vmem:[#allocation10 + $0x108] sm:$0xff]  }
 0x3b3   :  { %v3824_v56 = vmul.f32 %v3768_v24, %v3376_v0  ;;  %v3770_v39 = vadd.f32 1.0, %v5691_v17  ;;  %5708 = vtanh.f32 %v3680_v5  ;;  %v3626_v35 = vadd.f32 %v6932_v2, %v6989_v10 }
 0x3b4   :  { %v3634_v32 = vadd.f32 %v6954_v43, %v3578_v12  ;;  %v3818_v19 = vmul.f32 %v3762_v58, %v3370_v6  ;;  %5710 = vtanh.f32 %v3688_v41  ;;  %v7087_v7 = vmul.f32 0.5, %v6851_v55  ;;  %v7121_v41 = vld [vmem:[#allocation10 + $0x1d0] sm:$0xff]  }
 0x3b5   :  { %v3872_v42 = vpack.c.bf16 %v3824_v56, %v3816_v36  ;;  %v3826_v50 = vmul.f32 %v3770_v39, %v3378_v25  ;;  %v5693_v57 = vpop.eup %5692  ;;  %v3682_v0 = vmul.f32 0.7978846, %v3626_v35  ;;  %v3623_v3 = vadd.f32 %v6899_v48, %v6980_v52  ;;  %v7096_v25 = vld [vmem:[#allocation10 + $0x180] sm:$0xff]   ;;  %7643 = vst [vmem:[#allocation34_spill] sm:$0xff] %v7121_v41  ;;  %v5569_v35 = vld [vmem:[#allocation10 + $0x110] sm:$0xff]  }
 0x3b6   :  { %v3690_v4 = vmul.f32 0.7978846, %v3634_v32  ;;  %v5695_v27 = vpop.eup %5694  ;;  %v3776_v34 = vadd.f32 1.0, %v5693_v57  ;;  %v7092_v12 = vmul.f32 0.5, %v6886_v16  ;;  %v3631_v6 = vadd.f32 %v6935_v53, %v6992_v8 }
 0x3b7   :  { %4454 = vmatprep.mubr.bf16.mxu1 %v3872_v42  ;;  %v3874_v10 = vpack.c.bf16 %v3826_v50, %v3818_v19  ;;  %v5697_v55 = vpop.eup %5696  ;;  %v3784_v31 = vadd.f32 1.0, %v5695_v27  ;;  %v7102_v52 = vmul.f32 0.5, %v6920_v44  ;;  %5712 = vtanh.f32 %v3682_v0  ;;  %v5572_v50 = vld [vmem:[#allocation10 + $0x158] sm:$0xff]  }
 0x3b8   :  { %4455 = vmatmul.mubr.bf16.vlgmr.msra.gmra.mrb[48].mxu1 %v3871_v45  ;;  %v3679_v9 = vmul.f32 0.7978846, %v3623_v3  ;;  %v5699_v16 = vpop.eup %5698  ;;  %v3832_v46 = vmul.f32 %v3776_v34, %v7058_v40  ;;  %v3778_v8 = vadd.f32 1.0, %v5697_v55  ;;  %5714 = vtanh.f32 %v3690_v4  ;;  %v5568_v45 = vld [vmem:[#allocation10 + $0x150] sm:$0xff]   ;;  %v7135_v27 = vld [vmem:[#allocation10 + $0x1d8] sm:$0xff]  }
 0x3b9   :  { %4518 = vmatprep.mubr.bf16.mxu0 %v3874_v10  ;;  %v3687_v30 = vmul.f32 0.7978846, %v3631_v6  ;;  %5186 = vmatpush3.bf16.msra.mxu1 %v5561_v38  ;;  %v5701_v33 = vpop.eup %5700  ;;  %v3840_v44 = vmul.f32 %v3784_v31, %v7063_v29  ;;  %v3786_v1 = vadd.f32 1.0, %v5699_v16  ;;  %v3625_v20 = vadd.f32 %v6908_v49, %v6983_v59  ;;  %7645 = vst [vmem:[#allocation28_spill] sm:$0xff] %v7135_v27  ;;  %v5573_v6 = vld [vmem:[#allocation10 + $0x118] sm:$0xff]  }
 0x3ba   :  { %4519 = vmatmul.mubr.bf16.vlgmr.msra.gmra.mrb[64].mxu0 %v3873_v37  ;;  %5716 = vtanh.f32 %v3679_v9  ;;  %5187 = vmatprep.subr.bf16.mxu1 %v5564_v14  ;;  %v5703_v40 = vpop.eup %5702  ;;  %v3834_v24 = vmul.f32 %v3778_v8, %v7068_v63  ;;  %v3775_v5 = vadd.f32 1.0, %v5701_v33  ;;  %v3633_v17 = vadd.f32 %v6943_v62, %v6996_v60  ;;  %v7646_v9 = vld [vmem:[#allocation32_spill] sm:$0xff] }
 0x3bb   :  { %5718 = vtanh.f32 %v3687_v30  ;;  %5226 = vmatpush3.bf16.msra.mxu0 %v7096_v25  ;;  %v5705_v28 = vpop.eup %5704  ;;  %v3880_v37 = vpack.c.bf16 %v3840_v44, %v3832_v46  ;;  %v3842_v29 = vmul.f32 %v3786_v1, %v7074_v13  ;;  %v3783_v58 = vadd.f32 1.0, %v5703_v40  ;;  %v7149_v44 = vld [vmem:[#allocation10 + $0x198] sm:$0xff]   ;;  %v7154_v40 = vld [vmem:[#allocation10 + $0x1e0] sm:$0xff]  }
 0x3bc   :  { %v3681_v59 = vmul.f32 0.7978846, %v3625_v20  ;;  %5227 = vmatprep.subr.bf16.mxu0 %v7104_v15  ;;  %v5707_v63 = vpop.eup %5706  ;;  %v3831_v36 = vmul.f32 %v3775_v5, %v7077_v23  ;;  %v3777_v56 = vadd.f32 1.0, %v5705_v28  ;;  %v3408_v60 = vmul.f32 0.5, %v6951_v47  ;;  %v7130_v23 = vld [vmem:[#allocation10 + $0x190] sm:$0xff]   ;;  %7649 = vst [vmem:[#allocation36_spill] sm:$0xff] %v7149_v44 }
 0x3bd   :  { %v3689_v39 = vmul.f32 0.7978846, %v3633_v17  ;;  %5188 = vmatpush3.bf16.msra.mxu1 %v5565_v54  ;;  %v5709_v32 = vpop.eup %5708  ;;  %4462 = vmatprep.mubr.bf16.mxu1 %v3880_v37  ;;  %v3882_v42 = vpack.c.bf16 %v3842_v29, %v3834_v24  ;;  %v3839_v13 = vmul.f32 %v3783_v58, %v7081_v18  ;;  %v3785_v19 = vadd.f32 1.0, %v5707_v63  ;;  %7644 = vst [vmem:[#allocation27_spill] sm:$0xff] %v7130_v23  ;;  %v7647_v54 = vld [vmem:[#allocation25_spill] sm:$0xff] }
 0x3be   :  { %5720 = vtanh.f32 %v3681_v59  ;;  %5189 = vmatprep.subr.bf16.mxu1 %v5568_v45  ;;  %v5711_v38 = vpop.eup %5710  ;;  %v3792_v57 = vadd.f32 1.0, %v5709_v32  ;;  %v3402_v0 = vmul.f32 0.5, %v6932_v2  ;;  %v3584_v47 = vmul.f32 %v6975_v61, %v7040_v11  ;;  %7650 = vst [vmem:[#allocation35_spill] sm:$0xff] %v7154_v40  ;;  %v5577_v37 = vld [vmem:[#allocation10 + $0x120] sm:$0xff]  }
 0x3bf   :  { %5722 = vtanh.f32 %v3689_v39  ;;  %5228 = vmatpush3.bf16.msra.mxu0 %v7117_v22  ;;  %4526 = vmatprep.mubr.bf16.mxu0 %v3882_v42  ;;  %v3879_v4 = vpack.c.bf16 %v3839_v13, %v3831_v36  ;;  %v3833_v18 = vmul.f32 %v3777_v56, %v7087_v7  ;;  %v3841_v3 = vmul.f32 %v3785_v19, %v7092_v12  ;;  %v7158_v56 = vld [vmem:[#allocation10 + $0x1a0] sm:$0xff]   ;;  %v7161_v42 = vld [vmem:[#allocation10 + $0x1e8] sm:$0xff]  }
 0x3c0   :  { %v3800_v14 = vadd.f32 1.0, %v5711_v38  ;;  %5229 = vmatprep.subr.bf16.mxu0 %v7121_v41  ;;  %v3848_v2 = vmul.f32 %v3792_v57, %v7102_v52  ;;  %v3410_v10 = vmul.f32 0.5, %v6954_v43  ;;  %v3640_v11 = vadd.f32 %v6975_v61, %v3584_v47  ;;  %v5576_v52 = vld [vmem:[#allocation10 + $0x160] sm:$0xff]   ;;  %7651 = vst [vmem:[#allocation31_spill] sm:$0xff] %v7158_v56  ;;  %7652 = vst [vmem:[#allocation33_spill] sm:$0xff] %v7161_v42  ;;  %v5581_v38 = vld [vmem:[#allocation10 + $0x128] sm:$0xff]  }
 0x3c1   :  { %v3586_v34 = vmul.f32 %v7009_v26, %v7054_v51  ;;  %5190 = vmatpush3.bf16.msra.mxu1 %v5569_v35  ;;  %v5713_v55 = vpop.eup %5712  ;;  %v3881_v7 = vpack.c.bf16 %v3841_v3, %v3833_v18  ;;  %v3399_v31 = vmul.f32 0.5, %v6899_v48  ;;  %v3583_v16 = vmul.f32 %v7646_v9, %v7000_v21  ;;  %v7648_v51 = vld [vmem:[#allocation23_spill] sm:$0xff]  ;;  %v7166_v18 = vld [vmem:[#allocation10 + $0x1a8] sm:$0xff]  }
 0x3c2   :  { %4463 = vmatmul.mubr.bf16.gmra.mrb[52].mxu1 %v3879_v4  ;;  %v3856_v12 = vmul.f32 %v3800_v14, %v3408_v60  ;;  %5191 = vmatprep.subr.bf16.mxu1 %v5572_v50  ;;  %v5715_v46 = vpop.eup %5714  ;;  %v3794_v43 = vadd.f32 1.0, %v5713_v55  ;;  %v3696_v8 = vmul.f32 0.7978846, %v3640_v11  ;;  %v3585_v33 = vmul.f32 %v7648_v51, %v7647_v54  ;;  %v5584_v4 = vld [vmem:[#allocation10 + $0x170] sm:$0xff]   ;;  %7653 = vst [vmem:[#allocation20_spill] sm:$0xff] %v7166_v18 }
 0x3c3   :  { %v3642_v30 = vadd.f32 %v7009_v26, %v3586_v34  ;;  %5230 = vmatpush3.bf16.msra.mxu0 %v7130_v23  ;;  %v3802_v20 = vadd.f32 1.0, %v5715_v46  ;;  %v3407_v21 = vmul.f32 0.5, %v6935_v53  ;;  %v3639_v45 = vadd.f32 %v7646_v9, %v3583_v16  ;;  %v5580_v53 = vld [vmem:[#allocation10 + $0x168] sm:$0xff]   ;;  %v7172_v34 = vld [vmem:[#allocation10 + $0x1b0] sm:$0xff]  }
 0x3c4   :  { %v5717_v1 = vpop.eup %5716  ;;  %4527 = vmatmul.mubr.bf16.gmra.mrb[68].mxu0 %v3881_v7  ;;  %v3888_v48 = vpack.c.bf16 %v3856_v12, %v3848_v2  ;;  %5231 = vmatprep.subr.bf16.mxu0 %v7135_v27  ;;  %v3850_v5 = vmul.f32 %v3794_v43, %v3402_v0  ;;  %5724 = vtanh.f32 %v3696_v8  ;;  %v3641_v63 = vadd.f32 %v7648_v51, %v3585_v33  ;;  %v5585_v2 = vld [vmem:[#allocation10 + $0x130] sm:$0xff]   ;;  %v7176_v7 = vld [vmem:[#allocation10 + $0x1f8] sm:$0xff]  }
 0x3c5   :  { %v5719_v24 = vpop.eup %5718  ;;  %v3791_v17 = vadd.f32 1.0, %v5717_v1  ;;  %v3698_v28 = vmul.f32 0.7978846, %v3642_v30  ;;  %5192 = vmatpush3.bf16.msra.mxu1 %v5573_v6  ;;  %v3858_v29 = vmul.f32 %v3802_v20, %v3410_v10  ;;  %v3695_v59 = vmul.f32 0.7978846, %v3639_v45  ;;  %7655 = vst [vmem:[#allocation19_spill] sm:$0xff] %v7172_v34 }
 0x3c6   :  { %4470 = vmatprep.mubr.bf16.mxu1 %v3888_v48  ;;  %v3799_v58 = vadd.f32 1.0, %v5719_v24  ;;  %5193 = vmatprep.subr.bf16.mxu1 %v5576_v52  ;;  %v3697_v32 = vmul.f32 0.7978846, %v3641_v63  ;;  %v3401_v19 = vmul.f32 0.5, %v6908_v49  ;;  %v3409_v0 = vmul.f32 0.5, %v6943_v62  ;;  %v7169_v49 = vld [vmem:[#allocation10 + $0x1f0] sm:$0xff]  }
 0x3c7   :  { %v3847_v36 = vmul.f32 %v3791_v17, %v3399_v31  ;;  %5726 = vtanh.f32 %v3698_v28  ;;  %5232 = vmatpush3.bf16.msra.mxu0 %v7149_v44  ;;  %v3890_v39 = vpack.c.bf16 %v3858_v29, %v3850_v5  ;;  %7654 = vst [vmem:[#allocation30_spill] sm:$0xff] %v7169_v49  ;;  %v5588_v62 = vld [vmem:[#allocation10 + $0x178] sm:$0xff]   ;;  %v3416_v6 = vmul.f32 0.5, %v6975_v61  ;;  %7656 = vst [vmem:[#allocation29_spill] sm:$0xff] %v7176_v7  ;;  %v7658_v45 = vld [vmem:[#allocation26_spill] sm:$0xff] }
 0x3c8   :  { %v5721_v60 = vpop.eup %5720  ;;  %v3855_v35 = vmul.f32 %v3799_v58, %v3407_v21  ;;  %5728 = vtanh.f32 %v3695_v59  ;;  %5233 = vmatprep.subr.bf16.mxu0 %v7154_v40  ;;  %v5589_v31 = vld [vmem:[#allocation10 + $0x138] sm:$0xff]   ;;  %v3418_v46 = vmul.f32 0.5, %v7009_v26  ;;  %v3415_v8 = vmul.f32 0.5, %v7646_v9  ;;  %v7660_v29 = vld [vmem:[#allocation21_spill] sm:$0xff] }
 0x3c9   :  { %v5723_v13 = vpop.eup %5722  ;;  %v3793_v50 = vadd.f32 1.0, %v5721_v60  ;;  %5194 = vmatpush3.bf16.msra.mxu1 %v5577_v37  ;;  %4534 = vmatprep.mubr.bf16.mxu0 %v3890_v39  ;;  %5730 = vtanh.f32 %v3697_v32  ;;  %v7181_v61 = vld [vmem:[#allocation10 + $0x1b8] sm:$0xff]   ;;  %v3417_v20 = vmul.f32 0.5, %v7648_v51 }
 0x3ca   :  { %v3887_v57 = vpack.c.bf16 %v3855_v35, %v3847_v36  ;;  %v3801_v47 = vadd.f32 1.0, %v5723_v13  ;;  %5195 = vmatprep.subr.bf16.mxu1 %v5580_v53  ;;  %7657 = vst [vmem:[#allocation17_spill] sm:$0xff] %v7181_v61  ;;  %v7659_v17 = vld [vmem:[#allocation16_spill] sm:$0xff] }
 0x3cb   :  { %5234 = vmatpush3.bf16.msra.mxu0 %v7158_v56  ;;  %v3849_v3 = vmul.f32 %v3793_v50, %v3401_v19  ;;  %v1497_v28 = vsub.s32 4, %v7659_v17  ;;  %v1505_v37 = vsub.s32 6, %v7659_v17  ;;  %v1501_v51 = vsub.s32 5, %v7659_v17 }
 0x3cc   :  { %4471 = vmatmul.mubr.bf16.gmra.mrb[56].mxu1 %v3887_v57  ;;  %v3857_v14 = vmul.f32 %v3801_v47, %v3409_v0  ;;  %5235 = vmatprep.subr.bf16.mxu0 %v7161_v42  ;;  %v1509_v63 = vsub.s32 7, %v7659_v17 }
 0x3cd   :  { %5196 = vmatpush3.bf16.msra.mxu1 %v5581_v38  ;;  %v7191_v58 = vrot.slane %v7660_v29, %v1497_v28  ;;  %v7194_v59 = vrot.slane %v7660_v29, %v1505_v37  ;;  %v7198_v53 = vrot.slane %v7660_v29, %v1501_v51 }
 0x3ce   :  { %v3889_v10 = vpack.c.bf16 %v3857_v14, %v3849_v3  ;;  %5197 = vmatprep.subr.bf16.mxu1 %v5584_v4  ;;  %v5725_v11 = vpop.eup %5724  ;;  %v7203_v13 = vrot.slane %v7660_v29, %v1509_v63 }
 0x3cf   :  { %5236 = vmatpush3.bf16.msra.mxu0 %v7166_v18  ;;  %v3808_v55 = vadd.f32 1.0, %v5725_v11 }
 0x3d0   :  { %4535 = vmatmul.mubr.bf16.gmra.mrb[72].mxu0 %v3889_v10  ;;  %5237 = vmatprep.subr.bf16.mxu0 %v7169_v49 }
 0x3d1   :  { %v5727_v12 = vpop.eup %5726  ;;  %5198 = vmatpush3.bf16.msra.mxu1 %v5585_v2  ;;  %v3864_v52 = vmul.f32 %v3808_v55, %v3416_v6 }
 0x3d2   :  { %v5729_v16 = vpop.eup %5728  ;;  %v3810_v43 = vadd.f32 1.0, %v5727_v12  ;;  %5199 = vmatprep.subr.bf16.mxu1 %v5588_v62 }
 0x3d3   :  { %v3807_v30 = vadd.f32 1.0, %v5729_v16  ;;  %5238 = vmatpush3.bf16.msra.mxu0 %v7172_v34  ;;  %v5731_v54 = vpop.eup %5730  ;;  %v3896_v33 = vpack.c.bf16 %v3864_v52, %v3864_v52 }
 0x3d4   :  { %v3866_v1 = vmul.f32 %v3810_v43, %v3418_v46  ;;  %5239 = vmatprep.subr.bf16.mxu0 %v7176_v7  ;;  %v3809_v21 = vadd.f32 1.0, %v5731_v54 }
 0x3d5   :  { %v3863_v48 = vmul.f32 %v3807_v30, %v3415_v8  ;;  %5200 = vmatpush3.bf16.msra.mxu1 %v5589_v31  ;;  %4478 = vmatprep.mubr.bf16.mxu1 %v3896_v33 }
 0x3d6   :  { %v3898_v26 = vpack.c.bf16 %v3866_v1, %v3866_v1  ;;  %5265 = vmatprep.subr.bf16.mxu1 %v7658_v45  ;;  %v3865_v24 = vmul.f32 %v3809_v21, %v3417_v20 }
 0x3d7   :  { %v3895_v9 = vpack.c.bf16 %v3863_v48, %v3863_v48  ;;  %5240 = vmatpush3.bf16.msra.mxu0 %v7181_v61 }
 0x3d8   :  { %4542 = vmatprep.mubr.bf16.mxu0 %v3898_v26  ;;  %v3897_v5 = vpack.c.bf16 %v3865_v24, %v3865_v24 }
 0x3d9   :  { %4479 = vmatmul.mubr.bf16.gmra.mrb[60].mxu1 %v3895_v9 }
 0x3da   :  { %4543 = vmatmul.mubr.bf16.gmra.mrb[76].mxu0 %v3897_v5 }
 0x403   :  { %v3188_v36 = vpop.f32.mrb[32].mxu1 }
 0x404   :  { %v5309_v60 = vadd.f32 %v3188_v36, %v7191_v58  ;;  %v3330_v39 = vpop.f32.mrb[48].mxu0  ;;  %v3190_v35 = vpop.f32.mrb[33].mxu1 }
 0x405   :  { %v5323_v32 = vadd.f32 %v3330_v39, %v7194_v59  ;;  %v3332_v19 = vpop.f32.mrb[49].mxu0  ;;  %v3192_v50 = vpop.f32.mrb[34].mxu1  ;;  %v7206_v57 = vadd.f32 %v3190_v35, %v7198_v53 }
 0x406   :  { %v3427_v38 = vmul.f32 0.044715, %v5309_v60  ;;  %v5311_v0 = vadd.f32 %v3192_v50, %v7191_v58  ;;  %v3334_v47 = vpop.f32.mrb[50].mxu0  ;;  %v3194_v4 = vpop.f32.mrb[35].mxu1  ;;  %v7211_v6 = vadd.f32 %v3332_v19, %v7203_v13  ;;  %v7228_v51 = vmul.f32 0.5, %v5309_v60 }
 0x407   :  { %v3429_v3 = vmul.f32 0.044715, %v5323_v32  ;;  %v5325_v14 = vadd.f32 %v3334_v47, %v7194_v59  ;;  %v3336_v2 = vpop.f32.mrb[51].mxu0  ;;  %v3428_v31 = vmul.f32 0.044715, %v7206_v57  ;;  %v7215_v43 = vadd.f32 %v3194_v4, %v7198_v53 }
 0x408   :  { %v3483_v10 = vmul.f32 %v5309_v60, %v3427_v38  ;;  %v3435_v62 = vmul.f32 0.044715, %v5311_v0  ;;  %v7218_v8 = vadd.f32 %v3336_v2, %v7203_v13  ;;  %v3430_v20 = vmul.f32 0.044715, %v7211_v6 }
 0x409   :  { %v3485_v11 = vmul.f32 %v5323_v32, %v3429_v3  ;;  %v3437_v55 = vmul.f32 0.044715, %v5325_v14  ;;  %v3484_v5 = vmul.f32 %v7206_v57, %v3428_v31  ;;  %v3436_v63 = vmul.f32 0.044715, %v7215_v43 }
 0x40a   :  { %v3539_v12 = vmul.f32 %v5309_v60, %v3483_v10  ;;  %v3491_v16 = vmul.f32 %v5311_v0, %v3435_v62  ;;  %v3438_v36 = vmul.f32 0.044715, %v7218_v8  ;;  %v7232_v19 = vmul.f32 0.5, %v5323_v32 }
 0x40b   :  { %v3541_v52 = vmul.f32 %v5323_v32, %v3485_v11  ;;  %v3493_v46 = vmul.f32 %v5325_v14, %v3437_v55  ;;  %v3198_v30 = vpop.f32.mrb[36].mxu1  ;;  %v3486_v47 = vmul.f32 %v7211_v6, %v3430_v20  ;;  %v7236_v4 = vmul.f32 0.5, %v5311_v0 }
 0x40c   :  { %v3595_v54 = vadd.f32 %v5309_v60, %v3539_v12  ;;  %v3547_v33 = vmul.f32 %v5311_v0, %v3491_v16  ;;  %v3340_v1 = vpop.f32.mrb[52].mxu0  ;;  %v3200_v48 = vpop.f32.mrb[37].mxu1  ;;  %v7222_v26 = vadd.f32 %v3198_v30, %v7191_v58  ;;  %v7238_v3 = vmul.f32 0.5, %v5325_v14 }
 0x40d   :  { %v3549_v21 = vmul.f32 %v5325_v14, %v3493_v46  ;;  %v3342_v45 = vpop.f32.mrb[53].mxu0  ;;  %v3202_v9 = vpop.f32.mrb[38].mxu1  ;;  %v3597_v24 = vadd.f32 %v5323_v32, %v3541_v52  ;;  %v7226_v17 = vadd.f32 %v3340_v1, %v7194_v59  ;;  %v7242_v10 = vmul.f32 %v7206_v57, %v3484_v5 }
 0x40e   :  { %v3344_v28 = vpop.f32.mrb[54].mxu0  ;;  %v3204_v37 = vpop.f32.mrb[39].mxu1  ;;  %v3603_v29 = vadd.f32 %v5311_v0, %v3547_v33  ;;  %v3651_v35 = vmul.f32 0.7978846, %v3595_v54  ;;  %v3443_v38 = vmul.f32 0.044715, %v7222_v26  ;;  %v7245_v62 = vadd.f32 %v3200_v48, %v7198_v53 }
 0x40f   :  { %v3346_v39 = vpop.f32.mrb[55].mxu0  ;;  %v3605_v50 = vadd.f32 %v5325_v14, %v3549_v21  ;;  %v3445_v60 = vmul.f32 0.044715, %v7226_v17  ;;  %v3653_v2 = vmul.f32 0.7978846, %v3597_v24  ;;  %v7248_v32 = vadd.f32 %v3342_v45, %v7203_v13 }
 0x410   :  { %v3659_v11 = vmul.f32 0.7978846, %v3603_v29  ;;  %v3492_v55 = vmul.f32 %v7215_v43, %v3436_v63  ;;  %v3494_v0 = vmul.f32 %v7218_v8, %v3438_v36  ;;  %v7253_v14 = vadd.f32 %v3202_v9, %v7191_v58 }
 0x411   :  { %5732 = vtanh.f32 %v3651_v35  ;;  %v3661_v31 = vmul.f32 0.7978846, %v3605_v50  ;;  %v3499_v16 = vmul.f32 %v7222_v26, %v3443_v38  ;;  %v7257_v52 = vadd.f32 %v3344_v28, %v7194_v59 }
 0x412   :  { %v3501_v54 = vmul.f32 %v7226_v17, %v3445_v60  ;;  %v3444_v33 = vmul.f32 0.044715, %v7245_v62  ;;  %v3446_v1 = vmul.f32 0.044715, %v7248_v32  ;;  %v7263_v48 = vadd.f32 %v3204_v37, %v7198_v53 }
 0x413   :  { %v3208_v12 = vpop.f32.mrb[40].mxu1  ;;  %5734 = vtanh.f32 %v3653_v2  ;;  %v7266_v45 = vmul.f32 %v7211_v6, %v3486_v47  ;;  %v7269_v9 = vadd.f32 %v3346_v39, %v7203_v13  ;;  %v7275_v29 = vmul.f32 %v7215_v43, %v3492_v55 }
 0x414   :  { %v3350_v46 = vpop.f32.mrb[56].mxu0  ;;  %v3210_v30 = vpop.f32.mrb[41].mxu1  ;;  %v7272_v24 = vadd.f32 %v3208_v12, %v7191_v58  ;;  %5736 = vtanh.f32 %v3659_v11  ;;  %v3451_v37 = vmul.f32 0.044715, %v7253_v14  ;;  %v7282_v35 = vmul.f32 %v7218_v8, %v3494_v0 }
 0x415   :  { %v3352_v20 = vpop.f32.mrb[57].mxu0  ;;  %v3212_v21 = vpop.f32.mrb[42].mxu1  ;;  %v7279_v63 = vadd.f32 %v3350_v46, %v7194_v59  ;;  %5738 = vtanh.f32 %v3661_v31  ;;  %v7285_v39 = vmul.f32 %v7222_v26, %v3499_v16  ;;  %v3453_v50 = vmul.f32 0.044715, %v7257_v52 }
 0x416   :  { %v3354_v5 = vpop.f32.mrb[58].mxu0  ;;  %v3214_v28 = vpop.f32.mrb[43].mxu1  ;;  %v7289_v38 = vmul.f32 %v7226_v17, %v3501_v54  ;;  %v3500_v47 = vmul.f32 %v7245_v62, %v3444_v33  ;;  %v3502_v60 = vmul.f32 %v7248_v32, %v3446_v1  ;;  %v3452_v2 = vmul.f32 0.044715, %v7263_v48 }
 0x417   :  { %v3356_v36 = vpop.f32.mrb[59].mxu0  ;;  %v3454_v11 = vmul.f32 0.044715, %v7269_v9  ;;  %v3459_v55 = vmul.f32 0.044715, %v7272_v24  ;;  %v7297_v0 = vadd.f32 %v3210_v30, %v7198_v53  ;;  %v7300_v12 = vadd.f32 %v3352_v20, %v7203_v13 }
 0x418   :  { %v3507_v31 = vmul.f32 %v7253_v14, %v3451_v37  ;;  %v3461_v16 = vmul.f32 0.044715, %v7279_v63  ;;  %v7305_v46 = vadd.f32 %v3212_v21, %v7191_v58  ;;  %v7308_v54 = vadd.f32 %v3354_v5, %v7194_v59 }
 0x419   :  { %v3509_v1 = vmul.f32 %v7257_v52, %v3453_v50  ;;  %v3460_v61 = vmul.f32 0.044715, %v7297_v0  ;;  %v3462_v30 = vmul.f32 0.044715, %v7300_v12  ;;  %v7314_v20 = vadd.f32 %v3214_v28, %v7198_v53 }
 0x41a   :  { %7661 = vst [vmem:[#allocation18_spill] sm:$0xff] %v7308_v54  ;;  %v3467_v34 = vmul.f32 0.044715, %v7305_v46  ;;  %v3469_v21 = vmul.f32 0.044715, %v7308_v54  ;;  %v7319_v49 = vadd.f32 %v3356_v36, %v7203_v13  ;;  %v3508_v56 = vmul.f32 %v7263_v48, %v3452_v2 }
 0x41b   :  { %v3218_v33 = vpop.f32.mrb[44].mxu1  ;;  %v5733_v42 = vpop.eup %5732  ;;  %v3510_v28 = vmul.f32 %v7269_v9, %v3454_v11  ;;  %v3515_v40 = vmul.f32 %v7272_v24, %v3459_v55  ;;  %v3468_v44 = vmul.f32 0.044715, %v7314_v20  ;;  %v3556_v41 = vmul.f32 %v7245_v62, %v3500_v47 }
 0x41c   :  { %v3360_v7 = vpop.f32.mrb[60].mxu0  ;;  %v3220_v37 = vpop.f32.mrb[45].mxu1  ;;  %v7322_v5 = vadd.f32 %v3218_v33, %v7191_v58  ;;  %v3517_v36 = vmul.f32 %v7279_v63, %v3461_v16  ;;  %v3516_v58 = vmul.f32 %v7297_v0, %v3460_v61  ;;  %v3518_v33 = vmul.f32 %v7300_v12, %v3462_v30 }
 0x41d   :  { %v3362_v50 = vpop.f32.mrb[61].mxu0  ;;  %v3222_v18 = vpop.f32.mrb[46].mxu1  ;;  %v3558_v2 = vmul.f32 %v7248_v32, %v3502_v60  ;;  %v3523_v11 = vmul.f32 %v7305_v46, %v3467_v34  ;;  %v3525_v55 = vmul.f32 %v7308_v54, %v3469_v21  ;;  %v3470_v15 = vmul.f32 0.044715, %v7319_v49 }
 0x41e   :  { %7662 = vst [vmem:[#allocation32_spill] sm:$0xff] %v7322_v5  ;;  %v3364_v27 = vpop.f32.mrb[62].mxu0  ;;  %v3223_v23 = vpop.f32.mrb[47].mxu1  ;;  %v7338_v47 = vmul.f32 %v7257_v52, %v3509_v1  ;;  %v3524_v61 = vmul.f32 %v7314_v20, %v3468_v44  ;;  %v3475_v16 = vmul.f32 0.044715, %v7322_v5  ;;  %v3566_v60 = vmul.f32 %v7269_v9, %v3510_v28 }
 0x41f   :  { %v3365_v18 = vpop.f32.mrb[63].mxu0  ;;  %v5735_v22 = vpop.eup %5734  ;;  %v3563_v23 = vmul.f32 %v7253_v14, %v3507_v31  ;;  %v7345_v34 = vmul.f32 %v7272_v24, %v3515_v40  ;;  %v7348_v21 = vadd.f32 %v3360_v7, %v7194_v59  ;;  %v7351_v31 = vmul.f32 %v7279_v63, %v3517_v36 }
 0x420   :  { %v5737_v27 = vpop.eup %5736  ;;  %v3564_v18 = vmul.f32 %v7263_v48, %v3508_v56  ;;  %v7354_v1 = vmul.f32 %v7297_v0, %v3516_v58  ;;  %v7357_v44 = vmul.f32 %v7300_v12, %v3518_v33  ;;  %v3596_v56 = vadd.f32 %v7206_v57, %v7242_v10 }
 0x421   :  { %v5739_v30 = vpop.eup %5738  ;;  %v7362_v28 = vmul.f32 %v7305_v46, %v3523_v11  ;;  %v7365_v40 = vmul.f32 %v7308_v54, %v3525_v55  ;;  %v3526_v7 = vmul.f32 %v7319_v49, %v3470_v15  ;;  %v3604_v59 = vadd.f32 %v7215_v43, %v7275_v29 }
 0x422   :  { %v7371_v36 = vmul.f32 %v7314_v20, %v3524_v61  ;;  %v7374_v58 = vmul.f32 %v7322_v5, %v3475_v16  ;;  %v3652_v33 = vmul.f32 0.7978846, %v3596_v56  ;;  %v3598_v10 = vadd.f32 %v7211_v6, %v7266_v45 }
 0x423   :  { %v3477_v11 = vmul.f32 0.044715, %v7348_v21  ;;  %v7380_v55 = vadd.f32 %v3220_v37, %v7198_v53  ;;  %v7383_v15 = vadd.f32 %v3362_v50, %v7203_v13  ;;  %v3660_v54 = vmul.f32 0.7978846, %v3604_v59 }
 0x424   :  { %7663 = vst [vmem:[#allocation25_spill] sm:$0xff] %v7374_v58  ;;  %5740 = vtanh.f32 %v3652_v33  ;;  %v3606_v29 = vadd.f32 %v7218_v8, %v7282_v35  ;;  %v3654_v61 = vmul.f32 0.7978846, %v3598_v10  ;;  %v3763_v16 = vadd.f32 1.0, %v5733_v42 }
 0x425   :  { %v7388_v56 = vmul.f32 %v7319_v49, %v3526_v7  ;;  %5742 = vtanh.f32 %v3660_v54  ;;  %v3771_v45 = vadd.f32 1.0, %v5737_v27  ;;  %v3765_v5 = vadd.f32 1.0, %v5735_v22 }
 0x426   :  { %v3372_v58 = vmul.f32 0.5, %v7206_v57  ;;  %v3662_v53 = vmul.f32 0.7978846, %v3606_v29  ;;  %5744 = vtanh.f32 %v3654_v61  ;;  %v3773_v37 = vadd.f32 1.0, %v5739_v30 }
 0x427   :  { %v3533_v13 = vmul.f32 %v7348_v21, %v3477_v11  ;;  %v3380_v50 = vmul.f32 0.5, %v7215_v43  ;;  %v7394_v59 = vmul.f32 %v3763_v16, %v7228_v51  ;;  %v7397_v42 = vmul.f32 %v3771_v45, %v7236_v4 }
 0x428   :  { %5746 = vtanh.f32 %v3662_v53  ;;  %v7400_v35 = vmul.f32 %v3765_v5, %v7232_v19  ;;  %v7403_v22 = vmul.f32 %v3773_v37, %v7238_v3  ;;  %v3612_v57 = vadd.f32 %v7245_v62, %v3556_v41 }
 0x429   :  { %v3476_v54 = vmul.f32 0.044715, %v7380_v55  ;;  %v3478_v27 = vmul.f32 0.044715, %v7383_v15  ;;  %v3875_v43 = vpack.c.bf16 %v7397_v42, %v7394_v59  ;;  %v3620_v51 = vadd.f32 %v7263_v48, %v3564_v18 }
 0x42a   :  { %v3374_v4 = vmul.f32 0.5, %v7211_v6  ;;  %v3877_v19 = vpack.c.bf16 %v7403_v22, %v7400_v35  ;;  %v3668_v5 = vmul.f32 0.7978846, %v3612_v57  ;;  %v3614_v3 = vadd.f32 %v7248_v32, %v3558_v2  ;;  %v7666_v22 = vld [vmem:[#allocation34_spill] sm:$0xff] }
 0x42b   :  { %v3589_v30 = vmul.f32 %v7348_v21, %v3533_v13  ;;  %v3382_v41 = vmul.f32 0.5, %v7218_v8  ;;  %v3676_v7 = vmul.f32 0.7978846, %v3620_v51  ;;  %v3622_v33 = vadd.f32 %v7269_v9, %v3566_v60 }
 0x42c   :  { %5748 = vtanh.f32 %v3668_v5  ;;  %v3670_v10 = vmul.f32 0.7978846, %v3614_v3  ;;  %v3611_v18 = vadd.f32 %v7222_v26, %v7285_v39  ;;  %v3619_v6 = vadd.f32 %v7253_v14, %v3563_v23 }
 0x42d   :  { %v7422_v11 = vmul.f32 %v7380_v55, %v3476_v54  ;;  %v7425_v29 = vmul.f32 %v7383_v15, %v3478_v27  ;;  %5750 = vtanh.f32 %v3676_v7  ;;  %v3678_v2 = vmul.f32 0.7978846, %v3622_v33 }
 0x42e   :  { %v5741_v61 = vpop.eup %5740  ;;  %5752 = vtanh.f32 %v3670_v10  ;;  %v3667_v8 = vmul.f32 0.7978846, %v3611_v18  ;;  %v3675_v16 = vmul.f32 0.7978846, %v3619_v6  ;;  %v3613_v60 = vadd.f32 %v7226_v17, %v7289_v38 }
 0x42f   :  { %v5743_v45 = vpop.eup %5742  ;;  %v7430_v39 = vadd.f32 %v7348_v21, %v3589_v30  ;;  %v3764_v23 = vadd.f32 1.0, %v5741_v61  ;;  %5754 = vtanh.f32 %v3678_v2  ;;  %v3621_v53 = vadd.f32 %v7257_v52, %v7338_v47 }
 0x430   :  { %v5745_v37 = vpop.eup %5744  ;;  %v3772_v13 = vadd.f32 1.0, %v5743_v45  ;;  %v3388_v59 = vmul.f32 0.5, %v7245_v62  ;;  %5756 = vtanh.f32 %v3667_v8  ;;  %v3669_v42 = vmul.f32 0.7978846, %v3613_v60 }
 0x431   :  { %v3820_v57 = vmul.f32 %v3764_v23, %v3372_v58  ;;  %v3766_v54 = vadd.f32 1.0, %v5745_v37  ;;  %5758 = vtanh.f32 %v3675_v16  ;;  %v3677_v27 = vmul.f32 0.7978846, %v3621_v53 }
 0x432   :  { %v5747_v38 = vpop.eup %5746  ;;  %v3828_v51 = vmul.f32 %v3772_v13, %v3380_v50  ;;  %5760 = vtanh.f32 %v3669_v42  ;;  %v3628_v5 = vadd.f32 %v7297_v0, %v7354_v1  ;;  %v3636_v3 = vadd.f32 %v7314_v20, %v7371_v36 }
 0x433   :  { %v3774_v47 = vadd.f32 1.0, %v5747_v38  ;;  %v3396_v30 = vmul.f32 0.5, %v7263_v48  ;;  %v3390_v62 = vmul.f32 0.5, %v7248_v32  ;;  %5762 = vtanh.f32 %v3677_v27 }
 0x434   :  { %v3876_v7 = vpack.c.bf16 %v3828_v51, %v3820_v57  ;;  %v3398_v58 = vmul.f32 0.5, %v7269_v9  ;;  %v3684_v33 = vmul.f32 0.7978846, %v3628_v5  ;;  %v3692_v10 = vmul.f32 0.7978846, %v3636_v3  ;;  %v7667_v5 = vld [vmem:[#allocation18_spill] sm:$0xff] }
 0x435   :  { %v3822_v18 = vmul.f32 %v3766_v54, %v3374_v4  ;;  %v3830_v50 = vmul.f32 %v3774_v47, %v3382_v41  ;;  %v3630_v6 = vadd.f32 %v7300_v12, %v7357_v44  ;;  %v3638_v1 = vadd.f32 %v7319_v49, %v7388_v56 }
 0x436   :  { %v5749_v36 = vpop.eup %5748  ;;  %4582 = vmatprep.mubr.bf16.mxu1 %v3876_v7  ;;  %v3387_v48 = vmul.f32 0.5, %v7222_v26  ;;  %5764 = vtanh.f32 %v3684_v33  ;;  %v3627_v32 = vadd.f32 %v7272_v24, %v7345_v34  ;;  %v3635_v9 = vadd.f32 %v7305_v46, %v7362_v28  ;;  %v7664_v34 = vld [vmem:[#allocation22_spill] sm:$0xff] }
 0x437   :  { %v5751_v2 = vpop.eup %5750  ;;  %v3878_v4 = vpack.c.bf16 %v3830_v50, %v3822_v18  ;;  %4583 = vmatmul.mubr.bf16.vlgmr.msra.gmra.mrb[64].mxu1 %v3875_v43  ;;  %v3780_v41 = vadd.f32 1.0, %v5749_v36  ;;  %5766 = vtanh.f32 %v3692_v10  ;;  %v3686_v44 = vmul.f32 0.7978846, %v3630_v6  ;;  %v7670_v36 = vld [vmem:[#allocation32_spill] sm:$0xff] }
 0x438   :  { %v5753_v61 = vpop.eup %5752  ;;  %5273 = vmatpush3.bf16.msra.mxu1 %v7096_v25  ;;  %v3788_v56 = vadd.f32 1.0, %v5751_v2  ;;  %v3395_v8 = vmul.f32 0.5, %v7253_v14  ;;  %v3694_v26 = vmul.f32 0.7978846, %v3638_v1  ;;  %v3683_v16 = vmul.f32 0.7978846, %v3627_v32 }
 0x439   :  { %v5755_v60 = vpop.eup %5754  ;;  %4646 = vmatprep.mubr.bf16.mxu0 %v3878_v4  ;;  %5266 = vmatprep.subr.bf16.mxu1 %v7664_v34  ;;  %v3782_v45 = vadd.f32 1.0, %v5753_v61  ;;  %v3389_v28 = vmul.f32 0.5, %v7226_v17  ;;  %5768 = vtanh.f32 %v3686_v44  ;;  %v3691_v43 = vmul.f32 0.7978846, %v3635_v9  ;;  %v7665_v17 = vld [vmem:[#allocation24_spill] sm:$0xff]  ;;  %v7669_v1 = vld [vmem:[#allocation25_spill] sm:$0xff] }
 0x43a   :  { %v5757_v23 = vpop.eup %5756  ;;  %4647 = vmatmul.mubr.bf16.vlgmr.msra.gmra.mrb[80].mxu0 %v3877_v19  ;;  %v3836_v25 = vmul.f32 %v3780_v41, %v3388_v59  ;;  %v3844_v53 = vmul.f32 %v3788_v56, %v3396_v30  ;;  %v3790_v37 = vadd.f32 1.0, %v5755_v60  ;;  %5770 = vtanh.f32 %v3694_v26  ;;  %v7671_v9 = vld [vmem:[#allocation28_spill] sm:$0xff] }
 0x43b   :  { %v5759_v14 = vpop.eup %5758  ;;  %v3838_v13 = vmul.f32 %v3782_v45, %v3390_v62  ;;  %v3779_v42 = vadd.f32 1.0, %v5757_v23  ;;  %5772 = vtanh.f32 %v3683_v16  ;;  %v3629_v57 = vadd.f32 %v7279_v63, %v7351_v31  ;;  %v7672_v34 = vld [vmem:[#allocation36_spill] sm:$0xff] }
 0x43c   :  { %v5761_v54 = vpop.eup %5760  ;;  %5274 = vmatpush3.bf16.msra.mxu1 %v7665_v17  ;;  %v3884_v27 = vpack.c.bf16 %v3844_v53, %v3836_v25  ;;  %v3846_v38 = vmul.f32 %v3790_v37, %v3398_v58  ;;  %v3787_v51 = vadd.f32 1.0, %v5759_v14  ;;  %5774 = vtanh.f32 %v3691_v43  ;;  %v7673_v53 = vld [vmem:[#allocation35_spill] sm:$0xff] }
 0x43d   :  { %v5763_v35 = vpop.eup %5762  ;;  %5267 = vmatprep.subr.bf16.mxu1 %v7666_v22  ;;  %v3397_v19 = vmul.f32 0.5, %v7257_v52  ;;  %v3781_v59 = vadd.f32 1.0, %v5761_v54  ;;  %v3637_v3 = vadd.f32 %v7667_v5, %v7365_v40  ;;  %v3685_v47 = vmul.f32 0.7978846, %v3629_v57  ;;  %v7668_v52 = vld [vmem:[#allocation27_spill] sm:$0xff] }
 0x43e   :  { %4590 = vmatprep.mubr.bf16.mxu1 %v3884_v27  ;;  %v3886_v30 = vpack.c.bf16 %v3846_v38, %v3838_v13  ;;  %v3835_v31 = vmul.f32 %v3779_v42, %v3387_v48  ;;  %v3843_v62 = vmul.f32 %v3787_v51, %v3395_v8  ;;  %v3789_v7 = vadd.f32 1.0, %v5763_v35  ;;  %v7674_v38 = vld [vmem:[#allocation31_spill] sm:$0xff] }
 0x43f   :  { %v3837_v33 = vmul.f32 %v3781_v59, %v3389_v28  ;;  %v3693_v10 = vmul.f32 0.7978846, %v3637_v3  ;;  %5776 = vtanh.f32 %v3685_v47  ;;  %v3588_v58 = vmul.f32 %v7380_v55, %v7422_v11 }
 0x440   :  { %v5765_v18 = vpop.eup %5764  ;;  %4654 = vmatprep.mubr.bf16.mxu0 %v3886_v30  ;;  %v3883_v50 = vpack.c.bf16 %v3843_v62, %v3835_v31  ;;  %5275 = vmatpush3.bf16.msra.mxu1 %v7668_v52  ;;  %v3845_v6 = vmul.f32 %v3789_v7, %v3397_v19  ;;  %v3404_v40 = vmul.f32 0.5, %v7297_v0  ;;  %v3587_v32 = vmul.f32 %v7670_v36, %v7669_v1  ;;  %v7676_v31 = vld [vmem:[#allocation20_spill] sm:$0xff]  ;;  %v7677_v62 = vld [vmem:[#allocation30_spill] sm:$0xff] }
 0x441   :  { %v5767_v48 = vpop.eup %5766  ;;  %5268 = vmatprep.subr.bf16.mxu1 %v7671_v9  ;;  %v3412_v2 = vmul.f32 0.5, %v7314_v20  ;;  %v3796_v4 = vadd.f32 1.0, %v5765_v18  ;;  %5778 = vtanh.f32 %v3693_v10  ;;  %v3644_v11 = vadd.f32 %v7380_v55, %v3588_v58 }
 0x442   :  { %4591 = vmatmul.mubr.bf16.gmra.mrb[68].mxu1 %v3883_v50  ;;  %v3885_v41 = vpack.c.bf16 %v3845_v6, %v3837_v33  ;;  %v3804_v44 = vadd.f32 1.0, %v5767_v48  ;;  %v3643_v61 = vadd.f32 %v7670_v36, %v3587_v32  ;;  %v3590_v0 = vmul.f32 %v7383_v15, %v7425_v29  ;;  %v7678_v6 = vld [vmem:[#allocation19_spill] sm:$0xff] }
 0x443   :  { %v5769_v56 = vpop.eup %5768  ;;  %v3701_v8 = vmul.f32 0.7978846, %v7430_v39  ;;  %v3852_v26 = vmul.f32 %v3796_v4, %v3404_v40  ;;  %v3406_v16 = vmul.f32 0.5, %v7300_v12  ;;  %v3700_v60 = vmul.f32 0.7978846, %v3644_v11 }
 0x444   :  { %v5771_v20 = vpop.eup %5770  ;;  %4655 = vmatmul.mubr.bf16.gmra.mrb[84].mxu0 %v3885_v41  ;;  %5276 = vmatpush3.bf16.msra.mxu1 %v7672_v34  ;;  %v3860_v45 = vmul.f32 %v3804_v44, %v3412_v2  ;;  %v3798_v28 = vadd.f32 1.0, %v5769_v56  ;;  %v3699_v43 = vmul.f32 0.7978846, %v3643_v61  ;;  %v3646_v23 = vadd.f32 %v7383_v15, %v3590_v0  ;;  %v7680_v41 = vld [vmem:[#allocation17_spill] sm:$0xff] }
 0x445   :  { %v5773_v25 = vpop.eup %5772  ;;  %5269 = vmatprep.subr.bf16.mxu1 %v7673_v53  ;;  %v3414_v29 = vmul.f32 0.5, %v7319_v49  ;;  %v3806_v37 = vadd.f32 1.0, %v5771_v20  ;;  %v3403_v39 = vmul.f32 0.5, %v7272_v24  ;;  %5780 = vtanh.f32 %v3700_v60  ;;  %v7675_v24 = vld [vmem:[#allocation33_spill] sm:$0xff] }
 0x446   :  { %v5775_v12 = vpop.eup %5774  ;;  %v3892_v14 = vpack.c.bf16 %v3860_v45, %v3852_v26  ;;  %v3411_v13 = vmul.f32 0.5, %v7305_v46  ;;  %v3795_v42 = vadd.f32 1.0, %v5773_v25  ;;  %5782 = vtanh.f32 %v3699_v43 }
 0x447   :  { %v3854_v57 = vmul.f32 %v3798_v28, %v3406_v16  ;;  %v3862_v54 = vmul.f32 %v3806_v37, %v3414_v29  ;;  %v3803_v17 = vadd.f32 1.0, %v5775_v12  ;;  %v3702_v27 = vmul.f32 0.7978846, %v3646_v23 }
 0x448   :  { %5784 = vtanh.f32 %v3701_v8  ;;  %4598 = vmatprep.mubr.bf16.mxu1 %v3892_v14  ;;  %5277 = vmatpush3.bf16.msra.mxu1 %v7674_v38  ;;  %v3851_v35 = vmul.f32 %v3795_v42, %v3403_v39  ;;  %v3405_v3 = vmul.f32 0.5, %v7279_v63  ;;  %v3413_v47 = vmul.f32 0.5, %v7667_v5  ;;  %v7679_v5 = vld [vmem:[#allocation29_spill] sm:$0xff] }
 0x449   :  { %v5777_v51 = vpop.eup %5776  ;;  %v3894_v49 = vpack.c.bf16 %v3862_v54, %v3854_v57  ;;  %v3859_v22 = vmul.f32 %v3803_v17, %v3411_v13  ;;  %5270 = vmatprep.subr.bf16.mxu1 %v7675_v24  ;;  %5786 = vtanh.f32 %v3702_v27  ;;  %v3420_v50 = vmul.f32 0.5, %v7380_v55 }
 0x44a   :  { %v3797_v19 = vadd.f32 1.0, %v5777_v51  ;;  %v3419_v63 = vmul.f32 0.5, %v7670_v36  ;;  %v3422_v4 = vmul.f32 0.5, %v7383_v15  ;;  %v3421_v36 = vmul.f32 0.5, %v7348_v21  ;;  %v5040_v15 = vld [vmem:[%s7524_s8] ss:$0 sm:$0xff] }
 0x44b   :  { %v5779_v59 = vpop.eup %5778  ;;  %4662 = vmatprep.mubr.bf16.mxu0 %v3894_v49  ;;  %v3891_v46 = vpack.c.bf16 %v3859_v22, %v3851_v35  ;;  %s5942_s8 = smov [#allocation11]  }
 0x44c   :  { %v3805_v30 = vadd.f32 1.0, %v5779_v59  ;;  %5278 = vmatpush3.bf16.msra.mxu1 %v7676_v31  ;;  %v3853_v7 = vmul.f32 %v3797_v19, %v3405_v3  ;;  %s4690_s15 = sshll.u32 %s5942_s8, 4  ;;  %s4691_s15 = int_to_ptr.vmem [resolvable:$true] %s4690_s15 }
 0x44d   :  { %4599 = vmatmul.mubr.bf16.gmra.mrb[72].mxu1 %v3891_v46  ;;  %5271 = vmatprep.subr.bf16.mxu1 %v7677_v62  ;;  %s5898_s17 = scalar_lea.vmem %s4691_s15, 896  ;;  %p5903_p13 = scmp.lt.s32.totalorder %s4691_s15, %s4691_s15 }
 0x44e   :  { %v3861_v33 = vmul.f32 %v3805_v30, %v3413_v47  ;;  %p5899_p12 = scmp.ne.s32.totalorder %s4691_s15, %s5898_s17  ;;  %p5904_p0 = scmp.lt.s32.totalorder %s5898_s17, %s5898_s17 }
 0x44f   :  { %v5781_v10 = vpop.eup %5780 }
 0x450   :  { %v5783_v58 = vpop.eup %5782  ;;  %v3893_v18 = vpack.c.bf16 %v3861_v33, %v3853_v7  ;;  %v3812_v52 = vadd.f32 1.0, %v5781_v10  ;;  %5279 = vmatpush3.bf16.msra.mxu1 %v7678_v6  ;;  %p5905_p1 = por %p5904_p0, %p5903_p13 }
 0x451   :  { %v3811_v40 = vadd.f32 1.0, %v5783_v58  ;;  %5272 = vmatprep.subr.bf16.mxu1 %v7679_v5 }
 0x452   :  { %v5785_v1 = vpop.eup %5784  ;;  %4663 = vmatmul.mubr.bf16.gmra.mrb[88].mxu0 %v3893_v18  ;;  %v3868_v32 = vmul.f32 %v3812_v52, %v3420_v50  ;;  %p5906_p2 = pnand %p5905_p1, %p5899_p12 }
 0x453   :  { %v5787_v48 = vpop.eup %5786  ;;  %v3867_v9 = vmul.f32 %v3811_v40, %v3419_v63  ;;  %v3813_v44 = vadd.f32 1.0, %v5785_v1 }
 0x454   :  { %v3900_v2 = vpack.c.bf16 %v3868_v32, %v3868_v32  ;;  %v3814_v11 = vadd.f32 1.0, %v5787_v48  ;;  %5280 = vmatpush3.bf16.msra.mxu1 %v7680_v41 }
 0x455   :  { %v3899_v55 = vpack.c.bf16 %v3867_v9, %v3867_v9  ;;  %v3869_v56 = vmul.f32 %v3813_v44, %v3421_v36 }
 0x456   :  { %4606 = vmatprep.mubr.bf16.mxu1 %v3900_v2  ;;  %v3870_v61 = vmul.f32 %v3814_v11, %v3422_v4 }
 0x457   :  { %4607 = vmatmul.mubr.bf16.gmra.mrb[76].mxu1 %v3899_v55  ;;  %v3901_v8 = vpack.c.bf16 %v3869_v56, %v3869_v56 }
 0x458   :  { %v3902_v0 = vpack.c.bf16 %v3870_v61, %v3870_v61 }
 0x45a   :  { %4670 = vmatprep.mubr.bf16.mxu1 %v3902_v0 }
 0x45f   :  { %4671 = vmatmul.mubr.bf16.vlgmr.msra.gmra.mrb[80].mxu1 %v3901_v8 }
 0x48b   :  { %v5121_v26 = vpop.f32.mrb[48].mxu1 }
 0x48c   :  { %v5122_v16 = vpop.f32.mrb[49].mxu1 }
 0x48d   :  { %v5161_v60 = vpop.f32.mrb[64].mxu0  ;;  %v5123_v20 = vadd.f32 %v5122_v16, %v5121_v26  ;;  %v5124_v34 = vpop.f32.mrb[50].mxu1 }
 0x48e   :  { %v5162_v45 = vpop.f32.mrb[65].mxu0  ;;  %v5125_v28 = vpop.f32.mrb[51].mxu1 }
 0x48f   :  { %v4457_v43 = vadd.f32 %v5123_v20, %v5040_v15  ;;  %v5163_v23 = vadd.f32 %v5162_v45, %v5161_v60  ;;  %v5164_v21 = vpop.f32.mrb[66].mxu0  ;;  %v5126_v25 = vadd.f32 %v5125_v28, %v5124_v34 }
 0x490   :  { %v5165_v53 = vpop.f32.mrb[67].mxu0 }
 0x491   :  { %v4521_v29 = vadd.f32 %v5163_v23, %v4457_v43  ;;  %v4460_v37 = vadd.f32 %v5126_v25, %v5040_v15  ;;  %v5166_v39 = vadd.f32 %v5165_v53, %v5164_v21 }
 0x493   :  { %v4524_v12 = vadd.f32 %v5166_v39, %v4460_v37 }
 0x495   :  { %v5127_v14 = vpop.f32.mrb[52].mxu1 }
 0x496   :  { %v5128_v13 = vpop.f32.mrb[53].mxu1 }
 0x497   :  { %v5167_v42 = vpop.f32.mrb[68].mxu0  ;;  %v5129_v57 = vadd.f32 %v5128_v13, %v5127_v14  ;;  %v5130_v54 = vpop.f32.mrb[54].mxu1 }
 0x498   :  { %v5168_v17 = vpop.f32.mrb[69].mxu0  ;;  %v5131_v27 = vpop.f32.mrb[55].mxu1 }
 0x499   :  { %v4465_v38 = vadd.f32 %v5129_v57, %v5040_v15  ;;  %v5169_v51 = vadd.f32 %v5168_v17, %v5167_v42  ;;  %v5170_v49 = vpop.f32.mrb[70].mxu0  ;;  %v5132_v35 = vadd.f32 %v5131_v27, %v5130_v54 }
 0x49a   :  { %v5171_v22 = vpop.f32.mrb[71].mxu0 }
 0x49b   :  { %v4529_v24 = vadd.f32 %v5169_v51, %v4465_v38  ;;  %v4468_v19 = vadd.f32 %v5132_v35, %v5040_v15  ;;  %v5172_v59 = vadd.f32 %v5171_v22, %v5170_v49 }
 0x49d   :  { %v4532_v46 = vadd.f32 %v5172_v59, %v4468_v19 }
 0x49f   :  { %v5133_v3 = vpop.f32.mrb[56].mxu1 }
 0x4a0   :  { %v5134_v47 = vpop.f32.mrb[57].mxu1 }
 0x4a1   :  { %v5135_v30 = vadd.f32 %v5134_v47, %v5133_v3  ;;  %v5136_v31 = vpop.f32.mrb[58].mxu1 }
 0x4a2   :  { %v5137_v62 = vpop.f32.mrb[59].mxu1 }
 0x4a3   :  { %v5173_v7 = vpop.f32.mrb[72].mxu0  ;;  %v4473_v33 = vadd.f32 %v5135_v30, %v5040_v15  ;;  %v5138_v10 = vadd.f32 %v5137_v62, %v5136_v31 }
 0x4a4   :  { %v5174_v58 = vpop.f32.mrb[73].mxu0 }
 0x4a5   :  { %v5175_v18 = vadd.f32 %v5174_v58, %v5173_v7  ;;  %v5176_v50 = vpop.f32.mrb[74].mxu0  ;;  %v4476_v52 = vadd.f32 %v5138_v10, %v5040_v15 }
 0x4a6   :  { %v5177_v6 = vpop.f32.mrb[75].mxu0 }
 0x4a7   :  { %v4537_v63 = vadd.f32 %v5175_v18, %v4473_v33  ;;  %v5178_v40 = vadd.f32 %v5177_v6, %v5176_v50 }
 0x4a9   :  { %v4540_v5 = vadd.f32 %v5178_v40, %v4476_v52 }
 0x4ac   :  { %v5139_v1 = vpop.f32.mrb[60].mxu1 }
 0x4ad   :  { %v5140_v32 = vpop.f32.mrb[61].mxu1  ;;  %v5179_v48 = vpop.f32.mrb[76].mxu0 }
 0x4ae   :  { %v5141_v9 = vadd.f32 %v5140_v32, %v5139_v1  ;;  %v5142_v2 = vpop.f32.mrb[62].mxu1  ;;  %v5180_v4 = vpop.f32.mrb[77].mxu0 }
 0x4af   :  { %v5143_v11 = vpop.f32.mrb[63].mxu1  ;;  %v5181_v55 = vadd.f32 %v5180_v4, %v5179_v48  ;;  %v5182_v44 = vpop.f32.mrb[78].mxu0 }
 0x4b0   :  { %v4481_v41 = vadd.f32 %v5141_v9, %v5040_v15  ;;  %v5183_v61 = vpop.f32.mrb[79].mxu0 }
 0x4b2   :  { %v4545_v36 = vadd.f32 %v5181_v55, %v4481_v41 }
 0x50a   :  { %v5201_v0 = vpop.f32.mrb[64].mxu1 }
 0x50b   :  { %v5202_v56 = vpop.f32.mrb[65].mxu1 }
 0x50c   :  { %v5203_v8 = vadd.f32 %v5202_v56, %v5201_v0  ;;  %v5204_v26 = vpop.f32.mrb[66].mxu1 }
 0x50d   :  { %v5241_v16 = vpop.f32.mrb[80].mxu0  ;;  %v5205_v60 = vpop.f32.mrb[67].mxu1 }
 0x50e   :  { %v4585_v20 = vadd.f32 %v5203_v8, %v4521_v29  ;;  %v5242_v34 = vpop.f32.mrb[81].mxu0  ;;  %v5206_v45 = vadd.f32 %v5205_v60, %v5204_v26 }
 0x50f   :  { %v5243_v28 = vadd.f32 %v5242_v34, %v5241_v16  ;;  %v5244_v43 = vpop.f32.mrb[82].mxu0 }
 0x510   :  { %v4588_v23 = vadd.f32 %v5206_v45, %v4524_v12  ;;  %v5245_v21 = vpop.f32.mrb[83].mxu0 }
 0x511   :  { %v4649_v25 = vadd.f32 %v5243_v28, %v4585_v20  ;;  %v5246_v53 = vadd.f32 %v5245_v21, %v5244_v43 }
 0x513   :  { %4678 = vst [vmem:[#allocation11] sm:$0xff] %v4649_v25  ;;  %v4652_v15 = vadd.f32 %v5246_v53, %v4588_v23 }
 0x515   :  { %4679 = vst [vmem:[#allocation11 + $0x8] sm:$0xff] %v4652_v15  ;;  %v5207_v37 = vpop.f32.mrb[68].mxu1 }
 0x516   :  { %v5208_v39 = vpop.f32.mrb[69].mxu1 }
 0x517   :  { %v5247_v14 = vpop.f32.mrb[84].mxu0  ;;  %v5209_v13 = vadd.f32 %v5208_v39, %v5207_v37  ;;  %v5210_v42 = vpop.f32.mrb[70].mxu1 }
 0x518   :  { %v5248_v57 = vpop.f32.mrb[85].mxu0  ;;  %v5211_v54 = vpop.f32.mrb[71].mxu1 }
 0x519   :  { %v4593_v17 = vadd.f32 %v5209_v13, %v4529_v24  ;;  %v5249_v29 = vadd.f32 %v5248_v57, %v5247_v14  ;;  %v5250_v27 = vpop.f32.mrb[86].mxu0  ;;  %v5212_v38 = vadd.f32 %v5211_v54, %v5210_v42 }
 0x51a   :  { %v5251_v51 = vpop.f32.mrb[87].mxu0 }
 0x51b   :  { %v4657_v49 = vadd.f32 %v5249_v29, %v4593_v17  ;;  %v4596_v12 = vadd.f32 %v5212_v38, %v4532_v46  ;;  %v5252_v35 = vadd.f32 %v5251_v51, %v5250_v27 }
 0x51d   :  { %4680 = vst [vmem:[#allocation11 + $0x10] sm:$0xff] %v4657_v49  ;;  %v4660_v22 = vadd.f32 %v5252_v35, %v4596_v12 }
 0x51f   :  { %4681 = vst [vmem:[#allocation11 + $0x18] sm:$0xff] %v4660_v22 }
 0x520   :  { %v5213_v19 = vpop.f32.mrb[72].mxu1 }
 0x521   :  { %v5214_v59 = vpop.f32.mrb[73].mxu1 }
 0x522   :  { %v5215_v3 = vadd.f32 %v5214_v59, %v5213_v19  ;;  %v5216_v47 = vpop.f32.mrb[74].mxu1 }
 0x523   :  { %v5217_v30 = vpop.f32.mrb[75].mxu1 }
 0x524   :  { %v4601_v31 = vadd.f32 %v5215_v3, %v4537_v63  ;;  %v5218_v62 = vadd.f32 %v5217_v30, %v5216_v47 }
 0x525   :  { %v5253_v7 = vpop.f32.mrb[88].mxu0 }
 0x526   :  { %v5254_v33 = vpop.f32.mrb[89].mxu0  ;;  %v4604_v24 = vadd.f32 %v5218_v62, %v4540_v5 }
 0x527   :  { %v5255_v10 = vadd.f32 %v5254_v33, %v5253_v7  ;;  %v5256_v58 = vpop.f32.mrb[90].mxu0 }
 0x528   :  { %v5257_v18 = vpop.f32.mrb[91].mxu0 }
 0x529   :  { %v4665_v50 = vadd.f32 %v5255_v10, %v4601_v31  ;;  %v5258_v52 = vadd.f32 %v5257_v18, %v5256_v58 }
 0x52a   :  { %v5219_v46 = vpop.f32.mrb[76].mxu1 }
 0x52b   :  { %4682 = vst [vmem:[#allocation11 + $0x20] sm:$0xff] %v4665_v50  ;;  %v4668_v6 = vadd.f32 %v5258_v52, %v4604_v24  ;;  %v5220_v40 = vpop.f32.mrb[77].mxu1 }
 0x52c   :  { %v5221_v1 = vadd.f32 %v5220_v40, %v5219_v46  ;;  %v5222_v32 = vpop.f32.mrb[78].mxu1 }
 0x52d   :  { %4683 = vst [vmem:[#allocation11 + $0x28] sm:$0xff] %v4668_v6  ;;  %v5223_v48 = vpop.f32.mrb[79].mxu1 }
 0x52e   :  { %v4609_v9 = vadd.f32 %v5221_v1, %v4545_v36 }
 0x532   :  { %v5259_v2 = vpop.f32.mrb[80].mxu1 }
 0x533   :  { %v5260_v63 = vpop.f32.mrb[81].mxu1 }
 0x534   :  { %v5261_v4 = vadd.f32 %v5260_v63, %v5259_v2  ;;  %v5262_v5 = vpop.f32.mrb[82].mxu1 }
 0x535   :  { %v5263_v11 = vpop.f32.mrb[83].mxu1 }
 0x536   :  { %v4673_v41 = vadd.f32 %v5261_v4, %v4609_v9 }
 0x538   :  { %4684 = vst [vmem:[#allocation11 + $0x30] sm:$0xff] %v4673_v41 }
 0x539   :  { %5909 = shalt.err (!%p5906_p2)
}
 0x53a   :  { %s5910_s16 = scalar_lea.hbm %s7525_s9, 896 }
 0x53b   :  { %p5911_p3 = scmp.ne.s32.totalorder %s7525_s9, %s5910_s16  ;;  %p5914_p4 = scmp.lt.u32.totalorder %s5910_s16, %s7525_s9 }
 0x53d   :  { %p5916_p5 = pnand %p5914_p4, %p5911_p3 }
 0x53f   :  { %5919 = shalt.err (!%p5916_p5)
}
 0x540   :  { %4696 = dma.vmem_to_hbm [thread:$0]  %s4691_s15, 896, %s7525_s9, [#allocation4], %s5929_s19, %s5929_s19, %s5930_s20  }
 0x541   :  { %5926 = dma.done.wait [#allocation4], 896  }
 0x542   :  { %5927 = vsyncadd [#allocation4], 4294966400 }
 0x543   :  { %4700 = vsyncpa [#allocation3], 1 }
 0x544   :  { %4701 = vsyncpa [#allocation6], 1 }
 0x545   :  { %4702 = vsyncpa [#allocation9], 1 }
 0x546   :  { %4703 = vsyncpa [#allocation4], 1 }

</bundles_post_ra>
